<compile_context>
chip_gen: v7x
topology: tpu7x:2x2x1
jax: 0.10.0
libtpu: 0.0.40
codegen_flags: <defaults>
</compile_context>

<pallas_src>
import jax
import jax.numpy as jnp
import numpy as np
from jax.experimental import pallas as pl
from jax.experimental.pallas import tpu as pltpu


VMEM_SPEC = pl.BlockSpec(memory_space=pltpu.MemorySpace.VMEM)


# ----------------------------- fused kernel ---------------------------------


def _make_fused_kernel(num_layers, T, H, D, num_classes):
    """Build the fully-fused forward kernel for a fixed static configuration."""
    G = D * H  # per-time-step output width (both directions concatenated)

    def kernel(*refs):
        n_w = 3 * num_layers
        x_ref = refs[0]                 # (T, B, F) time-major input
        g_ref = refs[1]                 # (1, 1, F) layernorm gamma
        b_ref = refs[2]                 # (1, 1, F) layernorm beta
        layer_w = refs[3:3 + n_w]       # per layer: wih (D*Fin, G), whh (G, G), bias (1, G)
        dec_w_ref = refs[3 + n_w]       # (T*G, C) decoder weight (transposed)
        dec_b_ref = refs[4 + n_w]       # (1, C)
        y_ref = refs[5 + n_w]           # (B, C) output
        flat_ref = refs[6 + n_w]        # (B, T*G) lane-dense relu(rnn_out), flattened
        scr = refs[7 + n_w:]            # intermediate layer activations, (B, T*G) each

        B = x_ref.shape[1]

        # ----------------- LayerNorm over features (eps = 1e-5) -------------
        xv = x_ref[...]
        mu = jnp.mean(xv, axis=-1, keepdims=True)
        var = jnp.mean((xv - mu) ** 2, axis=-1, keepdims=True)
        h = (xv - mu) * jax.lax.rsqrt(var + 1e-5) * g_ref[...] + b_ref[...]   # (T, B, F)

        y_acc = jnp.zeros((B, num_classes), jnp.float32)

        # --------------- stacked (bi)directional recurrence -----------------
        for l in range(num_layers):
            wih = layer_w[3 * l][...]        # block-diag(W_ih_fw^T, W_ih_bw^T)
            whh = layer_w[3 * l + 1][...]    # block-diag(W_hh_fw^T, W_hh_bw^T)
            bias = layer_w[3 * l + 2][...]   # [b_ih_fw+b_hh_fw | b_ih_bw+b_hh_bw]
            last = l == num_layers - 1
            dst = flat_ref if last else scr[l % 2]

            hstate = jnp.zeros((B, G), jnp.float32)   # [h_fw | h_bw], h_0 = 0
            for s in range(T):                        # fully unrolled, static indices
                # forward half consumes time s, backward half consumes time T-1-s
                if l == 0:
                    x_fw = h[s]
                    x_bw = h[T - 1 - s] if D == 2 else None
                else:
                    src = scr[(l - 1) % 2]
                    x_fw = src[:, s * G:(s + 1) * G]
                    x_bw = src[:, (T - 1 - s) * G:(T - s) * G] if D == 2 else None
                xin = jnp.concatenate([x_fw, x_bw], axis=-1) if D == 2 else x_fw

                pre = (jnp.dot(xin, wih, preferred_element_type=jnp.float32) + bias
                       + jnp.dot(hstate, whh, preferred_element_type=jnp.float32))
                hstate = jnp.tanh(pre)

                # scatter the directional halves to their time slots; for the
                # last layer fuse relu + the decoder partial matmul here.
                fw = hstate[:, :H]
                if last:
                    fw = jnp.maximum(fw, 0.0)
                off = s * G
                dst[:, off:off + H] = fw
                if last:
                    y_acc = y_acc + jnp.dot(fw, dec_w_ref[off:off + H, :],
                                            preferred_element_type=jnp.float32)
                if D == 2:
                    bw = hstate[:, H:]
                    if last:
                        bw = jnp.maximum(bw, 0.0)
                    off = (T - 1 - s) * G + H
                    dst[:, off:off + H] = bw
                    if last:
                        y_acc = y_acc + jnp.dot(bw, dec_w_ref[off:off + H, :],
                                                preferred_element_type=jnp.float32)
            # TODO(synk): nn.RNN inter-layer dropout is a no-op in eval mode; not applied.

        y_ref[...] = y_acc + dec_b_ref[...]

    return kernel


# ----------------------- weight packing (wrapper side) ----------------------


def _pack_direction_weights(dirs, H):
    """Stack per-direction RNN weights into block-diagonal combined matrices."""
    D = len(dirs)
    if D == 1:
        wih, whh, bih, bhh = dirs[0]
        return [wih.T, whh.T, (bih + bhh).reshape(1, H)]
    (wf, hf, bif, bhf), (wb, hb, bib, bhb) = dirs
    fin = wf.shape[1]
    z_ih = jnp.zeros((fin, H), jnp.float32)
    wih = jnp.concatenate(
        [jnp.concatenate([wf.T, z_ih], axis=1),
         jnp.concatenate([z_ih, wb.T], axis=1)], axis=0)          # (2*Fin, 2H)
    z_hh = jnp.zeros((H, H), jnp.float32)
    whh = jnp.concatenate(
        [jnp.concatenate([hf.T, z_hh], axis=1),
         jnp.concatenate([z_hh, hb.T], axis=1)], axis=0)          # (2H, 2H)
    bias = jnp.concatenate([bif + bhf, bib + bhb]).reshape(1, 2 * H)
    return [wih, whh, bias]


# ------------------------------ forward -------------------------------------


def rnn_forward(params, x):
    """x: (B, T, F) float32 -> (y_s: (B, C), rnn_out: (B, T, D*H))"""
    B, T, F = x.shape
    rnn_layers = params["rnn"]
    num_layers = len(rnn_layers)
    D = len(rnn_layers[0])
    H = rnn_layers[0][0][1].shape[0]
    G = D * H
    C = params["dec_w"].shape[0]

    x_tm = jnp.transpose(x, (1, 0, 2))                    # (T, B, F) time-major
    gamma = params["ln_gamma"].reshape(1, 1, F)
    beta = params["ln_beta"].reshape(1, 1, F)

    weight_args = []
    for dirs in rnn_layers:
        weight_args.extend(_pack_direction_weights(dirs, H))
    dec_w = params["dec_w"].T                             # (T*G, C)
    dec_b = params["dec_b"].reshape(1, C)

    n_in = 3 + 3 * num_layers + 2
    n_scr = min(num_layers - 1, 2)                        # ping-pong inter-layer buffers
    kernel = _make_fused_kernel(num_layers, T, H, D, C)

    y_s, rnn_flat = pl.pallas_call(
        kernel,
        out_shape=(jax.ShapeDtypeStruct((B, C), jnp.float32),
                   jax.ShapeDtypeStruct((B, T * G), jnp.float32)),
        in_specs=[VMEM_SPEC] * n_in,
        out_specs=(VMEM_SPEC, VMEM_SPEC),
        scratch_shapes=[pltpu.VMEM((B, T * G), jnp.float32)] * n_scr,
    )(x_tm, gamma, beta, *weight_args, dec_w, dec_b)

    rnn_out = rnn_flat.reshape(B, T, G)                   # contiguous -> free reshape
    return y_s, rnn_out


# -------------------------- parameter init ----------------------------------


def init_params(key, input_feature_size, hidden_size, num_layers, bidirectional,
                num_classes, seq_len=23):
    num_dirs = 2 if bidirectional else 1

    def u(k, shape, bound):
        return jax.random.uniform(k, shape, jnp.float32, -bound, bound)

    params = {
        "ln_gamma": jnp.ones((input_feature_size,), jnp.float32),
        "ln_beta": jnp.zeros((input_feature_size,), jnp.float32),
    }

    bound = 1.0 / np.sqrt(hidden_size)
    rnn_layers = []
    for layer in range(num_layers):
        in_size = input_feature_size if layer == 0 else hidden_size * num_dirs
        dirs = []
        for _ in range(num_dirs):
            key, ka, kb, kc, kd = jax.random.split(key, 5)
            wih = u(ka, (hidden_size, in_size), bound)       # like PyTorch weight_ih
            whh = u(kb, (hidden_size, hidden_size), bound)   # like PyTorch weight_hh
            bih = u(kc, (hidden_size,), bound)
            bhh = u(kd, (hidden_size,), bound)
            dirs.append((wih, whh, bih, bhh))
        rnn_layers.append(dirs)
    params["rnn"] = rnn_layers

    dec_in = hidden_size * num_dirs * seq_len
    dbound = 1.0 / np.sqrt(dec_in)
    key, ka, kb = jax.random.split(key, 3)
    params["dec_w"] = u(ka, (num_classes, dec_in), dbound)
    params["dec_b"] = u(kb, (num_classes,), dbound)
    return params


# ------------------------- pure-JAX reference --------------------------------


def reference_forward(params, x):
    mu = jnp.mean(x, -1, keepdims=True)
    var = jnp.mean((x - mu) ** 2, -1, keepdims=True)
    h = (x - mu) / jnp.sqrt(var + 1e-5) * params["ln_gamma"] + params["ln_beta"]

    layer_in = jnp.transpose(h, (1, 0, 2))
    for dirs in params["rnn"]:
        outs = []
        for d, (wih, whh, bih, bhh) in enumerate(dirs):
            xin = layer_in if d == 0 else layer_in[::-1]
            B = xin.shape[1]
            H = whh.shape[0]

            def step(hprev, xt):
                hnew = jnp.tanh(xt @ wih.T + bih + hprev @ whh.T + bhh)
                return hnew, hnew

            _, ys = jax.lax.scan(step, jnp.zeros((B, H), jnp.float32), xin)
            if d == 1:
                ys = ys[::-1]
            outs.append(ys)
        layer_in = jnp.concatenate(outs, axis=-1)

    rnn_out = jnp.maximum(jnp.transpose(layer_in, (1, 0, 2)), 0.0)
    flat = rnn_out.reshape(rnn_out.shape[0], -1)
    y_s = flat @ params["dec_w"].T + params["dec_b"]
    return y_s, rnn_out


# -------------------------------- main ---------------------------------------


if __name__ == "__main__":
    # Small, module-consistent sizes (seq must be 23: decoder in-features = H*D*23)
    B, T, F = 2, 23, 16
    hidden_size, num_layers, bidirectional, num_classes = 32, 2, True, 10

    key = jax.random.PRNGKey(0)
    kx, kp = jax.random.split(key)
    x = jax.random.normal(kx, (B, T, F), jnp.float32)
    params = init_params(kp, F, hidden_size, num_layers, bidirectional, num_classes,
                         seq_len=T)

    fwd = jax.jit(rnn_forward)
    y_s, rnn_out = fwd(params, x)
    jax.block_until_ready(y_s)
    jax.block_until_ready(rnn_out)

    y_ref, rnn_ref = reference_forward(params, x)
    np.testing.assert_allclose(np.asarray(rnn_out), np.asarray(rnn_ref),
                               rtol=1e-4, atol=1e-4)
    np.testing.assert_allclose(np.asarray(y_s), np.asarray(y_ref),
                               rtol=1e-4, atol=1e-4)

    assert y_s.shape == (B, num_classes)
    assert rnn_out.shape == (B, T, hidden_size * 2)
    print("KERNEL_OK")
</pallas_src>

<mosaic_0001>
module attributes {stable_mosaic.version = 11 : i64} {
  func.func @kernel(%arg0: memref<23x2x16xf32, #tpu.memory_space<vmem>>, %arg1: memref<1x1x16xf32, #tpu.memory_space<vmem>>, %arg2: memref<1x1x16xf32, #tpu.memory_space<vmem>>, %arg3: memref<32x64xf32, #tpu.memory_space<vmem>>, %arg4: memref<64x64xf32, #tpu.memory_space<vmem>>, %arg5: memref<1x64xf32, #tpu.memory_space<vmem>>, %arg6: memref<128x64xf32, #tpu.memory_space<vmem>>, %arg7: memref<64x64xf32, #tpu.memory_space<vmem>>, %arg8: memref<1x64xf32, #tpu.memory_space<vmem>>, %arg9: memref<1472x10xf32, #tpu.memory_space<vmem>>, %arg10: memref<1x10xf32, #tpu.memory_space<vmem>>, %arg11: memref<2x10xf32, #tpu.memory_space<vmem>>, %arg12: memref<2x1472xf32, #tpu.memory_space<vmem>>, %arg13: memref<2x1472xf32, #tpu.memory_space<vmem>>) attributes {dimension_semantics = [], scalar_prefetch = 0 : i64, scratch_operands = 1 : i64, tpu.core_type = #tpu.core_type<tc>} {
    %c0 = arith.constant 0 : index
    %c0_0 = arith.constant 0 : index
    %c0_1 = arith.constant 0 : index
    %0 = vector.load %arg0[%c0, %c0_0, %c0_1] : memref<23x2x16xf32, #tpu.memory_space<vmem>>, vector<23x2x16xf32>
    %cst = arith.constant dense<0.000000e+00> : vector<23x2xf32>
    %1 = vector.multi_reduction <add>, %0, %cst [2] : vector<23x2x16xf32> to vector<23x2xf32>
    %2 = vector.shape_cast %1 : vector<23x2xf32> to vector<23x2x1xf32>
    %cst_2 = arith.constant 1.600000e+01 : f32
    %3 = vector.broadcast %cst_2 : f32 to vector<23x2x1xf32>
    %4 = arith.divf %2, %3 : vector<23x2x1xf32>
    %5 = vector.broadcast %4 : vector<23x2x1xf32> to vector<23x2x16xf32>
    %6 = arith.subf %0, %5 : vector<23x2x16xf32>
    %7 = arith.mulf %6, %6 : vector<23x2x16xf32>
    %cst_3 = arith.constant dense<0.000000e+00> : vector<23x2xf32>
    %8 = vector.multi_reduction <add>, %7, %cst_3 [2] : vector<23x2x16xf32> to vector<23x2xf32>
    %9 = vector.shape_cast %8 : vector<23x2xf32> to vector<23x2x1xf32>
    %cst_4 = arith.constant 1.600000e+01 : f32
    %10 = vector.broadcast %cst_4 : f32 to vector<23x2x1xf32>
    %11 = arith.divf %9, %10 : vector<23x2x1xf32>
    %12 = vector.broadcast %4 : vector<23x2x1xf32> to vector<23x2x16xf32>
    %13 = arith.subf %0, %12 : vector<23x2x16xf32>
    %cst_5 = arith.constant 9.99999974E-6 : f32
    %14 = vector.broadcast %cst_5 : f32 to vector<23x2x1xf32>
    %15 = arith.addf %11, %14 : vector<23x2x1xf32>
    %16 = math.rsqrt %15 : vector<23x2x1xf32>
    %17 = vector.broadcast %16 : vector<23x2x1xf32> to vector<23x2x16xf32>
    %18 = arith.mulf %13, %17 : vector<23x2x16xf32>
    %c0_6 = arith.constant 0 : index
    %c0_7 = arith.constant 0 : index
    %c0_8 = arith.constant 0 : index
    %19 = vector.load %arg1[%c0_6, %c0_7, %c0_8] : memref<1x1x16xf32, #tpu.memory_space<vmem>>, vector<1x1x16xf32>
    %20 = vector.broadcast %19 : vector<1x1x16xf32> to vector<23x2x16xf32>
    %21 = arith.mulf %18, %20 : vector<23x2x16xf32>
    %c0_9 = arith.constant 0 : index
    %c0_10 = arith.constant 0 : index
    %c0_11 = arith.constant 0 : index
    %22 = vector.load %arg2[%c0_9, %c0_10, %c0_11] : memref<1x1x16xf32, #tpu.memory_space<vmem>>, vector<1x1x16xf32>
    %23 = vector.broadcast %22 : vector<1x1x16xf32> to vector<23x2x16xf32>
    %24 = arith.addf %21, %23 : vector<23x2x16xf32>
    %cst_12 = arith.constant 0.000000e+00 : f32
    %25 = vector.broadcast %cst_12 : f32 to vector<2x10xf32>
    %c0_13 = arith.constant 0 : index
    %c0_14 = arith.constant 0 : index
    %26 = vector.load %arg3[%c0_13, %c0_14] : memref<32x64xf32, #tpu.memory_space<vmem>>, vector<32x64xf32>
    %c0_15 = arith.constant 0 : index
    %c0_16 = arith.constant 0 : index
    %27 = vector.load %arg4[%c0_15, %c0_16] : memref<64x64xf32, #tpu.memory_space<vmem>>, vector<64x64xf32>
    %c0_17 = arith.constant 0 : index
    %c0_18 = arith.constant 0 : index
    %28 = vector.load %arg5[%c0_17, %c0_18] : memref<1x64xf32, #tpu.memory_space<vmem>>, vector<1x64xf32>
    %cst_19 = arith.constant 0.000000e+00 : f32
    %29 = vector.broadcast %cst_19 : f32 to vector<2x64xf32>
    %30 = vector.extract_strided_slice %24 {offsets = [0, 0, 0], sizes = [1, 2, 16], strides = [1, 1, 1]} : vector<23x2x16xf32> to vector<1x2x16xf32>
    %31 = vector.shape_cast %30 : vector<1x2x16xf32> to vector<2x16xf32>
    %32 = vector.extract_strided_slice %24 {offsets = [22, 0, 0], sizes = [1, 2, 16], strides = [1, 1, 1]} : vector<23x2x16xf32> to vector<1x2x16xf32>
    %33 = vector.shape_cast %32 : vector<1x2x16xf32> to vector<2x16xf32>
    %34 = tpu.concatenate %31, %33 in 1 : vector<2x16xf32>, vector<2x16xf32> -> vector<2x32xf32>
    %cst_20 = arith.constant dense<0.000000e+00> : vector<2x64xf32>
    %35 = tpu.matmul %34, %26, %cst_20 {dimension_numbers = #tpu.dot_dimension_numbers<[1], [0], [0], [1], [0, 0, 1, 1], [], []>} : vector<2x32xf32>, vector<32x64xf32>, vector<2x64xf32> -> vector<2x64xf32>
    %36 = vector.broadcast %28 : vector<1x64xf32> to vector<2x64xf32>
    %37 = arith.addf %35, %36 : vector<2x64xf32>
    %cst_21 = arith.constant dense<0.000000e+00> : vector<2x64xf32>
    %38 = tpu.matmul %29, %27, %cst_21 {dimension_numbers = #tpu.dot_dimension_numbers<[1], [0], [0], [1], [0, 0, 1, 1], [], []>} : vector<2x64xf32>, vector<64x64xf32>, vector<2x64xf32> -> vector<2x64xf32>
    %39 = arith.addf %37, %38 : vector<2x64xf32>
    %40 = math.tanh %39 : vector<2x64xf32>
    %41 = vector.extract_strided_slice %40 {offsets = [0, 0], sizes = [2, 32], strides = [1, 1]} : vector<2x64xf32> to vector<2x32xf32>
    %c0_22 = arith.constant 0 : index
    %c0_23 = arith.constant 0 : index
    %42 = vector.load %arg13[%c0_22, %c0_23] : memref<2x1472xf32, #tpu.memory_space<vmem>>, vector<2x32xf32>
    tpu.vector_store %arg13[%c0_22, %c0_23], %41 {strides = array<i32>} : memref<2x1472xf32, #tpu.memory_space<vmem>>, vector<2x32xf32>,
    %43 = vector.extract_strided_slice %40 {offsets = [0, 32], sizes = [2, 32], strides = [1, 1]} : vector<2x64xf32> to vector<2x32xf32>
    %c0_24 = arith.constant 0 : index
    %c1440 = arith.constant 1440 : index
    %44 = vector.load %arg13[%c0_24, %c1440] : memref<2x1472xf32, #tpu.memory_space<vmem>>, vector<2x32xf32>
    tpu.vector_store %arg13[%c0_24, %c1440], %43 {strides = array<i32>} : memref<2x1472xf32, #tpu.memory_space<vmem>>, vector<2x32xf32>,
    %45 = vector.extract_strided_slice %24 {offsets = [1, 0, 0], sizes = [1, 2, 16], strides = [1, 1, 1]} : vector<23x2x16xf32> to vector<1x2x16xf32>
    %46 = vector.shape_cast %45 : vector<1x2x16xf32> to vector<2x16xf32>
    %47 = vector.extract_strided_slice %24 {offsets = [21, 0, 0], sizes = [1, 2, 16], strides = [1, 1, 1]} : vector<23x2x16xf32> to vector<1x2x16xf32>
    %48 = vector.shape_cast %47 : vector<1x2x16xf32> to vector<2x16xf32>
    %49 = tpu.concatenate %46, %48 in 1 : vector<2x16xf32>, vector<2x16xf32> -> vector<2x32xf32>
    %cst_25 = arith.constant dense<0.000000e+00> : vector<2x64xf32>
    %50 = tpu.matmul %49, %26, %cst_25 {dimension_numbers = #tpu.dot_dimension_numbers<[1], [0], [0], [1], [0, 0, 1, 1], [], []>} : vector<2x32xf32>, vector<32x64xf32>, vector<2x64xf32> -> vector<2x64xf32>
    %51 = vector.broadcast %28 : vector<1x64xf32> to vector<2x64xf32>
    %52 = arith.addf %50, %51 : vector<2x64xf32>
    %cst_26 = arith.constant dense<0.000000e+00> : vector<2x64xf32>
    %53 = tpu.matmul %40, %27, %cst_26 {dimension_numbers = #tpu.dot_dimension_numbers<[1], [0], [0], [1], [0, 0, 1, 1], [], []>} : vector<2x64xf32>, vector<64x64xf32>, vector<2x64xf32> -> vector<2x64xf32>
    %54 = arith.addf %52, %53 : vector<2x64xf32>
    %55 = math.tanh %54 : vector<2x64xf32>
    %56 = vector.extract_strided_slice %55 {offsets = [0, 0], sizes = [2, 32], strides = [1, 1]} : vector<2x64xf32> to vector<2x32xf32>
    %c0_27 = arith.constant 0 : index
    %c64 = arith.constant 64 : index
    %57 = vector.load %arg13[%c0_27, %c64] : memref<2x1472xf32, #tpu.memory_space<vmem>>, vector<2x32xf32>
    tpu.vector_store %arg13[%c0_27, %c64], %56 {strides = array<i32>} : memref<2x1472xf32, #tpu.memory_space<vmem>>, vector<2x32xf32>,
    %58 = vector.extract_strided_slice %55 {offsets = [0, 32], sizes = [2, 32], strides = [1, 1]} : vector<2x64xf32> to vector<2x32xf32>
    %c0_28 = arith.constant 0 : index
    %c1376 = arith.constant 1376 : index
    %59 = vector.load %arg13[%c0_28, %c1376] : memref<2x1472xf32, #tpu.memory_space<vmem>>, vector<2x32xf32>
    tpu.vector_store %arg13[%c0_28, %c1376], %58 {strides = array<i32>} : memref<2x1472xf32, #tpu.memory_space<vmem>>, vector<2x32xf32>,
    %60 = vector.extract_strided_slice %24 {offsets = [2, 0, 0], sizes = [1, 2, 16], strides = [1, 1, 1]} : vector<23x2x16xf32> to vector<1x2x16xf32>
    %61 = vector.shape_cast %60 : vector<1x2x16xf32> to vector<2x16xf32>
    %62 = vector.extract_strided_slice %24 {offsets = [20, 0, 0], sizes = [1, 2, 16], strides = [1, 1, 1]} : vector<23x2x16xf32> to vector<1x2x16xf32>
    %63 = vector.shape_cast %62 : vector<1x2x16xf32> to vector<2x16xf32>
    %64 = tpu.concatenate %61, %63 in 1 : vector<2x16xf32>, vector<2x16xf32> -> vector<2x32xf32>
    %cst_29 = arith.constant dense<0.000000e+00> : vector<2x64xf32>
    %65 = tpu.matmul %64, %26, %cst_29 {dimension_numbers = #tpu.dot_dimension_numbers<[1], [0], [0], [1], [0, 0, 1, 1], [], []>} : vector<2x32xf32>, vector<32x64xf32>, vector<2x64xf32> -> vector<2x64xf32>
    %66 = vector.broadcast %28 : vector<1x64xf32> to vector<2x64xf32>
    %67 = arith.addf %65, %66 : vector<2x64xf32>
    %cst_30 = arith.constant dense<0.000000e+00> : vector<2x64xf32>
    %68 = tpu.matmul %55, %27, %cst_30 {dimension_numbers = #tpu.dot_dimension_numbers<[1], [0], [0], [1], [0, 0, 1, 1], [], []>} : vector<2x64xf32>, vector<64x64xf32>, vector<2x64xf32> -> vector<2x64xf32>
    %69 = arith.addf %67, %68 : vector<2x64xf32>
    %70 = math.tanh %69 : vector<2x64xf32>
    %71 = vector.extract_strided_slice %70 {offsets = [0, 0], sizes = [2, 32], strides = [1, 1]} : vector<2x64xf32> to vector<2x32xf32>
    %c0_31 = arith.constant 0 : index
    %c128 = arith.constant 128 : index
    %72 = vector.load %arg13[%c0_31, %c128] : memref<2x1472xf32, #tpu.memory_space<vmem>>, vector<2x32xf32>
    tpu.vector_store %arg13[%c0_31, %c128], %71 {strides = array<i32>} : memref<2x1472xf32, #tpu.memory_space<vmem>>, vector<2x32xf32>,
    %73 = vector.extract_strided_slice %70 {offsets = [0, 32], sizes = [2, 32], strides = [1, 1]} : vector<2x64xf32> to vector<2x32xf32>
    %c0_32 = arith.constant 0 : index
    %c1312 = arith.constant 1312 : index
    %74 = vector.load %arg13[%c0_32, %c1312] : memref<2x1472xf32, #tpu.memory_space<vmem>>, vector<2x32xf32>
    tpu.vector_store %arg13[%c0_32, %c1312], %73 {strides = array<i32>} : memref<2x1472xf32, #tpu.memory_space<vmem>>, vector<2x32xf32>,
    %75 = vector.extract_strided_slice %24 {offsets = [3, 0, 0], sizes = [1, 2, 16], strides = [1, 1, 1]} : vector<23x2x16xf32> to vector<1x2x16xf32>
    %76 = vector.shape_cast %75 : vector<1x2x16xf32> to vector<2x16xf32>
    %77 = vector.extract_strided_slice %24 {offsets = [19, 0, 0], sizes = [1, 2, 16], strides = [1, 1, 1]} : vector<23x2x16xf32> to vector<1x2x16xf32>
    %78 = vector.shape_cast %77 : vector<1x2x16xf32> to vector<2x16xf32>
    %79 = tpu.concatenate %76, %78 in 1 : vector<2x16xf32>, vector<2x16xf32> -> vector<2x32xf32>
    %cst_33 = arith.constant dense<0.000000e+00> : vector<2x64xf32>
    %80 = tpu.matmul %79, %26, %cst_33 {dimension_numbers = #tpu.dot_dimension_numbers<[1], [0], [0], [1], [0, 0, 1, 1], [], []>} : vector<2x32xf32>, vector<32x64xf32>, vector<2x64xf32> -> vector<2x64xf32>
    %81 = vector.broadcast %28 : vector<1x64xf32> to vector<2x64xf32>
    %82 = arith.addf %80, %81 : vector<2x64xf32>
    %cst_34 = arith.constant dense<0.000000e+00> : vector<2x64xf32>
    %83 = tpu.matmul %70, %27, %cst_34 {dimension_numbers = #tpu.dot_dimension_numbers<[1], [0], [0], [1], [0, 0, 1, 1], [], []>} : vector<2x64xf32>, vector<64x64xf32>, vector<2x64xf32> -> vector<2x64xf32>
    %84 = arith.addf %82, %83 : vector<2x64xf32>
    %85 = math.tanh %84 : vector<2x64xf32>
    %86 = vector.extract_strided_slice %85 {offsets = [0, 0], sizes = [2, 32], strides = [1, 1]} : vector<2x64xf32> to vector<2x32xf32>
    %c0_35 = arith.constant 0 : index
    %c192 = arith.constant 192 : index
    %87 = vector.load %arg13[%c0_35, %c192] : memref<2x1472xf32, #tpu.memory_space<vmem>>, vector<2x32xf32>
    tpu.vector_store %arg13[%c0_35, %c192], %86 {strides = array<i32>} : memref<2x1472xf32, #tpu.memory_space<vmem>>, vector<2x32xf32>,
    %88 = vector.extract_strided_slice %85 {offsets = [0, 32], sizes = [2, 32], strides = [1, 1]} : vector<2x64xf32> to vector<2x32xf32>
    %c0_36 = arith.constant 0 : index
    %c1248 = arith.constant 1248 : index
    %89 = vector.load %arg13[%c0_36, %c1248] : memref<2x1472xf32, #tpu.memory_space<vmem>>, vector<2x32xf32>
    tpu.vector_store %arg13[%c0_36, %c1248], %88 {strides = array<i32>} : memref<2x1472xf32, #tpu.memory_space<vmem>>, vector<2x32xf32>,
    %90 = vector.extract_strided_slice %24 {offsets = [4, 0, 0], sizes = [1, 2, 16], strides = [1, 1, 1]} : vector<23x2x16xf32> to vector<1x2x16xf32>
    %91 = vector.shape_cast %90 : vector<1x2x16xf32> to vector<2x16xf32>
    %92 = vector.extract_strided_slice %24 {offsets = [18, 0, 0], sizes = [1, 2, 16], strides = [1, 1, 1]} : vector<23x2x16xf32> to vector<1x2x16xf32>
    %93 = vector.shape_cast %92 : vector<1x2x16xf32> to vector<2x16xf32>
    %94 = tpu.concatenate %91, %93 in 1 : vector<2x16xf32>, vector<2x16xf32> -> vector<2x32xf32>
    %cst_37 = arith.constant dense<0.000000e+00> : vector<2x64xf32>
    %95 = tpu.matmul %94, %26, %cst_37 {dimension_numbers = #tpu.dot_dimension_numbers<[1], [0], [0], [1], [0, 0, 1, 1], [], []>} : vector<2x32xf32>, vector<32x64xf32>, vector<2x64xf32> -> vector<2x64xf32>
    %96 = vector.broadcast %28 : vector<1x64xf32> to vector<2x64xf32>
    %97 = arith.addf %95, %96 : vector<2x64xf32>
    %cst_38 = arith.constant dense<0.000000e+00> : vector<2x64xf32>
    %98 = tpu.matmul %85, %27, %cst_38 {dimension_numbers = #tpu.dot_dimension_numbers<[1], [0], [0], [1], [0, 0, 1, 1], [], []>} : vector<2x64xf32>, vector<64x64xf32>, vector<2x64xf32> -> vector<2x64xf32>
    %99 = arith.addf %97, %98 : vector<2x64xf32>
    %100 = math.tanh %99 : vector<2x64xf32>
    %101 = vector.extract_strided_slice %100 {offsets = [0, 0], sizes = [2, 32], strides = [1, 1]} : vector<2x64xf32> to vector<2x32xf32>
    %c0_39 = arith.constant 0 : index
    %c256 = arith.constant 256 : index
    %102 = vector.load %arg13[%c0_39, %c256] : memref<2x1472xf32, #tpu.memory_space<vmem>>, vector<2x32xf32>
    tpu.vector_store %arg13[%c0_39, %c256], %101 {strides = array<i32>} : memref<2x1472xf32, #tpu.memory_space<vmem>>, vector<2x32xf32>,
    %103 = vector.extract_strided_slice %100 {offsets = [0, 32], sizes = [2, 32], strides = [1, 1]} : vector<2x64xf32> to vector<2x32xf32>
    %c0_40 = arith.constant 0 : index
    %c1184 = arith.constant 1184 : index
    %104 = vector.load %arg13[%c0_40, %c1184] : memref<2x1472xf32, #tpu.memory_space<vmem>>, vector<2x32xf32>
    tpu.vector_store %arg13[%c0_40, %c1184], %103 {strides = array<i32>} : memref<2x1472xf32, #tpu.memory_space<vmem>>, vector<2x32xf32>,
    %105 = vector.extract_strided_slice %24 {offsets = [5, 0, 0], sizes = [1, 2, 16], strides = [1, 1, 1]} : vector<23x2x16xf32> to vector<1x2x16xf32>
    %106 = vector.shape_cast %105 : vector<1x2x16xf32> to vector<2x16xf32>
    %107 = vector.extract_strided_slice %24 {offsets = [17, 0, 0], sizes = [1, 2, 16], strides = [1, 1, 1]} : vector<23x2x16xf32> to vector<1x2x16xf32>
    %108 = vector.shape_cast %107 : vector<1x2x16xf32> to vector<2x16xf32>
    %109 = tpu.concatenate %106, %108 in 1 : vector<2x16xf32>, vector<2x16xf32> -> vector<2x32xf32>
    %cst_41 = arith.constant dense<0.000000e+00> : vector<2x64xf32>
    %110 = tpu.matmul %109, %26, %cst_41 {dimension_numbers = #tpu.dot_dimension_numbers<[1], [0], [0], [1], [0, 0, 1, 1], [], []>} : vector<2x32xf32>, vector<32x64xf32>, vector<2x64xf32> -> vector<2x64xf32>
    %111 = vector.broadcast %28 : vector<1x64xf32> to vector<2x64xf32>
    %112 = arith.addf %110, %111 : vector<2x64xf32>
    %cst_42 = arith.constant dense<0.000000e+00> : vector<2x64xf32>
    %113 = tpu.matmul %100, %27, %cst_42 {dimension_numbers = #tpu.dot_dimension_numbers<[1], [0], [0], [1], [0, 0, 1, 1], [], []>} : vector<2x64xf32>, vector<64x64xf32>, vector<2x64xf32> -> vector<2x64xf32>
    %114 = arith.addf %112, %113 : vector<2x64xf32>
    %115 = math.tanh %114 : vector<2x64xf32>
    %116 = vector.extract_strided_slice %115 {offsets = [0, 0], sizes = [2, 32], strides = [1, 1]} : vector<2x64xf32> to vector<2x32xf32>
    %c0_43 = arith.constant 0 : index
    %c320 = arith.constant 320 : index
    %117 = vector.load %arg13[%c0_43, %c320] : memref<2x1472xf32, #tpu.memory_space<vmem>>, vector<2x32xf32>
    tpu.vector_store %arg13[%c0_43, %c320], %116 {strides = array<i32>} : memref<2x1472xf32, #tpu.memory_space<vmem>>, vector<2x32xf32>,
    %118 = vector.extract_strided_slice %115 {offsets = [0, 32], sizes = [2, 32], strides = [1, 1]} : vector<2x64xf32> to vector<2x32xf32>
    %c0_44 = arith.constant 0 : index
    %c1120 = arith.constant 1120 : index
    %119 = vector.load %arg13[%c0_44, %c1120] : memref<2x1472xf32, #tpu.memory_space<vmem>>, vector<2x32xf32>
    tpu.vector_store %arg13[%c0_44, %c1120], %118 {strides = array<i32>} : memref<2x1472xf32, #tpu.memory_space<vmem>>, vector<2x32xf32>,
    %120 = vector.extract_strided_slice %24 {offsets = [6, 0, 0], sizes = [1, 2, 16], strides = [1, 1, 1]} : vector<23x2x16xf32> to vector<1x2x16xf32>
    %121 = vector.shape_cast %120 : vector<1x2x16xf32> to vector<2x16xf32>
    %122 = vector.extract_strided_slice %24 {offsets = [16, 0, 0], sizes = [1, 2, 16], strides = [1, 1, 1]} : vector<23x2x16xf32> to vector<1x2x16xf32>
    %123 = vector.shape_cast %122 : vector<1x2x16xf32> to vector<2x16xf32>
    %124 = tpu.concatenate %121, %123 in 1 : vector<2x16xf32>, vector<2x16xf32> -> vector<2x32xf32>
    %cst_45 = arith.constant dense<0.000000e+00> : vector<2x64xf32>
    %125 = tpu.matmul %124, %26, %cst_45 {dimension_numbers = #tpu.dot_dimension_numbers<[1], [0], [0], [1], [0, 0, 1, 1], [], []>} : vector<2x32xf32>, vector<32x64xf32>, vector<2x64xf32> -> vector<2x64xf32>
    %126 = vector.broadcast %28 : vector<1x64xf32> to vector<2x64xf32>
    %127 = arith.addf %125, %126 : vector<2x64xf32>
    %cst_46 = arith.constant dense<0.000000e+00> : vector<2x64xf32>
    %128 = tpu.matmul %115, %27, %cst_46 {dimension_numbers = #tpu.dot_dimension_numbers<[1], [0], [0], [1], [0, 0, 1, 1], [], []>} : vector<2x64xf32>, vector<64x64xf32>, vector<2x64xf32> -> vector<2x64xf32>
    %129 = arith.addf %127, %128 : vector<2x64xf32>
    %130 = math.tanh %129 : vector<2x64xf32>
    %131 = vector.extract_strided_slice %130 {offsets = [0, 0], sizes = [2, 32], strides = [1, 1]} : vector<2x64xf32> to vector<2x32xf32>
    %c0_47 = arith.constant 0 : index
    %c384 = arith.constant 384 : index
    %132 = vector.load %arg13[%c0_47, %c384] : memref<2x1472xf32, #tpu.memory_space<vmem>>, vector<2x32xf32>
    tpu.vector_store %arg13[%c0_47, %c384], %131 {strides = array<i32>} : memref<2x1472xf32, #tpu.memory_space<vmem>>, vector<2x32xf32>,
    %133 = vector.extract_strided_slice %130 {offsets = [0, 32], sizes = [2, 32], strides = [1, 1]} : vector<2x64xf32> to vector<2x32xf32>
    %c0_48 = arith.constant 0 : index
    %c1056 = arith.constant 1056 : index
    %134 = vector.load %arg13[%c0_48, %c1056] : memref<2x1472xf32, #tpu.memory_space<vmem>>, vector<2x32xf32>
    tpu.vector_store %arg13[%c0_48, %c1056], %133 {strides = array<i32>} : memref<2x1472xf32, #tpu.memory_space<vmem>>, vector<2x32xf32>,
    %135 = vector.extract_strided_slice %24 {offsets = [7, 0, 0], sizes = [1, 2, 16], strides = [1, 1, 1]} : vector<23x2x16xf32> to vector<1x2x16xf32>
    %136 = vector.shape_cast %135 : vector<1x2x16xf32> to vector<2x16xf32>
    %137 = vector.extract_strided_slice %24 {offsets = [15, 0, 0], sizes = [1, 2, 16], strides = [1, 1, 1]} : vector<23x2x16xf32> to vector<1x2x16xf32>
    %138 = vector.shape_cast %137 : vector<1x2x16xf32> to vector<2x16xf32>
    %139 = tpu.concatenate %136, %138 in 1 : vector<2x16xf32>, vector<2x16xf32> -> vector<2x32xf32>
    %cst_49 = arith.constant dense<0.000000e+00> : vector<2x64xf32>
    %140 = tpu.matmul %139, %26, %cst_49 {dimension_numbers = #tpu.dot_dimension_numbers<[1], [0], [0], [1], [0, 0, 1, 1], [], []>} : vector<2x32xf32>, vector<32x64xf32>, vector<2x64xf32> -> vector<2x64xf32>
    %141 = vector.broadcast %28 : vector<1x64xf32> to vector<2x64xf32>
    %142 = arith.addf %140, %141 : vector<2x64xf32>
    %cst_50 = arith.constant dense<0.000000e+00> : vector<2x64xf32>
    %143 = tpu.matmul %130, %27, %cst_50 {dimension_numbers = #tpu.dot_dimension_numbers<[1], [0], [0], [1], [0, 0, 1, 1], [], []>} : vector<2x64xf32>, vector<64x64xf32>, vector<2x64xf32> -> vector<2x64xf32>
    %144 = arith.addf %142, %143 : vector<2x64xf32>
    %145 = math.tanh %144 : vector<2x64xf32>
    %146 = vector.extract_strided_slice %145 {offsets = [0, 0], sizes = [2, 32], strides = [1, 1]} : vector<2x64xf32> to vector<2x32xf32>
    %c0_51 = arith.constant 0 : index
    %c448 = arith.constant 448 : index
    %147 = vector.load %arg13[%c0_51, %c448] : memref<2x1472xf32, #tpu.memory_space<vmem>>, vector<2x32xf32>
    tpu.vector_store %arg13[%c0_51, %c448], %146 {strides = array<i32>} : memref<2x1472xf32, #tpu.memory_space<vmem>>, vector<2x32xf32>,
    %148 = vector.extract_strided_slice %145 {offsets = [0, 32], sizes = [2, 32], strides = [1, 1]} : vector<2x64xf32> to vector<2x32xf32>
    %c0_52 = arith.constant 0 : index
    %c992 = arith.constant 992 : index
    %149 = vector.load %arg13[%c0_52, %c992] : memref<2x1472xf32, #tpu.memory_space<vmem>>, vector<2x32xf32>
    tpu.vector_store %arg13[%c0_52, %c992], %148 {strides = array<i32>} : memref<2x1472xf32, #tpu.memory_space<vmem>>, vector<2x32xf32>,
    %150 = vector.extract_strided_slice %24 {offsets = [8, 0, 0], sizes = [1, 2, 16], strides = [1, 1, 1]} : vector<23x2x16xf32> to vector<1x2x16xf32>
    %151 = vector.shape_cast %150 : vector<1x2x16xf32> to vector<2x16xf32>
    %152 = vector.extract_strided_slice %24 {offsets = [14, 0, 0], sizes = [1, 2, 16], strides = [1, 1, 1]} : vector<23x2x16xf32> to vector<1x2x16xf32>
    %153 = vector.shape_cast %152 : vector<1x2x16xf32> to vector<2x16xf32>
    %154 = tpu.concatenate %151, %153 in 1 : vector<2x16xf32>, vector<2x16xf32> -> vector<2x32xf32>
    %cst_53 = arith.constant dense<0.000000e+00> : vector<2x64xf32>
    %155 = tpu.matmul %154, %26, %cst_53 {dimension_numbers = #tpu.dot_dimension_numbers<[1], [0], [0], [1], [0, 0, 1, 1], [], []>} : vector<2x32xf32>, vector<32x64xf32>, vector<2x64xf32> -> vector<2x64xf32>
    %156 = vector.broadcast %28 : vector<1x64xf32> to vector<2x64xf32>
    %157 = arith.addf %155, %156 : vector<2x64xf32>
    %cst_54 = arith.constant dense<0.000000e+00> : vector<2x64xf32>
    %158 = tpu.matmul %145, %27, %cst_54 {dimension_numbers = #tpu.dot_dimension_numbers<[1], [0], [0], [1], [0, 0, 1, 1], [], []>} : vector<2x64xf32>, vector<64x64xf32>, vector<2x64xf32> -> vector<2x64xf32>
    %159 = arith.addf %157, %158 : vector<2x64xf32>
    %160 = math.tanh %159 : vector<2x64xf32>
    %161 = vector.extract_strided_slice %160 {offsets = [0, 0], sizes = [2, 32], strides = [1, 1]} : vector<2x64xf32> to vector<2x32xf32>
    %c0_55 = arith.constant 0 : index
    %c512 = arith.constant 512 : index
    %162 = vector.load %arg13[%c0_55, %c512] : memref<2x1472xf32, #tpu.memory_space<vmem>>, vector<2x32xf32>
    tpu.vector_store %arg13[%c0_55, %c512], %161 {strides = array<i32>} : memref<2x1472xf32, #tpu.memory_space<vmem>>, vector<2x32xf32>,
    %163 = vector.extract_strided_slice %160 {offsets = [0, 32], sizes = [2, 32], strides = [1, 1]} : vector<2x64xf32> to vector<2x32xf32>
    %c0_56 = arith.constant 0 : index
    %c928 = arith.constant 928 : index
    %164 = vector.load %arg13[%c0_56, %c928] : memref<2x1472xf32, #tpu.memory_space<vmem>>, vector<2x32xf32>
    tpu.vector_store %arg13[%c0_56, %c928], %163 {strides = array<i32>} : memref<2x1472xf32, #tpu.memory_space<vmem>>, vector<2x32xf32>,
    %165 = vector.extract_strided_slice %24 {offsets = [9, 0, 0], sizes = [1, 2, 16], strides = [1, 1, 1]} : vector<23x2x16xf32> to vector<1x2x16xf32>
    %166 = vector.shape_cast %165 : vector<1x2x16xf32> to vector<2x16xf32>
    %167 = vector.extract_strided_slice %24 {offsets = [13, 0, 0], sizes = [1, 2, 16], strides = [1, 1, 1]} : vector<23x2x16xf32> to vector<1x2x16xf32>
    %168 = vector.shape_cast %167 : vector<1x2x16xf32> to vector<2x16xf32>
    %169 = tpu.concatenate %166, %168 in 1 : vector<2x16xf32>, vector<2x16xf32> -> vector<2x32xf32>
    %cst_57 = arith.constant dense<0.000000e+00> : vector<2x64xf32>
    %170 = tpu.matmul %169, %26, %cst_57 {dimension_numbers = #tpu.dot_dimension_numbers<[1], [0], [0], [1], [0, 0, 1, 1], [], []>} : vector<2x32xf32>, vector<32x64xf32>, vector<2x64xf32> -> vector<2x64xf32>
    %171 = vector.broadcast %28 : vector<1x64xf32> to vector<2x64xf32>
    %172 = arith.addf %170, %171 : vector<2x64xf32>
    %cst_58 = arith.constant dense<0.000000e+00> : vector<2x64xf32>
    %173 = tpu.matmul %160, %27, %cst_58 {dimension_numbers = #tpu.dot_dimension_numbers<[1], [0], [0], [1], [0, 0, 1, 1], [], []>} : vector<2x64xf32>, vector<64x64xf32>, vector<2x64xf32> -> vector<2x64xf32>
    %174 = arith.addf %172, %173 : vector<2x64xf32>
    %175 = math.tanh %174 : vector<2x64xf32>
    %176 = vector.extract_strided_slice %175 {offsets = [0, 0], sizes = [2, 32], strides = [1, 1]} : vector<2x64xf32> to vector<2x32xf32>
    %c0_59 = arith.constant 0 : index
    %c576 = arith.constant 576 : index
    %177 = vector.load %arg13[%c0_59, %c576] : memref<2x1472xf32, #tpu.memory_space<vmem>>, vector<2x32xf32>
    tpu.vector_store %arg13[%c0_59, %c576], %176 {strides = array<i32>} : memref<2x1472xf32, #tpu.memory_space<vmem>>, vector<2x32xf32>,
    %178 = vector.extract_strided_slice %175 {offsets = [0, 32], sizes = [2, 32], strides = [1, 1]} : vector<2x64xf32> to vector<2x32xf32>
    %c0_60 = arith.constant 0 : index
    %c864 = arith.constant 864 : index
    %179 = vector.load %arg13[%c0_60, %c864] : memref<2x1472xf32, #tpu.memory_space<vmem>>, vector<2x32xf32>
    tpu.vector_store %arg13[%c0_60, %c864], %178 {strides = array<i32>} : memref<2x1472xf32, #tpu.memory_space<vmem>>, vector<2x32xf32>,
    %180 = vector.extract_strided_slice %24 {offsets = [10, 0, 0], sizes = [1, 2, 16], strides = [1, 1, 1]} : vector<23x2x16xf32> to vector<1x2x16xf32>
    %181 = vector.shape_cast %180 : vector<1x2x16xf32> to vector<2x16xf32>
    %182 = vector.extract_strided_slice %24 {offsets = [12, 0, 0], sizes = [1, 2, 16], strides = [1, 1, 1]} : vector<23x2x16xf32> to vector<1x2x16xf32>
    %183 = vector.shape_cast %182 : vector<1x2x16xf32> to vector<2x16xf32>
    %184 = tpu.concatenate %181, %183 in 1 : vector<2x16xf32>, vector<2x16xf32> -> vector<2x32xf32>
    %cst_61 = arith.constant dense<0.000000e+00> : vector<2x64xf32>
    %185 = tpu.matmul %184, %26, %cst_61 {dimension_numbers = #tpu.dot_dimension_numbers<[1], [0], [0], [1], [0, 0, 1, 1], [], []>} : vector<2x32xf32>, vector<32x64xf32>, vector<2x64xf32> -> vector<2x64xf32>
    %186 = vector.broadcast %28 : vector<1x64xf32> to vector<2x64xf32>
    %187 = arith.addf %185, %186 : vector<2x64xf32>
    %cst_62 = arith.constant dense<0.000000e+00> : vector<2x64xf32>
    %188 = tpu.matmul %175, %27, %cst_62 {dimension_numbers = #tpu.dot_dimension_numbers<[1], [0], [0], [1], [0, 0, 1, 1], [], []>} : vector<2x64xf32>, vector<64x64xf32>, vector<2x64xf32> -> vector<2x64xf32>
    %189 = arith.addf %187, %188 : vector<2x64xf32>
    %190 = math.tanh %189 : vector<2x64xf32>
    %191 = vector.extract_strided_slice %190 {offsets = [0, 0], sizes = [2, 32], strides = [1, 1]} : vector<2x64xf32> to vector<2x32xf32>
    %c0_63 = arith.constant 0 : index
    %c640 = arith.constant 640 : index
    %192 = vector.load %arg13[%c0_63, %c640] : memref<2x1472xf32, #tpu.memory_space<vmem>>, vector<2x32xf32>
    tpu.vector_store %arg13[%c0_63, %c640], %191 {strides = array<i32>} : memref<2x1472xf32, #tpu.memory_space<vmem>>, vector<2x32xf32>,
    %193 = vector.extract_strided_slice %190 {offsets = [0, 32], sizes = [2, 32], strides = [1, 1]} : vector<2x64xf32> to vector<2x32xf32>
    %c0_64 = arith.constant 0 : index
    %c800 = arith.constant 800 : index
    %194 = vector.load %arg13[%c0_64, %c800] : memref<2x1472xf32, #tpu.memory_space<vmem>>, vector<2x32xf32>
    tpu.vector_store %arg13[%c0_64, %c800], %193 {strides = array<i32>} : memref<2x1472xf32, #tpu.memory_space<vmem>>, vector<2x32xf32>,
    %195 = vector.extract_strided_slice %24 {offsets = [11, 0, 0], sizes = [1, 2, 16], strides = [1, 1, 1]} : vector<23x2x16xf32> to vector<1x2x16xf32>
    %196 = vector.shape_cast %195 : vector<1x2x16xf32> to vector<2x16xf32>
    %197 = vector.extract_strided_slice %24 {offsets = [11, 0, 0], sizes = [1, 2, 16], strides = [1, 1, 1]} : vector<23x2x16xf32> to vector<1x2x16xf32>
    %198 = vector.shape_cast %197 : vector<1x2x16xf32> to vector<2x16xf32>
    %199 = tpu.concatenate %196, %198 in 1 : vector<2x16xf32>, vector<2x16xf32> -> vector<2x32xf32>
    %cst_65 = arith.constant dense<0.000000e+00> : vector<2x64xf32>
    %200 = tpu.matmul %199, %26, %cst_65 {dimension_numbers = #tpu.dot_dimension_numbers<[1], [0], [0], [1], [0, 0, 1, 1], [], []>} : vector<2x32xf32>, vector<32x64xf32>, vector<2x64xf32> -> vector<2x64xf32>
    %201 = vector.broadcast %28 : vector<1x64xf32> to vector<2x64xf32>
    %202 = arith.addf %200, %201 : vector<2x64xf32>
    %cst_66 = arith.constant dense<0.000000e+00> : vector<2x64xf32>
    %203 = tpu.matmul %190, %27, %cst_66 {dimension_numbers = #tpu.dot_dimension_numbers<[1], [0], [0], [1], [0, 0, 1, 1], [], []>} : vector<2x64xf32>, vector<64x64xf32>, vector<2x64xf32> -> vector<2x64xf32>
    %204 = arith.addf %202, %203 : vector<2x64xf32>
    %205 = math.tanh %204 : vector<2x64xf32>
    %206 = vector.extract_strided_slice %205 {offsets = [0, 0], sizes = [2, 32], strides = [1, 1]} : vector<2x64xf32> to vector<2x32xf32>
    %c0_67 = arith.constant 0 : index
    %c704 = arith.constant 704 : index
    %207 = vector.load %arg13[%c0_67, %c704] : memref<2x1472xf32, #tpu.memory_space<vmem>>, vector<2x32xf32>
    tpu.vector_store %arg13[%c0_67, %c704], %206 {strides = array<i32>} : memref<2x1472xf32, #tpu.memory_space<vmem>>, vector<2x32xf32>,
    %208 = vector.extract_strided_slice %205 {offsets = [0, 32], sizes = [2, 32], strides = [1, 1]} : vector<2x64xf32> to vector<2x32xf32>
    %c0_68 = arith.constant 0 : index
    %c736 = arith.constant 736 : index
    %209 = vector.load %arg13[%c0_68, %c736] : memref<2x1472xf32, #tpu.memory_space<vmem>>, vector<2x32xf32>
    tpu.vector_store %arg13[%c0_68, %c736], %208 {strides = array<i32>} : memref<2x1472xf32, #tpu.memory_space<vmem>>, vector<2x32xf32>,
    %210 = vector.extract_strided_slice %24 {offsets = [12, 0, 0], sizes = [1, 2, 16], strides = [1, 1, 1]} : vector<23x2x16xf32> to vector<1x2x16xf32>
    %211 = vector.shape_cast %210 : vector<1x2x16xf32> to vector<2x16xf32>
    %212 = vector.extract_strided_slice %24 {offsets = [10, 0, 0], sizes = [1, 2, 16], strides = [1, 1, 1]} : vector<23x2x16xf32> to vector<1x2x16xf32>
    %213 = vector.shape_cast %212 : vector<1x2x16xf32> to vector<2x16xf32>
    %214 = tpu.concatenate %211, %213 in 1 : vector<2x16xf32>, vector<2x16xf32> -> vector<2x32xf32>
    %cst_69 = arith.constant dense<0.000000e+00> : vector<2x64xf32>
    %215 = tpu.matmul %214, %26, %cst_69 {dimension_numbers = #tpu.dot_dimension_numbers<[1], [0], [0], [1], [0, 0, 1, 1], [], []>} : vector<2x32xf32>, vector<32x64xf32>, vector<2x64xf32> -> vector<2x64xf32>
    %216 = vector.broadcast %28 : vector<1x64xf32> to vector<2x64xf32>
    %217 = arith.addf %215, %216 : vector<2x64xf32>
    %cst_70 = arith.constant dense<0.000000e+00> : vector<2x64xf32>
    %218 = tpu.matmul %205, %27, %cst_70 {dimension_numbers = #tpu.dot_dimension_numbers<[1], [0], [0], [1], [0, 0, 1, 1], [], []>} : vector<2x64xf32>, vector<64x64xf32>, vector<2x64xf32> -> vector<2x64xf32>
    %219 = arith.addf %217, %218 : vector<2x64xf32>
    %220 = math.tanh %219 : vector<2x64xf32>
    %221 = vector.extract_strided_slice %220 {offsets = [0, 0], sizes = [2, 32], strides = [1, 1]} : vector<2x64xf32> to vector<2x32xf32>
    %c0_71 = arith.constant 0 : index
    %c768 = arith.constant 768 : index
    %222 = vector.load %arg13[%c0_71, %c768] : memref<2x1472xf32, #tpu.memory_space<vmem>>, vector<2x32xf32>
    tpu.vector_store %arg13[%c0_71, %c768], %221 {strides = array<i32>} : memref<2x1472xf32, #tpu.memory_space<vmem>>, vector<2x32xf32>,
    %223 = vector.extract_strided_slice %220 {offsets = [0, 32], sizes = [2, 32], strides = [1, 1]} : vector<2x64xf32> to vector<2x32xf32>
    %c0_72 = arith.constant 0 : index
    %c672 = arith.constant 672 : index
    %224 = vector.load %arg13[%c0_72, %c672] : memref<2x1472xf32, #tpu.memory_space<vmem>>, vector<2x32xf32>
    tpu.vector_store %arg13[%c0_72, %c672], %223 {strides = array<i32>} : memref<2x1472xf32, #tpu.memory_space<vmem>>, vector<2x32xf32>,
    %225 = vector.extract_strided_slice %24 {offsets = [13, 0, 0], sizes = [1, 2, 16], strides = [1, 1, 1]} : vector<23x2x16xf32> to vector<1x2x16xf32>
    %226 = vector.shape_cast %225 : vector<1x2x16xf32> to vector<2x16xf32>
    %227 = vector.extract_strided_slice %24 {offsets = [9, 0, 0], sizes = [1, 2, 16], strides = [1, 1, 1]} : vector<23x2x16xf32> to vector<1x2x16xf32>
    %228 = vector.shape_cast %227 : vector<1x2x16xf32> to vector<2x16xf32>
    %229 = tpu.concatenate %226, %228 in 1 : vector<2x16xf32>, vector<2x16xf32> -> vector<2x32xf32>
    %cst_73 = arith.constant dense<0.000000e+00> : vector<2x64xf32>
    %230 = tpu.matmul %229, %26, %cst_73 {dimension_numbers = #tpu.dot_dimension_numbers<[1], [0], [0], [1], [0, 0, 1, 1], [], []>} : vector<2x32xf32>, vector<32x64xf32>, vector<2x64xf32> -> vector<2x64xf32>
    %231 = vector.broadcast %28 : vector<1x64xf32> to vector<2x64xf32>
    %232 = arith.addf %230, %231 : vector<2x64xf32>
    %cst_74 = arith.constant dense<0.000000e+00> : vector<2x64xf32>
    %233 = tpu.matmul %220, %27, %cst_74 {dimension_numbers = #tpu.dot_dimension_numbers<[1], [0], [0], [1], [0, 0, 1, 1], [], []>} : vector<2x64xf32>, vector<64x64xf32>, vector<2x64xf32> -> vector<2x64xf32>
    %234 = arith.addf %232, %233 : vector<2x64xf32>
    %235 = math.tanh %234 : vector<2x64xf32>
    %236 = vector.extract_strided_slice %235 {offsets = [0, 0], sizes = [2, 32], strides = [1, 1]} : vector<2x64xf32> to vector<2x32xf32>
    %c0_75 = arith.constant 0 : index
    %c832 = arith.constant 832 : index
    %237 = vector.load %arg13[%c0_75, %c832] : memref<2x1472xf32, #tpu.memory_space<vmem>>, vector<2x32xf32>
    tpu.vector_store %arg13[%c0_75, %c832], %236 {strides = array<i32>} : memref<2x1472xf32, #tpu.memory_space<vmem>>, vector<2x32xf32>,
    %238 = vector.extract_strided_slice %235 {offsets = [0, 32], sizes = [2, 32], strides = [1, 1]} : vector<2x64xf32> to vector<2x32xf32>
    %c0_76 = arith.constant 0 : index
    %c608 = arith.constant 608 : index
    %239 = vector.load %arg13[%c0_76, %c608] : memref<2x1472xf32, #tpu.memory_space<vmem>>, vector<2x32xf32>
    tpu.vector_store %arg13[%c0_76, %c608], %238 {strides = array<i32>} : memref<2x1472xf32, #tpu.memory_space<vmem>>, vector<2x32xf32>,
    %240 = vector.extract_strided_slice %24 {offsets = [14, 0, 0], sizes = [1, 2, 16], strides = [1, 1, 1]} : vector<23x2x16xf32> to vector<1x2x16xf32>
    %241 = vector.shape_cast %240 : vector<1x2x16xf32> to vector<2x16xf32>
    %242 = vector.extract_strided_slice %24 {offsets = [8, 0, 0], sizes = [1, 2, 16], strides = [1, 1, 1]} : vector<23x2x16xf32> to vector<1x2x16xf32>
    %243 = vector.shape_cast %242 : vector<1x2x16xf32> to vector<2x16xf32>
    %244 = tpu.concatenate %241, %243 in 1 : vector<2x16xf32>, vector<2x16xf32> -> vector<2x32xf32>
    %cst_77 = arith.constant dense<0.000000e+00> : vector<2x64xf32>
    %245 = tpu.matmul %244, %26, %cst_77 {dimension_numbers = #tpu.dot_dimension_numbers<[1], [0], [0], [1], [0, 0, 1, 1], [], []>} : vector<2x32xf32>, vector<32x64xf32>, vector<2x64xf32> -> vector<2x64xf32>
    %246 = vector.broadcast %28 : vector<1x64xf32> to vector<2x64xf32>
    %247 = arith.addf %245, %246 : vector<2x64xf32>
    %cst_78 = arith.constant dense<0.000000e+00> : vector<2x64xf32>
    %248 = tpu.matmul %235, %27, %cst_78 {dimension_numbers = #tpu.dot_dimension_numbers<[1], [0], [0], [1], [0, 0, 1, 1], [], []>} : vector<2x64xf32>, vector<64x64xf32>, vector<2x64xf32> -> vector<2x64xf32>
    %249 = arith.addf %247, %248 : vector<2x64xf32>
    %250 = math.tanh %249 : vector<2x64xf32>
    %251 = vector.extract_strided_slice %250 {offsets = [0, 0], sizes = [2, 32], strides = [1, 1]} : vector<2x64xf32> to vector<2x32xf32>
    %c0_79 = arith.constant 0 : index
    %c896 = arith.constant 896 : index
    %252 = vector.load %arg13[%c0_79, %c896] : memref<2x1472xf32, #tpu.memory_space<vmem>>, vector<2x32xf32>
    tpu.vector_store %arg13[%c0_79, %c896], %251 {strides = array<i32>} : memref<2x1472xf32, #tpu.memory_space<vmem>>, vector<2x32xf32>,
    %253 = vector.extract_strided_slice %250 {offsets = [0, 32], sizes = [2, 32], strides = [1, 1]} : vector<2x64xf32> to vector<2x32xf32>
    %c0_80 = arith.constant 0 : index
    %c544 = arith.constant 544 : index
    %254 = vector.load %arg13[%c0_80, %c544] : memref<2x1472xf32, #tpu.memory_space<vmem>>, vector<2x32xf32>
    tpu.vector_store %arg13[%c0_80, %c544], %253 {strides = array<i32>} : memref<2x1472xf32, #tpu.memory_space<vmem>>, vector<2x32xf32>,
    %255 = vector.extract_strided_slice %24 {offsets = [15, 0, 0], sizes = [1, 2, 16], strides = [1, 1, 1]} : vector<23x2x16xf32> to vector<1x2x16xf32>
    %256 = vector.shape_cast %255 : vector<1x2x16xf32> to vector<2x16xf32>
    %257 = vector.extract_strided_slice %24 {offsets = [7, 0, 0], sizes = [1, 2, 16], strides = [1, 1, 1]} : vector<23x2x16xf32> to vector<1x2x16xf32>
    %258 = vector.shape_cast %257 : vector<1x2x16xf32> to vector<2x16xf32>
    %259 = tpu.concatenate %256, %258 in 1 : vector<2x16xf32>, vector<2x16xf32> -> vector<2x32xf32>
    %cst_81 = arith.constant dense<0.000000e+00> : vector<2x64xf32>
    %260 = tpu.matmul %259, %26, %cst_81 {dimension_numbers = #tpu.dot_dimension_numbers<[1], [0], [0], [1], [0, 0, 1, 1], [], []>} : vector<2x32xf32>, vector<32x64xf32>, vector<2x64xf32> -> vector<2x64xf32>
    %261 = vector.broadcast %28 : vector<1x64xf32> to vector<2x64xf32>
    %262 = arith.addf %260, %261 : vector<2x64xf32>
    %cst_82 = arith.constant dense<0.000000e+00> : vector<2x64xf32>
    %263 = tpu.matmul %250, %27, %cst_82 {dimension_numbers = #tpu.dot_dimension_numbers<[1], [0], [0], [1], [0, 0, 1, 1], [], []>} : vector<2x64xf32>, vector<64x64xf32>, vector<2x64xf32> -> vector<2x64xf32>
    %264 = arith.addf %262, %263 : vector<2x64xf32>
    %265 = math.tanh %264 : vector<2x64xf32>
    %266 = vector.extract_strided_slice %265 {offsets = [0, 0], sizes = [2, 32], strides = [1, 1]} : vector<2x64xf32> to vector<2x32xf32>
    %c0_83 = arith.constant 0 : index
    %c960 = arith.constant 960 : index
    %267 = vector.load %arg13[%c0_83, %c960] : memref<2x1472xf32, #tpu.memory_space<vmem>>, vector<2x32xf32>
    tpu.vector_store %arg13[%c0_83, %c960], %266 {strides = array<i32>} : memref<2x1472xf32, #tpu.memory_space<vmem>>, vector<2x32xf32>,
    %268 = vector.extract_strided_slice %265 {offsets = [0, 32], sizes = [2, 32], strides = [1, 1]} : vector<2x64xf32> to vector<2x32xf32>
    %c0_84 = arith.constant 0 : index
    %c480 = arith.constant 480 : index
    %269 = vector.load %arg13[%c0_84, %c480] : memref<2x1472xf32, #tpu.memory_space<vmem>>, vector<2x32xf32>
    tpu.vector_store %arg13[%c0_84, %c480], %268 {strides = array<i32>} : memref<2x1472xf32, #tpu.memory_space<vmem>>, vector<2x32xf32>,
    %270 = vector.extract_strided_slice %24 {offsets = [16, 0, 0], sizes = [1, 2, 16], strides = [1, 1, 1]} : vector<23x2x16xf32> to vector<1x2x16xf32>
    %271 = vector.shape_cast %270 : vector<1x2x16xf32> to vector<2x16xf32>
    %272 = vector.extract_strided_slice %24 {offsets = [6, 0, 0], sizes = [1, 2, 16], strides = [1, 1, 1]} : vector<23x2x16xf32> to vector<1x2x16xf32>
    %273 = vector.shape_cast %272 : vector<1x2x16xf32> to vector<2x16xf32>
    %274 = tpu.concatenate %271, %273 in 1 : vector<2x16xf32>, vector<2x16xf32> -> vector<2x32xf32>
    %cst_85 = arith.constant dense<0.000000e+00> : vector<2x64xf32>
    %275 = tpu.matmul %274, %26, %cst_85 {dimension_numbers = #tpu.dot_dimension_numbers<[1], [0], [0], [1], [0, 0, 1, 1], [], []>} : vector<2x32xf32>, vector<32x64xf32>, vector<2x64xf32> -> vector<2x64xf32>
    %276 = vector.broadcast %28 : vector<1x64xf32> to vector<2x64xf32>
    %277 = arith.addf %275, %276 : vector<2x64xf32>
    %cst_86 = arith.constant dense<0.000000e+00> : vector<2x64xf32>
    %278 = tpu.matmul %265, %27, %cst_86 {dimension_numbers = #tpu.dot_dimension_numbers<[1], [0], [0], [1], [0, 0, 1, 1], [], []>} : vector<2x64xf32>, vector<64x64xf32>, vector<2x64xf32> -> vector<2x64xf32>
    %279 = arith.addf %277, %278 : vector<2x64xf32>
    %280 = math.tanh %279 : vector<2x64xf32>
    %281 = vector.extract_strided_slice %280 {offsets = [0, 0], sizes = [2, 32], strides = [1, 1]} : vector<2x64xf32> to vector<2x32xf32>
    %c0_87 = arith.constant 0 : index
    %c1024 = arith.constant 1024 : index
    %282 = vector.load %arg13[%c0_87, %c1024] : memref<2x1472xf32, #tpu.memory_space<vmem>>, vector<2x32xf32>
    tpu.vector_store %arg13[%c0_87, %c1024], %281 {strides = array<i32>} : memref<2x1472xf32, #tpu.memory_space<vmem>>, vector<2x32xf32>,
    %283 = vector.extract_strided_slice %280 {offsets = [0, 32], sizes = [2, 32], strides = [1, 1]} : vector<2x64xf32> to vector<2x32xf32>
    %c0_88 = arith.constant 0 : index
    %c416 = arith.constant 416 : index
    %284 = vector.load %arg13[%c0_88, %c416] : memref<2x1472xf32, #tpu.memory_space<vmem>>, vector<2x32xf32>
    tpu.vector_store %arg13[%c0_88, %c416], %283 {strides = array<i32>} : memref<2x1472xf32, #tpu.memory_space<vmem>>, vector<2x32xf32>,
    %285 = vector.extract_strided_slice %24 {offsets = [17, 0, 0], sizes = [1, 2, 16], strides = [1, 1, 1]} : vector<23x2x16xf32> to vector<1x2x16xf32>
    %286 = vector.shape_cast %285 : vector<1x2x16xf32> to vector<2x16xf32>
    %287 = vector.extract_strided_slice %24 {offsets = [5, 0, 0], sizes = [1, 2, 16], strides = [1, 1, 1]} : vector<23x2x16xf32> to vector<1x2x16xf32>
    %288 = vector.shape_cast %287 : vector<1x2x16xf32> to vector<2x16xf32>
    %289 = tpu.concatenate %286, %288 in 1 : vector<2x16xf32>, vector<2x16xf32> -> vector<2x32xf32>
    %cst_89 = arith.constant dense<0.000000e+00> : vector<2x64xf32>
    %290 = tpu.matmul %289, %26, %cst_89 {dimension_numbers = #tpu.dot_dimension_numbers<[1], [0], [0], [1], [0, 0, 1, 1], [], []>} : vector<2x32xf32>, vector<32x64xf32>, vector<2x64xf32> -> vector<2x64xf32>
    %291 = vector.broadcast %28 : vector<1x64xf32> to vector<2x64xf32>
    %292 = arith.addf %290, %291 : vector<2x64xf32>
    %cst_90 = arith.constant dense<0.000000e+00> : vector<2x64xf32>
    %293 = tpu.matmul %280, %27, %cst_90 {dimension_numbers = #tpu.dot_dimension_numbers<[1], [0], [0], [1], [0, 0, 1, 1], [], []>} : vector<2x64xf32>, vector<64x64xf32>, vector<2x64xf32> -> vector<2x64xf32>
    %294 = arith.addf %292, %293 : vector<2x64xf32>
    %295 = math.tanh %294 : vector<2x64xf32>
    %296 = vector.extract_strided_slice %295 {offsets = [0, 0], sizes = [2, 32], strides = [1, 1]} : vector<2x64xf32> to vector<2x32xf32>
    %c0_91 = arith.constant 0 : index
    %c1088 = arith.constant 1088 : index
    %297 = vector.load %arg13[%c0_91, %c1088] : memref<2x1472xf32, #tpu.memory_space<vmem>>, vector<2x32xf32>
    tpu.vector_store %arg13[%c0_91, %c1088], %296 {strides = array<i32>} : memref<2x1472xf32, #tpu.memory_space<vmem>>, vector<2x32xf32>,
    %298 = vector.extract_strided_slice %295 {offsets = [0, 32], sizes = [2, 32], strides = [1, 1]} : vector<2x64xf32> to vector<2x32xf32>
    %c0_92 = arith.constant 0 : index
    %c352 = arith.constant 352 : index
    %299 = vector.load %arg13[%c0_92, %c352] : memref<2x1472xf32, #tpu.memory_space<vmem>>, vector<2x32xf32>
    tpu.vector_store %arg13[%c0_92, %c352], %298 {strides = array<i32>} : memref<2x1472xf32, #tpu.memory_space<vmem>>, vector<2x32xf32>,
    %300 = vector.extract_strided_slice %24 {offsets = [18, 0, 0], sizes = [1, 2, 16], strides = [1, 1, 1]} : vector<23x2x16xf32> to vector<1x2x16xf32>
    %301 = vector.shape_cast %300 : vector<1x2x16xf32> to vector<2x16xf32>
    %302 = vector.extract_strided_slice %24 {offsets = [4, 0, 0], sizes = [1, 2, 16], strides = [1, 1, 1]} : vector<23x2x16xf32> to vector<1x2x16xf32>
    %303 = vector.shape_cast %302 : vector<1x2x16xf32> to vector<2x16xf32>
    %304 = tpu.concatenate %301, %303 in 1 : vector<2x16xf32>, vector<2x16xf32> -> vector<2x32xf32>
    %cst_93 = arith.constant dense<0.000000e+00> : vector<2x64xf32>
    %305 = tpu.matmul %304, %26, %cst_93 {dimension_numbers = #tpu.dot_dimension_numbers<[1], [0], [0], [1], [0, 0, 1, 1], [], []>} : vector<2x32xf32>, vector<32x64xf32>, vector<2x64xf32> -> vector<2x64xf32>
    %306 = vector.broadcast %28 : vector<1x64xf32> to vector<2x64xf32>
    %307 = arith.addf %305, %306 : vector<2x64xf32>
    %cst_94 = arith.constant dense<0.000000e+00> : vector<2x64xf32>
    %308 = tpu.matmul %295, %27, %cst_94 {dimension_numbers = #tpu.dot_dimension_numbers<[1], [0], [0], [1], [0, 0, 1, 1], [], []>} : vector<2x64xf32>, vector<64x64xf32>, vector<2x64xf32> -> vector<2x64xf32>
    %309 = arith.addf %307, %308 : vector<2x64xf32>
    %310 = math.tanh %309 : vector<2x64xf32>
    %311 = vector.extract_strided_slice %310 {offsets = [0, 0], sizes = [2, 32], strides = [1, 1]} : vector<2x64xf32> to vector<2x32xf32>
    %c0_95 = arith.constant 0 : index
    %c1152 = arith.constant 1152 : index
    %312 = vector.load %arg13[%c0_95, %c1152] : memref<2x1472xf32, #tpu.memory_space<vmem>>, vector<2x32xf32>
    tpu.vector_store %arg13[%c0_95, %c1152], %311 {strides = array<i32>} : memref<2x1472xf32, #tpu.memory_space<vmem>>, vector<2x32xf32>,
    %313 = vector.extract_strided_slice %310 {offsets = [0, 32], sizes = [2, 32], strides = [1, 1]} : vector<2x64xf32> to vector<2x32xf32>
    %c0_96 = arith.constant 0 : index
    %c288 = arith.constant 288 : index
    %314 = vector.load %arg13[%c0_96, %c288] : memref<2x1472xf32, #tpu.memory_space<vmem>>, vector<2x32xf32>
    tpu.vector_store %arg13[%c0_96, %c288], %313 {strides = array<i32>} : memref<2x1472xf32, #tpu.memory_space<vmem>>, vector<2x32xf32>,
    %315 = vector.extract_strided_slice %24 {offsets = [19, 0, 0], sizes = [1, 2, 16], strides = [1, 1, 1]} : vector<23x2x16xf32> to vector<1x2x16xf32>
    %316 = vector.shape_cast %315 : vector<1x2x16xf32> to vector<2x16xf32>
    %317 = vector.extract_strided_slice %24 {offsets = [3, 0, 0], sizes = [1, 2, 16], strides = [1, 1, 1]} : vector<23x2x16xf32> to vector<1x2x16xf32>
    %318 = vector.shape_cast %317 : vector<1x2x16xf32> to vector<2x16xf32>
    %319 = tpu.concatenate %316, %318 in 1 : vector<2x16xf32>, vector<2x16xf32> -> vector<2x32xf32>
    %cst_97 = arith.constant dense<0.000000e+00> : vector<2x64xf32>
    %320 = tpu.matmul %319, %26, %cst_97 {dimension_numbers = #tpu.dot_dimension_numbers<[1], [0], [0], [1], [0, 0, 1, 1], [], []>} : vector<2x32xf32>, vector<32x64xf32>, vector<2x64xf32> -> vector<2x64xf32>
    %321 = vector.broadcast %28 : vector<1x64xf32> to vector<2x64xf32>
    %322 = arith.addf %320, %321 : vector<2x64xf32>
    %cst_98 = arith.constant dense<0.000000e+00> : vector<2x64xf32>
    %323 = tpu.matmul %310, %27, %cst_98 {dimension_numbers = #tpu.dot_dimension_numbers<[1], [0], [0], [1], [0, 0, 1, 1], [], []>} : vector<2x64xf32>, vector<64x64xf32>, vector<2x64xf32> -> vector<2x64xf32>
    %324 = arith.addf %322, %323 : vector<2x64xf32>
    %325 = math.tanh %324 : vector<2x64xf32>
    %326 = vector.extract_strided_slice %325 {offsets = [0, 0], sizes = [2, 32], strides = [1, 1]} : vector<2x64xf32> to vector<2x32xf32>
    %c0_99 = arith.constant 0 : index
    %c1216 = arith.constant 1216 : index
    %327 = vector.load %arg13[%c0_99, %c1216] : memref<2x1472xf32, #tpu.memory_space<vmem>>, vector<2x32xf32>
    tpu.vector_store %arg13[%c0_99, %c1216], %326 {strides = array<i32>} : memref<2x1472xf32, #tpu.memory_space<vmem>>, vector<2x32xf32>,
    %328 = vector.extract_strided_slice %325 {offsets = [0, 32], sizes = [2, 32], strides = [1, 1]} : vector<2x64xf32> to vector<2x32xf32>
    %c0_100 = arith.constant 0 : index
    %c224 = arith.constant 224 : index
    %329 = vector.load %arg13[%c0_100, %c224] : memref<2x1472xf32, #tpu.memory_space<vmem>>, vector<2x32xf32>
    tpu.vector_store %arg13[%c0_100, %c224], %328 {strides = array<i32>} : memref<2x1472xf32, #tpu.memory_space<vmem>>, vector<2x32xf32>,
    %330 = vector.extract_strided_slice %24 {offsets = [20, 0, 0], sizes = [1, 2, 16], strides = [1, 1, 1]} : vector<23x2x16xf32> to vector<1x2x16xf32>
    %331 = vector.shape_cast %330 : vector<1x2x16xf32> to vector<2x16xf32>
    %332 = vector.extract_strided_slice %24 {offsets = [2, 0, 0], sizes = [1, 2, 16], strides = [1, 1, 1]} : vector<23x2x16xf32> to vector<1x2x16xf32>
    %333 = vector.shape_cast %332 : vector<1x2x16xf32> to vector<2x16xf32>
    %334 = tpu.concatenate %331, %333 in 1 : vector<2x16xf32>, vector<2x16xf32> -> vector<2x32xf32>
    %cst_101 = arith.constant dense<0.000000e+00> : vector<2x64xf32>
    %335 = tpu.matmul %334, %26, %cst_101 {dimension_numbers = #tpu.dot_dimension_numbers<[1], [0], [0], [1], [0, 0, 1, 1], [], []>} : vector<2x32xf32>, vector<32x64xf32>, vector<2x64xf32> -> vector<2x64xf32>
    %336 = vector.broadcast %28 : vector<1x64xf32> to vector<2x64xf32>
    %337 = arith.addf %335, %336 : vector<2x64xf32>
    %cst_102 = arith.constant dense<0.000000e+00> : vector<2x64xf32>
    %338 = tpu.matmul %325, %27, %cst_102 {dimension_numbers = #tpu.dot_dimension_numbers<[1], [0], [0], [1], [0, 0, 1, 1], [], []>} : vector<2x64xf32>, vector<64x64xf32>, vector<2x64xf32> -> vector<2x64xf32>
    %339 = arith.addf %337, %338 : vector<2x64xf32>
    %340 = math.tanh %339 : vector<2x64xf32>
    %341 = vector.extract_strided_slice %340 {offsets = [0, 0], sizes = [2, 32], strides = [1, 1]} : vector<2x64xf32> to vector<2x32xf32>
    %c0_103 = arith.constant 0 : index
    %c1280 = arith.constant 1280 : index
    %342 = vector.load %arg13[%c0_103, %c1280] : memref<2x1472xf32, #tpu.memory_space<vmem>>, vector<2x32xf32>
    tpu.vector_store %arg13[%c0_103, %c1280], %341 {strides = array<i32>} : memref<2x1472xf32, #tpu.memory_space<vmem>>, vector<2x32xf32>,
    %343 = vector.extract_strided_slice %340 {offsets = [0, 32], sizes = [2, 32], strides = [1, 1]} : vector<2x64xf32> to vector<2x32xf32>
    %c0_104 = arith.constant 0 : index
    %c160 = arith.constant 160 : index
    %344 = vector.load %arg13[%c0_104, %c160] : memref<2x1472xf32, #tpu.memory_space<vmem>>, vector<2x32xf32>
    tpu.vector_store %arg13[%c0_104, %c160], %343 {strides = array<i32>} : memref<2x1472xf32, #tpu.memory_space<vmem>>, vector<2x32xf32>,
    %345 = vector.extract_strided_slice %24 {offsets = [21, 0, 0], sizes = [1, 2, 16], strides = [1, 1, 1]} : vector<23x2x16xf32> to vector<1x2x16xf32>
    %346 = vector.shape_cast %345 : vector<1x2x16xf32> to vector<2x16xf32>
    %347 = vector.extract_strided_slice %24 {offsets = [1, 0, 0], sizes = [1, 2, 16], strides = [1, 1, 1]} : vector<23x2x16xf32> to vector<1x2x16xf32>
    %348 = vector.shape_cast %347 : vector<1x2x16xf32> to vector<2x16xf32>
    %349 = tpu.concatenate %346, %348 in 1 : vector<2x16xf32>, vector<2x16xf32> -> vector<2x32xf32>
    %cst_105 = arith.constant dense<0.000000e+00> : vector<2x64xf32>
    %350 = tpu.matmul %349, %26, %cst_105 {dimension_numbers = #tpu.dot_dimension_numbers<[1], [0], [0], [1], [0, 0, 1, 1], [], []>} : vector<2x32xf32>, vector<32x64xf32>, vector<2x64xf32> -> vector<2x64xf32>
    %351 = vector.broadcast %28 : vector<1x64xf32> to vector<2x64xf32>
    %352 = arith.addf %350, %351 : vector<2x64xf32>
    %cst_106 = arith.constant dense<0.000000e+00> : vector<2x64xf32>
    %353 = tpu.matmul %340, %27, %cst_106 {dimension_numbers = #tpu.dot_dimension_numbers<[1], [0], [0], [1], [0, 0, 1, 1], [], []>} : vector<2x64xf32>, vector<64x64xf32>, vector<2x64xf32> -> vector<2x64xf32>
    %354 = arith.addf %352, %353 : vector<2x64xf32>
    %355 = math.tanh %354 : vector<2x64xf32>
    %356 = vector.extract_strided_slice %355 {offsets = [0, 0], sizes = [2, 32], strides = [1, 1]} : vector<2x64xf32> to vector<2x32xf32>
    %c0_107 = arith.constant 0 : index
    %c1344 = arith.constant 1344 : index
    %357 = vector.load %arg13[%c0_107, %c1344] : memref<2x1472xf32, #tpu.memory_space<vmem>>, vector<2x32xf32>
    tpu.vector_store %arg13[%c0_107, %c1344], %356 {strides = array<i32>} : memref<2x1472xf32, #tpu.memory_space<vmem>>, vector<2x32xf32>,
    %358 = vector.extract_strided_slice %355 {offsets = [0, 32], sizes = [2, 32], strides = [1, 1]} : vector<2x64xf32> to vector<2x32xf32>
    %c0_108 = arith.constant 0 : index
    %c96 = arith.constant 96 : index
    %359 = vector.load %arg13[%c0_108, %c96] : memref<2x1472xf32, #tpu.memory_space<vmem>>, vector<2x32xf32>
    tpu.vector_store %arg13[%c0_108, %c96], %358 {strides = array<i32>} : memref<2x1472xf32, #tpu.memory_space<vmem>>, vector<2x32xf32>,
    %360 = vector.extract_strided_slice %24 {offsets = [22, 0, 0], sizes = [1, 2, 16], strides = [1, 1, 1]} : vector<23x2x16xf32> to vector<1x2x16xf32>
    %361 = vector.shape_cast %360 : vector<1x2x16xf32> to vector<2x16xf32>
    %362 = vector.extract_strided_slice %24 {offsets = [0, 0, 0], sizes = [1, 2, 16], strides = [1, 1, 1]} : vector<23x2x16xf32> to vector<1x2x16xf32>
    %363 = vector.shape_cast %362 : vector<1x2x16xf32> to vector<2x16xf32>
    %364 = tpu.concatenate %361, %363 in 1 : vector<2x16xf32>, vector<2x16xf32> -> vector<2x32xf32>
    %cst_109 = arith.constant dense<0.000000e+00> : vector<2x64xf32>
    %365 = tpu.matmul %364, %26, %cst_109 {dimension_numbers = #tpu.dot_dimension_numbers<[1], [0], [0], [1], [0, 0, 1, 1], [], []>} : vector<2x32xf32>, vector<32x64xf32>, vector<2x64xf32> -> vector<2x64xf32>
    %366 = vector.broadcast %28 : vector<1x64xf32> to vector<2x64xf32>
    %367 = arith.addf %365, %366 : vector<2x64xf32>
    %cst_110 = arith.constant dense<0.000000e+00> : vector<2x64xf32>
    %368 = tpu.matmul %355, %27, %cst_110 {dimension_numbers = #tpu.dot_dimension_numbers<[1], [0], [0], [1], [0, 0, 1, 1], [], []>} : vector<2x64xf32>, vector<64x64xf32>, vector<2x64xf32> -> vector<2x64xf32>
    %369 = arith.addf %367, %368 : vector<2x64xf32>
    %370 = math.tanh %369 : vector<2x64xf32>
    %371 = vector.extract_strided_slice %370 {offsets = [0, 0], sizes = [2, 32], strides = [1, 1]} : vector<2x64xf32> to vector<2x32xf32>
    %c0_111 = arith.constant 0 : index
    %c1408 = arith.constant 1408 : index
    %372 = vector.load %arg13[%c0_111, %c1408] : memref<2x1472xf32, #tpu.memory_space<vmem>>, vector<2x32xf32>
    tpu.vector_store %arg13[%c0_111, %c1408], %371 {strides = array<i32>} : memref<2x1472xf32, #tpu.memory_space<vmem>>, vector<2x32xf32>,
    %373 = vector.extract_strided_slice %370 {offsets = [0, 32], sizes = [2, 32], strides = [1, 1]} : vector<2x64xf32> to vector<2x32xf32>
    %c0_112 = arith.constant 0 : index
    %c32 = arith.constant 32 : index
    %374 = vector.load %arg13[%c0_112, %c32] : memref<2x1472xf32, #tpu.memory_space<vmem>>, vector<2x32xf32>
    tpu.vector_store %arg13[%c0_112, %c32], %373 {strides = array<i32>} : memref<2x1472xf32, #tpu.memory_space<vmem>>, vector<2x32xf32>,
    %c0_113 = arith.constant 0 : index
    %c0_114 = arith.constant 0 : index
    %375 = vector.load %arg6[%c0_113, %c0_114] : memref<128x64xf32, #tpu.memory_space<vmem>>, vector<128x64xf32>
    %c0_115 = arith.constant 0 : index
    %c0_116 = arith.constant 0 : index
    %376 = vector.load %arg7[%c0_115, %c0_116] : memref<64x64xf32, #tpu.memory_space<vmem>>, vector<64x64xf32>
    %c0_117 = arith.constant 0 : index
    %c0_118 = arith.constant 0 : index
    %377 = vector.load %arg8[%c0_117, %c0_118] : memref<1x64xf32, #tpu.memory_space<vmem>>, vector<1x64xf32>
    %cst_119 = arith.constant 0.000000e+00 : f32
    %378 = vector.broadcast %cst_119 : f32 to vector<2x64xf32>
    %c0_120 = arith.constant 0 : index
    %c0_121 = arith.constant 0 : index
    %379 = vector.load %arg13[%c0_120, %c0_121] : memref<2x1472xf32, #tpu.memory_space<vmem>>, vector<2x64xf32>
    %c0_122 = arith.constant 0 : index
    %c1408_123 = arith.constant 1408 : index
    %380 = vector.load %arg13[%c0_122, %c1408_123] : memref<2x1472xf32, #tpu.memory_space<vmem>>, vector<2x64xf32>
    %381 = tpu.concatenate %379, %380 in 1 : vector<2x64xf32>, vector<2x64xf32> -> vector<2x128xf32>
    %cst_124 = arith.constant dense<0.000000e+00> : vector<2x64xf32>
    %382 = tpu.matmul %381, %375, %cst_124 {dimension_numbers = #tpu.dot_dimension_numbers<[1], [0], [0], [1], [0, 0, 1, 1], [], []>} : vector<2x128xf32>, vector<128x64xf32>, vector<2x64xf32> -> vector<2x64xf32>
    %383 = vector.broadcast %377 : vector<1x64xf32> to vector<2x64xf32>
    %384 = arith.addf %382, %383 : vector<2x64xf32>
    %cst_125 = arith.constant dense<0.000000e+00> : vector<2x64xf32>
    %385 = tpu.matmul %378, %376, %cst_125 {dimension_numbers = #tpu.dot_dimension_numbers<[1], [0], [0], [1], [0, 0, 1, 1], [], []>} : vector<2x64xf32>, vector<64x64xf32>, vector<2x64xf32> -> vector<2x64xf32>
    %386 = arith.addf %384, %385 : vector<2x64xf32>
    %387 = math.tanh %386 : vector<2x64xf32>
    %388 = vector.extract_strided_slice %387 {offsets = [0, 0], sizes = [2, 32], strides = [1, 1]} : vector<2x64xf32> to vector<2x32xf32>
    %cst_126 = arith.constant 0.000000e+00 : f32
    %389 = vector.broadcast %cst_126 : f32 to vector<2x32xf32>
    %390 = arith.maximumf %388, %389 : vector<2x32xf32>
    %c0_127 = arith.constant 0 : index
    %c0_128 = arith.constant 0 : index
    %391 = vector.load %arg12[%c0_127, %c0_128] : memref<2x1472xf32, #tpu.memory_space<vmem>>, vector<2x32xf32>
    tpu.vector_store %arg12[%c0_127, %c0_128], %390 {strides = array<i32>} : memref<2x1472xf32, #tpu.memory_space<vmem>>, vector<2x32xf32>,
    %c0_129 = arith.constant 0 : index
    %c0_130 = arith.constant 0 : index
    %392 = vector.load %arg9[%c0_129, %c0_130] : memref<1472x10xf32, #tpu.memory_space<vmem>>, vector<32x10xf32>
    %cst_131 = arith.constant dense<0.000000e+00> : vector<2x10xf32>
    %393 = tpu.matmul %390, %392, %cst_131 {dimension_numbers = #tpu.dot_dimension_numbers<[1], [0], [0], [1], [0, 0, 1, 1], [], []>} : vector<2x32xf32>, vector<32x10xf32>, vector<2x10xf32> -> vector<2x10xf32>
    %394 = arith.addf %25, %393 : vector<2x10xf32>
    %395 = vector.extract_strided_slice %387 {offsets = [0, 32], sizes = [2, 32], strides = [1, 1]} : vector<2x64xf32> to vector<2x32xf32>
    %cst_132 = arith.constant 0.000000e+00 : f32
    %396 = vector.broadcast %cst_132 : f32 to vector<2x32xf32>
    %397 = arith.maximumf %395, %396 : vector<2x32xf32>
    %c0_133 = arith.constant 0 : index
    %c1440_134 = arith.constant 1440 : index
    %398 = vector.load %arg12[%c0_133, %c1440_134] : memref<2x1472xf32, #tpu.memory_space<vmem>>, vector<2x32xf32>
    tpu.vector_store %arg12[%c0_133, %c1440_134], %397 {strides = array<i32>} : memref<2x1472xf32, #tpu.memory_space<vmem>>, vector<2x32xf32>,
    %c1440_135 = arith.constant 1440 : index
    %c0_136 = arith.constant 0 : index
    %399 = vector.load %arg9[%c1440_135, %c0_136] : memref<1472x10xf32, #tpu.memory_space<vmem>>, vector<32x10xf32>
    %cst_137 = arith.constant dense<0.000000e+00> : vector<2x10xf32>
    %400 = tpu.matmul %397, %399, %cst_137 {dimension_numbers = #tpu.dot_dimension_numbers<[1], [0], [0], [1], [0, 0, 1, 1], [], []>} : vector<2x32xf32>, vector<32x10xf32>, vector<2x10xf32> -> vector<2x10xf32>
    %401 = arith.addf %394, %400 : vector<2x10xf32>
    %c0_138 = arith.constant 0 : index
    %c64_139 = arith.constant 64 : index
    %402 = vector.load %arg13[%c0_138, %c64_139] : memref<2x1472xf32, #tpu.memory_space<vmem>>, vector<2x64xf32>
    %c0_140 = arith.constant 0 : index
    %c1344_141 = arith.constant 1344 : index
    %403 = vector.load %arg13[%c0_140, %c1344_141] : memref<2x1472xf32, #tpu.memory_space<vmem>>, vector<2x64xf32>
    %404 = tpu.concatenate %402, %403 in 1 : vector<2x64xf32>, vector<2x64xf32> -> vector<2x128xf32>
    %cst_142 = arith.constant dense<0.000000e+00> : vector<2x64xf32>
    %405 = tpu.matmul %404, %375, %cst_142 {dimension_numbers = #tpu.dot_dimension_numbers<[1], [0], [0], [1], [0, 0, 1, 1], [], []>} : vector<2x128xf32>, vector<128x64xf32>, vector<2x64xf32> -> vector<2x64xf32>
    %406 = vector.broadcast %377 : vector<1x64xf32> to vector<2x64xf32>
    %407 = arith.addf %405, %406 : vector<2x64xf32>
    %cst_143 = arith.constant dense<0.000000e+00> : vector<2x64xf32>
    %408 = tpu.matmul %387, %376, %cst_143 {dimension_numbers = #tpu.dot_dimension_numbers<[1], [0], [0], [1], [0, 0, 1, 1], [], []>} : vector<2x64xf32>, vector<64x64xf32>, vector<2x64xf32> -> vector<2x64xf32>
    %409 = arith.addf %407, %408 : vector<2x64xf32>
    %410 = math.tanh %409 : vector<2x64xf32>
    %411 = vector.extract_strided_slice %410 {offsets = [0, 0], sizes = [2, 32], strides = [1, 1]} : vector<2x64xf32> to vector<2x32xf32>
    %cst_144 = arith.constant 0.000000e+00 : f32
    %412 = vector.broadcast %cst_144 : f32 to vector<2x32xf32>
    %413 = arith.maximumf %411, %412 : vector<2x32xf32>
    %c0_145 = arith.constant 0 : index
    %c64_146 = arith.constant 64 : index
    %414 = vector.load %arg12[%c0_145, %c64_146] : memref<2x1472xf32, #tpu.memory_space<vmem>>, vector<2x32xf32>
    tpu.vector_store %arg12[%c0_145, %c64_146], %413 {strides = array<i32>} : memref<2x1472xf32, #tpu.memory_space<vmem>>, vector<2x32xf32>,
    %c64_147 = arith.constant 64 : index
    %c0_148 = arith.constant 0 : index
    %415 = vector.load %arg9[%c64_147, %c0_148] : memref<1472x10xf32, #tpu.memory_space<vmem>>, vector<32x10xf32>
    %cst_149 = arith.constant dense<0.000000e+00> : vector<2x10xf32>
    %416 = tpu.matmul %413, %415, %cst_149 {dimension_numbers = #tpu.dot_dimension_numbers<[1], [0], [0], [1], [0, 0, 1, 1], [], []>} : vector<2x32xf32>, vector<32x10xf32>, vector<2x10xf32> -> vector<2x10xf32>
    %417 = arith.addf %401, %416 : vector<2x10xf32>
    %418 = vector.extract_strided_slice %410 {offsets = [0, 32], sizes = [2, 32], strides = [1, 1]} : vector<2x64xf32> to vector<2x32xf32>
    %cst_150 = arith.constant 0.000000e+00 : f32
    %419 = vector.broadcast %cst_150 : f32 to vector<2x32xf32>
    %420 = arith.maximumf %418, %419 : vector<2x32xf32>
    %c0_151 = arith.constant 0 : index
    %c1376_152 = arith.constant 1376 : index
    %421 = vector.load %arg12[%c0_151, %c1376_152] : memref<2x1472xf32, #tpu.memory_space<vmem>>, vector<2x32xf32>
    tpu.vector_store %arg12[%c0_151, %c1376_152], %420 {strides = array<i32>} : memref<2x1472xf32, #tpu.memory_space<vmem>>, vector<2x32xf32>,
    %c1376_153 = arith.constant 1376 : index
    %c0_154 = arith.constant 0 : index
    %422 = vector.load %arg9[%c1376_153, %c0_154] : memref<1472x10xf32, #tpu.memory_space<vmem>>, vector<32x10xf32>
    %cst_155 = arith.constant dense<0.000000e+00> : vector<2x10xf32>
    %423 = tpu.matmul %420, %422, %cst_155 {dimension_numbers = #tpu.dot_dimension_numbers<[1], [0], [0], [1], [0, 0, 1, 1], [], []>} : vector<2x32xf32>, vector<32x10xf32>, vector<2x10xf32> -> vector<2x10xf32>
    %424 = arith.addf %417, %423 : vector<2x10xf32>
    %c0_156 = arith.constant 0 : index
    %c128_157 = arith.constant 128 : index
    %425 = vector.load %arg13[%c0_156, %c128_157] : memref<2x1472xf32, #tpu.memory_space<vmem>>, vector<2x64xf32>
    %c0_158 = arith.constant 0 : index
    %c1280_159 = arith.constant 1280 : index
    %426 = vector.load %arg13[%c0_158, %c1280_159] : memref<2x1472xf32, #tpu.memory_space<vmem>>, vector<2x64xf32>
    %427 = tpu.concatenate %425, %426 in 1 : vector<2x64xf32>, vector<2x64xf32> -> vector<2x128xf32>
    %cst_160 = arith.constant dense<0.000000e+00> : vector<2x64xf32>
    %428 = tpu.matmul %427, %375, %cst_160 {dimension_numbers = #tpu.dot_dimension_numbers<[1], [0], [0], [1], [0, 0, 1, 1], [], []>} : vector<2x128xf32>, vector<128x64xf32>, vector<2x64xf32> -> vector<2x64xf32>
    %429 = vector.broadcast %377 : vector<1x64xf32> to vector<2x64xf32>
    %430 = arith.addf %428, %429 : vector<2x64xf32>
    %cst_161 = arith.constant dense<0.000000e+00> : vector<2x64xf32>
    %431 = tpu.matmul %410, %376, %cst_161 {dimension_numbers = #tpu.dot_dimension_numbers<[1], [0], [0], [1], [0, 0, 1, 1], [], []>} : vector<2x64xf32>, vector<64x64xf32>, vector<2x64xf32> -> vector<2x64xf32>
    %432 = arith.addf %430, %431 : vector<2x64xf32>
    %433 = math.tanh %432 : vector<2x64xf32>
    %434 = vector.extract_strided_slice %433 {offsets = [0, 0], sizes = [2, 32], strides = [1, 1]} : vector<2x64xf32> to vector<2x32xf32>
    %cst_162 = arith.constant 0.000000e+00 : f32
    %435 = vector.broadcast %cst_162 : f32 to vector<2x32xf32>
    %436 = arith.maximumf %434, %435 : vector<2x32xf32>
    %c0_163 = arith.constant 0 : index
    %c128_164 = arith.constant 128 : index
    %437 = vector.load %arg12[%c0_163, %c128_164] : memref<2x1472xf32, #tpu.memory_space<vmem>>, vector<2x32xf32>
    tpu.vector_store %arg12[%c0_163, %c128_164], %436 {strides = array<i32>} : memref<2x1472xf32, #tpu.memory_space<vmem>>, vector<2x32xf32>,
    %c128_165 = arith.constant 128 : index
    %c0_166 = arith.constant 0 : index
    %438 = vector.load %arg9[%c128_165, %c0_166] : memref<1472x10xf32, #tpu.memory_space<vmem>>, vector<32x10xf32>
    %cst_167 = arith.constant dense<0.000000e+00> : vector<2x10xf32>
    %439 = tpu.matmul %436, %438, %cst_167 {dimension_numbers = #tpu.dot_dimension_numbers<[1], [0], [0], [1], [0, 0, 1, 1], [], []>} : vector<2x32xf32>, vector<32x10xf32>, vector<2x10xf32> -> vector<2x10xf32>
    %440 = arith.addf %424, %439 : vector<2x10xf32>
    %441 = vector.extract_strided_slice %433 {offsets = [0, 32], sizes = [2, 32], strides = [1, 1]} : vector<2x64xf32> to vector<2x32xf32>
    %cst_168 = arith.constant 0.000000e+00 : f32
    %442 = vector.broadcast %cst_168 : f32 to vector<2x32xf32>
    %443 = arith.maximumf %441, %442 : vector<2x32xf32>
    %c0_169 = arith.constant 0 : index
    %c1312_170 = arith.constant 1312 : index
    %444 = vector.load %arg12[%c0_169, %c1312_170] : memref<2x1472xf32, #tpu.memory_space<vmem>>, vector<2x32xf32>
    tpu.vector_store %arg12[%c0_169, %c1312_170], %443 {strides = array<i32>} : memref<2x1472xf32, #tpu.memory_space<vmem>>, vector<2x32xf32>,
    %c1312_171 = arith.constant 1312 : index
    %c0_172 = arith.constant 0 : index
    %445 = vector.load %arg9[%c1312_171, %c0_172] : memref<1472x10xf32, #tpu.memory_space<vmem>>, vector<32x10xf32>
    %cst_173 = arith.constant dense<0.000000e+00> : vector<2x10xf32>
    %446 = tpu.matmul %443, %445, %cst_173 {dimension_numbers = #tpu.dot_dimension_numbers<[1], [0], [0], [1], [0, 0, 1, 1], [], []>} : vector<2x32xf32>, vector<32x10xf32>, vector<2x10xf32> -> vector<2x10xf32>
    %447 = arith.addf %440, %446 : vector<2x10xf32>
    %c0_174 = arith.constant 0 : index
    %c192_175 = arith.constant 192 : index
    %448 = vector.load %arg13[%c0_174, %c192_175] : memref<2x1472xf32, #tpu.memory_space<vmem>>, vector<2x64xf32>
    %c0_176 = arith.constant 0 : index
    %c1216_177 = arith.constant 1216 : index
    %449 = vector.load %arg13[%c0_176, %c1216_177] : memref<2x1472xf32, #tpu.memory_space<vmem>>, vector<2x64xf32>
    %450 = tpu.concatenate %448, %449 in 1 : vector<2x64xf32>, vector<2x64xf32> -> vector<2x128xf32>
    %cst_178 = arith.constant dense<0.000000e+00> : vector<2x64xf32>
    %451 = tpu.matmul %450, %375, %cst_178 {dimension_numbers = #tpu.dot_dimension_numbers<[1], [0], [0], [1], [0, 0, 1, 1], [], []>} : vector<2x128xf32>, vector<128x64xf32>, vector<2x64xf32> -> vector<2x64xf32>
    %452 = vector.broadcast %377 : vector<1x64xf32> to vector<2x64xf32>
    %453 = arith.addf %451, %452 : vector<2x64xf32>
    %cst_179 = arith.constant dense<0.000000e+00> : vector<2x64xf32>
    %454 = tpu.matmul %433, %376, %cst_179 {dimension_numbers = #tpu.dot_dimension_numbers<[1], [0], [0], [1], [0, 0, 1, 1], [], []>} : vector<2x64xf32>, vector<64x64xf32>, vector<2x64xf32> -> vector<2x64xf32>
    %455 = arith.addf %453, %454 : vector<2x64xf32>
    %456 = math.tanh %455 : vector<2x64xf32>
    %457 = vector.extract_strided_slice %456 {offsets = [0, 0], sizes = [2, 32], strides = [1, 1]} : vector<2x64xf32> to vector<2x32xf32>
    %cst_180 = arith.constant 0.000000e+00 : f32
    %458 = vector.broadcast %cst_180 : f32 to vector<2x32xf32>
    %459 = arith.maximumf %457, %458 : vector<2x32xf32>
    %c0_181 = arith.constant 0 : index
    %c192_182 = arith.constant 192 : index
    %460 = vector.load %arg12[%c0_181, %c192_182] : memref<2x1472xf32, #tpu.memory_space<vmem>>, vector<2x32xf32>
    tpu.vector_store %arg12[%c0_181, %c192_182], %459 {strides = array<i32>} : memref<2x1472xf32, #tpu.memory_space<vmem>>, vector<2x32xf32>,
    %c192_183 = arith.constant 192 : index
    %c0_184 = arith.constant 0 : index
    %461 = vector.load %arg9[%c192_183, %c0_184] : memref<1472x10xf32, #tpu.memory_space<vmem>>, vector<32x10xf32>
    %cst_185 = arith.constant dense<0.000000e+00> : vector<2x10xf32>
    %462 = tpu.matmul %459, %461, %cst_185 {dimension_numbers = #tpu.dot_dimension_numbers<[1], [0], [0], [1], [0, 0, 1, 1], [], []>} : vector<2x32xf32>, vector<32x10xf32>, vector<2x10xf32> -> vector<2x10xf32>
    %463 = arith.addf %447, %462 : vector<2x10xf32>
    %464 = vector.extract_strided_slice %456 {offsets = [0, 32], sizes = [2, 32], strides = [1, 1]} : vector<2x64xf32> to vector<2x32xf32>
    %cst_186 = arith.constant 0.000000e+00 : f32
    %465 = vector.broadcast %cst_186 : f32 to vector<2x32xf32>
    %466 = arith.maximumf %464, %465 : vector<2x32xf32>
    %c0_187 = arith.constant 0 : index
    %c1248_188 = arith.constant 1248 : index
    %467 = vector.load %arg12[%c0_187, %c1248_188] : memref<2x1472xf32, #tpu.memory_space<vmem>>, vector<2x32xf32>
    tpu.vector_store %arg12[%c0_187, %c1248_188], %466 {strides = array<i32>} : memref<2x1472xf32, #tpu.memory_space<vmem>>, vector<2x32xf32>,
    %c1248_189 = arith.constant 1248 : index
    %c0_190 = arith.constant 0 : index
    %468 = vector.load %arg9[%c1248_189, %c0_190] : memref<1472x10xf32, #tpu.memory_space<vmem>>, vector<32x10xf32>
    %cst_191 = arith.constant dense<0.000000e+00> : vector<2x10xf32>
    %469 = tpu.matmul %466, %468, %cst_191 {dimension_numbers = #tpu.dot_dimension_numbers<[1], [0], [0], [1], [0, 0, 1, 1], [], []>} : vector<2x32xf32>, vector<32x10xf32>, vector<2x10xf32> -> vector<2x10xf32>
    %470 = arith.addf %463, %469 : vector<2x10xf32>
    %c0_192 = arith.constant 0 : index
    %c256_193 = arith.constant 256 : index
    %471 = vector.load %arg13[%c0_192, %c256_193] : memref<2x1472xf32, #tpu.memory_space<vmem>>, vector<2x64xf32>
    %c0_194 = arith.constant 0 : index
    %c1152_195 = arith.constant 1152 : index
    %472 = vector.load %arg13[%c0_194, %c1152_195] : memref<2x1472xf32, #tpu.memory_space<vmem>>, vector<2x64xf32>
    %473 = tpu.concatenate %471, %472 in 1 : vector<2x64xf32>, vector<2x64xf32> -> vector<2x128xf32>
    %cst_196 = arith.constant dense<0.000000e+00> : vector<2x64xf32>
    %474 = tpu.matmul %473, %375, %cst_196 {dimension_numbers = #tpu.dot_dimension_numbers<[1], [0], [0], [1], [0, 0, 1, 1], [], []>} : vector<2x128xf32>, vector<128x64xf32>, vector<2x64xf32> -> vector<2x64xf32>
    %475 = vector.broadcast %377 : vector<1x64xf32> to vector<2x64xf32>
    %476 = arith.addf %474, %475 : vector<2x64xf32>
    %cst_197 = arith.constant dense<0.000000e+00> : vector<2x64xf32>
    %477 = tpu.matmul %456, %376, %cst_197 {dimension_numbers = #tpu.dot_dimension_numbers<[1], [0], [0], [1], [0, 0, 1, 1], [], []>} : vector<2x64xf32>, vector<64x64xf32>, vector<2x64xf32> -> vector<2x64xf32>
    %478 = arith.addf %476, %477 : vector<2x64xf32>
    %479 = math.tanh %478 : vector<2x64xf32>
    %480 = vector.extract_strided_slice %479 {offsets = [0, 0], sizes = [2, 32], strides = [1, 1]} : vector<2x64xf32> to vector<2x32xf32>
    %cst_198 = arith.constant 0.000000e+00 : f32
    %481 = vector.broadcast %cst_198 : f32 to vector<2x32xf32>
    %482 = arith.maximumf %480, %481 : vector<2x32xf32>
    %c0_199 = arith.constant 0 : index
    %c256_200 = arith.constant 256 : index
    %483 = vector.load %arg12[%c0_199, %c256_200] : memref<2x1472xf32, #tpu.memory_space<vmem>>, vector<2x32xf32>
    tpu.vector_store %arg12[%c0_199, %c256_200], %482 {strides = array<i32>} : memref<2x1472xf32, #tpu.memory_space<vmem>>, vector<2x32xf32>,
    %c256_201 = arith.constant 256 : index
    %c0_202 = arith.constant 0 : index
    %484 = vector.load %arg9[%c256_201, %c0_202] : memref<1472x10xf32, #tpu.memory_space<vmem>>, vector<32x10xf32>
    %cst_203 = arith.constant dense<0.000000e+00> : vector<2x10xf32>
    %485 = tpu.matmul %482, %484, %cst_203 {dimension_numbers = #tpu.dot_dimension_numbers<[1], [0], [0], [1], [0, 0, 1, 1], [], []>} : vector<2x32xf32>, vector<32x10xf32>, vector<2x10xf32> -> vector<2x10xf32>
    %486 = arith.addf %470, %485 : vector<2x10xf32>
    %487 = vector.extract_strided_slice %479 {offsets = [0, 32], sizes = [2, 32], strides = [1, 1]} : vector<2x64xf32> to vector<2x32xf32>
    %cst_204 = arith.constant 0.000000e+00 : f32
    %488 = vector.broadcast %cst_204 : f32 to vector<2x32xf32>
    %489 = arith.maximumf %487, %488 : vector<2x32xf32>
    %c0_205 = arith.constant 0 : index
    %c1184_206 = arith.constant 1184 : index
    %490 = vector.load %arg12[%c0_205, %c1184_206] : memref<2x1472xf32, #tpu.memory_space<vmem>>, vector<2x32xf32>
    tpu.vector_store %arg12[%c0_205, %c1184_206], %489 {strides = array<i32>} : memref<2x1472xf32, #tpu.memory_space<vmem>>, vector<2x32xf32>,
    %c1184_207 = arith.constant 1184 : index
    %c0_208 = arith.constant 0 : index
    %491 = vector.load %arg9[%c1184_207, %c0_208] : memref<1472x10xf32, #tpu.memory_space<vmem>>, vector<32x10xf32>
    %cst_209 = arith.constant dense<0.000000e+00> : vector<2x10xf32>
    %492 = tpu.matmul %489, %491, %cst_209 {dimension_numbers = #tpu.dot_dimension_numbers<[1], [0], [0], [1], [0, 0, 1, 1], [], []>} : vector<2x32xf32>, vector<32x10xf32>, vector<2x10xf32> -> vector<2x10xf32>
    %493 = arith.addf %486, %492 : vector<2x10xf32>
    %c0_210 = arith.constant 0 : index
    %c320_211 = arith.constant 320 : index
    %494 = vector.load %arg13[%c0_210, %c320_211] : memref<2x1472xf32, #tpu.memory_space<vmem>>, vector<2x64xf32>
    %c0_212 = arith.constant 0 : index
    %c1088_213 = arith.constant 1088 : index
    %495 = vector.load %arg13[%c0_212, %c1088_213] : memref<2x1472xf32, #tpu.memory_space<vmem>>, vector<2x64xf32>
    %496 = tpu.concatenate %494, %495 in 1 : vector<2x64xf32>, vector<2x64xf32> -> vector<2x128xf32>
    %cst_214 = arith.constant dense<0.000000e+00> : vector<2x64xf32>
    %497 = tpu.matmul %496, %375, %cst_214 {dimension_numbers = #tpu.dot_dimension_numbers<[1], [0], [0], [1], [0, 0, 1, 1], [], []>} : vector<2x128xf32>, vector<128x64xf32>, vector<2x64xf32> -> vector<2x64xf32>
    %498 = vector.broadcast %377 : vector<1x64xf32> to vector<2x64xf32>
    %499 = arith.addf %497, %498 : vector<2x64xf32>
    %cst_215 = arith.constant dense<0.000000e+00> : vector<2x64xf32>
    %500 = tpu.matmul %479, %376, %cst_215 {dimension_numbers = #tpu.dot_dimension_numbers<[1], [0], [0], [1], [0, 0, 1, 1], [], []>} : vector<2x64xf32>, vector<64x64xf32>, vector<2x64xf32> -> vector<2x64xf32>
    %501 = arith.addf %499, %500 : vector<2x64xf32>
    %502 = math.tanh %501 : vector<2x64xf32>
    %503 = vector.extract_strided_slice %502 {offsets = [0, 0], sizes = [2, 32], strides = [1, 1]} : vector<2x64xf32> to vector<2x32xf32>
    %cst_216 = arith.constant 0.000000e+00 : f32
    %504 = vector.broadcast %cst_216 : f32 to vector<2x32xf32>
    %505 = arith.maximumf %503, %504 : vector<2x32xf32>
    %c0_217 = arith.constant 0 : index
    %c320_218 = arith.constant 320 : index
    %506 = vector.load %arg12[%c0_217, %c320_218] : memref<2x1472xf32, #tpu.memory_space<vmem>>, vector<2x32xf32>
    tpu.vector_store %arg12[%c0_217, %c320_218], %505 {strides = array<i32>} : memref<2x1472xf32, #tpu.memory_space<vmem>>, vector<2x32xf32>,
    %c320_219 = arith.constant 320 : index
    %c0_220 = arith.constant 0 : index
    %507 = vector.load %arg9[%c320_219, %c0_220] : memref<1472x10xf32, #tpu.memory_space<vmem>>, vector<32x10xf32>
    %cst_221 = arith.constant dense<0.000000e+00> : vector<2x10xf32>
    %508 = tpu.matmul %505, %507, %cst_221 {dimension_numbers = #tpu.dot_dimension_numbers<[1], [0], [0], [1], [0, 0, 1, 1], [], []>} : vector<2x32xf32>, vector<32x10xf32>, vector<2x10xf32> -> vector<2x10xf32>
    %509 = arith.addf %493, %508 : vector<2x10xf32>
    %510 = vector.extract_strided_slice %502 {offsets = [0, 32], sizes = [2, 32], strides = [1, 1]} : vector<2x64xf32> to vector<2x32xf32>
    %cst_222 = arith.constant 0.000000e+00 : f32
    %511 = vector.broadcast %cst_222 : f32 to vector<2x32xf32>
    %512 = arith.maximumf %510, %511 : vector<2x32xf32>
    %c0_223 = arith.constant 0 : index
    %c1120_224 = arith.constant 1120 : index
    %513 = vector.load %arg12[%c0_223, %c1120_224] : memref<2x1472xf32, #tpu.memory_space<vmem>>, vector<2x32xf32>
    tpu.vector_store %arg12[%c0_223, %c1120_224], %512 {strides = array<i32>} : memref<2x1472xf32, #tpu.memory_space<vmem>>, vector<2x32xf32>,
    %c1120_225 = arith.constant 1120 : index
    %c0_226 = arith.constant 0 : index
    %514 = vector.load %arg9[%c1120_225, %c0_226] : memref<1472x10xf32, #tpu.memory_space<vmem>>, vector<32x10xf32>
    %cst_227 = arith.constant dense<0.000000e+00> : vector<2x10xf32>
    %515 = tpu.matmul %512, %514, %cst_227 {dimension_numbers = #tpu.dot_dimension_numbers<[1], [0], [0], [1], [0, 0, 1, 1], [], []>} : vector<2x32xf32>, vector<32x10xf32>, vector<2x10xf32> -> vector<2x10xf32>
    %516 = arith.addf %509, %515 : vector<2x10xf32>
    %c0_228 = arith.constant 0 : index
    %c384_229 = arith.constant 384 : index
    %517 = vector.load %arg13[%c0_228, %c384_229] : memref<2x1472xf32, #tpu.memory_space<vmem>>, vector<2x64xf32>
    %c0_230 = arith.constant 0 : index
    %c1024_231 = arith.constant 1024 : index
    %518 = vector.load %arg13[%c0_230, %c1024_231] : memref<2x1472xf32, #tpu.memory_space<vmem>>, vector<2x64xf32>
    %519 = tpu.concatenate %517, %518 in 1 : vector<2x64xf32>, vector<2x64xf32> -> vector<2x128xf32>
    %cst_232 = arith.constant dense<0.000000e+00> : vector<2x64xf32>
    %520 = tpu.matmul %519, %375, %cst_232 {dimension_numbers = #tpu.dot_dimension_numbers<[1], [0], [0], [1], [0, 0, 1, 1], [], []>} : vector<2x128xf32>, vector<128x64xf32>, vector<2x64xf32> -> vector<2x64xf32>
    %521 = vector.broadcast %377 : vector<1x64xf32> to vector<2x64xf32>
    %522 = arith.addf %520, %521 : vector<2x64xf32>
    %cst_233 = arith.constant dense<0.000000e+00> : vector<2x64xf32>
    %523 = tpu.matmul %502, %376, %cst_233 {dimension_numbers = #tpu.dot_dimension_numbers<[1], [0], [0], [1], [0, 0, 1, 1], [], []>} : vector<2x64xf32>, vector<64x64xf32>, vector<2x64xf32> -> vector<2x64xf32>
    %524 = arith.addf %522, %523 : vector<2x64xf32>
    %525 = math.tanh %524 : vector<2x64xf32>
    %526 = vector.extract_strided_slice %525 {offsets = [0, 0], sizes = [2, 32], strides = [1, 1]} : vector<2x64xf32> to vector<2x32xf32>
    %cst_234 = arith.constant 0.000000e+00 : f32
    %527 = vector.broadcast %cst_234 : f32 to vector<2x32xf32>
    %528 = arith.maximumf %526, %527 : vector<2x32xf32>
    %c0_235 = arith.constant 0 : index
    %c384_236 = arith.constant 384 : index
    %529 = vector.load %arg12[%c0_235, %c384_236] : memref<2x1472xf32, #tpu.memory_space<vmem>>, vector<2x32xf32>
    tpu.vector_store %arg12[%c0_235, %c384_236], %528 {strides = array<i32>} : memref<2x1472xf32, #tpu.memory_space<vmem>>, vector<2x32xf32>,
    %c384_237 = arith.constant 384 : index
    %c0_238 = arith.constant 0 : index
    %530 = vector.load %arg9[%c384_237, %c0_238] : memref<1472x10xf32, #tpu.memory_space<vmem>>, vector<32x10xf32>
    %cst_239 = arith.constant dense<0.000000e+00> : vector<2x10xf32>
    %531 = tpu.matmul %528, %530, %cst_239 {dimension_numbers = #tpu.dot_dimension_numbers<[1], [0], [0], [1], [0, 0, 1, 1], [], []>} : vector<2x32xf32>, vector<32x10xf32>, vector<2x10xf32> -> vector<2x10xf32>
    %532 = arith.addf %516, %531 : vector<2x10xf32>
    %533 = vector.extract_strided_slice %525 {offsets = [0, 32], sizes = [2, 32], strides = [1, 1]} : vector<2x64xf32> to vector<2x32xf32>
    %cst_240 = arith.constant 0.000000e+00 : f32
    %534 = vector.broadcast %cst_240 : f32 to vector<2x32xf32>
    %535 = arith.maximumf %533, %534 : vector<2x32xf32>
    %c0_241 = arith.constant 0 : index
    %c1056_242 = arith.constant 1056 : index
    %536 = vector.load %arg12[%c0_241, %c1056_242] : memref<2x1472xf32, #tpu.memory_space<vmem>>, vector<2x32xf32>
    tpu.vector_store %arg12[%c0_241, %c1056_242], %535 {strides = array<i32>} : memref<2x1472xf32, #tpu.memory_space<vmem>>, vector<2x32xf32>,
    %c1056_243 = arith.constant 1056 : index
    %c0_244 = arith.constant 0 : index
    %537 = vector.load %arg9[%c1056_243, %c0_244] : memref<1472x10xf32, #tpu.memory_space<vmem>>, vector<32x10xf32>
    %cst_245 = arith.constant dense<0.000000e+00> : vector<2x10xf32>
    %538 = tpu.matmul %535, %537, %cst_245 {dimension_numbers = #tpu.dot_dimension_numbers<[1], [0], [0], [1], [0, 0, 1, 1], [], []>} : vector<2x32xf32>, vector<32x10xf32>, vector<2x10xf32> -> vector<2x10xf32>
    %539 = arith.addf %532, %538 : vector<2x10xf32>
    %c0_246 = arith.constant 0 : index
    %c448_247 = arith.constant 448 : index
    %540 = vector.load %arg13[%c0_246, %c448_247] : memref<2x1472xf32, #tpu.memory_space<vmem>>, vector<2x64xf32>
    %c0_248 = arith.constant 0 : index
    %c960_249 = arith.constant 960 : index
    %541 = vector.load %arg13[%c0_248, %c960_249] : memref<2x1472xf32, #tpu.memory_space<vmem>>, vector<2x64xf32>
    %542 = tpu.concatenate %540, %541 in 1 : vector<2x64xf32>, vector<2x64xf32> -> vector<2x128xf32>
    %cst_250 = arith.constant dense<0.000000e+00> : vector<2x64xf32>
    %543 = tpu.matmul %542, %375, %cst_250 {dimension_numbers = #tpu.dot_dimension_numbers<[1], [0], [0], [1], [0, 0, 1, 1], [], []>} : vector<2x128xf32>, vector<128x64xf32>, vector<2x64xf32> -> vector<2x64xf32>
    %544 = vector.broadcast %377 : vector<1x64xf32> to vector<2x64xf32>
    %545 = arith.addf %543, %544 : vector<2x64xf32>
    %cst_251 = arith.constant dense<0.000000e+00> : vector<2x64xf32>
    %546 = tpu.matmul %525, %376, %cst_251 {dimension_numbers = #tpu.dot_dimension_numbers<[1], [0], [0], [1], [0, 0, 1, 1], [], []>} : vector<2x64xf32>, vector<64x64xf32>, vector<2x64xf32> -> vector<2x64xf32>
    %547 = arith.addf %545, %546 : vector<2x64xf32>
    %548 = math.tanh %547 : vector<2x64xf32>
    %549 = vector.extract_strided_slice %548 {offsets = [0, 0], sizes = [2, 32], strides = [1, 1]} : vector<2x64xf32> to vector<2x32xf32>
    %cst_252 = arith.constant 0.000000e+00 : f32
    %550 = vector.broadcast %cst_252 : f32 to vector<2x32xf32>
    %551 = arith.maximumf %549, %550 : vector<2x32xf32>
    %c0_253 = arith.constant 0 : index
    %c448_254 = arith.constant 448 : index
    %552 = vector.load %arg12[%c0_253, %c448_254] : memref<2x1472xf32, #tpu.memory_space<vmem>>, vector<2x32xf32>
    tpu.vector_store %arg12[%c0_253, %c448_254], %551 {strides = array<i32>} : memref<2x1472xf32, #tpu.memory_space<vmem>>, vector<2x32xf32>,
    %c448_255 = arith.constant 448 : index
    %c0_256 = arith.constant 0 : index
    %553 = vector.load %arg9[%c448_255, %c0_256] : memref<1472x10xf32, #tpu.memory_space<vmem>>, vector<32x10xf32>
    %cst_257 = arith.constant dense<0.000000e+00> : vector<2x10xf32>
    %554 = tpu.matmul %551, %553, %cst_257 {dimension_numbers = #tpu.dot_dimension_numbers<[1], [0], [0], [1], [0, 0, 1, 1], [], []>} : vector<2x32xf32>, vector<32x10xf32>, vector<2x10xf32> -> vector<2x10xf32>
    %555 = arith.addf %539, %554 : vector<2x10xf32>
    %556 = vector.extract_strided_slice %548 {offsets = [0, 32], sizes = [2, 32], strides = [1, 1]} : vector<2x64xf32> to vector<2x32xf32>
    %cst_258 = arith.constant 0.000000e+00 : f32
    %557 = vector.broadcast %cst_258 : f32 to vector<2x32xf32>
    %558 = arith.maximumf %556, %557 : vector<2x32xf32>
    %c0_259 = arith.constant 0 : index
    %c992_260 = arith.constant 992 : index
    %559 = vector.load %arg12[%c0_259, %c992_260] : memref<2x1472xf32, #tpu.memory_space<vmem>>, vector<2x32xf32>
    tpu.vector_store %arg12[%c0_259, %c992_260], %558 {strides = array<i32>} : memref<2x1472xf32, #tpu.memory_space<vmem>>, vector<2x32xf32>,
    %c992_261 = arith.constant 992 : index
    %c0_262 = arith.constant 0 : index
    %560 = vector.load %arg9[%c992_261, %c0_262] : memref<1472x10xf32, #tpu.memory_space<vmem>>, vector<32x10xf32>
    %cst_263 = arith.constant dense<0.000000e+00> : vector<2x10xf32>
    %561 = tpu.matmul %558, %560, %cst_263 {dimension_numbers = #tpu.dot_dimension_numbers<[1], [0], [0], [1], [0, 0, 1, 1], [], []>} : vector<2x32xf32>, vector<32x10xf32>, vector<2x10xf32> -> vector<2x10xf32>
    %562 = arith.addf %555, %561 : vector<2x10xf32>
    %c0_264 = arith.constant 0 : index
    %c512_265 = arith.constant 512 : index
    %563 = vector.load %arg13[%c0_264, %c512_265] : memref<2x1472xf32, #tpu.memory_space<vmem>>, vector<2x64xf32>
    %c0_266 = arith.constant 0 : index
    %c896_267 = arith.constant 896 : index
    %564 = vector.load %arg13[%c0_266, %c896_267] : memref<2x1472xf32, #tpu.memory_space<vmem>>, vector<2x64xf32>
    %565 = tpu.concatenate %563, %564 in 1 : vector<2x64xf32>, vector<2x64xf32> -> vector<2x128xf32>
    %cst_268 = arith.constant dense<0.000000e+00> : vector<2x64xf32>
    %566 = tpu.matmul %565, %375, %cst_268 {dimension_numbers = #tpu.dot_dimension_numbers<[1], [0], [0], [1], [0, 0, 1, 1], [], []>} : vector<2x128xf32>, vector<128x64xf32>, vector<2x64xf32> -> vector<2x64xf32>
    %567 = vector.broadcast %377 : vector<1x64xf32> to vector<2x64xf32>
    %568 = arith.addf %566, %567 : vector<2x64xf32>
    %cst_269 = arith.constant dense<0.000000e+00> : vector<2x64xf32>
    %569 = tpu.matmul %548, %376, %cst_269 {dimension_numbers = #tpu.dot_dimension_numbers<[1], [0], [0], [1], [0, 0, 1, 1], [], []>} : vector<2x64xf32>, vector<64x64xf32>, vector<2x64xf32> -> vector<2x64xf32>
    %570 = arith.addf %568, %569 : vector<2x64xf32>
    %571 = math.tanh %570 : vector<2x64xf32>
    %572 = vector.extract_strided_slice %571 {offsets = [0, 0], sizes = [2, 32], strides = [1, 1]} : vector<2x64xf32> to vector<2x32xf32>
    %cst_270 = arith.constant 0.000000e+00 : f32
    %573 = vector.broadcast %cst_270 : f32 to vector<2x32xf32>
    %574 = arith.maximumf %572, %573 : vector<2x32xf32>
    %c0_271 = arith.constant 0 : index
    %c512_272 = arith.constant 512 : index
    %575 = vector.load %arg12[%c0_271, %c512_272] : memref<2x1472xf32, #tpu.memory_space<vmem>>, vector<2x32xf32>
    tpu.vector_store %arg12[%c0_271, %c512_272], %574 {strides = array<i32>} : memref<2x1472xf32, #tpu.memory_space<vmem>>, vector<2x32xf32>,
    %c512_273 = arith.constant 512 : index
    %c0_274 = arith.constant 0 : index
    %576 = vector.load %arg9[%c512_273, %c0_274] : memref<1472x10xf32, #tpu.memory_space<vmem>>, vector<32x10xf32>
    %cst_275 = arith.constant dense<0.000000e+00> : vector<2x10xf32>
    %577 = tpu.matmul %574, %576, %cst_275 {dimension_numbers = #tpu.dot_dimension_numbers<[1], [0], [0], [1], [0, 0, 1, 1], [], []>} : vector<2x32xf32>, vector<32x10xf32>, vector<2x10xf32> -> vector<2x10xf32>
    %578 = arith.addf %562, %577 : vector<2x10xf32>
    %579 = vector.extract_strided_slice %571 {offsets = [0, 32], sizes = [2, 32], strides = [1, 1]} : vector<2x64xf32> to vector<2x32xf32>
    %cst_276 = arith.constant 0.000000e+00 : f32
    %580 = vector.broadcast %cst_276 : f32 to vector<2x32xf32>
    %581 = arith.maximumf %579, %580 : vector<2x32xf32>
    %c0_277 = arith.constant 0 : index
    %c928_278 = arith.constant 928 : index
    %582 = vector.load %arg12[%c0_277, %c928_278] : memref<2x1472xf32, #tpu.memory_space<vmem>>, vector<2x32xf32>
    tpu.vector_store %arg12[%c0_277, %c928_278], %581 {strides = array<i32>} : memref<2x1472xf32, #tpu.memory_space<vmem>>, vector<2x32xf32>,
    %c928_279 = arith.constant 928 : index
    %c0_280 = arith.constant 0 : index
    %583 = vector.load %arg9[%c928_279, %c0_280] : memref<1472x10xf32, #tpu.memory_space<vmem>>, vector<32x10xf32>
    %cst_281 = arith.constant dense<0.000000e+00> : vector<2x10xf32>
    %584 = tpu.matmul %581, %583, %cst_281 {dimension_numbers = #tpu.dot_dimension_numbers<[1], [0], [0], [1], [0, 0, 1, 1], [], []>} : vector<2x32xf32>, vector<32x10xf32>, vector<2x10xf32> -> vector<2x10xf32>
    %585 = arith.addf %578, %584 : vector<2x10xf32>
    %c0_282 = arith.constant 0 : index
    %c576_283 = arith.constant 576 : index
    %586 = vector.load %arg13[%c0_282, %c576_283] : memref<2x1472xf32, #tpu.memory_space<vmem>>, vector<2x64xf32>
    %c0_284 = arith.constant 0 : index
    %c832_285 = arith.constant 832 : index
    %587 = vector.load %arg13[%c0_284, %c832_285] : memref<2x1472xf32, #tpu.memory_space<vmem>>, vector<2x64xf32>
    %588 = tpu.concatenate %586, %587 in 1 : vector<2x64xf32>, vector<2x64xf32> -> vector<2x128xf32>
    %cst_286 = arith.constant dense<0.000000e+00> : vector<2x64xf32>
    %589 = tpu.matmul %588, %375, %cst_286 {dimension_numbers = #tpu.dot_dimension_numbers<[1], [0], [0], [1], [0, 0, 1, 1], [], []>} : vector<2x128xf32>, vector<128x64xf32>, vector<2x64xf32> -> vector<2x64xf32>
    %590 = vector.broadcast %377 : vector<1x64xf32> to vector<2x64xf32>
    %591 = arith.addf %589, %590 : vector<2x64xf32>
    %cst_287 = arith.constant dense<0.000000e+00> : vector<2x64xf32>
    %592 = tpu.matmul %571, %376, %cst_287 {dimension_numbers = #tpu.dot_dimension_numbers<[1], [0], [0], [1], [0, 0, 1, 1], [], []>} : vector<2x64xf32>, vector<64x64xf32>, vector<2x64xf32> -> vector<2x64xf32>
    %593 = arith.addf %591, %592 : vector<2x64xf32>
    %594 = math.tanh %593 : vector<2x64xf32>
    %595 = vector.extract_strided_slice %594 {offsets = [0, 0], sizes = [2, 32], strides = [1, 1]} : vector<2x64xf32> to vector<2x32xf32>
    %cst_288 = arith.constant 0.000000e+00 : f32
    %596 = vector.broadcast %cst_288 : f32 to vector<2x32xf32>
    %597 = arith.maximumf %595, %596 : vector<2x32xf32>
    %c0_289 = arith.constant 0 : index
    %c576_290 = arith.constant 576 : index
    %598 = vector.load %arg12[%c0_289, %c576_290] : memref<2x1472xf32, #tpu.memory_space<vmem>>, vector<2x32xf32>
    tpu.vector_store %arg12[%c0_289, %c576_290], %597 {strides = array<i32>} : memref<2x1472xf32, #tpu.memory_space<vmem>>, vector<2x32xf32>,
    %c576_291 = arith.constant 576 : index
    %c0_292 = arith.constant 0 : index
    %599 = vector.load %arg9[%c576_291, %c0_292] : memref<1472x10xf32, #tpu.memory_space<vmem>>, vector<32x10xf32>
    %cst_293 = arith.constant dense<0.000000e+00> : vector<2x10xf32>
    %600 = tpu.matmul %597, %599, %cst_293 {dimension_numbers = #tpu.dot_dimension_numbers<[1], [0], [0], [1], [0, 0, 1, 1], [], []>} : vector<2x32xf32>, vector<32x10xf32>, vector<2x10xf32> -> vector<2x10xf32>
    %601 = arith.addf %585, %600 : vector<2x10xf32>
    %602 = vector.extract_strided_slice %594 {offsets = [0, 32], sizes = [2, 32], strides = [1, 1]} : vector<2x64xf32> to vector<2x32xf32>
    %cst_294 = arith.constant 0.000000e+00 : f32
    %603 = vector.broadcast %cst_294 : f32 to vector<2x32xf32>
    %604 = arith.maximumf %602, %603 : vector<2x32xf32>
    %c0_295 = arith.constant 0 : index
    %c864_296 = arith.constant 864 : index
    %605 = vector.load %arg12[%c0_295, %c864_296] : memref<2x1472xf32, #tpu.memory_space<vmem>>, vector<2x32xf32>
    tpu.vector_store %arg12[%c0_295, %c864_296], %604 {strides = array<i32>} : memref<2x1472xf32, #tpu.memory_space<vmem>>, vector<2x32xf32>,
    %c864_297 = arith.constant 864 : index
    %c0_298 = arith.constant 0 : index
    %606 = vector.load %arg9[%c864_297, %c0_298] : memref<1472x10xf32, #tpu.memory_space<vmem>>, vector<32x10xf32>
    %cst_299 = arith.constant dense<0.000000e+00> : vector<2x10xf32>
    %607 = tpu.matmul %604, %606, %cst_299 {dimension_numbers = #tpu.dot_dimension_numbers<[1], [0], [0], [1], [0, 0, 1, 1], [], []>} : vector<2x32xf32>, vector<32x10xf32>, vector<2x10xf32> -> vector<2x10xf32>
    %608 = arith.addf %601, %607 : vector<2x10xf32>
    %c0_300 = arith.constant 0 : index
    %c640_301 = arith.constant 640 : index
    %609 = vector.load %arg13[%c0_300, %c640_301] : memref<2x1472xf32, #tpu.memory_space<vmem>>, vector<2x64xf32>
    %c0_302 = arith.constant 0 : index
    %c768_303 = arith.constant 768 : index
    %610 = vector.load %arg13[%c0_302, %c768_303] : memref<2x1472xf32, #tpu.memory_space<vmem>>, vector<2x64xf32>
    %611 = tpu.concatenate %609, %610 in 1 : vector<2x64xf32>, vector<2x64xf32> -> vector<2x128xf32>
    %cst_304 = arith.constant dense<0.000000e+00> : vector<2x64xf32>
    %612 = tpu.matmul %611, %375, %cst_304 {dimension_numbers = #tpu.dot_dimension_numbers<[1], [0], [0], [1], [0, 0, 1, 1], [], []>} : vector<2x128xf32>, vector<128x64xf32>, vector<2x64xf32> -> vector<2x64xf32>
    %613 = vector.broadcast %377 : vector<1x64xf32> to vector<2x64xf32>
    %614 = arith.addf %612, %613 : vector<2x64xf32>
    %cst_305 = arith.constant dense<0.000000e+00> : vector<2x64xf32>
    %615 = tpu.matmul %594, %376, %cst_305 {dimension_numbers = #tpu.dot_dimension_numbers<[1], [0], [0], [1], [0, 0, 1, 1], [], []>} : vector<2x64xf32>, vector<64x64xf32>, vector<2x64xf32> -> vector<2x64xf32>
    %616 = arith.addf %614, %615 : vector<2x64xf32>
    %617 = math.tanh %616 : vector<2x64xf32>
    %618 = vector.extract_strided_slice %617 {offsets = [0, 0], sizes = [2, 32], strides = [1, 1]} : vector<2x64xf32> to vector<2x32xf32>
    %cst_306 = arith.constant 0.000000e+00 : f32
    %619 = vector.broadcast %cst_306 : f32 to vector<2x32xf32>
    %620 = arith.maximumf %618, %619 : vector<2x32xf32>
    %c0_307 = arith.constant 0 : index
    %c640_308 = arith.constant 640 : index
    %621 = vector.load %arg12[%c0_307, %c640_308] : memref<2x1472xf32, #tpu.memory_space<vmem>>, vector<2x32xf32>
    tpu.vector_store %arg12[%c0_307, %c640_308], %620 {strides = array<i32>} : memref<2x1472xf32, #tpu.memory_space<vmem>>, vector<2x32xf32>,
    %c640_309 = arith.constant 640 : index
    %c0_310 = arith.constant 0 : index
    %622 = vector.load %arg9[%c640_309, %c0_310] : memref<1472x10xf32, #tpu.memory_space<vmem>>, vector<32x10xf32>
    %cst_311 = arith.constant dense<0.000000e+00> : vector<2x10xf32>
    %623 = tpu.matmul %620, %622, %cst_311 {dimension_numbers = #tpu.dot_dimension_numbers<[1], [0], [0], [1], [0, 0, 1, 1], [], []>} : vector<2x32xf32>, vector<32x10xf32>, vector<2x10xf32> -> vector<2x10xf32>
    %624 = arith.addf %608, %623 : vector<2x10xf32>
    %625 = vector.extract_strided_slice %617 {offsets = [0, 32], sizes = [2, 32], strides = [1, 1]} : vector<2x64xf32> to vector<2x32xf32>
    %cst_312 = arith.constant 0.000000e+00 : f32
    %626 = vector.broadcast %cst_312 : f32 to vector<2x32xf32>
    %627 = arith.maximumf %625, %626 : vector<2x32xf32>
    %c0_313 = arith.constant 0 : index
    %c800_314 = arith.constant 800 : index
    %628 = vector.load %arg12[%c0_313, %c800_314] : memref<2x1472xf32, #tpu.memory_space<vmem>>, vector<2x32xf32>
    tpu.vector_store %arg12[%c0_313, %c800_314], %627 {strides = array<i32>} : memref<2x1472xf32, #tpu.memory_space<vmem>>, vector<2x32xf32>,
    %c800_315 = arith.constant 800 : index
    %c0_316 = arith.constant 0 : index
    %629 = vector.load %arg9[%c800_315, %c0_316] : memref<1472x10xf32, #tpu.memory_space<vmem>>, vector<32x10xf32>
    %cst_317 = arith.constant dense<0.000000e+00> : vector<2x10xf32>
    %630 = tpu.matmul %627, %629, %cst_317 {dimension_numbers = #tpu.dot_dimension_numbers<[1], [0], [0], [1], [0, 0, 1, 1], [], []>} : vector<2x32xf32>, vector<32x10xf32>, vector<2x10xf32> -> vector<2x10xf32>
    %631 = arith.addf %624, %630 : vector<2x10xf32>
    %c0_318 = arith.constant 0 : index
    %c704_319 = arith.constant 704 : index
    %632 = vector.load %arg13[%c0_318, %c704_319] : memref<2x1472xf32, #tpu.memory_space<vmem>>, vector<2x64xf32>
    %c0_320 = arith.constant 0 : index
    %c704_321 = arith.constant 704 : index
    %633 = vector.load %arg13[%c0_320, %c704_321] : memref<2x1472xf32, #tpu.memory_space<vmem>>, vector<2x64xf32>
    %634 = tpu.concatenate %632, %633 in 1 : vector<2x64xf32>, vector<2x64xf32> -> vector<2x128xf32>
    %cst_322 = arith.constant dense<0.000000e+00> : vector<2x64xf32>
    %635 = tpu.matmul %634, %375, %cst_322 {dimension_numbers = #tpu.dot_dimension_numbers<[1], [0], [0], [1], [0, 0, 1, 1], [], []>} : vector<2x128xf32>, vector<128x64xf32>, vector<2x64xf32> -> vector<2x64xf32>
    %636 = vector.broadcast %377 : vector<1x64xf32> to vector<2x64xf32>
    %637 = arith.addf %635, %636 : vector<2x64xf32>
    %cst_323 = arith.constant dense<0.000000e+00> : vector<2x64xf32>
    %638 = tpu.matmul %617, %376, %cst_323 {dimension_numbers = #tpu.dot_dimension_numbers<[1], [0], [0], [1], [0, 0, 1, 1], [], []>} : vector<2x64xf32>, vector<64x64xf32>, vector<2x64xf32> -> vector<2x64xf32>
    %639 = arith.addf %637, %638 : vector<2x64xf32>
    %640 = math.tanh %639 : vector<2x64xf32>
    %641 = vector.extract_strided_slice %640 {offsets = [0, 0], sizes = [2, 32], strides = [1, 1]} : vector<2x64xf32> to vector<2x32xf32>
    %cst_324 = arith.constant 0.000000e+00 : f32
    %642 = vector.broadcast %cst_324 : f32 to vector<2x32xf32>
    %643 = arith.maximumf %641, %642 : vector<2x32xf32>
    %c0_325 = arith.constant 0 : index
    %c704_326 = arith.constant 704 : index
    %644 = vector.load %arg12[%c0_325, %c704_326] : memref<2x1472xf32, #tpu.memory_space<vmem>>, vector<2x32xf32>
    tpu.vector_store %arg12[%c0_325, %c704_326], %643 {strides = array<i32>} : memref<2x1472xf32, #tpu.memory_space<vmem>>, vector<2x32xf32>,
    %c704_327 = arith.constant 704 : index
    %c0_328 = arith.constant 0 : index
    %645 = vector.load %arg9[%c704_327, %c0_328] : memref<1472x10xf32, #tpu.memory_space<vmem>>, vector<32x10xf32>
    %cst_329 = arith.constant dense<0.000000e+00> : vector<2x10xf32>
    %646 = tpu.matmul %643, %645, %cst_329 {dimension_numbers = #tpu.dot_dimension_numbers<[1], [0], [0], [1], [0, 0, 1, 1], [], []>} : vector<2x32xf32>, vector<32x10xf32>, vector<2x10xf32> -> vector<2x10xf32>
    %647 = arith.addf %631, %646 : vector<2x10xf32>
    %648 = vector.extract_strided_slice %640 {offsets = [0, 32], sizes = [2, 32], strides = [1, 1]} : vector<2x64xf32> to vector<2x32xf32>
    %cst_330 = arith.constant 0.000000e+00 : f32
    %649 = vector.broadcast %cst_330 : f32 to vector<2x32xf32>
    %650 = arith.maximumf %648, %649 : vector<2x32xf32>
    %c0_331 = arith.constant 0 : index
    %c736_332 = arith.constant 736 : index
    %651 = vector.load %arg12[%c0_331, %c736_332] : memref<2x1472xf32, #tpu.memory_space<vmem>>, vector<2x32xf32>
    tpu.vector_store %arg12[%c0_331, %c736_332], %650 {strides = array<i32>} : memref<2x1472xf32, #tpu.memory_space<vmem>>, vector<2x32xf32>,
    %c736_333 = arith.constant 736 : index
    %c0_334 = arith.constant 0 : index
    %652 = vector.load %arg9[%c736_333, %c0_334] : memref<1472x10xf32, #tpu.memory_space<vmem>>, vector<32x10xf32>
    %cst_335 = arith.constant dense<0.000000e+00> : vector<2x10xf32>
    %653 = tpu.matmul %650, %652, %cst_335 {dimension_numbers = #tpu.dot_dimension_numbers<[1], [0], [0], [1], [0, 0, 1, 1], [], []>} : vector<2x32xf32>, vector<32x10xf32>, vector<2x10xf32> -> vector<2x10xf32>
    %654 = arith.addf %647, %653 : vector<2x10xf32>
    %c0_336 = arith.constant 0 : index
    %c768_337 = arith.constant 768 : index
    %655 = vector.load %arg13[%c0_336, %c768_337] : memref<2x1472xf32, #tpu.memory_space<vmem>>, vector<2x64xf32>
    %c0_338 = arith.constant 0 : index
    %c640_339 = arith.constant 640 : index
    %656 = vector.load %arg13[%c0_338, %c640_339] : memref<2x1472xf32, #tpu.memory_space<vmem>>, vector<2x64xf32>
    %657 = tpu.concatenate %655, %656 in 1 : vector<2x64xf32>, vector<2x64xf32> -> vector<2x128xf32>
    %cst_340 = arith.constant dense<0.000000e+00> : vector<2x64xf32>
    %658 = tpu.matmul %657, %375, %cst_340 {dimension_numbers = #tpu.dot_dimension_numbers<[1], [0], [0], [1], [0, 0, 1, 1], [], []>} : vector<2x128xf32>, vector<128x64xf32>, vector<2x64xf32> -> vector<2x64xf32>
    %659 = vector.broadcast %377 : vector<1x64xf32> to vector<2x64xf32>
    %660 = arith.addf %658, %659 : vector<2x64xf32>
    %cst_341 = arith.constant dense<0.000000e+00> : vector<2x64xf32>
    %661 = tpu.matmul %640, %376, %cst_341 {dimension_numbers = #tpu.dot_dimension_numbers<[1], [0], [0], [1], [0, 0, 1, 1], [], []>} : vector<2x64xf32>, vector<64x64xf32>, vector<2x64xf32> -> vector<2x64xf32>
    %662 = arith.addf %660, %661 : vector<2x64xf32>
    %663 = math.tanh %662 : vector<2x64xf32>
    %664 = vector.extract_strided_slice %663 {offsets = [0, 0], sizes = [2, 32], strides = [1, 1]} : vector<2x64xf32> to vector<2x32xf32>
    %cst_342 = arith.constant 0.000000e+00 : f32
    %665 = vector.broadcast %cst_342 : f32 to vector<2x32xf32>
    %666 = arith.maximumf %664, %665 : vector<2x32xf32>
    %c0_343 = arith.constant 0 : index
    %c768_344 = arith.constant 768 : index
    %667 = vector.load %arg12[%c0_343, %c768_344] : memref<2x1472xf32, #tpu.memory_space<vmem>>, vector<2x32xf32>
    tpu.vector_store %arg12[%c0_343, %c768_344], %666 {strides = array<i32>} : memref<2x1472xf32, #tpu.memory_space<vmem>>, vector<2x32xf32>,
    %c768_345 = arith.constant 768 : index
    %c0_346 = arith.constant 0 : index
    %668 = vector.load %arg9[%c768_345, %c0_346] : memref<1472x10xf32, #tpu.memory_space<vmem>>, vector<32x10xf32>
    %cst_347 = arith.constant dense<0.000000e+00> : vector<2x10xf32>
    %669 = tpu.matmul %666, %668, %cst_347 {dimension_numbers = #tpu.dot_dimension_numbers<[1], [0], [0], [1], [0, 0, 1, 1], [], []>} : vector<2x32xf32>, vector<32x10xf32>, vector<2x10xf32> -> vector<2x10xf32>
    %670 = arith.addf %654, %669 : vector<2x10xf32>
    %671 = vector.extract_strided_slice %663 {offsets = [0, 32], sizes = [2, 32], strides = [1, 1]} : vector<2x64xf32> to vector<2x32xf32>
    %cst_348 = arith.constant 0.000000e+00 : f32
    %672 = vector.broadcast %cst_348 : f32 to vector<2x32xf32>
    %673 = arith.maximumf %671, %672 : vector<2x32xf32>
    %c0_349 = arith.constant 0 : index
    %c672_350 = arith.constant 672 : index
    %674 = vector.load %arg12[%c0_349, %c672_350] : memref<2x1472xf32, #tpu.memory_space<vmem>>, vector<2x32xf32>
    tpu.vector_store %arg12[%c0_349, %c672_350], %673 {strides = array<i32>} : memref<2x1472xf32, #tpu.memory_space<vmem>>, vector<2x32xf32>,
    %c672_351 = arith.constant 672 : index
    %c0_352 = arith.constant 0 : index
    %675 = vector.load %arg9[%c672_351, %c0_352] : memref<1472x10xf32, #tpu.memory_space<vmem>>, vector<32x10xf32>
    %cst_353 = arith.constant dense<0.000000e+00> : vector<2x10xf32>
    %676 = tpu.matmul %673, %675, %cst_353 {dimension_numbers = #tpu.dot_dimension_numbers<[1], [0], [0], [1], [0, 0, 1, 1], [], []>} : vector<2x32xf32>, vector<32x10xf32>, vector<2x10xf32> -> vector<2x10xf32>
    %677 = arith.addf %670, %676 : vector<2x10xf32>
    %c0_354 = arith.constant 0 : index
    %c832_355 = arith.constant 832 : index
    %678 = vector.load %arg13[%c0_354, %c832_355] : memref<2x1472xf32, #tpu.memory_space<vmem>>, vector<2x64xf32>
    %c0_356 = arith.constant 0 : index
    %c576_357 = arith.constant 576 : index
    %679 = vector.load %arg13[%c0_356, %c576_357] : memref<2x1472xf32, #tpu.memory_space<vmem>>, vector<2x64xf32>
    %680 = tpu.concatenate %678, %679 in 1 : vector<2x64xf32>, vector<2x64xf32> -> vector<2x128xf32>
    %cst_358 = arith.constant dense<0.000000e+00> : vector<2x64xf32>
    %681 = tpu.matmul %680, %375, %cst_358 {dimension_numbers = #tpu.dot_dimension_numbers<[1], [0], [0], [1], [0, 0, 1, 1], [], []>} : vector<2x128xf32>, vector<128x64xf32>, vector<2x64xf32> -> vector<2x64xf32>
    %682 = vector.broadcast %377 : vector<1x64xf32> to vector<2x64xf32>
    %683 = arith.addf %681, %682 : vector<2x64xf32>
    %cst_359 = arith.constant dense<0.000000e+00> : vector<2x64xf32>
    %684 = tpu.matmul %663, %376, %cst_359 {dimension_numbers = #tpu.dot_dimension_numbers<[1], [0], [0], [1], [0, 0, 1, 1], [], []>} : vector<2x64xf32>, vector<64x64xf32>, vector<2x64xf32> -> vector<2x64xf32>
    %685 = arith.addf %683, %684 : vector<2x64xf32>
    %686 = math.tanh %685 : vector<2x64xf32>
    %687 = vector.extract_strided_slice %686 {offsets = [0, 0], sizes = [2, 32], strides = [1, 1]} : vector<2x64xf32> to vector<2x32xf32>
    %cst_360 = arith.constant 0.000000e+00 : f32
    %688 = vector.broadcast %cst_360 : f32 to vector<2x32xf32>
    %689 = arith.maximumf %687, %688 : vector<2x32xf32>
    %c0_361 = arith.constant 0 : index
    %c832_362 = arith.constant 832 : index
    %690 = vector.load %arg12[%c0_361, %c832_362] : memref<2x1472xf32, #tpu.memory_space<vmem>>, vector<2x32xf32>
    tpu.vector_store %arg12[%c0_361, %c832_362], %689 {strides = array<i32>} : memref<2x1472xf32, #tpu.memory_space<vmem>>, vector<2x32xf32>,
    %c832_363 = arith.constant 832 : index
    %c0_364 = arith.constant 0 : index
    %691 = vector.load %arg9[%c832_363, %c0_364] : memref<1472x10xf32, #tpu.memory_space<vmem>>, vector<32x10xf32>
    %cst_365 = arith.constant dense<0.000000e+00> : vector<2x10xf32>
    %692 = tpu.matmul %689, %691, %cst_365 {dimension_numbers = #tpu.dot_dimension_numbers<[1], [0], [0], [1], [0, 0, 1, 1], [], []>} : vector<2x32xf32>, vector<32x10xf32>, vector<2x10xf32> -> vector<2x10xf32>
    %693 = arith.addf %677, %692 : vector<2x10xf32>
    %694 = vector.extract_strided_slice %686 {offsets = [0, 32], sizes = [2, 32], strides = [1, 1]} : vector<2x64xf32> to vector<2x32xf32>
    %cst_366 = arith.constant 0.000000e+00 : f32
    %695 = vector.broadcast %cst_366 : f32 to vector<2x32xf32>
    %696 = arith.maximumf %694, %695 : vector<2x32xf32>
    %c0_367 = arith.constant 0 : index
    %c608_368 = arith.constant 608 : index
    %697 = vector.load %arg12[%c0_367, %c608_368] : memref<2x1472xf32, #tpu.memory_space<vmem>>, vector<2x32xf32>
    tpu.vector_store %arg12[%c0_367, %c608_368], %696 {strides = array<i32>} : memref<2x1472xf32, #tpu.memory_space<vmem>>, vector<2x32xf32>,
    %c608_369 = arith.constant 608 : index
    %c0_370 = arith.constant 0 : index
    %698 = vector.load %arg9[%c608_369, %c0_370] : memref<1472x10xf32, #tpu.memory_space<vmem>>, vector<32x10xf32>
    %cst_371 = arith.constant dense<0.000000e+00> : vector<2x10xf32>
    %699 = tpu.matmul %696, %698, %cst_371 {dimension_numbers = #tpu.dot_dimension_numbers<[1], [0], [0], [1], [0, 0, 1, 1], [], []>} : vector<2x32xf32>, vector<32x10xf32>, vector<2x10xf32> -> vector<2x10xf32>
    %700 = arith.addf %693, %699 : vector<2x10xf32>
    %c0_372 = arith.constant 0 : index
    %c896_373 = arith.constant 896 : index
    %701 = vector.load %arg13[%c0_372, %c896_373] : memref<2x1472xf32, #tpu.memory_space<vmem>>, vector<2x64xf32>
    %c0_374 = arith.constant 0 : index
    %c512_375 = arith.constant 512 : index
    %702 = vector.load %arg13[%c0_374, %c512_375] : memref<2x1472xf32, #tpu.memory_space<vmem>>, vector<2x64xf32>
    %703 = tpu.concatenate %701, %702 in 1 : vector<2x64xf32>, vector<2x64xf32> -> vector<2x128xf32>
    %cst_376 = arith.constant dense<0.000000e+00> : vector<2x64xf32>
    %704 = tpu.matmul %703, %375, %cst_376 {dimension_numbers = #tpu.dot_dimension_numbers<[1], [0], [0], [1], [0, 0, 1, 1], [], []>} : vector<2x128xf32>, vector<128x64xf32>, vector<2x64xf32> -> vector<2x64xf32>
    %705 = vector.broadcast %377 : vector<1x64xf32> to vector<2x64xf32>
    %706 = arith.addf %704, %705 : vector<2x64xf32>
    %cst_377 = arith.constant dense<0.000000e+00> : vector<2x64xf32>
    %707 = tpu.matmul %686, %376, %cst_377 {dimension_numbers = #tpu.dot_dimension_numbers<[1], [0], [0], [1], [0, 0, 1, 1], [], []>} : vector<2x64xf32>, vector<64x64xf32>, vector<2x64xf32> -> vector<2x64xf32>
    %708 = arith.addf %706, %707 : vector<2x64xf32>
    %709 = math.tanh %708 : vector<2x64xf32>
    %710 = vector.extract_strided_slice %709 {offsets = [0, 0], sizes = [2, 32], strides = [1, 1]} : vector<2x64xf32> to vector<2x32xf32>
    %cst_378 = arith.constant 0.000000e+00 : f32
    %711 = vector.broadcast %cst_378 : f32 to vector<2x32xf32>
    %712 = arith.maximumf %710, %711 : vector<2x32xf32>
    %c0_379 = arith.constant 0 : index
    %c896_380 = arith.constant 896 : index
    %713 = vector.load %arg12[%c0_379, %c896_380] : memref<2x1472xf32, #tpu.memory_space<vmem>>, vector<2x32xf32>
    tpu.vector_store %arg12[%c0_379, %c896_380], %712 {strides = array<i32>} : memref<2x1472xf32, #tpu.memory_space<vmem>>, vector<2x32xf32>,
    %c896_381 = arith.constant 896 : index
    %c0_382 = arith.constant 0 : index
    %714 = vector.load %arg9[%c896_381, %c0_382] : memref<1472x10xf32, #tpu.memory_space<vmem>>, vector<32x10xf32>
    %cst_383 = arith.constant dense<0.000000e+00> : vector<2x10xf32>
    %715 = tpu.matmul %712, %714, %cst_383 {dimension_numbers = #tpu.dot_dimension_numbers<[1], [0], [0], [1], [0, 0, 1, 1], [], []>} : vector<2x32xf32>, vector<32x10xf32>, vector<2x10xf32> -> vector<2x10xf32>
    %716 = arith.addf %700, %715 : vector<2x10xf32>
    %717 = vector.extract_strided_slice %709 {offsets = [0, 32], sizes = [2, 32], strides = [1, 1]} : vector<2x64xf32> to vector<2x32xf32>
    %cst_384 = arith.constant 0.000000e+00 : f32
    %718 = vector.broadcast %cst_384 : f32 to vector<2x32xf32>
    %719 = arith.maximumf %717, %718 : vector<2x32xf32>
    %c0_385 = arith.constant 0 : index
    %c544_386 = arith.constant 544 : index
    %720 = vector.load %arg12[%c0_385, %c544_386] : memref<2x1472xf32, #tpu.memory_space<vmem>>, vector<2x32xf32>
    tpu.vector_store %arg12[%c0_385, %c544_386], %719 {strides = array<i32>} : memref<2x1472xf32, #tpu.memory_space<vmem>>, vector<2x32xf32>,
    %c544_387 = arith.constant 544 : index
    %c0_388 = arith.constant 0 : index
    %721 = vector.load %arg9[%c544_387, %c0_388] : memref<1472x10xf32, #tpu.memory_space<vmem>>, vector<32x10xf32>
    %cst_389 = arith.constant dense<0.000000e+00> : vector<2x10xf32>
    %722 = tpu.matmul %719, %721, %cst_389 {dimension_numbers = #tpu.dot_dimension_numbers<[1], [0], [0], [1], [0, 0, 1, 1], [], []>} : vector<2x32xf32>, vector<32x10xf32>, vector<2x10xf32> -> vector<2x10xf32>
    %723 = arith.addf %716, %722 : vector<2x10xf32>
    %c0_390 = arith.constant 0 : index
    %c960_391 = arith.constant 960 : index
    %724 = vector.load %arg13[%c0_390, %c960_391] : memref<2x1472xf32, #tpu.memory_space<vmem>>, vector<2x64xf32>
    %c0_392 = arith.constant 0 : index
    %c448_393 = arith.constant 448 : index
    %725 = vector.load %arg13[%c0_392, %c448_393] : memref<2x1472xf32, #tpu.memory_space<vmem>>, vector<2x64xf32>
    %726 = tpu.concatenate %724, %725 in 1 : vector<2x64xf32>, vector<2x64xf32> -> vector<2x128xf32>
    %cst_394 = arith.constant dense<0.000000e+00> : vector<2x64xf32>
    %727 = tpu.matmul %726, %375, %cst_394 {dimension_numbers = #tpu.dot_dimension_numbers<[1], [0], [0], [1], [0, 0, 1, 1], [], []>} : vector<2x128xf32>, vector<128x64xf32>, vector<2x64xf32> -> vector<2x64xf32>
    %728 = vector.broadcast %377 : vector<1x64xf32> to vector<2x64xf32>
    %729 = arith.addf %727, %728 : vector<2x64xf32>
    %cst_395 = arith.constant dense<0.000000e+00> : vector<2x64xf32>
    %730 = tpu.matmul %709, %376, %cst_395 {dimension_numbers = #tpu.dot_dimension_numbers<[1], [0], [0], [1], [0, 0, 1, 1], [], []>} : vector<2x64xf32>, vector<64x64xf32>, vector<2x64xf32> -> vector<2x64xf32>
    %731 = arith.addf %729, %730 : vector<2x64xf32>
    %732 = math.tanh %731 : vector<2x64xf32>
    %733 = vector.extract_strided_slice %732 {offsets = [0, 0], sizes = [2, 32], strides = [1, 1]} : vector<2x64xf32> to vector<2x32xf32>
    %cst_396 = arith.constant 0.000000e+00 : f32
    %734 = vector.broadcast %cst_396 : f32 to vector<2x32xf32>
    %735 = arith.maximumf %733, %734 : vector<2x32xf32>
    %c0_397 = arith.constant 0 : index
    %c960_398 = arith.constant 960 : index
    %736 = vector.load %arg12[%c0_397, %c960_398] : memref<2x1472xf32, #tpu.memory_space<vmem>>, vector<2x32xf32>
    tpu.vector_store %arg12[%c0_397, %c960_398], %735 {strides = array<i32>} : memref<2x1472xf32, #tpu.memory_space<vmem>>, vector<2x32xf32>,
    %c960_399 = arith.constant 960 : index
    %c0_400 = arith.constant 0 : index
    %737 = vector.load %arg9[%c960_399, %c0_400] : memref<1472x10xf32, #tpu.memory_space<vmem>>, vector<32x10xf32>
    %cst_401 = arith.constant dense<0.000000e+00> : vector<2x10xf32>
    %738 = tpu.matmul %735, %737, %cst_401 {dimension_numbers = #tpu.dot_dimension_numbers<[1], [0], [0], [1], [0, 0, 1, 1], [], []>} : vector<2x32xf32>, vector<32x10xf32>, vector<2x10xf32> -> vector<2x10xf32>
    %739 = arith.addf %723, %738 : vector<2x10xf32>
    %740 = vector.extract_strided_slice %732 {offsets = [0, 32], sizes = [2, 32], strides = [1, 1]} : vector<2x64xf32> to vector<2x32xf32>
    %cst_402 = arith.constant 0.000000e+00 : f32
    %741 = vector.broadcast %cst_402 : f32 to vector<2x32xf32>
    %742 = arith.maximumf %740, %741 : vector<2x32xf32>
    %c0_403 = arith.constant 0 : index
    %c480_404 = arith.constant 480 : index
    %743 = vector.load %arg12[%c0_403, %c480_404] : memref<2x1472xf32, #tpu.memory_space<vmem>>, vector<2x32xf32>
    tpu.vector_store %arg12[%c0_403, %c480_404], %742 {strides = array<i32>} : memref<2x1472xf32, #tpu.memory_space<vmem>>, vector<2x32xf32>,
    %c480_405 = arith.constant 480 : index
    %c0_406 = arith.constant 0 : index
    %744 = vector.load %arg9[%c480_405, %c0_406] : memref<1472x10xf32, #tpu.memory_space<vmem>>, vector<32x10xf32>
    %cst_407 = arith.constant dense<0.000000e+00> : vector<2x10xf32>
    %745 = tpu.matmul %742, %744, %cst_407 {dimension_numbers = #tpu.dot_dimension_numbers<[1], [0], [0], [1], [0, 0, 1, 1], [], []>} : vector<2x32xf32>, vector<32x10xf32>, vector<2x10xf32> -> vector<2x10xf32>
    %746 = arith.addf %739, %745 : vector<2x10xf32>
    %c0_408 = arith.constant 0 : index
    %c1024_409 = arith.constant 1024 : index
    %747 = vector.load %arg13[%c0_408, %c1024_409] : memref<2x1472xf32, #tpu.memory_space<vmem>>, vector<2x64xf32>
    %c0_410 = arith.constant 0 : index
    %c384_411 = arith.constant 384 : index
    %748 = vector.load %arg13[%c0_410, %c384_411] : memref<2x1472xf32, #tpu.memory_space<vmem>>, vector<2x64xf32>
    %749 = tpu.concatenate %747, %748 in 1 : vector<2x64xf32>, vector<2x64xf32> -> vector<2x128xf32>
    %cst_412 = arith.constant dense<0.000000e+00> : vector<2x64xf32>
    %750 = tpu.matmul %749, %375, %cst_412 {dimension_numbers = #tpu.dot_dimension_numbers<[1], [0], [0], [1], [0, 0, 1, 1], [], []>} : vector<2x128xf32>, vector<128x64xf32>, vector<2x64xf32> -> vector<2x64xf32>
    %751 = vector.broadcast %377 : vector<1x64xf32> to vector<2x64xf32>
    %752 = arith.addf %750, %751 : vector<2x64xf32>
    %cst_413 = arith.constant dense<0.000000e+00> : vector<2x64xf32>
    %753 = tpu.matmul %732, %376, %cst_413 {dimension_numbers = #tpu.dot_dimension_numbers<[1], [0], [0], [1], [0, 0, 1, 1], [], []>} : vector<2x64xf32>, vector<64x64xf32>, vector<2x64xf32> -> vector<2x64xf32>
    %754 = arith.addf %752, %753 : vector<2x64xf32>
    %755 = math.tanh %754 : vector<2x64xf32>
    %756 = vector.extract_strided_slice %755 {offsets = [0, 0], sizes = [2, 32], strides = [1, 1]} : vector<2x64xf32> to vector<2x32xf32>
    %cst_414 = arith.constant 0.000000e+00 : f32
    %757 = vector.broadcast %cst_414 : f32 to vector<2x32xf32>
    %758 = arith.maximumf %756, %757 : vector<2x32xf32>
    %c0_415 = arith.constant 0 : index
    %c1024_416 = arith.constant 1024 : index
    %759 = vector.load %arg12[%c0_415, %c1024_416] : memref<2x1472xf32, #tpu.memory_space<vmem>>, vector<2x32xf32>
    tpu.vector_store %arg12[%c0_415, %c1024_416], %758 {strides = array<i32>} : memref<2x1472xf32, #tpu.memory_space<vmem>>, vector<2x32xf32>,
    %c1024_417 = arith.constant 1024 : index
    %c0_418 = arith.constant 0 : index
    %760 = vector.load %arg9[%c1024_417, %c0_418] : memref<1472x10xf32, #tpu.memory_space<vmem>>, vector<32x10xf32>
    %cst_419 = arith.constant dense<0.000000e+00> : vector<2x10xf32>
    %761 = tpu.matmul %758, %760, %cst_419 {dimension_numbers = #tpu.dot_dimension_numbers<[1], [0], [0], [1], [0, 0, 1, 1], [], []>} : vector<2x32xf32>, vector<32x10xf32>, vector<2x10xf32> -> vector<2x10xf32>
    %762 = arith.addf %746, %761 : vector<2x10xf32>
    %763 = vector.extract_strided_slice %755 {offsets = [0, 32], sizes = [2, 32], strides = [1, 1]} : vector<2x64xf32> to vector<2x32xf32>
    %cst_420 = arith.constant 0.000000e+00 : f32
    %764 = vector.broadcast %cst_420 : f32 to vector<2x32xf32>
    %765 = arith.maximumf %763, %764 : vector<2x32xf32>
    %c0_421 = arith.constant 0 : index
    %c416_422 = arith.constant 416 : index
    %766 = vector.load %arg12[%c0_421, %c416_422] : memref<2x1472xf32, #tpu.memory_space<vmem>>, vector<2x32xf32>
    tpu.vector_store %arg12[%c0_421, %c416_422], %765 {strides = array<i32>} : memref<2x1472xf32, #tpu.memory_space<vmem>>, vector<2x32xf32>,
    %c416_423 = arith.constant 416 : index
    %c0_424 = arith.constant 0 : index
    %767 = vector.load %arg9[%c416_423, %c0_424] : memref<1472x10xf32, #tpu.memory_space<vmem>>, vector<32x10xf32>
    %cst_425 = arith.constant dense<0.000000e+00> : vector<2x10xf32>
    %768 = tpu.matmul %765, %767, %cst_425 {dimension_numbers = #tpu.dot_dimension_numbers<[1], [0], [0], [1], [0, 0, 1, 1], [], []>} : vector<2x32xf32>, vector<32x10xf32>, vector<2x10xf32> -> vector<2x10xf32>
    %769 = arith.addf %762, %768 : vector<2x10xf32>
    %c0_426 = arith.constant 0 : index
    %c1088_427 = arith.constant 1088 : index
    %770 = vector.load %arg13[%c0_426, %c1088_427] : memref<2x1472xf32, #tpu.memory_space<vmem>>, vector<2x64xf32>
    %c0_428 = arith.constant 0 : index
    %c320_429 = arith.constant 320 : index
    %771 = vector.load %arg13[%c0_428, %c320_429] : memref<2x1472xf32, #tpu.memory_space<vmem>>, vector<2x64xf32>
    %772 = tpu.concatenate %770, %771 in 1 : vector<2x64xf32>, vector<2x64xf32> -> vector<2x128xf32>
    %cst_430 = arith.constant dense<0.000000e+00> : vector<2x64xf32>
    %773 = tpu.matmul %772, %375, %cst_430 {dimension_numbers = #tpu.dot_dimension_numbers<[1], [0], [0], [1], [0, 0, 1, 1], [], []>} : vector<2x128xf32>, vector<128x64xf32>, vector<2x64xf32> -> vector<2x64xf32>
    %774 = vector.broadcast %377 : vector<1x64xf32> to vector<2x64xf32>
    %775 = arith.addf %773, %774 : vector<2x64xf32>
    %cst_431 = arith.constant dense<0.000000e+00> : vector<2x64xf32>
    %776 = tpu.matmul %755, %376, %cst_431 {dimension_numbers = #tpu.dot_dimension_numbers<[1], [0], [0], [1], [0, 0, 1, 1], [], []>} : vector<2x64xf32>, vector<64x64xf32>, vector<2x64xf32> -> vector<2x64xf32>
    %777 = arith.addf %775, %776 : vector<2x64xf32>
    %778 = math.tanh %777 : vector<2x64xf32>
    %779 = vector.extract_strided_slice %778 {offsets = [0, 0], sizes = [2, 32], strides = [1, 1]} : vector<2x64xf32> to vector<2x32xf32>
    %cst_432 = arith.constant 0.000000e+00 : f32
    %780 = vector.broadcast %cst_432 : f32 to vector<2x32xf32>
    %781 = arith.maximumf %779, %780 : vector<2x32xf32>
    %c0_433 = arith.constant 0 : index
    %c1088_434 = arith.constant 1088 : index
    %782 = vector.load %arg12[%c0_433, %c1088_434] : memref<2x1472xf32, #tpu.memory_space<vmem>>, vector<2x32xf32>
    tpu.vector_store %arg12[%c0_433, %c1088_434], %781 {strides = array<i32>} : memref<2x1472xf32, #tpu.memory_space<vmem>>, vector<2x32xf32>,
    %c1088_435 = arith.constant 1088 : index
    %c0_436 = arith.constant 0 : index
    %783 = vector.load %arg9[%c1088_435, %c0_436] : memref<1472x10xf32, #tpu.memory_space<vmem>>, vector<32x10xf32>
    %cst_437 = arith.constant dense<0.000000e+00> : vector<2x10xf32>
    %784 = tpu.matmul %781, %783, %cst_437 {dimension_numbers = #tpu.dot_dimension_numbers<[1], [0], [0], [1], [0, 0, 1, 1], [], []>} : vector<2x32xf32>, vector<32x10xf32>, vector<2x10xf32> -> vector<2x10xf32>
    %785 = arith.addf %769, %784 : vector<2x10xf32>
    %786 = vector.extract_strided_slice %778 {offsets = [0, 32], sizes = [2, 32], strides = [1, 1]} : vector<2x64xf32> to vector<2x32xf32>
    %cst_438 = arith.constant 0.000000e+00 : f32
    %787 = vector.broadcast %cst_438 : f32 to vector<2x32xf32>
    %788 = arith.maximumf %786, %787 : vector<2x32xf32>
    %c0_439 = arith.constant 0 : index
    %c352_440 = arith.constant 352 : index
    %789 = vector.load %arg12[%c0_439, %c352_440] : memref<2x1472xf32, #tpu.memory_space<vmem>>, vector<2x32xf32>
    tpu.vector_store %arg12[%c0_439, %c352_440], %788 {strides = array<i32>} : memref<2x1472xf32, #tpu.memory_space<vmem>>, vector<2x32xf32>,
    %c352_441 = arith.constant 352 : index
    %c0_442 = arith.constant 0 : index
    %790 = vector.load %arg9[%c352_441, %c0_442] : memref<1472x10xf32, #tpu.memory_space<vmem>>, vector<32x10xf32>
    %cst_443 = arith.constant dense<0.000000e+00> : vector<2x10xf32>
    %791 = tpu.matmul %788, %790, %cst_443 {dimension_numbers = #tpu.dot_dimension_numbers<[1], [0], [0], [1], [0, 0, 1, 1], [], []>} : vector<2x32xf32>, vector<32x10xf32>, vector<2x10xf32> -> vector<2x10xf32>
    %792 = arith.addf %785, %791 : vector<2x10xf32>
    %c0_444 = arith.constant 0 : index
    %c1152_445 = arith.constant 1152 : index
    %793 = vector.load %arg13[%c0_444, %c1152_445] : memref<2x1472xf32, #tpu.memory_space<vmem>>, vector<2x64xf32>
    %c0_446 = arith.constant 0 : index
    %c256_447 = arith.constant 256 : index
    %794 = vector.load %arg13[%c0_446, %c256_447] : memref<2x1472xf32, #tpu.memory_space<vmem>>, vector<2x64xf32>
    %795 = tpu.concatenate %793, %794 in 1 : vector<2x64xf32>, vector<2x64xf32> -> vector<2x128xf32>
    %cst_448 = arith.constant dense<0.000000e+00> : vector<2x64xf32>
    %796 = tpu.matmul %795, %375, %cst_448 {dimension_numbers = #tpu.dot_dimension_numbers<[1], [0], [0], [1], [0, 0, 1, 1], [], []>} : vector<2x128xf32>, vector<128x64xf32>, vector<2x64xf32> -> vector<2x64xf32>
    %797 = vector.broadcast %377 : vector<1x64xf32> to vector<2x64xf32>
    %798 = arith.addf %796, %797 : vector<2x64xf32>
    %cst_449 = arith.constant dense<0.000000e+00> : vector<2x64xf32>
    %799 = tpu.matmul %778, %376, %cst_449 {dimension_numbers = #tpu.dot_dimension_numbers<[1], [0], [0], [1], [0, 0, 1, 1], [], []>} : vector<2x64xf32>, vector<64x64xf32>, vector<2x64xf32> -> vector<2x64xf32>
    %800 = arith.addf %798, %799 : vector<2x64xf32>
    %801 = math.tanh %800 : vector<2x64xf32>
    %802 = vector.extract_strided_slice %801 {offsets = [0, 0], sizes = [2, 32], strides = [1, 1]} : vector<2x64xf32> to vector<2x32xf32>
    %cst_450 = arith.constant 0.000000e+00 : f32
    %803 = vector.broadcast %cst_450 : f32 to vector<2x32xf32>
    %804 = arith.maximumf %802, %803 : vector<2x32xf32>
    %c0_451 = arith.constant 0 : index
    %c1152_452 = arith.constant 1152 : index
    %805 = vector.load %arg12[%c0_451, %c1152_452] : memref<2x1472xf32, #tpu.memory_space<vmem>>, vector<2x32xf32>
    tpu.vector_store %arg12[%c0_451, %c1152_452], %804 {strides = array<i32>} : memref<2x1472xf32, #tpu.memory_space<vmem>>, vector<2x32xf32>,
    %c1152_453 = arith.constant 1152 : index
    %c0_454 = arith.constant 0 : index
    %806 = vector.load %arg9[%c1152_453, %c0_454] : memref<1472x10xf32, #tpu.memory_space<vmem>>, vector<32x10xf32>
    %cst_455 = arith.constant dense<0.000000e+00> : vector<2x10xf32>
    %807 = tpu.matmul %804, %806, %cst_455 {dimension_numbers = #tpu.dot_dimension_numbers<[1], [0], [0], [1], [0, 0, 1, 1], [], []>} : vector<2x32xf32>, vector<32x10xf32>, vector<2x10xf32> -> vector<2x10xf32>
    %808 = arith.addf %792, %807 : vector<2x10xf32>
    %809 = vector.extract_strided_slice %801 {offsets = [0, 32], sizes = [2, 32], strides = [1, 1]} : vector<2x64xf32> to vector<2x32xf32>
    %cst_456 = arith.constant 0.000000e+00 : f32
    %810 = vector.broadcast %cst_456 : f32 to vector<2x32xf32>
    %811 = arith.maximumf %809, %810 : vector<2x32xf32>
    %c0_457 = arith.constant 0 : index
    %c288_458 = arith.constant 288 : index
    %812 = vector.load %arg12[%c0_457, %c288_458] : memref<2x1472xf32, #tpu.memory_space<vmem>>, vector<2x32xf32>
    tpu.vector_store %arg12[%c0_457, %c288_458], %811 {strides = array<i32>} : memref<2x1472xf32, #tpu.memory_space<vmem>>, vector<2x32xf32>,
    %c288_459 = arith.constant 288 : index
    %c0_460 = arith.constant 0 : index
    %813 = vector.load %arg9[%c288_459, %c0_460] : memref<1472x10xf32, #tpu.memory_space<vmem>>, vector<32x10xf32>
    %cst_461 = arith.constant dense<0.000000e+00> : vector<2x10xf32>
    %814 = tpu.matmul %811, %813, %cst_461 {dimension_numbers = #tpu.dot_dimension_numbers<[1], [0], [0], [1], [0, 0, 1, 1], [], []>} : vector<2x32xf32>, vector<32x10xf32>, vector<2x10xf32> -> vector<2x10xf32>
    %815 = arith.addf %808, %814 : vector<2x10xf32>
    %c0_462 = arith.constant 0 : index
    %c1216_463 = arith.constant 1216 : index
    %816 = vector.load %arg13[%c0_462, %c1216_463] : memref<2x1472xf32, #tpu.memory_space<vmem>>, vector<2x64xf32>
    %c0_464 = arith.constant 0 : index
    %c192_465 = arith.constant 192 : index
    %817 = vector.load %arg13[%c0_464, %c192_465] : memref<2x1472xf32, #tpu.memory_space<vmem>>, vector<2x64xf32>
    %818 = tpu.concatenate %816, %817 in 1 : vector<2x64xf32>, vector<2x64xf32> -> vector<2x128xf32>
    %cst_466 = arith.constant dense<0.000000e+00> : vector<2x64xf32>
    %819 = tpu.matmul %818, %375, %cst_466 {dimension_numbers = #tpu.dot_dimension_numbers<[1], [0], [0], [1], [0, 0, 1, 1], [], []>} : vector<2x128xf32>, vector<128x64xf32>, vector<2x64xf32> -> vector<2x64xf32>
    %820 = vector.broadcast %377 : vector<1x64xf32> to vector<2x64xf32>
    %821 = arith.addf %819, %820 : vector<2x64xf32>
    %cst_467 = arith.constant dense<0.000000e+00> : vector<2x64xf32>
    %822 = tpu.matmul %801, %376, %cst_467 {dimension_numbers = #tpu.dot_dimension_numbers<[1], [0], [0], [1], [0, 0, 1, 1], [], []>} : vector<2x64xf32>, vector<64x64xf32>, vector<2x64xf32> -> vector<2x64xf32>
    %823 = arith.addf %821, %822 : vector<2x64xf32>
    %824 = math.tanh %823 : vector<2x64xf32>
    %825 = vector.extract_strided_slice %824 {offsets = [0, 0], sizes = [2, 32], strides = [1, 1]} : vector<2x64xf32> to vector<2x32xf32>
    %cst_468 = arith.constant 0.000000e+00 : f32
    %826 = vector.broadcast %cst_468 : f32 to vector<2x32xf32>
    %827 = arith.maximumf %825, %826 : vector<2x32xf32>
    %c0_469 = arith.constant 0 : index
    %c1216_470 = arith.constant 1216 : index
    %828 = vector.load %arg12[%c0_469, %c1216_470] : memref<2x1472xf32, #tpu.memory_space<vmem>>, vector<2x32xf32>
    tpu.vector_store %arg12[%c0_469, %c1216_470], %827 {strides = array<i32>} : memref<2x1472xf32, #tpu.memory_space<vmem>>, vector<2x32xf32>,
    %c1216_471 = arith.constant 1216 : index
    %c0_472 = arith.constant 0 : index
    %829 = vector.load %arg9[%c1216_471, %c0_472] : memref<1472x10xf32, #tpu.memory_space<vmem>>, vector<32x10xf32>
    %cst_473 = arith.constant dense<0.000000e+00> : vector<2x10xf32>
    %830 = tpu.matmul %827, %829, %cst_473 {dimension_numbers = #tpu.dot_dimension_numbers<[1], [0], [0], [1], [0, 0, 1, 1], [], []>} : vector<2x32xf32>, vector<32x10xf32>, vector<2x10xf32> -> vector<2x10xf32>
    %831 = arith.addf %815, %830 : vector<2x10xf32>
    %832 = vector.extract_strided_slice %824 {offsets = [0, 32], sizes = [2, 32], strides = [1, 1]} : vector<2x64xf32> to vector<2x32xf32>
    %cst_474 = arith.constant 0.000000e+00 : f32
    %833 = vector.broadcast %cst_474 : f32 to vector<2x32xf32>
    %834 = arith.maximumf %832, %833 : vector<2x32xf32>
    %c0_475 = arith.constant 0 : index
    %c224_476 = arith.constant 224 : index
    %835 = vector.load %arg12[%c0_475, %c224_476] : memref<2x1472xf32, #tpu.memory_space<vmem>>, vector<2x32xf32>
    tpu.vector_store %arg12[%c0_475, %c224_476], %834 {strides = array<i32>} : memref<2x1472xf32, #tpu.memory_space<vmem>>, vector<2x32xf32>,
    %c224_477 = arith.constant 224 : index
    %c0_478 = arith.constant 0 : index
    %836 = vector.load %arg9[%c224_477, %c0_478] : memref<1472x10xf32, #tpu.memory_space<vmem>>, vector<32x10xf32>
    %cst_479 = arith.constant dense<0.000000e+00> : vector<2x10xf32>
    %837 = tpu.matmul %834, %836, %cst_479 {dimension_numbers = #tpu.dot_dimension_numbers<[1], [0], [0], [1], [0, 0, 1, 1], [], []>} : vector<2x32xf32>, vector<32x10xf32>, vector<2x10xf32> -> vector<2x10xf32>
    %838 = arith.addf %831, %837 : vector<2x10xf32>
    %c0_480 = arith.constant 0 : index
    %c1280_481 = arith.constant 1280 : index
    %839 = vector.load %arg13[%c0_480, %c1280_481] : memref<2x1472xf32, #tpu.memory_space<vmem>>, vector<2x64xf32>
    %c0_482 = arith.constant 0 : index
    %c128_483 = arith.constant 128 : index
    %840 = vector.load %arg13[%c0_482, %c128_483] : memref<2x1472xf32, #tpu.memory_space<vmem>>, vector<2x64xf32>
    %841 = tpu.concatenate %839, %840 in 1 : vector<2x64xf32>, vector<2x64xf32> -> vector<2x128xf32>
    %cst_484 = arith.constant dense<0.000000e+00> : vector<2x64xf32>
    %842 = tpu.matmul %841, %375, %cst_484 {dimension_numbers = #tpu.dot_dimension_numbers<[1], [0], [0], [1], [0, 0, 1, 1], [], []>} : vector<2x128xf32>, vector<128x64xf32>, vector<2x64xf32> -> vector<2x64xf32>
    %843 = vector.broadcast %377 : vector<1x64xf32> to vector<2x64xf32>
    %844 = arith.addf %842, %843 : vector<2x64xf32>
    %cst_485 = arith.constant dense<0.000000e+00> : vector<2x64xf32>
    %845 = tpu.matmul %824, %376, %cst_485 {dimension_numbers = #tpu.dot_dimension_numbers<[1], [0], [0], [1], [0, 0, 1, 1], [], []>} : vector<2x64xf32>, vector<64x64xf32>, vector<2x64xf32> -> vector<2x64xf32>
    %846 = arith.addf %844, %845 : vector<2x64xf32>
    %847 = math.tanh %846 : vector<2x64xf32>
    %848 = vector.extract_strided_slice %847 {offsets = [0, 0], sizes = [2, 32], strides = [1, 1]} : vector<2x64xf32> to vector<2x32xf32>
    %cst_486 = arith.constant 0.000000e+00 : f32
    %849 = vector.broadcast %cst_486 : f32 to vector<2x32xf32>
    %850 = arith.maximumf %848, %849 : vector<2x32xf32>
    %c0_487 = arith.constant 0 : index
    %c1280_488 = arith.constant 1280 : index
    %851 = vector.load %arg12[%c0_487, %c1280_488] : memref<2x1472xf32, #tpu.memory_space<vmem>>, vector<2x32xf32>
    tpu.vector_store %arg12[%c0_487, %c1280_488], %850 {strides = array<i32>} : memref<2x1472xf32, #tpu.memory_space<vmem>>, vector<2x32xf32>,
    %c1280_489 = arith.constant 1280 : index
    %c0_490 = arith.constant 0 : index
    %852 = vector.load %arg9[%c1280_489, %c0_490] : memref<1472x10xf32, #tpu.memory_space<vmem>>, vector<32x10xf32>
    %cst_491 = arith.constant dense<0.000000e+00> : vector<2x10xf32>
    %853 = tpu.matmul %850, %852, %cst_491 {dimension_numbers = #tpu.dot_dimension_numbers<[1], [0], [0], [1], [0, 0, 1, 1], [], []>} : vector<2x32xf32>, vector<32x10xf32>, vector<2x10xf32> -> vector<2x10xf32>
    %854 = arith.addf %838, %853 : vector<2x10xf32>
    %855 = vector.extract_strided_slice %847 {offsets = [0, 32], sizes = [2, 32], strides = [1, 1]} : vector<2x64xf32> to vector<2x32xf32>
    %cst_492 = arith.constant 0.000000e+00 : f32
    %856 = vector.broadcast %cst_492 : f32 to vector<2x32xf32>
    %857 = arith.maximumf %855, %856 : vector<2x32xf32>
    %c0_493 = arith.constant 0 : index
    %c160_494 = arith.constant 160 : index
    %858 = vector.load %arg12[%c0_493, %c160_494] : memref<2x1472xf32, #tpu.memory_space<vmem>>, vector<2x32xf32>
    tpu.vector_store %arg12[%c0_493, %c160_494], %857 {strides = array<i32>} : memref<2x1472xf32, #tpu.memory_space<vmem>>, vector<2x32xf32>,
    %c160_495 = arith.constant 160 : index
    %c0_496 = arith.constant 0 : index
    %859 = vector.load %arg9[%c160_495, %c0_496] : memref<1472x10xf32, #tpu.memory_space<vmem>>, vector<32x10xf32>
    %cst_497 = arith.constant dense<0.000000e+00> : vector<2x10xf32>
    %860 = tpu.matmul %857, %859, %cst_497 {dimension_numbers = #tpu.dot_dimension_numbers<[1], [0], [0], [1], [0, 0, 1, 1], [], []>} : vector<2x32xf32>, vector<32x10xf32>, vector<2x10xf32> -> vector<2x10xf32>
    %861 = arith.addf %854, %860 : vector<2x10xf32>
    %c0_498 = arith.constant 0 : index
    %c1344_499 = arith.constant 1344 : index
    %862 = vector.load %arg13[%c0_498, %c1344_499] : memref<2x1472xf32, #tpu.memory_space<vmem>>, vector<2x64xf32>
    %c0_500 = arith.constant 0 : index
    %c64_501 = arith.constant 64 : index
    %863 = vector.load %arg13[%c0_500, %c64_501] : memref<2x1472xf32, #tpu.memory_space<vmem>>, vector<2x64xf32>
    %864 = tpu.concatenate %862, %863 in 1 : vector<2x64xf32>, vector<2x64xf32> -> vector<2x128xf32>
    %cst_502 = arith.constant dense<0.000000e+00> : vector<2x64xf32>
    %865 = tpu.matmul %864, %375, %cst_502 {dimension_numbers = #tpu.dot_dimension_numbers<[1], [0], [0], [1], [0, 0, 1, 1], [], []>} : vector<2x128xf32>, vector<128x64xf32>, vector<2x64xf32> -> vector<2x64xf32>
    %866 = vector.broadcast %377 : vector<1x64xf32> to vector<2x64xf32>
    %867 = arith.addf %865, %866 : vector<2x64xf32>
    %cst_503 = arith.constant dense<0.000000e+00> : vector<2x64xf32>
    %868 = tpu.matmul %847, %376, %cst_503 {dimension_numbers = #tpu.dot_dimension_numbers<[1], [0], [0], [1], [0, 0, 1, 1], [], []>} : vector<2x64xf32>, vector<64x64xf32>, vector<2x64xf32> -> vector<2x64xf32>
    %869 = arith.addf %867, %868 : vector<2x64xf32>
    %870 = math.tanh %869 : vector<2x64xf32>
    %871 = vector.extract_strided_slice %870 {offsets = [0, 0], sizes = [2, 32], strides = [1, 1]} : vector<2x64xf32> to vector<2x32xf32>
    %cst_504 = arith.constant 0.000000e+00 : f32
    %872 = vector.broadcast %cst_504 : f32 to vector<2x32xf32>
    %873 = arith.maximumf %871, %872 : vector<2x32xf32>
    %c0_505 = arith.constant 0 : index
    %c1344_506 = arith.constant 1344 : index
    %874 = vector.load %arg12[%c0_505, %c1344_506] : memref<2x1472xf32, #tpu.memory_space<vmem>>, vector<2x32xf32>
    tpu.vector_store %arg12[%c0_505, %c1344_506], %873 {strides = array<i32>} : memref<2x1472xf32, #tpu.memory_space<vmem>>, vector<2x32xf32>,
    %c1344_507 = arith.constant 1344 : index
    %c0_508 = arith.constant 0 : index
    %875 = vector.load %arg9[%c1344_507, %c0_508] : memref<1472x10xf32, #tpu.memory_space<vmem>>, vector<32x10xf32>
    %cst_509 = arith.constant dense<0.000000e+00> : vector<2x10xf32>
    %876 = tpu.matmul %873, %875, %cst_509 {dimension_numbers = #tpu.dot_dimension_numbers<[1], [0], [0], [1], [0, 0, 1, 1], [], []>} : vector<2x32xf32>, vector<32x10xf32>, vector<2x10xf32> -> vector<2x10xf32>
    %877 = arith.addf %861, %876 : vector<2x10xf32>
    %878 = vector.extract_strided_slice %870 {offsets = [0, 32], sizes = [2, 32], strides = [1, 1]} : vector<2x64xf32> to vector<2x32xf32>
    %cst_510 = arith.constant 0.000000e+00 : f32
    %879 = vector.broadcast %cst_510 : f32 to vector<2x32xf32>
    %880 = arith.maximumf %878, %879 : vector<2x32xf32>
    %c0_511 = arith.constant 0 : index
    %c96_512 = arith.constant 96 : index
    %881 = vector.load %arg12[%c0_511, %c96_512] : memref<2x1472xf32, #tpu.memory_space<vmem>>, vector<2x32xf32>
    tpu.vector_store %arg12[%c0_511, %c96_512], %880 {strides = array<i32>} : memref<2x1472xf32, #tpu.memory_space<vmem>>, vector<2x32xf32>,
    %c96_513 = arith.constant 96 : index
    %c0_514 = arith.constant 0 : index
    %882 = vector.load %arg9[%c96_513, %c0_514] : memref<1472x10xf32, #tpu.memory_space<vmem>>, vector<32x10xf32>
    %cst_515 = arith.constant dense<0.000000e+00> : vector<2x10xf32>
    %883 = tpu.matmul %880, %882, %cst_515 {dimension_numbers = #tpu.dot_dimension_numbers<[1], [0], [0], [1], [0, 0, 1, 1], [], []>} : vector<2x32xf32>, vector<32x10xf32>, vector<2x10xf32> -> vector<2x10xf32>
    %884 = arith.addf %877, %883 : vector<2x10xf32>
    %c0_516 = arith.constant 0 : index
    %c1408_517 = arith.constant 1408 : index
    %885 = vector.load %arg13[%c0_516, %c1408_517] : memref<2x1472xf32, #tpu.memory_space<vmem>>, vector<2x64xf32>
    %c0_518 = arith.constant 0 : index
    %c0_519 = arith.constant 0 : index
    %886 = vector.load %arg13[%c0_518, %c0_519] : memref<2x1472xf32, #tpu.memory_space<vmem>>, vector<2x64xf32>
    %887 = tpu.concatenate %885, %886 in 1 : vector<2x64xf32>, vector<2x64xf32> -> vector<2x128xf32>
    %cst_520 = arith.constant dense<0.000000e+00> : vector<2x64xf32>
    %888 = tpu.matmul %887, %375, %cst_520 {dimension_numbers = #tpu.dot_dimension_numbers<[1], [0], [0], [1], [0, 0, 1, 1], [], []>} : vector<2x128xf32>, vector<128x64xf32>, vector<2x64xf32> -> vector<2x64xf32>
    %889 = vector.broadcast %377 : vector<1x64xf32> to vector<2x64xf32>
    %890 = arith.addf %888, %889 : vector<2x64xf32>
    %cst_521 = arith.constant dense<0.000000e+00> : vector<2x64xf32>
    %891 = tpu.matmul %870, %376, %cst_521 {dimension_numbers = #tpu.dot_dimension_numbers<[1], [0], [0], [1], [0, 0, 1, 1], [], []>} : vector<2x64xf32>, vector<64x64xf32>, vector<2x64xf32> -> vector<2x64xf32>
    %892 = arith.addf %890, %891 : vector<2x64xf32>
    %893 = math.tanh %892 : vector<2x64xf32>
    %894 = vector.extract_strided_slice %893 {offsets = [0, 0], sizes = [2, 32], strides = [1, 1]} : vector<2x64xf32> to vector<2x32xf32>
    %cst_522 = arith.constant 0.000000e+00 : f32
    %895 = vector.broadcast %cst_522 : f32 to vector<2x32xf32>
    %896 = arith.maximumf %894, %895 : vector<2x32xf32>
    %c0_523 = arith.constant 0 : index
    %c1408_524 = arith.constant 1408 : index
    %897 = vector.load %arg12[%c0_523, %c1408_524] : memref<2x1472xf32, #tpu.memory_space<vmem>>, vector<2x32xf32>
    tpu.vector_store %arg12[%c0_523, %c1408_524], %896 {strides = array<i32>} : memref<2x1472xf32, #tpu.memory_space<vmem>>, vector<2x32xf32>,
    %c1408_525 = arith.constant 1408 : index
    %c0_526 = arith.constant 0 : index
    %898 = vector.load %arg9[%c1408_525, %c0_526] : memref<1472x10xf32, #tpu.memory_space<vmem>>, vector<32x10xf32>
    %cst_527 = arith.constant dense<0.000000e+00> : vector<2x10xf32>
    %899 = tpu.matmul %896, %898, %cst_527 {dimension_numbers = #tpu.dot_dimension_numbers<[1], [0], [0], [1], [0, 0, 1, 1], [], []>} : vector<2x32xf32>, vector<32x10xf32>, vector<2x10xf32> -> vector<2x10xf32>
    %900 = arith.addf %884, %899 : vector<2x10xf32>
    %901 = vector.extract_strided_slice %893 {offsets = [0, 32], sizes = [2, 32], strides = [1, 1]} : vector<2x64xf32> to vector<2x32xf32>
    %cst_528 = arith.constant 0.000000e+00 : f32
    %902 = vector.broadcast %cst_528 : f32 to vector<2x32xf32>
    %903 = arith.maximumf %901, %902 : vector<2x32xf32>
    %c0_529 = arith.constant 0 : index
    %c32_530 = arith.constant 32 : index
    %904 = vector.load %arg12[%c0_529, %c32_530] : memref<2x1472xf32, #tpu.memory_space<vmem>>, vector<2x32xf32>
    tpu.vector_store %arg12[%c0_529, %c32_530], %903 {strides = array<i32>} : memref<2x1472xf32, #tpu.memory_space<vmem>>, vector<2x32xf32>,
    %c32_531 = arith.constant 32 : index
    %c0_532 = arith.constant 0 : index
    %905 = vector.load %arg9[%c32_531, %c0_532] : memref<1472x10xf32, #tpu.memory_space<vmem>>, vector<32x10xf32>
    %cst_533 = arith.constant dense<0.000000e+00> : vector<2x10xf32>
    %906 = tpu.matmul %903, %905, %cst_533 {dimension_numbers = #tpu.dot_dimension_numbers<[1], [0], [0], [1], [0, 0, 1, 1], [], []>} : vector<2x32xf32>, vector<32x10xf32>, vector<2x10xf32> -> vector<2x10xf32>
    %907 = arith.addf %900, %906 : vector<2x10xf32>
    %c0_534 = arith.constant 0 : index
    %c0_535 = arith.constant 0 : index
    %908 = vector.load %arg10[%c0_534, %c0_535] : memref<1x10xf32, #tpu.memory_space<vmem>>, vector<1x10xf32>
    %909 = vector.broadcast %908 : vector<1x10xf32> to vector<2x10xf32>
    %910 = arith.addf %907, %909 : vector<2x10xf32>
    %c0_536 = arith.constant 0 : index
    %c0_537 = arith.constant 0 : index
    %911 = vector.load %arg11[%c0_536, %c0_537] : memref<2x10xf32, #tpu.memory_space<vmem>>, vector<2x10xf32>
    tpu.vector_store %arg11[%c0_536, %c0_537], %910 {strides = array<i32>} : memref<2x10xf32, #tpu.memory_space<vmem>>, vector<2x10xf32>,
    return
  }
}

</mosaic_0001>

<bundles_post_ra>
// kernel: rnn_forward.1
= control target key start
LH: loop header
LB: loop body
LE: loop exit
PB: predicated region body
PF: predicated region fallthrough
CT: control target
= control target key end

     0   :  { %vm64_vm0 = vcmask 123904   ;;  %s20338_s0 = inlined_call_operand.vmem [shape: f32[23,2,16], index: 0, kind: input, shape index: {}]   ;;  %s20339_s1 = inlined_call_operand.vmem [shape: f32[1,1,16], index: 1, kind: input, shape index: {}]   ;;  %s20340_s2 = inlined_call_operand.vmem [shape: f32[1,1,16], index: 2, kind: input, shape index: {}]   ;;  %s20341_s3 = inlined_call_operand.vmem [shape: f32[32,64], index: 3, kind: input, shape index: {}]   ;;  %s20342_s4 = inlined_call_operand.vmem [shape: f32[64,64], index: 4, kind: input, shape index: {}]   ;;  %s20343_s5 = inlined_call_operand.vmem [shape: f32[1,64], index: 5, kind: input, shape index: {}]   ;;  %s20344_s6 = inlined_call_operand.vmem [shape: f32[128,64], index: 6, kind: input, shape index: {}]   ;;  %s20345_s7 = inlined_call_operand.vmem [shape: f32[64,64], index: 7, kind: input, shape index: {}]   ;;  %s20346_s8 = inlined_call_operand.vmem [shape: f32[1,64], index: 8, kind: input, shape index: {}]   ;;  %s20347_s9 = inlined_call_operand.vmem [shape: f32[1472,10], index: 9, kind: input, shape index: {}]   ;;  %s20348_s10 = inlined_call_operand.vmem [shape: f32[1,10], index: 10, kind: input, shape index: {}]   ;;  %s20349_s11 = inlined_call_operand.hbm [shape: f32[2,10], index: 11, kind: output, shape index: {0}]   ;;  %s20350_s12 = inlined_call_operand.vmem [shape: f32[2,1472], index: 12, kind: output, shape index: {1}]  }
   0x1   :  { %v63_v0 = vld [vmem:[%s20338_s0 + $0x2c] sm:$0x3]  ;;  %v41_v1 = vld [vmem:[%s20338_s0] sm:$0x3] }
   0x2   :  { %v131_v2 = vsel %vm64_vm0, %v63_v0, 0.0 }
   0x3   :  { %18 = vsyncpa [#allocation4], 0  ;;  %132 = vadd.xlane.f32.xlu0 %v131_v2  ;;  %v65_v3 = vsel %vm64_vm0, %v41_v1, 0.0  ;;  %v62_v13 = vld [vmem:[%s20338_s0 + $0x2a] sm:$0x3]  ;;  %v425_v18 = vld [vmem:[%s20341_s3] sm:$0xff] }
   0x4   :  { %v128_v15 = vsel %vm64_vm0, %v62_v13, 0.0  ;;  %v42_v16 = vld [vmem:[%s20338_s0 + $0x2] sm:$0x3]  ;;  %v426_v19 = vld [vmem:[%s20341_s3 + $0x8] sm:$0xff]  ;;  %v427_v20 = vld [vmem:[%s20341_s3 + $0x10] sm:$0xff]  ;;  %v17186_v21 = vmov 0.0|0.0  }
   0x5   :  { %v68_v17 = vsel %vm64_vm0, %v42_v16, 0.0  ;;  %15354 = vmatprep.subr.bf16.mxu0 %v17186_v21  ;;  %v17291_v22 = vpack.c.bf16 %v426_v19, %v425_v18  ;;  %v428_v23 = vld [vmem:[%s20341_s3 + $0x18] sm:$0xff]  ;;  %15372 = vmatprep.subr.bf16.mxu1 %v17186_v21  ;;  %vm17187_vm1 = vmmov 0   ;;  %v17188_v31 = vmov 0.0   ;;  %v17321_v39 = vld [vmem:[%s20339_s1] ss:$0 sm:$0xff] }
   0x6   :  { %v17298_v24 = vpack.c.bf16 %v428_v23, %v427_v20  ;;  %12924 = vmatprep.mubr.msk.f32.mxu0 %vm17187_vm1, %v17188_v31  ;;  %12954 = vmatprep.mubr.msk.f32.mxu1 %vm17187_vm1, %v17188_v31  ;;  %v17328_v42 = vld [vmem:[%s20340_s2] ss:$0 sm:$0xff]  ;;  %s17189_s22 = smov 16   ;;  %v61_v46 = vld [vmem:[%s20338_s0 + $0x28] sm:$0x3]  ;;  %vm442_vm2 = vcmask 130048  }
   0x7   :  { %66 = vadd.xlane.f32.xlu0 %v65_v3  ;;  %15356 = vmatpush3.bf16.msra.mxu0 %v17291_v22  ;;  %v125_v47 = vsel %vm64_vm0, %v61_v46, 0.0  ;;  %v429_v53 = vld [vmem:[%s20342_s4] sm:$0xff]  ;;  %v430_v54 = vld [vmem:[%s20342_s4 + $0x8] sm:$0xff]  ;;  %vm450_vm3 = vcmask 261120   ;;  %v431_v58 = vld [vmem:[%s20342_s4 + $0x10] sm:$0xff]  ;;  %vm602_vm4 = vcmask 517376  }
   0x8   :  { %15374 = vmatpush3.bf16.msra.mxu1 %v17291_v22  ;;  %15357 = vmatprep.subr.bf16.mxu0 %v17186_v21  ;;  %v17352_v56 = vpack.c.bf16 %v430_v54, %v429_v53  ;;  %v432_v59 = vld [vmem:[%s20342_s4 + $0x18] sm:$0xff]  ;;  %v433_v62 = vld [vmem:[%s20342_s4 + $0x20] sm:$0xff]  ;;  %v434_v63 = vld [vmem:[%s20342_s4 + $0x28] sm:$0xff]  ;;  %vm524_vm5 = vcmask 523264   ;;  %vm600_vm6 = vcmask 254976   ;;  %vm768_vm7 = vcmask 779776  }
   0x9   :  { %15375 = vmatprep.subr.bf16.mxu1 %v17186_v21  ;;  %v17364_v61 = vpack.c.bf16 %v432_v59, %v431_v58  ;;  %v436_v2 = vld [vmem:[%s20342_s4 + $0x38] sm:$0xff]  ;;  %v60_v18 = vld [vmem:[%s20338_s0 + $0x26] sm:$0x3]  ;;  %vm770_vm8 = vcmask 1042176   ;;  %s17192_s15 = smov 96   ;;  %s17193_s30 = smov [#allocation3]  }
   0xa   :  { %v122_v19 = vsel %vm64_vm0, %v60_v18, 0.0  ;;  %v44_v20 = vld [vmem:[%s20338_s0 + $0x6] sm:$0x3]  ;;  %s11614_s13 = sshll.u32 %s17193_s30, 4  ;;  %vm11606_vm9 = vcmask 74752   ;;  %s11615_s13 = int_to_ptr.vmem [resolvable:$true] %s11614_s13 }
   0xb   :  { %15359 = vmatpush3.bf16.msra.mxu0 %v17298_v24  ;;  %v74_v23 = vsel %vm64_vm0, %v44_v20, 0.0  ;;  %s17162_s14 = scalar_lea.vmem %s11615_s13, 32  ;;  %p17167_p1 = scmp.lt.s32.totalorder %s11615_s13, %s11615_s13 }
   0xc   :  { %15377 = vmatpush3.bf16.msra.mxu1 %v17298_v24  ;;  %15360 = vmatprep.subr.bf16.mxu0 %v17186_v21  ;;  %p17163_p0 = scmp.ne.s32.totalorder %s11615_s13, %s17162_s14  ;;  %p17168_p2 = scmp.lt.s32.totalorder %s17162_s14, %s17162_s14 }
   0xd   :  { %15378 = vmatprep.subr.bf16.mxu1 %v17186_v21 }
   0xe   :  { %p17169_p3 = por %p17168_p2, %p17167_p1 }
  0x10   :  { %p17170_p4 = pnand %p17169_p3, %p17163_p0 }
  0x90   :  { %v133_v4 = vpop.xlane.xlu0 %132 }
  0x91   :  { %v157_v5 = vmul.f32 0.0625, %v133_v4 }
  0x93   :  { %v180_v6 = vsub.f32 %v63_v0, %v157_v5  ;;  %v17376_v0 = vpack.c.bf16 %v434_v63, %v433_v62  ;;  %v59_v62 = vld [vmem:[%s20338_s0 + $0x24] sm:$0x3] }
  0x94   :  { %v67_v7 = vpop.xlane.xlu0 %66 }
  0x95   :  { %v135_v8 = vmul.f32 0.0625, %v67_v7  ;;  %v203_v9 = vmul.f32 %v180_v6, %v180_v6 }
  0x97   :  { %v17267_v10 = vsub.f32 %v41_v1, %v135_v8  ;;  %v270_v11 = vsel %vm64_vm0, %v203_v9, 0.0  ;;  %v435_v1 = vld [vmem:[%s20342_s4 + $0x30] sm:$0xff] }
  0x98   :  { %271 = vadd.xlane.f32.xlu1 %v270_v11  ;;  %v17386_v3 = vpack.c.bf16 %v436_v2, %v435_v1  ;;  %v119_v2 = vsel %vm64_vm0, %v59_v62, 0.0 }
  0x99   :  { %v181_v12 = vmul.f32 %v17267_v10, %v17267_v10 }
  0x9b   :  { %v204_v14 = vsel %vm64_vm0, %v181_v12, 0.0 }
  0x9c   :  { %205 = vadd.xlane.f32.xlu1 %v204_v14 }
  0xa0   :  { %129 = vadd.xlane.f32.xlu1 %v128_v15 }
  0xa4   :  { %69 = vadd.xlane.f32.xlu1 %v68_v17 }
 0x125   :  { %v272_v25 = vpop.xlane.xlu1 %271 }
 0x126   :  { %v295_v26 = vmul.f32 0.0625, %v272_v25 }
 0x128   :  { %v318_v27 = vadd.f32 1e-05, %v295_v26 }
 0x129   :  { %v206_v28 = vpop.xlane.xlu1 %205 }
 0x12a   :  { %17018 = vrsqrt.f32 %v318_v27  ;;  %v273_v48 = vmul.f32 0.0625, %v206_v28 }
 0x12c   :  { %v296_v49 = vadd.f32 1e-05, %v273_v48  ;;  %v17443_v48 = vld [vmem:[%s20343_s5] ss:$0 sm:$0xff] }
 0x12d   :  { %v130_v29 = vpop.xlane.xlu1 %129 }
 0x12e   :  { %v156_v30 = vmul.f32 0.0625, %v130_v29  ;;  %17020 = vrsqrt.f32 %v296_v49 }
 0x130   :  { %v17311_v32 = vsub.f32 %v62_v13, %v156_v30 }
 0x131   :  { %v70_v33 = vpop.xlane.xlu1 %69 }
 0x132   :  { %v136_v34 = vmul.f32 0.0625, %v70_v33  ;;  %v202_v35 = vmul.f32 %v17311_v32, %v17311_v32 }
 0x134   :  { %v17019_v36 = vpop.eup %17018  ;;  %v17315_v37 = vsub.f32 %v42_v16, %v136_v34  ;;  %v267_v38 = vsel %vm64_vm0, %v202_v35, 0.0  ;;  %v43_v16 = vld [vmem:[%s20338_s0 + $0x4] sm:$0x3] }
 0x135   :  { %268 = vadd.xlane.f32.xlu1 %v267_v38  ;;  %v364_v40 = vmul.f32 %v17019_v36, %v180_v6  ;;  %v71_v17 = vsel %vm64_vm0, %v43_v16, 0.0 }
 0x136   :  { %v182_v41 = vmul.f32 %v17315_v37, %v17315_v37 }
 0x137   :  { %v394_v43 = vmul.f32 %v17321_v39, %v364_v40 }
 0x138   :  { %v207_v44 = vsel %vm64_vm0, %v182_v41, 0.0  ;;  %v17021_v50 = vpop.eup %17020 }
 0x139   :  { %208 = vadd.xlane.f32.xlu1 %v207_v44  ;;  %v17333_v45 = vadd.f32 %v17328_v42, %v394_v43  ;;  %v342_v51 = vmul.f32 %v17021_v50, %v17267_v10 }
 0x13b   :  { %439 = vrot.lane.b32.xlu0 %v17333_v45, %s17189_s22  ;;  %v372_v52 = vmul.f32 %v17321_v39, %v342_v51 }
 0x13d   :  { %v17350_v55 = vadd.f32 %v17328_v42, %v372_v52 }
 0x15a   :  { %126 = vadd.xlane.f32.xlu0 %v125_v47 }
 0x1ad   :  { %v440_v57 = vpop.permute.xlu0 %439 }
 0x1ae   :  { %v443_v60 = vsel %vm442_vm2, %v17350_v55, %v440_v57 }
 0x1af   :  { %12925 = vmatmul.mubr.msk.f32.vlgmr.msra.gmra.mrb[0].mxu0 %vm450_vm3, %v443_v60 }
 0x1b0   :  { %15362 = vmatpush3.bf16.msra.mxu0 %v17352_v56  ;;  %12943 = vmatprep.mubr.msk.f32.mxu0 %vm17187_vm1, %v17188_v31 }
 0x1b1   :  { %15363 = vmatprep.subr.bf16.mxu0 %v17186_v21 }
 0x1b4   :  { %15365 = vmatpush3.bf16.msra.mxu0 %v17364_v61 }
 0x1b5   :  { %15366 = vmatprep.subr.bf16.mxu0 %v17186_v21 }
 0x1b8   :  { %15368 = vmatpush3.bf16.msra.mxu0 %v17376_v0 }
 0x1b9   :  { %15369 = vmatprep.subr.bf16.mxu0 %v17186_v21 }
 0x1bc   :  { %15371 = vmatpush3.bf16.msra.mxu0 %v17386_v3 }
 0x1bd   :  { %15390 = vmatprep.subr.bf16.mxu0 %v17186_v21 }
 0x1bf   :  { %12944 = vmatmul.mubr.f32.vlgmr.msra.gmra.mrb[0].mxu0 %v17188_v31 }
 0x1c0   :  { %15392 = vmatpush3.bf16.msra.mxu0 %v17291_v22  ;;  %12984 = vmatprep.mubr.msk.f32.mxu0 %vm17187_vm1, %v17188_v31 }
 0x1c1   :  { %15393 = vmatprep.subr.bf16.mxu0 %v17186_v21 }
 0x1c2   :  { %v269_v4 = vpop.xlane.xlu1 %268 }
 0x1c3   :  { %v294_v5 = vmul.f32 0.0625, %v269_v4 }
 0x1c4   :  { %15395 = vmatpush3.bf16.msra.mxu0 %v17298_v24 }
 0x1c5   :  { %v317_v6 = vadd.f32 1e-05, %v294_v5  ;;  %15396 = vmatprep.subr.bf16.mxu0 %v17186_v21 }
 0x1c6   :  { %v209_v25 = vpop.xlane.xlu1 %208 }
 0x1c7   :  { %17022 = vrsqrt.f32 %v317_v6  ;;  %v274_v26 = vmul.f32 0.0625, %v209_v25 }
 0x1c9   :  { %v297_v27 = vadd.f32 1e-05, %v274_v26 }
 0x1cb   :  { %17024 = vrsqrt.f32 %v297_v27 }
 0x1d1   :  { %v17023_v7 = vpop.eup %17022 }
 0x1d2   :  { %v363_v8 = vmul.f32 %v17023_v7, %v17311_v32 }
 0x1d4   :  { %v393_v9 = vmul.f32 %v17321_v39, %v363_v8 }
 0x1d5   :  { %v17025_v28 = vpop.eup %17024 }
 0x1d6   :  { %v17401_v10 = vadd.f32 %v17328_v42, %v393_v9  ;;  %v343_v29 = vmul.f32 %v17025_v28, %v17315_v37 }
 0x1d8   :  { %605 = vrot.lane.b32.xlu1 %v17401_v10, %s17189_s22  ;;  %v373_v30 = vmul.f32 %v17321_v39, %v343_v29 }
 0x1da   :  { %v17425_v32 = vadd.f32 %v17328_v42, %v373_v30 }
 0x1e7   :  { %v127_v11 = vpop.xlane.xlu0 %126 }
 0x1e8   :  { %v155_v12 = vmul.f32 0.0625, %v127_v11 }
 0x1ea   :  { %v17405_v13 = vsub.f32 %v61_v46, %v155_v12 }
 0x1ec   :  { %v201_v14 = vmul.f32 %v17405_v13, %v17405_v13 }
 0x1ee   :  { %v264_v15 = vsel %vm64_vm0, %v201_v14, 0.0 }
 0x1ef   :  { %265 = vadd.xlane.f32.xlu0 %v264_v15 }
 0x1fc   :  { %72 = vadd.xlane.f32.xlu1 %v71_v17 }
 0x200   :  { %123 = vadd.xlane.f32.xlu1 %v122_v19 }
 0x204   :  { %75 = vadd.xlane.f32.xlu1 %v74_v23 }
 0x24a   :  { %v606_v33 = vpop.permute.xlu1 %605 }
 0x24b   :  { %v608_v34 = vsel %vm442_vm2, %v17425_v32, %v606_v33 }
 0x24c   :  { %12955 = vmatmul.mubr.msk.f32.vlgmr.msra.gmra.mrb[0].mxu1 %vm450_vm3, %v608_v34 }
 0x24d   :  { %15380 = vmatpush3.bf16.msra.mxu1 %v17352_v56  ;;  %12973 = vmatprep.mubr.msk.f32.mxu1 %vm17187_vm1, %v17188_v31 }
 0x24e   :  { %15381 = vmatprep.subr.bf16.mxu1 %v17186_v21 }
 0x251   :  { %15383 = vmatpush3.bf16.msra.mxu1 %v17364_v61 }
 0x252   :  { %15384 = vmatprep.subr.bf16.mxu1 %v17186_v21 }
 0x255   :  { %15386 = vmatpush3.bf16.msra.mxu1 %v17376_v0 }
 0x256   :  { %15387 = vmatprep.subr.bf16.mxu1 %v17186_v21 }
 0x259   :  { %15389 = vmatpush3.bf16.msra.mxu1 %v17386_v3 }
 0x25a   :  { %15408 = vmatprep.subr.bf16.mxu1 %v17186_v21 }
 0x27c   :  { %v266_v35 = vpop.xlane.xlu0 %265 }
 0x27d   :  { %v293_v36 = vmul.f32 0.0625, %v266_v35 }
 0x27f   :  { %v316_v40 = vadd.f32 1e-05, %v293_v36  ;;  %v45_v36 = vld [vmem:[%s20338_s0 + $0x8] sm:$0x3] }
 0x281   :  { %17026 = vrsqrt.f32 %v316_v40 }
 0x289   :  { %v73_v37 = vpop.xlane.xlu1 %72 }
 0x28a   :  { %v137_v38 = vmul.f32 0.0625, %v73_v37  ;;  %v77_v37 = vsel %vm64_vm0, %v45_v36, 0.0 }
 0x28b   :  { %v17027_v1 = vpop.eup %17026 }
 0x28c   :  { %v160_v41 = vsub.f32 %v43_v16, %v137_v38  ;;  %v362_v4 = vmul.f32 %v17027_v1, %v17405_v13 }
 0x28d   :  { %v124_v43 = vpop.xlane.xlu1 %123 }
 0x28e   :  { %v154_v44 = vmul.f32 0.0625, %v124_v43  ;;  %v183_v46 = vmul.f32 %v160_v41, %v160_v41  ;;  %v392_v6 = vmul.f32 %v17321_v39, %v362_v4 }
 0x290   :  { %v177_v47 = vsub.f32 %v60_v18, %v154_v44  ;;  %v210_v49 = vsel %vm64_vm0, %v183_v46, 0.0  ;;  %v17467_v7 = vadd.f32 %v17328_v42, %v392_v6 }
 0x291   :  { %v76_v50 = vpop.xlane.xlu1 %75  ;;  %211 = vadd.xlane.f32.xlu0 %v210_v49 }
 0x292   :  { %v138_v51 = vmul.f32 0.0625, %v76_v50  ;;  %v594_v52 = vpop.f32.mrb[0].mxu0  ;;  %v200_v53 = vmul.f32 %v177_v47, %v177_v47  ;;  %v17520_v50 = vld [vmem:[%s20338_s0 + $0xa] sm:$0x3] }
 0x293   :  { %v16872_v54 = vadd.f32 %v17443_v48, %v594_v52  ;;  %v12945_v57 = vpop.f32.mrb[1].mxu0 }
 0x294   :  { %v17447_v58 = vsub.f32 %v44_v20, %v138_v51  ;;  %v261_v59 = vsel %vm64_vm0, %v200_v53, 0.0  ;;  %v80_v51 = vsel %vm64_vm0, %v17520_v50, 0.0 }
 0x295   :  { %17028 = vtanh.f32 %v16872_v54  ;;  %262 = vadd.xlane.f32.xlu1 %v261_v59 }
 0x296   :  { %v184_v60 = vmul.f32 %v17447_v58, %v17447_v58 }
 0x298   :  { %v213_v63 = vsel %vm64_vm0, %v184_v60, 0.0 }
 0x299   :  { %214 = vadd.xlane.f32.xlu1 %v213_v63 }
 0x29d   :  { %120 = vadd.xlane.f32.xlu1 %v119_v2 }
 0x29f   :  { %v17029_v5 = vpop.eup %17028 }
 0x2a0   :  { %603 = vst.msk [vmem:[#allocation2 + $0x16] sm:$0x3] %vm602_vm4, %v17029_v5  ;;  %12974 = vmatmul.mubr.msk.f32.vlgmr.msra.gmra.mrb[0].mxu1 %vm524_vm5, %v17029_v5 }
 0x2a1   :  { %601 = vst.msk [vmem:[#allocation2] sm:$0x3] %vm600_vm6, %v17029_v5  ;;  %15410 = vmatpush3.bf16.msra.mxu1 %v17291_v22  ;;  %13014 = vmatprep.mubr.msk.f32.mxu1 %vm17187_vm1, %v17188_v31 }
 0x2a2   :  { %15411 = vmatprep.subr.bf16.mxu1 %v17186_v21 }
 0x2a5   :  { %15413 = vmatpush3.bf16.msra.mxu1 %v17298_v24 }
 0x2a6   :  { %15414 = vmatprep.subr.bf16.mxu1 %v17186_v21 }
 0x2a7   :  { %773 = vrot.lane.b32.xlu0 %v17467_v7, %s17189_s22 }
 0x31e   :  { %v212_v8 = vpop.xlane.xlu0 %211 }
 0x31f   :  { %v275_v9 = vmul.f32 0.0625, %v212_v8 }
 0x321   :  { %v298_v11 = vadd.f32 1e-05, %v275_v9 }
 0x322   :  { %v263_v12 = vpop.xlane.xlu1 %262  ;;  %v774_v30 = vpop.permute.xlu0 %773 }
 0x323   :  { %17030 = vrsqrt.f32 %v298_v11  ;;  %v292_v13 = vmul.f32 0.0625, %v263_v12  ;;  %v58_v11 = vld [vmem:[%s20338_s0 + $0x22] sm:$0x3] }
 0x324   :  { %v116_v12 = vsel %vm64_vm0, %v58_v11, 0.0 }
 0x325   :  { %v315_v14 = vadd.f32 1e-05, %v292_v13  ;;  %v57_v13 = vld [vmem:[%s20338_s0 + $0x20] sm:$0x3] }
 0x326   :  { %v215_v15 = vpop.xlane.xlu1 %214 }
 0x327   :  { %17032 = vrsqrt.f32 %v315_v14  ;;  %v276_v44 = vmul.f32 0.0625, %v215_v15  ;;  %v113_v14 = vsel %vm64_vm0, %v57_v13, 0.0 }
 0x329   :  { %v299_v46 = vadd.f32 1e-05, %v276_v44 }
 0x32a   :  { %v121_v16 = vpop.xlane.xlu1 %120 }
 0x32b   :  { %v153_v17 = vmul.f32 0.0625, %v121_v16 }
 0x32d   :  { %v17031_v18 = vpop.eup %17030  ;;  %v17473_v19 = vsub.f32 %v59_v62, %v153_v17 }
 0x32e   :  { %v344_v20 = vmul.f32 %v17031_v18, %v160_v41 }
 0x32f   :  { %v199_v23 = vmul.f32 %v17473_v19, %v17473_v19 }
 0x330   :  { %v374_v25 = vmul.f32 %v17321_v39, %v344_v20 }
 0x331   :  { %v17033_v26 = vpop.eup %17032  ;;  %v258_v27 = vsel %vm64_vm0, %v199_v23, 0.0 }
 0x332   :  { %v17480_v28 = vadd.f32 %v17328_v42, %v374_v25  ;;  %259 = vadd.xlane.f32.xlu1 %v258_v27  ;;  %v361_v29 = vmul.f32 %v17033_v26, %v177_v47 }
 0x334   :  { %v776_v33 = vsel %vm442_vm2, %v17480_v28, %v774_v30  ;;  %v391_v34 = vmul.f32 %v17321_v39, %v361_v29 }
 0x335   :  { %12985 = vmatmul.mubr.msk.f32.vlgmr.msra.gmra.mrb[2].mxu0 %vm450_vm3, %v776_v33 }
 0x336   :  { %v17487_v35 = vadd.f32 %v17328_v42, %v391_v34  ;;  %15398 = vmatpush3.bf16.msra.mxu0 %v17352_v56  ;;  %13003 = vmatprep.mubr.msk.f32.mxu0 %vm17187_vm1, %v17188_v31 }
 0x337   :  { %15399 = vmatprep.subr.bf16.mxu0 %v17186_v21 }
 0x338   :  { %927 = vrot.lane.b32.xlu0 %v17487_v35, %s17189_s22 }
 0x33a   :  { %15401 = vmatpush3.bf16.msra.mxu0 %v17364_v61 }
 0x33b   :  { %15402 = vmatprep.subr.bf16.mxu0 %v17186_v21 }
 0x33e   :  { %15404 = vmatpush3.bf16.msra.mxu0 %v17376_v0 }
 0x33f   :  { %15405 = vmatprep.subr.bf16.mxu0 %v17186_v21 }
 0x342   :  { %15407 = vmatpush3.bf16.msra.mxu0 %v17386_v3 }
 0x343   :  { %15426 = vmatprep.subr.bf16.mxu0 %v17186_v21 }
 0x357   :  { %78 = vadd.xlane.f32.xlu0 %v77_v37 }
 0x35b   :  { %81 = vadd.xlane.f32.xlu0 %v80_v51 }
 0x373   :  { %v751_v38 = vpop.f32.mrb[0].mxu1 }
 0x374   :  { %v16873_v40 = vadd.f32 %v17443_v48, %v751_v38  ;;  %v12975_v41 = vpop.f32.mrb[1].mxu1 }
 0x376   :  { %17034 = vtanh.f32 %v16873_v40 }
 0x377   :  { %17036 = vrsqrt.f32 %v299_v46 }
 0x380   :  { %v17506_v43 = vpop.eup %17034 }
 0x381   :  { %13004 = vmatmul.mubr.msk.f32.vlgmr.msra.gmra.mrb[2].mxu0 %vm524_vm5, %v17506_v43  ;;  %v17037_v47 = vpop.eup %17036 }
 0x382   :  { %15428 = vmatpush3.bf16.msra.mxu0 %v17291_v22  ;;  %13044 = vmatprep.mubr.msk.f32.mxu0 %vm17187_vm1, %v17188_v31  ;;  %v345_v49 = vmul.f32 %v17037_v47, %v17447_v58 }
 0x383   :  { %15429 = vmatprep.subr.bf16.mxu0 %v17186_v21 }
 0x384   :  { %v375_v52 = vmul.f32 %v17321_v39, %v345_v49 }
 0x386   :  { %15431 = vmatpush3.bf16.msra.mxu0 %v17298_v24  ;;  %v17526_v53 = vadd.f32 %v17328_v42, %v375_v52 }
 0x387   :  { %15432 = vmatprep.subr.bf16.mxu0 %v17186_v21 }
 0x3aa   :  { %v928_v54 = vpop.permute.xlu0 %927 }
 0x3ab   :  { %v930_v57 = vsel %vm442_vm2, %v17526_v53, %v928_v54 }
 0x3ac   :  { %13015 = vmatmul.mubr.msk.f32.vlgmr.msra.gmra.mrb[2].mxu1 %vm450_vm3, %v930_v57 }
 0x3ad   :  { %15416 = vmatpush3.bf16.msra.mxu1 %v17352_v56  ;;  %13033 = vmatprep.mubr.msk.f32.mxu1 %vm17187_vm1, %v17188_v31 }
 0x3ae   :  { %15417 = vmatprep.subr.bf16.mxu1 %v17186_v21 }
 0x3b1   :  { %15419 = vmatpush3.bf16.msra.mxu1 %v17364_v61 }
 0x3b2   :  { %15420 = vmatprep.subr.bf16.mxu1 %v17186_v21 }
 0x3b5   :  { %15422 = vmatpush3.bf16.msra.mxu1 %v17376_v0 }
 0x3b6   :  { %15423 = vmatprep.subr.bf16.mxu1 %v17186_v21 }
 0x3b9   :  { %15425 = vmatpush3.bf16.msra.mxu1 %v17386_v3 }
 0x3ba   :  { %15444 = vmatprep.subr.bf16.mxu1 %v17186_v21 }
 0x3bf   :  { %v260_v58 = vpop.xlane.xlu1 %259 }
 0x3c0   :  { %v291_v59 = vmul.f32 0.0625, %v260_v58 }
 0x3c2   :  { %v314_v60 = vadd.f32 1e-05, %v291_v59 }
 0x3c4   :  { %17038 = vrsqrt.f32 %v314_v60 }
 0x3ce   :  { %v17039_v5 = vpop.eup %17038 }
 0x3cf   :  { %v360_v6 = vmul.f32 %v17039_v5, %v17473_v19 }
 0x3d1   :  { %v390_v8 = vmul.f32 %v17321_v39, %v360_v6 }
 0x3d3   :  { %v17545_v9 = vadd.f32 %v17328_v42, %v390_v8 }
 0x3e4   :  { %v79_v62 = vpop.xlane.xlu0 %78 }
 0x3e5   :  { %v139_v63 = vmul.f32 0.0625, %v79_v62 }
 0x3e7   :  { %v162_v1 = vsub.f32 %v45_v36, %v139_v63 }
 0x3e8   :  { %v82_v34 = vpop.xlane.xlu0 %81 }
 0x3e9   :  { %v185_v2 = vmul.f32 %v162_v1, %v162_v1  ;;  %v140_v36 = vmul.f32 0.0625, %v82_v34 }
 0x3eb   :  { %v216_v4 = vsel %vm64_vm0, %v185_v2, 0.0  ;;  %v163_v40 = vsub.f32 %v17520_v50, %v140_v36 }
 0x3ec   :  { %217 = vadd.xlane.f32.xlu1 %v216_v4 }
 0x3ed   :  { %v186_v47 = vmul.f32 %v163_v40, %v163_v40 }
 0x3ef   :  { %v219_v54 = vsel %vm64_vm0, %v186_v47, 0.0 }
 0x3fd   :  { %1093 = vrot.lane.b32.xlu1 %v17545_v9, %s17189_s22 }
 0x421   :  { %117 = vadd.xlane.f32.xlu1 %v116_v12 }
 0x425   :  { %114 = vadd.xlane.f32.xlu1 %v113_v14 }
 0x454   :  { %v918_v15 = vpop.f32.mrb[2].mxu0 }
 0x455   :  { %v16874_v16 = vadd.f32 %v17443_v48, %v918_v15  ;;  %v13005_v17 = vpop.f32.mrb[3].mxu0 }
 0x457   :  { %17040 = vtanh.f32 %v16874_v16 }
 0x461   :  { %v17558_v18 = vpop.eup %17040 }
 0x462   :  { %13034 = vmatmul.mubr.msk.f32.vlgmr.msra.gmra.mrb[2].mxu1 %vm524_vm5, %v17558_v18  ;;  %924 = vst.msk [vmem:[#allocation2 + $0x2] sm:$0x3] %vm600_vm6, %v17558_v18 }
 0x463   :  { %15446 = vmatpush3.bf16.msra.mxu1 %v17291_v22  ;;  %13074 = vmatprep.mubr.msk.f32.mxu1 %vm17187_vm1, %v17188_v31 }
 0x464   :  { %15447 = vmatprep.subr.bf16.mxu1 %v17186_v21 }
 0x467   :  { %15449 = vmatpush3.bf16.msra.mxu1 %v17298_v24 }
 0x468   :  { %15450 = vmatprep.subr.bf16.mxu1 %v17186_v21 }
 0x479   :  { %v218_v19 = vpop.xlane.xlu1 %217 }
 0x47a   :  { %v277_v20 = vmul.f32 0.0625, %v218_v19  ;;  %v17619_v19 = vld [vmem:[%s20338_s0 + $0xe] sm:$0x3] }
 0x47c   :  { %v300_v23 = vadd.f32 1e-05, %v277_v20  ;;  %v86_v20 = vsel %vm64_vm0, %v17619_v19, 0.0 }
 0x47d   :  { %v1094_v30 = vpop.permute.xlu1 %1093 }
 0x47e   :  { %17042 = vrsqrt.f32 %v300_v23 }
 0x488   :  { %v17043_v25 = vpop.eup %17042 }
 0x489   :  { %v346_v26 = vmul.f32 %v17043_v25, %v162_v1 }
 0x48b   :  { %v376_v27 = vmul.f32 %v17321_v39, %v346_v26 }
 0x48d   :  { %v17572_v29 = vadd.f32 %v17328_v42, %v376_v27 }
 0x48f   :  { %v1096_v33 = vsel %vm442_vm2, %v17572_v29, %v1094_v30 }
 0x490   :  { %13045 = vmatmul.mubr.msk.f32.vlgmr.msra.gmra.mrb[4].mxu0 %vm450_vm3, %v1096_v33 }
 0x491   :  { %15434 = vmatpush3.bf16.msra.mxu0 %v17352_v56  ;;  %13063 = vmatprep.mubr.msk.f32.mxu0 %vm17187_vm1, %v17188_v31 }
 0x492   :  { %15435 = vmatprep.subr.bf16.mxu0 %v17186_v21 }
 0x495   :  { %15437 = vmatpush3.bf16.msra.mxu0 %v17364_v61 }
 0x496   :  { %15438 = vmatprep.subr.bf16.mxu0 %v17186_v21 }
 0x499   :  { %15440 = vmatpush3.bf16.msra.mxu0 %v17376_v0 }
 0x49a   :  { %15441 = vmatprep.subr.bf16.mxu0 %v17186_v21 }
 0x49d   :  { %15443 = vmatpush3.bf16.msra.mxu0 %v17386_v3 }
 0x49e   :  { %15462 = vmatprep.subr.bf16.mxu0 %v17186_v21 }
 0x4ae   :  { %v118_v37 = vpop.xlane.xlu1 %117 }
 0x4af   :  { %v152_v38 = vmul.f32 0.0625, %v118_v37 }
 0x4b1   :  { %v175_v41 = vsub.f32 %v58_v11, %v152_v38  ;;  %v47_v11 = vld [vmem:[%s20338_s0 + $0xc] sm:$0x3] }
 0x4b2   :  { %v115_v44 = vpop.xlane.xlu1 %114  ;;  %v83_v12 = vsel %vm64_vm0, %v47_v11, 0.0 }
 0x4b3   :  { %v198_v46 = vmul.f32 %v175_v41, %v175_v41  ;;  %v151_v49 = vmul.f32 0.0625, %v115_v44 }
 0x4b5   :  { %v255_v51 = vsel %vm64_vm0, %v198_v46, 0.0  ;;  %v17589_v52 = vsub.f32 %v57_v13, %v151_v49 }
 0x4b6   :  { %256 = vadd.xlane.f32.xlu0 %v255_v51 }
 0x4b7   :  { %v197_v57 = vmul.f32 %v17589_v52, %v17589_v52 }
 0x4b9   :  { %v252_v58 = vsel %vm64_vm0, %v197_v57, 0.0 }
 0x4ba   :  { %220 = vadd.xlane.f32.xlu0 %v219_v54  ;;  %253 = vadd.xlane.f32.xlu1 %v252_v58 }
 0x535   :  { %v1073_v50 = vpop.f32.mrb[2].mxu1 }
 0x536   :  { %v16875_v59 = vadd.f32 %v17443_v48, %v1073_v50  ;;  %v13035_v60 = vpop.f32.mrb[3].mxu1 }
 0x538   :  { %17044 = vtanh.f32 %v16875_v59  ;;  %v55_v59 = vld [vmem:[%s20338_s0 + $0x1c] sm:$0x3] }
 0x539   :  { %v107_v60 = vsel %vm64_vm0, %v55_v59, 0.0 }
 0x542   :  { %v17596_v62 = vpop.eup %17044 }
 0x543   :  { %13064 = vmatmul.mubr.msk.f32.vlgmr.msra.gmra.mrb[4].mxu0 %vm524_vm5, %v17596_v62  ;;  %v257_v63 = vpop.xlane.xlu0 %256 }
 0x544   :  { %v290_v1 = vmul.f32 0.0625, %v257_v63  ;;  %15464 = vmatpush3.bf16.msra.mxu0 %v17291_v22  ;;  %13104 = vmatprep.mubr.msk.f32.mxu0 %vm17187_vm1, %v17188_v31 }
 0x545   :  { %15465 = vmatprep.subr.bf16.mxu0 %v17186_v21 }
 0x546   :  { %v313_v2 = vadd.f32 1e-05, %v290_v1 }
 0x547   :  { %v221_v13 = vpop.xlane.xlu0 %220  ;;  %v254_v30 = vpop.xlane.xlu1 %253 }
 0x548   :  { %17046 = vrsqrt.f32 %v313_v2  ;;  %15467 = vmatpush3.bf16.msra.mxu0 %v17298_v24  ;;  %v278_v14 = vmul.f32 0.0625, %v221_v13  ;;  %v289_v33 = vmul.f32 0.0625, %v254_v30 }
 0x549   :  { %15468 = vmatprep.subr.bf16.mxu0 %v17186_v21 }
 0x54a   :  { %v301_v15 = vadd.f32 1e-05, %v278_v14  ;;  %v312_v34 = vadd.f32 1e-05, %v289_v33 }
 0x54c   :  { %17048 = vrsqrt.f32 %v301_v15 }
 0x54d   :  { %17050 = vrsqrt.f32 %v312_v34 }
 0x552   :  { %v17047_v4 = vpop.eup %17046 }
 0x553   :  { %v359_v5 = vmul.f32 %v17047_v4, %v175_v41 }
 0x555   :  { %v389_v6 = vmul.f32 %v17321_v39, %v359_v5 }
 0x556   :  { %v17049_v16 = vpop.eup %17048 }
 0x557   :  { %v17608_v8 = vadd.f32 %v17328_v42, %v389_v6  ;;  %v347_v17 = vmul.f32 %v17049_v16, %v163_v40  ;;  %v17051_v44 = vpop.eup %17050 }
 0x558   :  { %v358_v46 = vmul.f32 %v17051_v44, %v17589_v52  ;;  %v56_v52 = vld [vmem:[%s20338_s0 + $0x1e] sm:$0x3] }
 0x559   :  { %1247 = vrot.lane.b32.xlu0 %v17608_v8, %s17189_s22  ;;  %v377_v23 = vmul.f32 %v17321_v39, %v347_v17  ;;  %v110_v50 = vsel %vm64_vm0, %v56_v52, 0.0 }
 0x55a   :  { %v388_v54 = vmul.f32 %v17321_v39, %v358_v46 }
 0x55b   :  { %v17625_v25 = vadd.f32 %v17328_v42, %v377_v23 }
 0x55c   :  { %v17645_v57 = vadd.f32 %v17328_v42, %v388_v54 }
 0x578   :  { %84 = vadd.xlane.f32.xlu0 %v83_v12 }
 0x57c   :  { %87 = vadd.xlane.f32.xlu0 %v86_v20 }
 0x5cb   :  { %v1248_v26 = vpop.permute.xlu0 %1247 }
 0x5cc   :  { %v1250_v27 = vsel %vm442_vm2, %v17625_v25, %v1248_v26 }
 0x5cd   :  { %13075 = vmatmul.mubr.msk.f32.vlgmr.msra.gmra.mrb[4].mxu1 %vm450_vm3, %v1250_v27 }
 0x5ce   :  { %15452 = vmatpush3.bf16.msra.mxu1 %v17352_v56  ;;  %13093 = vmatprep.mubr.msk.f32.mxu1 %vm17187_vm1, %v17188_v31 }
 0x5cf   :  { %15453 = vmatprep.subr.bf16.mxu1 %v17186_v21 }
 0x5d2   :  { %15455 = vmatpush3.bf16.msra.mxu1 %v17364_v61 }
 0x5d3   :  { %15456 = vmatprep.subr.bf16.mxu1 %v17186_v21 }
 0x5d6   :  { %15458 = vmatpush3.bf16.msra.mxu1 %v17376_v0 }
 0x5d7   :  { %15459 = vmatprep.subr.bf16.mxu1 %v17186_v21 }
 0x5da   :  { %15461 = vmatpush3.bf16.msra.mxu1 %v17386_v3 }
 0x5db   :  { %15480 = vmatprep.subr.bf16.mxu1 %v17186_v21 }
 0x605   :  { %v85_v36 = vpop.xlane.xlu0 %84 }
 0x606   :  { %v141_v37 = vmul.f32 0.0625, %v85_v36 }
 0x608   :  { %v164_v38 = vsub.f32 %v47_v11, %v141_v37 }
 0x609   :  { %v88_v14 = vpop.xlane.xlu0 %87 }
 0x60a   :  { %v187_v40 = vmul.f32 %v164_v38, %v164_v38  ;;  %v142_v15 = vmul.f32 0.0625, %v88_v14 }
 0x60c   :  { %v222_v41 = vsel %vm64_vm0, %v187_v40, 0.0  ;;  %v165_v20 = vsub.f32 %v17619_v19, %v142_v15  ;;  %v17719_v15 = vld [vmem:[%s20338_s0 + $0x12] sm:$0x3] }
 0x60d   :  { %223 = vadd.xlane.f32.xlu1 %v222_v41 }
 0x60e   :  { %v188_v30 = vmul.f32 %v165_v20, %v165_v20 }
 0x610   :  { %v225_v37 = vsel %vm64_vm0, %v188_v30, 0.0 }
 0x616   :  { %v1238_v47 = vpop.f32.mrb[4].mxu0 }
 0x617   :  { %v16876_v49 = vadd.f32 %v17443_v48, %v1238_v47  ;;  %v13065_v51 = vpop.f32.mrb[5].mxu0 }
 0x619   :  { %17052 = vtanh.f32 %v16876_v49 }
 0x61e   :  { %1413 = vrot.lane.b32.xlu1 %v17645_v57, %s17189_s22 }
 0x623   :  { %v17649_v58 = vpop.eup %17052 }
 0x624   :  { %13094 = vmatmul.mubr.msk.f32.vlgmr.msra.gmra.mrb[4].mxu1 %vm524_vm5, %v17649_v58  ;;  %1244 = vst.msk [vmem:[#allocation2 + $0x4] sm:$0x3] %vm600_vm6, %v17649_v58 }
 0x625   :  { %15482 = vmatpush3.bf16.msra.mxu1 %v17291_v22  ;;  %13134 = vmatprep.mubr.msk.f32.mxu1 %vm17187_vm1, %v17188_v31 }
 0x626   :  { %15483 = vmatprep.subr.bf16.mxu1 %v17186_v21 }
 0x629   :  { %15485 = vmatpush3.bf16.msra.mxu1 %v17298_v24 }
 0x62a   :  { %15486 = vmatprep.subr.bf16.mxu1 %v17186_v21 }
 0x642   :  { %111 = vadd.xlane.f32.xlu1 %v110_v50 }
 0x646   :  { %108 = vadd.xlane.f32.xlu1 %v107_v60  ;;  %v49_v60 = vld [vmem:[%s20338_s0 + $0x10] sm:$0x3] }
 0x69a   :  { %v224_v63 = vpop.xlane.xlu1 %223 }
 0x69b   :  { %v279_v1 = vmul.f32 0.0625, %v224_v63  ;;  %v89_v63 = vsel %vm64_vm0, %v49_v60, 0.0 }
 0x69d   :  { %v302_v2 = vadd.f32 1e-05, %v279_v1 }
 0x69e   :  { %v1414_v12 = vpop.permute.xlu1 %1413 }
 0x69f   :  { %17054 = vrsqrt.f32 %v302_v2 }
 0x6a9   :  { %v17055_v4 = vpop.eup %17054 }
 0x6aa   :  { %v348_v5 = vmul.f32 %v17055_v4, %v164_v38 }
 0x6ac   :  { %v378_v6 = vmul.f32 %v17321_v39, %v348_v5 }
 0x6ae   :  { %v17671_v11 = vadd.f32 %v17328_v42, %v378_v6 }
 0x6b0   :  { %v1416_v13 = vsel %vm442_vm2, %v17671_v11, %v1414_v12 }
 0x6b1   :  { %13105 = vmatmul.mubr.msk.f32.vlgmr.msra.gmra.mrb[6].mxu0 %vm450_vm3, %v1416_v13 }
 0x6b2   :  { %15470 = vmatpush3.bf16.msra.mxu0 %v17352_v56  ;;  %13123 = vmatprep.mubr.msk.f32.mxu0 %vm17187_vm1, %v17188_v31 }
 0x6b3   :  { %15471 = vmatprep.subr.bf16.mxu0 %v17186_v21 }
 0x6b6   :  { %15473 = vmatpush3.bf16.msra.mxu0 %v17364_v61 }
 0x6b7   :  { %15474 = vmatprep.subr.bf16.mxu0 %v17186_v21 }
 0x6ba   :  { %15476 = vmatpush3.bf16.msra.mxu0 %v17376_v0 }
 0x6bb   :  { %15477 = vmatprep.subr.bf16.mxu0 %v17186_v21 }
 0x6be   :  { %15479 = vmatpush3.bf16.msra.mxu0 %v17386_v3 }
 0x6bf   :  { %15498 = vmatprep.subr.bf16.mxu0 %v17186_v21 }
 0x6cf   :  { %v112_v16 = vpop.xlane.xlu1 %111 }
 0x6d0   :  { %v150_v17 = vmul.f32 0.0625, %v112_v16  ;;  %v92_v16 = vsel %vm64_vm0, %v17719_v15, 0.0 }
 0x6d2   :  { %v173_v23 = vsub.f32 %v56_v52, %v150_v17 }
 0x6d3   :  { %v109_v26 = vpop.xlane.xlu1 %108 }
 0x6d4   :  { %v196_v27 = vmul.f32 %v173_v23, %v173_v23  ;;  %v149_v33 = vmul.f32 0.0625, %v109_v26 }
 0x6d6   :  { %v249_v34 = vsel %vm64_vm0, %v196_v27, 0.0  ;;  %v17688_v36 = vsub.f32 %v55_v59, %v149_v33 }
 0x6d7   :  { %250 = vadd.xlane.f32.xlu0 %v249_v34 }
 0x6d8   :  { %v195_v38 = vmul.f32 %v17688_v36, %v17688_v36 }
 0x6da   :  { %v246_v40 = vsel %vm64_vm0, %v195_v38, 0.0 }
 0x6db   :  { %226 = vadd.xlane.f32.xlu0 %v225_v37  ;;  %247 = vadd.xlane.f32.xlu1 %v246_v40 }
 0x6f7   :  { %v1393_v19 = vpop.f32.mrb[4].mxu1 }
 0x6f8   :  { %v16877_v41 = vadd.f32 %v17443_v48, %v1393_v19  ;;  %v13095_v44 = vpop.f32.mrb[5].mxu1 }
 0x6fa   :  { %17056 = vtanh.f32 %v16877_v41 }
 0x704   :  { %v17695_v46 = vpop.eup %17056 }
 0x705   :  { %13124 = vmatmul.mubr.msk.f32.vlgmr.msra.gmra.mrb[6].mxu0 %vm524_vm5, %v17695_v46 }
 0x706   :  { %15500 = vmatpush3.bf16.msra.mxu0 %v17291_v22  ;;  %13164 = vmatprep.mubr.msk.f32.mxu0 %vm17187_vm1, %v17188_v31 }
 0x707   :  { %15501 = vmatprep.subr.bf16.mxu0 %v17186_v21 }
 0x70a   :  { %15503 = vmatpush3.bf16.msra.mxu0 %v17298_v24 }
 0x70b   :  { %15504 = vmatprep.subr.bf16.mxu0 %v17186_v21 }
 0x764   :  { %v251_v47 = vpop.xlane.xlu0 %250 }
 0x765   :  { %v288_v49 = vmul.f32 0.0625, %v251_v47 }
 0x767   :  { %v311_v51 = vadd.f32 1e-05, %v288_v49 }
 0x768   :  { %v227_v1 = vpop.xlane.xlu0 %226  ;;  %v248_v30 = vpop.xlane.xlu1 %247 }
 0x769   :  { %17058 = vrsqrt.f32 %v311_v51  ;;  %v280_v2 = vmul.f32 0.0625, %v227_v1  ;;  %v287_v33 = vmul.f32 0.0625, %v248_v30 }
 0x76b   :  { %v303_v4 = vadd.f32 1e-05, %v280_v2  ;;  %v310_v34 = vadd.f32 1e-05, %v287_v33 }
 0x76d   :  { %17060 = vrsqrt.f32 %v303_v4 }
 0x773   :  { %v17059_v54 = vpop.eup %17058 }
 0x774   :  { %v357_v52 = vmul.f32 %v17059_v54, %v173_v23  ;;  %v54_v54 = vld [vmem:[%s20338_s0 + $0x1a] sm:$0x3] }
 0x776   :  { %v387_v50 = vmul.f32 %v17321_v39, %v357_v52  ;;  %v104_v52 = vsel %vm64_vm0, %v54_v54, 0.0 }
 0x777   :  { %v17061_v13 = vpop.eup %17060 }
 0x778   :  { %v17707_v59 = vadd.f32 %v17328_v42, %v387_v50  ;;  %v349_v14 = vmul.f32 %v17061_v13, %v165_v20  ;;  %v53_v50 = vld [vmem:[%s20338_s0 + $0x18] sm:$0x3] }
 0x77a   :  { %1567 = vrot.lane.b32.xlu0 %v17707_v59, %s17189_s22  ;;  %v379_v23 = vmul.f32 %v17321_v39, %v349_v14 }
 0x77c   :  { %v17729_v26 = vadd.f32 %v17328_v42, %v379_v23 }
 0x799   :  { %90 = vadd.xlane.f32.xlu0 %v89_v63 }
 0x79d   :  { %93 = vadd.xlane.f32.xlu0 %v92_v16 }
 0x7d8   :  { %v1558_v5 = vpop.f32.mrb[6].mxu0 }
 0x7d9   :  { %v16878_v6 = vadd.f32 %v17443_v48, %v1558_v5  ;;  %v13125_v12 = vpop.f32.mrb[7].mxu0 }
 0x7db   :  { %17062 = vtanh.f32 %v16878_v6 }
 0x7dc   :  { %17064 = vrsqrt.f32 %v310_v34 }
 0x7e5   :  { %v17723_v17 = vpop.eup %17062 }
 0x7e6   :  { %1564 = vst.msk [vmem:[#allocation2 + $0x6] sm:$0x3] %vm600_vm6, %v17723_v17  ;;  %v17065_v44 = vpop.eup %17064 }
 0x7e7   :  { %v356_v47 = vmul.f32 %v17065_v44, %v17688_v36  ;;  %v101_v36 = vsel %vm64_vm0, %v53_v50, 0.0 }
 0x7e9   :  { %v386_v49 = vmul.f32 %v17321_v39, %v356_v47 }
 0x7eb   :  { %v17756_v51 = vadd.f32 %v17328_v42, %v386_v49 }
 0x7ec   :  { %v1568_v20 = vpop.permute.xlu0 %1567 }
 0x7ed   :  { %v1570_v27 = vsel %vm442_vm2, %v17729_v26, %v1568_v20 }
 0x7ee   :  { %13135 = vmatmul.mubr.msk.f32.vlgmr.msra.gmra.mrb[6].mxu1 %vm450_vm3, %v1570_v27 }
 0x7ef   :  { %15488 = vmatpush3.bf16.msra.mxu1 %v17352_v56  ;;  %13153 = vmatprep.mubr.msk.f32.mxu1 %vm17187_vm1, %v17188_v31 }
 0x7f0   :  { %15489 = vmatprep.subr.bf16.mxu1 %v17186_v21 }
 0x7f3   :  { %15491 = vmatpush3.bf16.msra.mxu1 %v17364_v61 }
 0x7f4   :  { %15492 = vmatprep.subr.bf16.mxu1 %v17186_v21 }
 0x7f7   :  { %15494 = vmatpush3.bf16.msra.mxu1 %v17376_v0 }
 0x7f8   :  { %15495 = vmatprep.subr.bf16.mxu1 %v17186_v21 }
 0x7fb   :  { %15497 = vmatpush3.bf16.msra.mxu1 %v17386_v3 }
 0x7fc   :  { %15516 = vmatprep.subr.bf16.mxu1 %v17186_v21 }
 0x7fe   :  { %13154 = vmatmul.mubr.msk.f32.vlgmr.msra.gmra.mrb[6].mxu1 %vm524_vm5, %v17723_v17 }
 0x7ff   :  { %15518 = vmatpush3.bf16.msra.mxu1 %v17291_v22  ;;  %13194 = vmatprep.mubr.msk.f32.mxu1 %vm17187_vm1, %v17188_v31 }
 0x800   :  { %15519 = vmatprep.subr.bf16.mxu1 %v17186_v21 }
 0x803   :  { %15521 = vmatpush3.bf16.msra.mxu1 %v17298_v24 }
 0x804   :  { %15522 = vmatprep.subr.bf16.mxu1 %v17186_v21 }
 0x826   :  { %v91_v37 = vpop.xlane.xlu0 %90 }
 0x827   :  { %v143_v38 = vmul.f32 0.0625, %v91_v37 }
 0x829   :  { %v166_v40 = vsub.f32 %v49_v60, %v143_v38 }
 0x82b   :  { %v189_v19 = vmul.f32 %v166_v40, %v166_v40 }
 0x82d   :  { %v228_v41 = vsel %vm64_vm0, %v189_v19, 0.0 }
 0x82e   :  { %229 = vadd.xlane.f32.xlu1 %v228_v41 }
 0x83f   :  { %1733 = vrot.lane.b32.xlu1 %v17756_v51, %s17189_s22 }
 0x863   :  { %105 = vadd.xlane.f32.xlu1 %v104_v52 }
 0x867   :  { %102 = vadd.xlane.f32.xlu1 %v101_v36 }
 0x8bb   :  { %v230_v60 = vpop.xlane.xlu1 %229 }
 0x8bc   :  { %v281_v63 = vmul.f32 0.0625, %v230_v60 }
 0x8be   :  { %v304_v1 = vadd.f32 1e-05, %v281_v63 }
 0x8bf   :  { %v1734_v12 = vpop.permute.xlu1 %1733 }
 0x8c0   :  { %17066 = vrsqrt.f32 %v304_v1 }
 0x8ca   :  { %v17067_v2 = vpop.eup %17066 }
 0x8cb   :  { %v350_v4 = vmul.f32 %v17067_v2, %v166_v40  ;;  %v17813_v2 = vld [vmem:[%s20340_s2] ss:$0 sm:$0xff] }
 0x8cd   :  { %v380_v5 = vmul.f32 %v17321_v39, %v350_v4 }
 0x8cf   :  { %v17770_v6 = vadd.f32 %v17328_v42, %v380_v5  ;;  %v94_v42 = vpop.xlane.xlu0 %93  ;;  %v51_v5 = vld [vmem:[%s20338_s0 + $0x14] sm:$0x3] }
 0x8d0   :  { %v144_v20 = vmul.f32 0.0625, %v94_v42 }
 0x8d1   :  { %v1736_v13 = vsel %vm442_vm2, %v17770_v6, %v1734_v12  ;;  %v1713_v14 = vpop.f32.mrb[6].mxu1 }
 0x8d2   :  { %v13155_v16 = vpop.f32.mrb[7].mxu1  ;;  %13165 = vmatmul.mubr.msk.f32.vlgmr.msra.gmra.mrb[8].mxu0 %vm450_vm3, %v1736_v13  ;;  %v16879_v23 = vadd.f32 %v17443_v48, %v1713_v14  ;;  %v167_v33 = vsub.f32 %v17719_v15, %v144_v20 }
 0x8d3   :  { %15506 = vmatpush3.bf16.msra.mxu0 %v17352_v56  ;;  %13183 = vmatprep.mubr.msk.f32.mxu0 %vm17187_vm1, %v17188_v31  ;;  %v95_v16 = vsel %vm64_vm0, %v51_v5, 0.0 }
 0x8d4   :  { %15507 = vmatprep.subr.bf16.mxu0 %v17186_v21  ;;  %17068 = vtanh.f32 %v16879_v23  ;;  %v190_v40 = vmul.f32 %v167_v33, %v167_v33 }
 0x8d6   :  { %v231_v47 = vsel %vm64_vm0, %v190_v40, 0.0 }
 0x8d7   :  { %15509 = vmatpush3.bf16.msra.mxu0 %v17364_v61 }
 0x8d8   :  { %15510 = vmatprep.subr.bf16.mxu0 %v17186_v21 }
 0x8db   :  { %15512 = vmatpush3.bf16.msra.mxu0 %v17376_v0 }
 0x8dc   :  { %15513 = vmatprep.subr.bf16.mxu0 %v17186_v21 }
 0x8de   :  { %v17786_v39 = vpop.eup %17068 }
 0x8df   :  { %15515 = vmatpush3.bf16.msra.mxu0 %v17386_v3 }
 0x8e0   :  { %15534 = vmatprep.subr.bf16.mxu0 %v17186_v21 }
 0x8e2   :  { %13184 = vmatmul.mubr.msk.f32.vlgmr.msra.gmra.mrb[8].mxu0 %vm524_vm5, %v17786_v39 }
 0x8e3   :  { %15536 = vmatpush3.bf16.msra.mxu0 %v17291_v22  ;;  %13224 = vmatprep.mubr.msk.f32.mxu0 %vm17187_vm1, %v17188_v31 }
 0x8e4   :  { %15537 = vmatprep.subr.bf16.mxu0 %v17186_v21 }
 0x8e7   :  { %15539 = vmatpush3.bf16.msra.mxu0 %v17298_v24 }
 0x8e8   :  { %15540 = vmatprep.subr.bf16.mxu0 %v17186_v21 }
 0x8f0   :  { %v106_v27 = vpop.xlane.xlu1 %105 }
 0x8f1   :  { %v148_v30 = vmul.f32 0.0625, %v106_v27 }
 0x8f3   :  { %v171_v34 = vsub.f32 %v54_v54, %v148_v30 }
 0x8f4   :  { %v103_v37 = vpop.xlane.xlu1 %102 }
 0x8f5   :  { %v194_v38 = vmul.f32 %v171_v34, %v171_v34  ;;  %v147_v19 = vmul.f32 0.0625, %v103_v37 }
 0x8f7   :  { %v243_v41 = vsel %vm64_vm0, %v194_v38, 0.0  ;;  %v17798_v44 = vsub.f32 %v53_v50, %v147_v19  ;;  %v17807_v50 = vld [vmem:[%s20339_s1] ss:$0 sm:$0xff] }
 0x8f8   :  { %244 = vadd.xlane.f32.xlu0 %v243_v41 }
 0x8f9   :  { %v193_v49 = vmul.f32 %v17798_v44, %v17798_v44 }
 0x8fb   :  { %v240_v52 = vsel %vm64_vm0, %v193_v49, 0.0 }
 0x8fc   :  { %232 = vadd.xlane.f32.xlu0 %v231_v47  ;;  %241 = vadd.xlane.f32.xlu1 %v240_v52 }
 0x985   :  { %v245_v15 = vpop.xlane.xlu0 %244 }
 0x986   :  { %v286_v54 = vmul.f32 0.0625, %v245_v15 }
 0x988   :  { %v309_v36 = vadd.f32 1e-05, %v286_v54 }
 0x989   :  { %v233_v42 = vpop.xlane.xlu0 %232 }
 0x98a   :  { %17070 = vrsqrt.f32 %v309_v36  ;;  %v282_v20 = vmul.f32 0.0625, %v233_v42  ;;  %v761_v42 = vlaneseq }
 0x98c   :  { %v305_v27 = vadd.f32 1e-05, %v282_v20  ;;  %v762_v20 = vshrl.u32 %v761_v42, 7 }
 0x994   :  { %v17071_v60 = vpop.eup %17070 }
 0x995   :  { %v355_v63 = vmul.f32 %v17071_v60, %v171_v34 }
 0x997   :  { %v385_v1 = vmul.f32 %v17807_v50, %v355_v63 }
 0x999   :  { %v17816_v4 = vadd.f32 %v17813_v2, %v385_v1 }
 0x99b   :  { %1887 = vrot.lane.b32.xlu0 %v17816_v4, %s17189_s22 }
 0x9b5   :  { %v1878_v12 = vpop.f32.mrb[8].mxu0 }
 0x9b6   :  { %v16880_v13 = vadd.f32 %v17443_v48, %v1878_v12  ;;  %v13185_v14 = vpop.f32.mrb[9].mxu0 }
 0x9b7   :  { %v17190_v14 = vmov 1983009808  }
 0x9b8   :  { %17072 = vtanh.f32 %v16880_v13  ;;  %v52_v13 = vld [vmem:[%s20338_s0 + $0x16] sm:$0x3]  ;;  %s17191_s0 = smov 64  }
 0x9b9   :  { %17074 = vrsqrt.f32 %v305_v27 }
 0x9ba   :  { %96 = vadd.xlane.f32.xlu0 %v95_v16  ;;  %v759_v16 = vunpack.c.l.s4 %v17190_v14 }
 0x9c2   :  { %v17825_v23 = vpop.eup %17072 }
 0x9c3   :  { %1884 = vst.msk [vmem:[#allocation2 + $0x8] sm:$0x3] %vm600_vm6, %v17825_v23  ;;  %v17075_v30 = vpop.eup %17074 }
 0x9c4   :  { %v351_v34 = vmul.f32 %v17075_v30, %v167_v33  ;;  %v242_v33 = vpop.xlane.xlu1 %241 }
 0x9c5   :  { %v285_v41 = vmul.f32 0.0625, %v242_v33 }
 0x9c6   :  { %v381_v37 = vmul.f32 %v17807_v50, %v351_v34 }
 0x9c7   :  { %v308_v47 = vadd.f32 1e-05, %v285_v41 }
 0x9c8   :  { %v17831_v38 = vadd.f32 %v17813_v2, %v381_v37 }
 0x9c9   :  { %17076 = vrsqrt.f32 %v308_v47 }
 0x9d3   :  { %v17077_v60 = vpop.eup %17076 }
 0x9d4   :  { %v354_v63 = vmul.f32 %v17077_v60, %v17798_v44  ;;  %v760_v44 = vunpack.c.0.s8 %v759_v16 }
 0x9d6   :  { %v384_v1 = vmul.f32 %v17807_v50, %v354_v63  ;;  %v17870_v27 = vsub.s32 %v760_v44, %v762_v20 }
 0x9d8   :  { %v17858_v12 = vadd.f32 %v17813_v2, %v384_v1  ;;  %v764_v30 = vrot.slane %v17506_v43, %v17870_v27 }
 0xa0d   :  { %v1888_v40 = vpop.permute.xlu0 %1887 }
 0xa0e   :  { %v1890_v19 = vsel %vm442_vm2, %v17831_v38, %v1888_v40 }
 0xa0f   :  { %13195 = vmatmul.mubr.msk.f32.vlgmr.msra.gmra.mrb[8].mxu1 %vm450_vm3, %v1890_v19 }
 0xa10   :  { %15524 = vmatpush3.bf16.msra.mxu1 %v17352_v56  ;;  %13213 = vmatprep.mubr.msk.f32.mxu1 %vm17187_vm1, %v17188_v31 }
 0xa11   :  { %15525 = vmatprep.subr.bf16.mxu1 %v17186_v21 }
 0xa14   :  { %15527 = vmatpush3.bf16.msra.mxu1 %v17364_v61 }
 0xa15   :  { %15528 = vmatprep.subr.bf16.mxu1 %v17186_v21 }
 0xa18   :  { %15530 = vmatpush3.bf16.msra.mxu1 %v17376_v0 }
 0xa19   :  { %15531 = vmatprep.subr.bf16.mxu1 %v17186_v21 }
 0xa1c   :  { %15533 = vmatpush3.bf16.msra.mxu1 %v17386_v3 }
 0xa1d   :  { %15552 = vmatprep.subr.bf16.mxu1 %v17186_v21 }
 0xa1f   :  { %13214 = vmatmul.mubr.msk.f32.vlgmr.msra.gmra.mrb[8].mxu1 %vm524_vm5, %v17825_v23 }
 0xa20   :  { %15554 = vmatpush3.bf16.msra.mxu1 %v17291_v22  ;;  %13254 = vmatprep.mubr.msk.f32.mxu1 %vm17187_vm1, %v17188_v31 }
 0xa21   :  { %15555 = vmatprep.subr.bf16.mxu1 %v17186_v21 }
 0xa24   :  { %15557 = vmatpush3.bf16.msra.mxu1 %v17298_v24 }
 0xa25   :  { %15558 = vmatprep.subr.bf16.mxu1 %v17186_v21 }
 0xa47   :  { %v97_v49 = vpop.xlane.xlu0 %96 }
 0xa48   :  { %v145_v52 = vmul.f32 0.0625, %v97_v49 }
 0xa4a   :  { %v168_v15 = vsub.f32 %v51_v5, %v145_v52  ;;  %v98_v5 = vsel %vm64_vm0, %v52_v13, 0.0 }
 0xa4c   :  { %v191_v54 = vmul.f32 %v168_v15, %v168_v15 }
 0xa4e   :  { %v234_v36 = vsel %vm64_vm0, %v191_v54, 0.0 }
 0xa4f   :  { %235 = vadd.xlane.f32.xlu1 %v234_v36 }
 0xa60   :  { %2053 = vrot.lane.b32.xlu1 %v17858_v12, %s17189_s22 }
 0xa84   :  { %99 = vadd.xlane.f32.xlu1 %v98_v5 }
 0xa95   :  { %2693 = vrot.lane.b32.xlu1 %v17770_v6, %s17189_s22 }
 0xa99   :  { %3487 = vrot.lane.b32.xlu1 %v17526_v53, %s17189_s22 }
 0xa9d   :  { %3807 = vrot.lane.b32.xlu1 %v17425_v32, %s17189_s22 }
 0xaa1   :  { %765 = vrot.lane.b32.xlu1 %v764_v30, %s17191_s0 }
 0xadc   :  { %v236_v34 = vpop.xlane.xlu1 %235 }
 0xadd   :  { %v283_v37 = vmul.f32 0.0625, %v236_v34 }
 0xadf   :  { %v306_v40 = vadd.f32 1e-05, %v283_v37 }
 0xae0   :  { %v2054_v41 = vpop.permute.xlu1 %2053 }
 0xae1   :  { %17078 = vrsqrt.f32 %v306_v40 }
 0xaeb   :  { %v17079_v6 = vpop.eup %17078 }
 0xaec   :  { %v352_v19 = vmul.f32 %v17079_v6, %v168_v15 }
 0xaee   :  { %v382_v33 = vmul.f32 %v17807_v50, %v352_v19 }
 0xaf0   :  { %v412_v53 = vadd.f32 %v17813_v2, %v382_v33 }
 0xaf2   :  { %v2056_v47 = vsel %vm442_vm2, %v412_v53, %v2054_v41  ;;  %v2033_v32 = vpop.f32.mrb[8].mxu1 }
 0xaf3   :  { %v13215_v49 = vpop.f32.mrb[9].mxu1  ;;  %13225 = vmatmul.mubr.msk.f32.vlgmr.msra.gmra.mrb[10].mxu0 %vm450_vm3, %v2056_v47  ;;  %v16881_v43 = vadd.f32 %v17443_v48, %v2033_v32 }
 0xaf4   :  { %15542 = vmatpush3.bf16.msra.mxu0 %v17352_v56  ;;  %13243 = vmatprep.mubr.msk.f32.mxu0 %vm17187_vm1, %v17188_v31 }
 0xaf5   :  { %15543 = vmatprep.subr.bf16.mxu0 %v17186_v21  ;;  %17080 = vtanh.f32 %v16881_v43 }
 0xaf8   :  { %15545 = vmatpush3.bf16.msra.mxu0 %v17364_v61 }
 0xaf9   :  { %15546 = vmatprep.subr.bf16.mxu0 %v17186_v21 }
 0xafc   :  { %15548 = vmatpush3.bf16.msra.mxu0 %v17376_v0 }
 0xafd   :  { %15549 = vmatprep.subr.bf16.mxu0 %v17186_v21 }
 0xaff   :  { %v17892_v48 = vpop.eup %17080 }
 0xb00   :  { %15551 = vmatpush3.bf16.msra.mxu0 %v17386_v3 }
 0xb01   :  { %15570 = vmatprep.subr.bf16.mxu0 %v17186_v21 }
 0xb03   :  { %13244 = vmatmul.mubr.msk.f32.vlgmr.msra.gmra.mrb[10].mxu0 %vm524_vm5, %v17892_v48 }
 0xb04   :  { %15572 = vmatpush3.bf16.msra.mxu0 %v17291_v22  ;;  %13284 = vmatprep.mubr.msk.f32.mxu0 %vm17187_vm1, %v17188_v31 }
 0xb05   :  { %15573 = vmatprep.subr.bf16.mxu0 %v17186_v21 }
 0xb08   :  { %15575 = vmatpush3.bf16.msra.mxu0 %v17298_v24 }
 0xb09   :  { %15576 = vmatprep.subr.bf16.mxu0 %v17186_v21 }
 0xb11   :  { %v100_v52 = vpop.xlane.xlu1 %99 }
 0xb12   :  { %v146_v15 = vmul.f32 0.0625, %v100_v52 }
 0xb14   :  { %v169_v54 = vsub.f32 %v52_v13, %v146_v15 }
 0xb15   :  { %v17902_v36 = vpop.permute.xlu1 %2693 }
 0xb16   :  { %v192_v60 = vmul.f32 %v169_v54, %v169_v54  ;;  %v2696_v19 = vsel %vm442_vm2, %v17756_v51, %v17902_v36 }
 0xb18   :  { %v237_v63 = vsel %vm64_vm0, %v192_v60, 0.0 }
 0xb19   :  { %238 = vadd.xlane.f32.xlu0 %v237_v63  ;;  %v17905_v1 = vpop.permute.xlu1 %3487 }
 0xb1d   :  { %v17907_v5 = vpop.permute.xlu1 %3807 }
 0xb21   :  { %v766_v14 = vpop.permute.xlu1 %765 }
 0xb22   :  { %769 = vst.msk [vmem:[#allocation2] sm:$0x3] %vm768_vm7, %v766_v14 }
 0xb23   :  { %771 = vst.msk [vmem:[#allocation2 + $0x14] sm:$0x3] %vm770_vm8, %v766_v14 }
 0xb24   :  { %925 = vst.msk [vmem:[#allocation2 + $0x14] sm:$0x3] %vm602_vm4, %v17558_v18 }
 0xba6   :  { %v239_v13 = vpop.xlane.xlu0 %238 }
 0xba7   :  { %v284_v16 = vmul.f32 0.0625, %v239_v13 }
 0xba9   :  { %v307_v42 = vadd.f32 1e-05, %v284_v16 }
 0xbab   :  { %17082 = vrsqrt.f32 %v307_v42 }
 0xbb5   :  { %v17083_v44 = vpop.eup %17082 }
 0xbb6   :  { %v353_v20 = vmul.f32 %v17083_v44, %v169_v54 }
 0xbb8   :  { %v383_v30 = vmul.f32 %v17807_v50, %v353_v20  ;;  %v17930_v50 = vld [vmem:[%s20343_s5] ss:$0 sm:$0xff] }
 0xbba   :  { %v413_v34 = vadd.f32 %v17813_v2, %v383_v30 }
 0xbbc   :  { %2207 = vrot.lane.b32.xlu0 %v413_v34, %s17189_s22 }
 0xbc0   :  { %2373 = vrot.lane.b32.xlu0 %v412_v53, %s17189_s22 }
 0xbc4   :  { %2527 = vrot.lane.b32.xlu0 %v17831_v38, %s17189_s22 }
 0xbc8   :  { %2847 = vrot.lane.b32.xlu0 %v17729_v26, %s17189_s22 }
 0xbcc   :  { %3013 = vrot.lane.b32.xlu0 %v17671_v11, %s17189_s22 }
 0xbd0   :  { %3167 = vrot.lane.b32.xlu0 %v17625_v25, %s17189_s22 }
 0xbd4   :  { %3333 = vrot.lane.b32.xlu0 %v17572_v29, %s17189_s22 }
 0xbd6   :  { %v2198_v18 = vpop.f32.mrb[10].mxu0 }
 0xbd7   :  { %v16882_v2 = vadd.f32 %v17930_v50, %v2198_v18  ;;  %v13245_v38 = vpop.f32.mrb[11].mxu0 }
 0xbd8   :  { %3653 = vrot.lane.b32.xlu0 %v17480_v28, %s17189_s22  ;;  %v3490_v38 = vsel %vm442_vm2, %v17487_v35, %v17905_v1 }
 0xbd9   :  { %17084 = vtanh.f32 %v16882_v2 }
 0xbdc   :  { %3973 = vrot.lane.b32.xlu0 %v17350_v55, %s17189_s22 }
 0xbe3   :  { %v17937_v25 = vpop.eup %17084 }
 0xbe4   :  { %2204 = vst.msk [vmem:[#allocation2 + $0xa] sm:$0x3] %vm600_vm6, %v17937_v25 }
 0xc2e   :  { %v2208_v29 = vpop.permute.xlu0 %2207 }
 0xc2f   :  { %v2210_v11 = vsel %vm442_vm2, %v413_v34, %v2208_v29 }
 0xc30   :  { %13255 = vmatmul.mubr.msk.f32.vlgmr.msra.gmra.mrb[10].mxu1 %vm450_vm3, %v2210_v11 }
 0xc31   :  { %15560 = vmatpush3.bf16.msra.mxu1 %v17352_v56  ;;  %13273 = vmatprep.mubr.msk.f32.mxu1 %vm17187_vm1, %v17188_v31 }
 0xc32   :  { %v2374_v28 = vpop.permute.xlu0 %2373  ;;  %15561 = vmatprep.subr.bf16.mxu1 %v17186_v21 }
 0xc33   :  { %v2376_v55 = vsel %vm442_vm2, %v17858_v12, %v2374_v28 }
 0xc34   :  { %13285 = vmatmul.mubr.msk.f32.vlgmr.msra.gmra.mrb[12].mxu0 %vm450_vm3, %v2376_v55 }
 0xc35   :  { %15563 = vmatpush3.bf16.msra.mxu1 %v17364_v61  ;;  %15578 = vmatpush3.bf16.msra.mxu0 %v17352_v56 }
 0xc36   :  { %15564 = vmatprep.subr.bf16.mxu1 %v17186_v21  ;;  %15579 = vmatprep.subr.bf16.mxu0 %v17186_v21  ;;  %v2528_v26 = vpop.permute.xlu0 %2527 }
 0xc37   :  { %13303 = vmatprep.mubr.msk.f32.mxu0 %vm17187_vm1, %v17188_v31  ;;  %v2530_v12 = vsel %vm442_vm2, %v17816_v4, %v2528_v26 }
 0xc39   :  { %15566 = vmatpush3.bf16.msra.mxu1 %v17376_v0  ;;  %15581 = vmatpush3.bf16.msra.mxu0 %v17364_v61 }
 0xc3a   :  { %15567 = vmatprep.subr.bf16.mxu1 %v17186_v21  ;;  %15582 = vmatprep.subr.bf16.mxu0 %v17186_v21  ;;  %v2848_v47 = vpop.permute.xlu0 %2847 }
 0xc3b   :  { %v2850_v32 = vsel %vm442_vm2, %v17707_v59, %v2848_v47 }
 0xc3d   :  { %15569 = vmatpush3.bf16.msra.mxu1 %v17386_v3  ;;  %15584 = vmatpush3.bf16.msra.mxu0 %v17376_v0 }
 0xc3e   :  { %15588 = vmatprep.subr.bf16.mxu1 %v17186_v21  ;;  %15585 = vmatprep.subr.bf16.mxu0 %v17186_v21  ;;  %v3014_v15 = vpop.permute.xlu0 %3013 }
 0xc3f   :  { %v3016_v54 = vsel %vm442_vm2, %v17645_v57, %v3014_v15 }
 0xc40   :  { %13274 = vmatmul.mubr.msk.f32.vlgmr.msra.gmra.mrb[10].mxu1 %vm524_vm5, %v17937_v25 }
 0xc41   :  { %15590 = vmatpush3.bf16.msra.mxu1 %v17291_v22  ;;  %13314 = vmatprep.mubr.msk.f32.mxu1 %vm17187_vm1, %v17188_v31 }
 0xc42   :  { %15591 = vmatprep.subr.bf16.mxu1 %v17186_v21  ;;  %15587 = vmatpush3.bf16.msra.mxu0 %v17386_v3  ;;  %v3168_v14 = vpop.permute.xlu0 %3167 }
 0xc43   :  { %15606 = vmatprep.subr.bf16.mxu0 %v17186_v21  ;;  %v3170_v13 = vsel %vm442_vm2, %v17608_v8, %v3168_v14 }
 0xc45   :  { %15593 = vmatpush3.bf16.msra.mxu1 %v17298_v24 }
 0xc46   :  { %15594 = vmatprep.subr.bf16.mxu1 %v17186_v21  ;;  %v3334_v20 = vpop.permute.xlu0 %3333 }
 0xc47   :  { %v3336_v30 = vsel %vm442_vm2, %v17545_v9, %v3334_v20  ;;  %v4135_v20 = vld [vmem:[%s20344_s6 + $0x48] sm:$0xff] }
 0xc48   :  { %13315 = vmatmul.mubr.msk.f32.vlgmr.msra.gmra.mrb[12].mxu1 %vm450_vm3, %v2530_v12 }
 0xc49   :  { %15596 = vmatpush3.bf16.msra.mxu1 %v17352_v56  ;;  %13333 = vmatprep.mubr.msk.f32.mxu1 %vm17187_vm1, %v17188_v31 }
 0xc4a   :  { %15597 = vmatprep.subr.bf16.mxu1 %v17186_v21  ;;  %v3654_v28 = vpop.permute.xlu0 %3653 }
 0xc4b   :  { %v3656_v55 = vsel %vm442_vm2, %v17467_v7, %v3654_v28  ;;  %v4141_v28 = vld [vmem:[%s20344_s6 + $0x78] sm:$0xff] }
 0xc4d   :  { %15599 = vmatpush3.bf16.msra.mxu1 %v17364_v61 }
 0xc4e   :  { %15600 = vmatprep.subr.bf16.mxu1 %v17186_v21 }
 0xc51   :  { %15602 = vmatpush3.bf16.msra.mxu1 %v17376_v0 }
 0xc52   :  { %15603 = vmatprep.subr.bf16.mxu1 %v17186_v21 }
 0xc55   :  { %15605 = vmatpush3.bf16.msra.mxu1 %v17386_v3 }
 0xc56   :  { %15624 = vmatprep.subr.bf16.mxu1 %v17186_v21 }
 0xd13   :  { %v2353_v4 = vpop.f32.mrb[10].mxu1 }
 0xd14   :  { %v16883_v37 = vadd.f32 %v17930_v50, %v2353_v4  ;;  %v13275_v40 = vpop.f32.mrb[11].mxu1 }
 0xd16   :  { %17086 = vtanh.f32 %v16883_v37  ;;  %v3810_v37 = vsel %vm442_vm2, %v17401_v10, %v17907_v5 }
 0xd20   :  { %v17988_v6 = vpop.eup %17086 }
 0xd21   :  { %13304 = vmatmul.mubr.msk.f32.vlgmr.msra.gmra.mrb[12].mxu0 %vm524_vm5, %v17988_v6 }
 0xd22   :  { %15608 = vmatpush3.bf16.msra.mxu0 %v17291_v22  ;;  %13344 = vmatprep.mubr.msk.f32.mxu0 %vm17187_vm1, %v17188_v31 }
 0xd23   :  { %15609 = vmatprep.subr.bf16.mxu0 %v17186_v21 }
 0xd26   :  { %15611 = vmatpush3.bf16.msra.mxu0 %v17298_v24 }
 0xd27   :  { %15612 = vmatprep.subr.bf16.mxu0 %v17186_v21 }
 0xd29   :  { %13345 = vmatmul.mubr.msk.f32.vlgmr.msra.gmra.mrb[14].mxu0 %vm450_vm3, %v2696_v19 }
 0xd2a   :  { %15614 = vmatpush3.bf16.msra.mxu0 %v17352_v56  ;;  %13363 = vmatprep.mubr.msk.f32.mxu0 %vm17187_vm1, %v17188_v31 }
 0xd2b   :  { %15615 = vmatprep.subr.bf16.mxu0 %v17186_v21 }
 0xd2e   :  { %15617 = vmatpush3.bf16.msra.mxu0 %v17364_v61 }
 0xd2f   :  { %15618 = vmatprep.subr.bf16.mxu0 %v17186_v21 }
 0xd32   :  { %15620 = vmatpush3.bf16.msra.mxu0 %v17376_v0 }
 0xd33   :  { %15621 = vmatprep.subr.bf16.mxu0 %v17186_v21 }
 0xd36   :  { %15623 = vmatpush3.bf16.msra.mxu0 %v17386_v3 }
 0xd37   :  { %15642 = vmatprep.subr.bf16.mxu0 %v17186_v21 }
 0xdf4   :  { %v2518_v51 = vpop.f32.mrb[12].mxu0 }
 0xdf5   :  { %v16884_v33 = vadd.f32 %v17930_v50, %v2518_v51  ;;  %v13305_v53 = vpop.f32.mrb[13].mxu0  ;;  %v3974_v51 = vpop.permute.xlu0 %3973 }
 0xdf7   :  { %17088 = vtanh.f32 %v16884_v33  ;;  %v3976_v33 = vsel %vm442_vm2, %v17333_v45, %v3974_v51 }
 0xe01   :  { %v18013_v41 = vpop.eup %17088 }
 0xe02   :  { %13334 = vmatmul.mubr.msk.f32.vlgmr.msra.gmra.mrb[12].mxu1 %vm524_vm5, %v18013_v41 }
 0xe03   :  { %15626 = vmatpush3.bf16.msra.mxu1 %v17291_v22  ;;  %13374 = vmatprep.mubr.msk.f32.mxu1 %vm17187_vm1, %v17188_v31 }
 0xe04   :  { %15627 = vmatprep.subr.bf16.mxu1 %v17186_v21 }
 0xe07   :  { %15629 = vmatpush3.bf16.msra.mxu1 %v17298_v24 }
 0xe08   :  { %15630 = vmatprep.subr.bf16.mxu1 %v17186_v21 }
 0xe0a   :  { %13375 = vmatmul.mubr.msk.f32.vlgmr.msra.gmra.mrb[14].mxu1 %vm450_vm3, %v2850_v32 }
 0xe0b   :  { %15632 = vmatpush3.bf16.msra.mxu1 %v17352_v56  ;;  %13393 = vmatprep.mubr.msk.f32.mxu1 %vm17187_vm1, %v17188_v31 }
 0xe0c   :  { %15633 = vmatprep.subr.bf16.mxu1 %v17186_v21 }
 0xe0f   :  { %15635 = vmatpush3.bf16.msra.mxu1 %v17364_v61 }
 0xe10   :  { %15636 = vmatprep.subr.bf16.mxu1 %v17186_v21 }
 0xe13   :  { %15638 = vmatpush3.bf16.msra.mxu1 %v17376_v0 }
 0xe14   :  { %15639 = vmatprep.subr.bf16.mxu1 %v17186_v21 }
 0xe17   :  { %15641 = vmatpush3.bf16.msra.mxu1 %v17386_v3 }
 0xe18   :  { %15660 = vmatprep.subr.bf16.mxu1 %v17186_v21 }
 0xed5   :  { %v2673_v59 = vpop.f32.mrb[12].mxu1 }
 0xed6   :  { %v16885_v49 = vadd.f32 %v17930_v50, %v2673_v59  ;;  %v13335_v43 = vpop.f32.mrb[13].mxu1  ;;  %v4126_v59 = vld [vmem:[%s20344_s6] sm:$0xff] }
 0xed7   :  { %v4128_v43 = vld [vmem:[%s20344_s6 + $0x10] sm:$0xff] }
 0xed8   :  { %17090 = vtanh.f32 %v16885_v49  ;;  %v4127_v49 = vld [vmem:[%s20344_s6 + $0x8] sm:$0xff] }
 0xed9   :  { %v18232_v15 = vpack.c.bf16 %v4127_v49, %v4126_v59 }
 0xee2   :  { %v18037_v52 = vpop.eup %17090 }
 0xee3   :  { %13364 = vmatmul.mubr.msk.f32.vlgmr.msra.gmra.mrb[14].mxu0 %vm524_vm5, %v18037_v52 }
 0xee4   :  { %15644 = vmatpush3.bf16.msra.mxu0 %v17291_v22  ;;  %13404 = vmatprep.mubr.msk.f32.mxu0 %vm17187_vm1, %v17188_v31 }
 0xee5   :  { %15645 = vmatprep.subr.bf16.mxu0 %v17186_v21 }
 0xee8   :  { %15647 = vmatpush3.bf16.msra.mxu0 %v17298_v24 }
 0xee9   :  { %15648 = vmatprep.subr.bf16.mxu0 %v17186_v21 }
 0xeeb   :  { %13405 = vmatmul.mubr.msk.f32.vlgmr.msra.gmra.mrb[16].mxu0 %vm450_vm3, %v3016_v54  ;;  %v4129_v54 = vld [vmem:[%s20344_s6 + $0x18] sm:$0xff] }
 0xeec   :  { %15650 = vmatpush3.bf16.msra.mxu0 %v17352_v56  ;;  %13423 = vmatprep.mubr.msk.f32.mxu0 %vm17187_vm1, %v17188_v31 }
 0xeed   :  { %15651 = vmatprep.subr.bf16.mxu0 %v17186_v21 }
 0xef0   :  { %15653 = vmatpush3.bf16.msra.mxu0 %v17364_v61 }
 0xef1   :  { %15654 = vmatprep.subr.bf16.mxu0 %v17186_v21 }
 0xef4   :  { %15656 = vmatpush3.bf16.msra.mxu0 %v17376_v0 }
 0xef5   :  { %15657 = vmatprep.subr.bf16.mxu0 %v17186_v21 }
 0xef8   :  { %15659 = vmatpush3.bf16.msra.mxu0 %v17386_v3 }
 0xef9   :  { %15678 = vmatprep.subr.bf16.mxu0 %v17186_v21 }
 0xfb6   :  { %v2838_v57 = vpop.f32.mrb[14].mxu0 }
 0xfb7   :  { %v16886_v36 = vadd.f32 %v17930_v50, %v2838_v57  ;;  %v13365_v60 = vpop.f32.mrb[15].mxu0  ;;  %v18238_v57 = vpack.c.bf16 %v4129_v54, %v4128_v43  ;;  %v4148_v43 = vld [vmem:[%s20345_s7 + $0x30] sm:$0xff]  ;;  %v4149_v54 = vld [vmem:[%s20345_s7 + $0x38] sm:$0xff] }
 0xfb8   :  { %v4131_v60 = vld [vmem:[%s20344_s6 + $0x28] sm:$0xff] }
 0xfb9   :  { %17092 = vtanh.f32 %v16886_v36  ;;  %v4130_v36 = vld [vmem:[%s20344_s6 + $0x20] sm:$0xff] }
 0xfba   :  { %v18248_v14 = vpack.c.bf16 %v4131_v60, %v4130_v36  ;;  %v18358_v36 = vpack.c.bf16 %v4149_v54, %v4148_v43  ;;  %v4321_v60 = vld [vmem:[%s20347_s9 + $0x5a8] sm:$0xff] }
 0xfc3   :  { %v18061_v63 = vpop.eup %17092 }
 0xfc4   :  { %13394 = vmatmul.mubr.msk.f32.vlgmr.msra.gmra.mrb[14].mxu1 %vm524_vm5, %v18061_v63 }
 0xfc5   :  { %15662 = vmatpush3.bf16.msra.mxu1 %v17291_v22  ;;  %13434 = vmatprep.mubr.msk.f32.mxu1 %vm17187_vm1, %v17188_v31 }
 0xfc6   :  { %15663 = vmatprep.subr.bf16.mxu1 %v17186_v21 }
 0xfc9   :  { %15665 = vmatpush3.bf16.msra.mxu1 %v17298_v24 }
 0xfca   :  { %15666 = vmatprep.subr.bf16.mxu1 %v17186_v21 }
 0xfcc   :  { %13435 = vmatmul.mubr.msk.f32.vlgmr.msra.gmra.mrb[16].mxu1 %vm450_vm3, %v3170_v13  ;;  %v4132_v13 = vld [vmem:[%s20344_s6 + $0x30] sm:$0xff] }
 0xfcd   :  { %15668 = vmatpush3.bf16.msra.mxu1 %v17352_v56  ;;  %13453 = vmatprep.mubr.msk.f32.mxu1 %vm17187_vm1, %v17188_v31 }
 0xfce   :  { %15669 = vmatprep.subr.bf16.mxu1 %v17186_v21 }
 0xfd1   :  { %15671 = vmatpush3.bf16.msra.mxu1 %v17364_v61 }
 0xfd2   :  { %15672 = vmatprep.subr.bf16.mxu1 %v17186_v21 }
 0xfd5   :  { %15674 = vmatpush3.bf16.msra.mxu1 %v17376_v0 }
 0xfd6   :  { %15675 = vmatprep.subr.bf16.mxu1 %v17186_v21 }
 0xfd9   :  { %15677 = vmatpush3.bf16.msra.mxu1 %v17386_v3 }
 0xfda   :  { %15696 = vmatprep.subr.bf16.mxu1 %v17186_v21 }
0x1097   :  { %v2993_v8 = vpop.f32.mrb[14].mxu1 }
0x1098   :  { %v16887_v16 = vadd.f32 %v17930_v50, %v2993_v8  ;;  %v13395_v42 = vpop.f32.mrb[15].mxu1  ;;  %v4133_v8 = vld [vmem:[%s20344_s6 + $0x38] sm:$0xff] }
0x1099   :  { %v4134_v42 = vld [vmem:[%s20344_s6 + $0x40] sm:$0xff] }
0x109a   :  { %17094 = vtanh.f32 %v16887_v16  ;;  %v18258_v16 = vpack.c.bf16 %v4133_v8, %v4132_v13  ;;  %v4322_v13 = vld [vmem:[%s20347_s9 + $0x5b0] sm:$0xff] }
0x10a4   :  { %v18085_v44 = vpop.eup %17094 }
0x10a5   :  { %13424 = vmatmul.mubr.msk.f32.vlgmr.msra.gmra.mrb[16].mxu0 %vm524_vm5, %v18085_v44 }
0x10a6   :  { %15680 = vmatpush3.bf16.msra.mxu0 %v17291_v22  ;;  %13464 = vmatprep.mubr.msk.f32.mxu0 %vm17187_vm1, %v17188_v31 }
0x10a7   :  { %15681 = vmatprep.subr.bf16.mxu0 %v17186_v21 }
0x10aa   :  { %15683 = vmatpush3.bf16.msra.mxu0 %v17298_v24 }
0x10ab   :  { %15684 = vmatprep.subr.bf16.mxu0 %v17186_v21 }
0x10ad   :  { %13465 = vmatmul.mubr.msk.f32.vlgmr.msra.gmra.mrb[18].mxu0 %vm450_vm3, %v3336_v30  ;;  %v18268_v30 = vpack.c.bf16 %v4135_v20, %v4134_v42  ;;  %v4323_v42 = vld [vmem:[%s20347_s9 + $0x5b8] sm:$0xff] }
0x10ae   :  { %15686 = vmatpush3.bf16.msra.mxu0 %v17352_v56  ;;  %13483 = vmatprep.mubr.msk.f32.mxu0 %vm17187_vm1, %v17188_v31  ;;  %v15808_v20 = vpack.c.bf16 %v4323_v42, %v4322_v13  ;;  %v4721_v13 = vld [vmem:[%s20347_s9 + $0x560] sm:$0xff] }
0x10af   :  { %15687 = vmatprep.subr.bf16.mxu0 %v17186_v21 }
0x10b2   :  { %15689 = vmatpush3.bf16.msra.mxu0 %v17364_v61 }
0x10b3   :  { %15690 = vmatprep.subr.bf16.mxu0 %v17186_v21 }
0x10b6   :  { %15692 = vmatpush3.bf16.msra.mxu0 %v17376_v0 }
0x10b7   :  { %15693 = vmatprep.subr.bf16.mxu0 %v17186_v21 }
0x10ba   :  { %15695 = vmatpush3.bf16.msra.mxu0 %v17386_v3 }
0x10bb   :  { %15714 = vmatprep.subr.bf16.mxu0 %v17186_v21 }
0x1178   :  { %v3158_v9 = vpop.f32.mrb[16].mxu0 }
0x1179   :  { %v16888_v34 = vadd.f32 %v17930_v50, %v3158_v9  ;;  %v13425_v18 = vpop.f32.mrb[17].mxu0  ;;  %v4136_v9 = vld [vmem:[%s20344_s6 + $0x50] sm:$0xff] }
0x117b   :  { %17096 = vtanh.f32 %v16888_v34  ;;  %v4137_v34 = vld [vmem:[%s20344_s6 + $0x58] sm:$0xff] }
0x117c   :  { %v18278_v18 = vpack.c.bf16 %v4137_v34, %v4136_v9  ;;  %v18383_v9 = vld [vmem:[%s20346_s8] ss:$0 sm:$0xff] }
0x1185   :  { %v18109_v2 = vpop.eup %17096 }
0x1186   :  { %13454 = vmatmul.mubr.msk.f32.vlgmr.msra.gmra.mrb[16].mxu1 %vm524_vm5, %v18109_v2 }
0x1187   :  { %15698 = vmatpush3.bf16.msra.mxu1 %v17291_v22  ;;  %13494 = vmatprep.mubr.msk.f32.mxu1 %vm17187_vm1, %v17188_v31 }
0x1188   :  { %15699 = vmatprep.subr.bf16.mxu1 %v17186_v21 }
0x118b   :  { %15701 = vmatpush3.bf16.msra.mxu1 %v17298_v24 }
0x118c   :  { %15702 = vmatprep.subr.bf16.mxu1 %v17186_v21 }
0x118e   :  { %13495 = vmatmul.mubr.msk.f32.vlgmr.msra.gmra.mrb[18].mxu1 %vm450_vm3, %v3490_v38  ;;  %v4138_v38 = vld [vmem:[%s20344_s6 + $0x60] sm:$0xff] }
0x118f   :  { %15704 = vmatpush3.bf16.msra.mxu1 %v17352_v56  ;;  %13513 = vmatprep.mubr.msk.f32.mxu1 %vm17187_vm1, %v17188_v31 }
0x1190   :  { %15705 = vmatprep.subr.bf16.mxu1 %v17186_v21 }
0x1193   :  { %15707 = vmatpush3.bf16.msra.mxu1 %v17364_v61 }
0x1194   :  { %15708 = vmatprep.subr.bf16.mxu1 %v17186_v21 }
0x1197   :  { %15710 = vmatpush3.bf16.msra.mxu1 %v17376_v0 }
0x1198   :  { %15711 = vmatprep.subr.bf16.mxu1 %v17186_v21 }
0x119b   :  { %15713 = vmatpush3.bf16.msra.mxu1 %v17386_v3 }
0x119c   :  { %15732 = vmatprep.subr.bf16.mxu1 %v17186_v21 }
0x1259   :  { %v3313_v35 = vpop.f32.mrb[16].mxu1 }
0x125a   :  { %v16889_v1 = vadd.f32 %v17930_v50, %v3313_v35  ;;  %v13455_v29 = vpop.f32.mrb[17].mxu1  ;;  %v4139_v35 = vld [vmem:[%s20344_s6 + $0x68] sm:$0xff] }
0x125b   :  { %v4140_v29 = vld [vmem:[%s20344_s6 + $0x70] sm:$0xff] }
0x125c   :  { %17098 = vtanh.f32 %v16889_v1  ;;  %v18288_v1 = vpack.c.bf16 %v4139_v35, %v4138_v38 }
0x1266   :  { %v18134_v11 = vpop.eup %17098 }
0x1267   :  { %13484 = vmatmul.mubr.msk.f32.vlgmr.msra.gmra.mrb[18].mxu0 %vm524_vm5, %v18134_v11 }
0x1268   :  { %15716 = vmatpush3.bf16.msra.mxu0 %v17291_v22  ;;  %13524 = vmatprep.mubr.msk.f32.mxu0 %vm17187_vm1, %v17188_v31 }
0x1269   :  { %15717 = vmatprep.subr.bf16.mxu0 %v17186_v21 }
0x126c   :  { %15719 = vmatpush3.bf16.msra.mxu0 %v17298_v24 }
0x126d   :  { %15720 = vmatprep.subr.bf16.mxu0 %v17186_v21 }
0x126f   :  { %13525 = vmatmul.mubr.msk.f32.vlgmr.msra.gmra.mrb[20].mxu0 %vm450_vm3, %v3656_v55  ;;  %v18298_v55 = vpack.c.bf16 %v4141_v28, %v4140_v29 }
0x1270   :  { %15722 = vmatpush3.bf16.msra.mxu0 %v17352_v56  ;;  %13543 = vmatprep.mubr.msk.f32.mxu0 %vm17187_vm1, %v17188_v31 }
0x1271   :  { %15723 = vmatprep.subr.bf16.mxu0 %v17186_v21 }
0x1274   :  { %15725 = vmatpush3.bf16.msra.mxu0 %v17364_v61 }
0x1275   :  { %15726 = vmatprep.subr.bf16.mxu0 %v17186_v21 }
0x1278   :  { %15728 = vmatpush3.bf16.msra.mxu0 %v17376_v0 }
0x1279   :  { %15729 = vmatprep.subr.bf16.mxu0 %v17186_v21 }
0x127c   :  { %15731 = vmatpush3.bf16.msra.mxu0 %v17386_v3 }
0x127d   :  { %15750 = vmatprep.subr.bf16.mxu0 %v17186_v21 }
0x133a   :  { %v3478_v7 = vpop.f32.mrb[18].mxu0 }
0x133b   :  { %v16890_v26 = vadd.f32 %v17930_v50, %v3478_v7  ;;  %v13485_v12 = vpop.f32.mrb[19].mxu0 }
0x133d   :  { %17100 = vtanh.f32 %v16890_v26 }
0x1347   :  { %v18158_v4 = vpop.eup %17100 }
0x1348   :  { %13514 = vmatmul.mubr.msk.f32.vlgmr.msra.gmra.mrb[18].mxu1 %vm524_vm5, %v18158_v4 }
0x1349   :  { %15734 = vmatpush3.bf16.msra.mxu1 %v17291_v22  ;;  %13554 = vmatprep.mubr.msk.f32.mxu1 %vm17187_vm1, %v17188_v31 }
0x134a   :  { %15735 = vmatprep.subr.bf16.mxu1 %v17186_v21 }
0x134d   :  { %15737 = vmatpush3.bf16.msra.mxu1 %v17298_v24 }
0x134e   :  { %15738 = vmatprep.subr.bf16.mxu1 %v17186_v21 }
0x1350   :  { %13555 = vmatmul.mubr.msk.f32.vlgmr.msra.gmra.mrb[20].mxu1 %vm450_vm3, %v3810_v37 }
0x1351   :  { %15740 = vmatpush3.bf16.msra.mxu1 %v17352_v56  ;;  %13573 = vmatprep.mubr.msk.f32.mxu1 %vm17187_vm1, %v17188_v31 }
0x1352   :  { %15741 = vmatprep.subr.bf16.mxu1 %v17186_v21 }
0x1355   :  { %15743 = vmatpush3.bf16.msra.mxu1 %v17364_v61 }
0x1356   :  { %15744 = vmatprep.subr.bf16.mxu1 %v17186_v21 }
0x1359   :  { %15746 = vmatpush3.bf16.msra.mxu1 %v17376_v0 }
0x135a   :  { %15747 = vmatprep.subr.bf16.mxu1 %v17186_v21 }
0x135d   :  { %15749 = vmatpush3.bf16.msra.mxu1 %v17386_v3 }
0x135e   :  { %15768 = vmatprep.subr.bf16.mxu1 %v17186_v21 }
0x141b   :  { %v3633_v10 = vpop.f32.mrb[18].mxu1 }
0x141c   :  { %v16891_v5 = vadd.f32 %v17930_v50, %v3633_v10  ;;  %v13515_v40 = vpop.f32.mrb[19].mxu1 }
0x141d   :  { %v1086_v40 = vrot.slane %v17596_v62, %v17870_v27  ;;  %v4144_v62 = vld [vmem:[%s20345_s7 + $0x10] sm:$0xff] }
0x141e   :  { %17102 = vtanh.f32 %v16891_v5 }
0x1428   :  { %v18183_v19 = vpop.eup %17102 }
0x1429   :  { %13544 = vmatmul.mubr.msk.f32.vlgmr.msra.gmra.mrb[20].mxu0 %vm524_vm5, %v18183_v19 }
0x142a   :  { %15752 = vmatpush3.bf16.msra.mxu0 %v17291_v22  ;;  %13584 = vmatprep.mubr.msk.f32.mxu0 %vm17187_vm1, %v17188_v31 }
0x142b   :  { %15753 = vmatprep.subr.bf16.mxu0 %v17186_v21 }
0x142e   :  { %15755 = vmatpush3.bf16.msra.mxu0 %v17298_v24 }
0x142f   :  { %15756 = vmatprep.subr.bf16.mxu0 %v17186_v21 }
0x1431   :  { %13585 = vmatmul.mubr.msk.f32.vlgmr.msra.gmra.mrb[22].mxu0 %vm450_vm3, %v3976_v33  ;;  %v4143_v33 = vld [vmem:[%s20345_s7 + $0x8] sm:$0xff] }
0x1432   :  { %15758 = vmatpush3.bf16.msra.mxu0 %v17352_v56  ;;  %13603 = vmatprep.mubr.msk.f32.mxu0 %vm17187_vm1, %v17188_v31 }
0x1433   :  { %15759 = vmatprep.subr.bf16.mxu0 %v17186_v21 }
0x1436   :  { %15761 = vmatpush3.bf16.msra.mxu0 %v17364_v61 }
0x1437   :  { %15762 = vmatprep.subr.bf16.mxu0 %v17186_v21 }
0x143a   :  { %15764 = vmatpush3.bf16.msra.mxu0 %v17376_v0 }
0x143b   :  { %15765 = vmatprep.subr.bf16.mxu0 %v17186_v21 }
0x143e   :  { %15767 = vmatpush3.bf16.msra.mxu0 %v17386_v3 }
0x143f   :  { %15804 = vmatprep.subr.bf16.mxu0 %v17186_v21 }
0x14fc   :  { %v3798_v22 = vpop.f32.mrb[20].mxu0 }
0x14fd   :  { %v16892_v24 = vadd.f32 %v17930_v50, %v3798_v22  ;;  %v13545_v45 = vpop.f32.mrb[21].mxu0 }
0x14ff   :  { %17104 = vtanh.f32 %v16892_v24 }
0x1509   :  { %v18207_v56 = vpop.eup %17104 }
0x150a   :  { %3804 = vst.msk [vmem:[#allocation2 + $0x14] sm:$0x3] %vm600_vm6, %v18207_v56  ;;  %13574 = vmatmul.mubr.msk.f32.vlgmr.msra.gmra.mrb[20].mxu1 %vm524_vm5, %v18207_v56 }
0x150b   :  { %13638 = vmatprep.mubr.msk.f32.mxu1 %vm17187_vm1, %v17188_v31  ;;  %15770 = vmatpush3.bf16.msra.mxu1 %v18232_v15 }
0x150c   :  { %15771 = vmatprep.subr.bf16.mxu1 %v17186_v21 }
0x150f   :  { %15773 = vmatpush3.bf16.msra.mxu1 %v18238_v57 }
0x1510   :  { %15774 = vmatprep.subr.bf16.mxu1 %v17186_v21 }
0x1513   :  { %15776 = vmatpush3.bf16.msra.mxu1 %v18248_v14 }
0x1514   :  { %15777 = vmatprep.subr.bf16.mxu1 %v17186_v21 }
0x1517   :  { %15779 = vmatpush3.bf16.msra.mxu1 %v18258_v16 }
0x1518   :  { %15780 = vmatprep.subr.bf16.mxu1 %v17186_v21 }
0x151b   :  { %15782 = vmatpush3.bf16.msra.mxu1 %v18268_v30 }
0x151c   :  { %15783 = vmatprep.subr.bf16.mxu1 %v17186_v21 }
0x151f   :  { %15785 = vmatpush3.bf16.msra.mxu1 %v18278_v18 }
0x1520   :  { %15786 = vmatprep.subr.bf16.mxu1 %v17186_v21 }
0x1523   :  { %15788 = vmatpush3.bf16.msra.mxu1 %v18288_v1 }
0x1524   :  { %15789 = vmatprep.subr.bf16.mxu1 %v17186_v21 }
0x1527   :  { %15791 = vmatpush3.bf16.msra.mxu1 %v18298_v55 }
0x1528   :  { %15792 = vmatprep.subr.bf16.mxu1 %v17186_v21 }
0x15dd   :  { %v3953_v61 = vpop.f32.mrb[20].mxu1 }
0x15de   :  { %v16893_v0 = vadd.f32 %v17930_v50, %v3953_v61  ;;  %v13575_v3 = vpop.f32.mrb[21].mxu1  ;;  %v4145_v61 = vld [vmem:[%s20345_s7 + $0x18] sm:$0xff] }
0x15df   :  { %v18328_v3 = vpack.c.bf16 %v4145_v61, %v4144_v62  ;;  %v4646_v61 = vld [vmem:[%s20347_s9 + $0x58] sm:$0xff] }
0x15e0   :  { %17106 = vtanh.f32 %v16893_v0 }
0x15ea   :  { %v17107_v53 = vpop.eup %17106 }
0x15eb   :  { %13604 = vmatmul.mubr.msk.f32.vlgmr.msra.gmra.mrb[22].mxu0 %vm524_vm5, %v17107_v53  ;;  %v3966_v47 = vrot.slane %v17107_v53, %v17870_v27 }
0x15ec   :  { %13668 = vmatprep.mubr.msk.f32.mxu0 %vm17187_vm1, %v17188_v31 }
0x15ed   :  { %3967 = vrot.lane.b32.xlu0 %v3966_v47, %s17191_s0  ;;  %v4146_v47 = vld [vmem:[%s20345_s7 + $0x20] sm:$0xff] }
0x165f   :  { %v3968_v32 = vpop.permute.xlu0 %3967 }
0x1660   :  { %3970 = vst.msk [vmem:[#allocation2 + $0x14] sm:$0x3] %vm768_vm7, %v3968_v32 }
0x1661   :  { %3971 = vst.msk [vmem:[#allocation2] sm:$0x3] %vm770_vm8, %v3968_v32  ;;  %v4147_v32 = vld [vmem:[%s20345_s7 + $0x28] sm:$0xff] }
0x1662   :  { %v18342_v59 = vpack.c.bf16 %v4147_v32, %v4146_v47 }
0x1667   :  { %v11682_v51 = vld.sshfl [vmem:[#allocation2 + $0x14] sm:$0x3 pattern:$0x76325410] }
0x16be   :  { %v4118_v7 = vpop.f32.mrb[22].mxu0 }
0x16bf   :  { %v16894_v26 = vadd.f32 %v17930_v50, %v4118_v7  ;;  %v13605_v12 = vpop.f32.mrb[23].mxu0  ;;  %v4142_v50 = vld [vmem:[%s20345_s7] sm:$0xff] }
0x16c0   :  { %v18318_v22 = vpack.c.bf16 %v4143_v33, %v4142_v50  ;;  %v4315_v7 = vld [vmem:[%s20347_s9] sm:$0xff] }
0x16c1   :  { %17108 = vtanh.f32 %v16894_v26  ;;  %v4316_v26 = vld [vmem:[%s20347_s9 + $0x8] sm:$0xff]  ;;  %v4643_v33 = vld [vmem:[%s20347_s9 + $0x40] sm:$0xff] }
0x16c2   :  { %v15811_v12 = vpack.c.bf16 %v4316_v26, %v4315_v7 }
0x16cb   :  { %v17109_v37 = vpop.eup %17108 }
0x16cc   :  { %4124 = vst.msk [vmem:[#allocation2 + $0x16] sm:$0x3] %vm600_vm6, %v17109_v37 }
0x16cd   :  { %4125 = vst.msk [vmem:[#allocation2] sm:$0x3] %vm602_vm4, %v17109_v37  ;;  %v4317_v37 = vld [vmem:[%s20347_s9 + $0x10] sm:$0xff] }
0x16d3   :  { %v11674_v10 = vld.sshfl [vmem:[#allocation2 + $0x16] sm:$0x3 pattern:$0x76325410] }
0x16d4   :  { %4161 = vrot.lane.b32.xlu1 %v11674_v10, %s17191_s0  ;;  %v11678_v5 = vld.sshfl [vmem:[#allocation2] sm:$0x3 pattern:$0x76325410]  ;;  %v4318_v10 = vld [vmem:[%s20347_s9 + $0x18] sm:$0xff] }
0x16d5   :  { %v4151_v24 = vld [vmem:[#allocation2] sm:$0x3] }
0x16d8   :  { %4481 = vrot.lane.b32.xlu1 %v11678_v5, %s17191_s0 }
0x16dc   :  { %1087 = vrot.lane.b32.xlu1 %v1086_v40, %s17191_s0  ;;  %v15814_v40 = vpack.c.bf16 %v4318_v10, %v4317_v37 }
0x16e0   :  { %4810 = vrot.lane.b32.xlu1 %v11682_v51, %s17191_s0  ;;  %v4472_v51 = vld [vmem:[#allocation2 + $0x14] sm:$0x3] }
0x1746   :  { %v4162_v45 = vpop.permute.xlu1 %4161 }
0x1747   :  { %v4164_v0 = vsel %vm524_vm5, %v4151_v24, %v4162_v45  ;;  %v4644_v24 = vld [vmem:[%s20347_s9 + $0x48] sm:$0xff]  ;;  %v4645_v45 = vld [vmem:[%s20347_s9 + $0x50] sm:$0xff] }
0x1748   :  { %13639 = vmatmul.mubr.f32.vlgmr.msra.gmra.mrb[22].mxu1 %v4164_v0  ;;  %v15853_v62 = vpack.c.bf16 %v4644_v24, %v4643_v33  ;;  %v15856_v0 = vpack.c.bf16 %v4646_v61, %v4645_v45  ;;  %v4961_v24 = vld [vmem:[%s20347_s9 + $0x80] sm:$0xff]  ;;  %v4962_v45 = vld [vmem:[%s20347_s9 + $0x88] sm:$0xff] }
0x1749   :  { %15794 = vmatpush3.bf16.msra.mxu1 %v18318_v22  ;;  %13657 = vmatprep.mubr.msk.f32.mxu1 %vm17187_vm1, %v17188_v31  ;;  %v15901_v61 = vpack.c.bf16 %v4962_v45, %v4961_v24 }
0x174a   :  { %v18332_v53 = vpop.permute.xlu1 %4481  ;;  %15795 = vmatprep.subr.bf16.mxu1 %v17186_v21 }
0x174b   :  { %v4484_v50 = vsel %vm524_vm5, %v18332_v53, %v4472_v51 }
0x174d   :  { %15797 = vmatpush3.bf16.msra.mxu1 %v18328_v3 }
0x174e   :  { %v1088_v49 = vpop.permute.xlu1 %1087  ;;  %15798 = vmatprep.subr.bf16.mxu1 %v17186_v21 }
0x174f   :  { %1090 = vst.msk [vmem:[#allocation2 + $0x2] sm:$0x3] %vm768_vm7, %v1088_v49 }
0x1750   :  { %1091 = vst.msk [vmem:[#allocation2 + $0x12] sm:$0x3] %vm770_vm8, %v1088_v49 }
0x1751   :  { %1245 = vst.msk [vmem:[#allocation2 + $0x12] sm:$0x3] %vm602_vm4, %v17649_v58  ;;  %15800 = vmatpush3.bf16.msra.mxu1 %v18342_v59  ;;  %v4320_v58 = vld [vmem:[%s20347_s9 + $0x5a0] sm:$0xff] }
0x1752   :  { %3484 = vst.msk [vmem:[#allocation2 + $0x12] sm:$0x3] %vm600_vm6, %v18158_v4  ;;  %15801 = vmatprep.subr.bf16.mxu1 %v17186_v21  ;;  %v15805_v8 = vpack.c.bf16 %v4321_v60, %v4320_v58 }
0x1754   :  { %15806 = vmatpush3.bf16.msra.mxu0 %v15805_v8  ;;  %v4722_v8 = vld [vmem:[%s20347_s9 + $0x568] sm:$0xff] }
0x1755   :  { %15803 = vmatpush3.bf16.msra.mxu1 %v18358_v36  ;;  %15807 = vmatprep.subr.bf16.mxu0 %v17186_v21 }
0x1756   :  { %15852 = vmatprep.subr.bf16.mxu1 %v17186_v21 }
0x1758   :  { %13658 = vmatmul.mubr.f32.vlgmr.msra.gmra.mrb[22].mxu1 %v17188_v31  ;;  %15809 = vmatpush3.bf16.msra.mxu0 %v15808_v20  ;;  %v15859_v20 = vpack.c.bf16 %v4722_v8, %v4721_v13 }
0x1759   :  { %13744 = vmatprep.mubr.msk.f32.mxu1 %vm17187_vm1, %v17188_v31  ;;  %15810 = vmatprep.subr.bf16.mxu0 %v17186_v21 }
0x175a   :  { %15854 = vmatpush3.bf16.msra.mxu1 %v15853_v62  ;;  %v4963_v62 = vld [vmem:[%s20347_s9 + $0x90] sm:$0xff] }
0x175b   :  { %15855 = vmatprep.subr.bf16.mxu1 %v17186_v21 }
0x175e   :  { %15857 = vmatpush3.bf16.msra.mxu1 %v15856_v0 }
0x175f   :  { %15858 = vmatprep.subr.bf16.mxu1 %v17186_v21 }
0x182b   :  { %v4307_v34 = vpop.f32.mrb[22].mxu1 }
0x182c   :  { %v16895_v38 = vadd.f32 %v18383_v9, %v4307_v34  ;;  %v13659_v35 = vpop.f32.mrb[23].mxu1 }
0x182d   :  { %v4724_v35 = vld [vmem:[%s20347_s9 + $0x578] sm:$0xff] }
0x182e   :  { %17110 = vtanh.f32 %v16895_v38  ;;  %v4723_v38 = vld [vmem:[%s20347_s9 + $0x570] sm:$0xff] }
0x1838   :  { %v17111_v29 = vpop.eup %17110 }
0x1839   :  { %v4313_v28 = vmax.f32 %v17111_v29, 0.0 }
0x183b   :  { %4325 = vrot.lane.b32.xlu0 %v4313_v28, %s17192_s15  ;;  %4314 = vst.msk [vmem:[%s20350_s12] sm:$0x3] %vm600_vm6, %v4313_v28 }
0x183c   :  { %4319 = vst.msk [vmem:[%s20350_s12 + $0x16] sm:$0x3] %vm602_vm4, %v4313_v28 }
0x18ad   :  { %v4326_v5 = vpop.permute.xlu0 %4325 }
0x18ae   :  { %13669 = vmatmul.mubr.msk.f32.vlgmr.msra.gmra.mrb[24].mxu0 %vm450_vm3, %v4326_v5 }
0x18af   :  { %15812 = vmatpush3.bf16.msra.mxu0 %v15811_v12  ;;  %13679 = vmatprep.mubr.msk.f32.mxu0 %vm17187_vm1, %v17188_v31  ;;  %v1406_v12 = vrot.slane %v17695_v46, %v17870_v27  ;;  %v4811_v46 = vpop.permute.xlu1 %4810 }
0x18b0   :  { %15813 = vmatprep.subr.bf16.mxu0 %v17186_v21 }
0x18b3   :  { %15815 = vmatpush3.bf16.msra.mxu0 %v15814_v40 }
0x18b4   :  { %15816 = vmatprep.subr.bf16.mxu0 %v17186_v21 }
0x18b6   :  { %13680 = vmatmul.mubr.msk.f32.vlgmr.msra.gmra.mrb[26].mxu0 %vm450_vm3, %v4313_v28  ;;  %v3646_v28 = vrot.slane %v18183_v19, %v17870_v27 }
0x18b7   :  { %15818 = vmatpush3.bf16.msra.mxu0 %v18232_v15  ;;  %13714 = vmatprep.mubr.msk.f32.mxu0 %vm17187_vm1, %v17188_v31 }
0x18b8   :  { %15819 = vmatprep.subr.bf16.mxu0 %v17186_v21 }
0x18bb   :  { %15821 = vmatpush3.bf16.msra.mxu0 %v18238_v57 }
0x18bc   :  { %15822 = vmatprep.subr.bf16.mxu0 %v17186_v21 }
0x18bf   :  { %15824 = vmatpush3.bf16.msra.mxu0 %v18248_v14 }
0x18c0   :  { %15825 = vmatprep.subr.bf16.mxu0 %v17186_v21 }
0x18c3   :  { %15827 = vmatpush3.bf16.msra.mxu0 %v18258_v16 }
0x18c4   :  { %15828 = vmatprep.subr.bf16.mxu0 %v17186_v21 }
0x18c7   :  { %15830 = vmatpush3.bf16.msra.mxu0 %v18268_v30 }
0x18c8   :  { %15831 = vmatprep.subr.bf16.mxu0 %v17186_v21 }
0x18cb   :  { %15833 = vmatpush3.bf16.msra.mxu0 %v18278_v18 }
0x18cc   :  { %15834 = vmatprep.subr.bf16.mxu0 %v17186_v21 }
0x18cf   :  { %15836 = vmatpush3.bf16.msra.mxu0 %v18288_v1 }
0x18d0   :  { %15837 = vmatprep.subr.bf16.mxu0 %v17186_v21 }
0x18d3   :  { %15839 = vmatpush3.bf16.msra.mxu0 %v18298_v55 }
0x18d4   :  { %15840 = vmatprep.subr.bf16.mxu0 %v17186_v21 }
0x18d6   :  { %13715 = vmatmul.mubr.f32.vlgmr.msra.gmra.mrb[28].mxu0 %v4484_v50 }
0x18d7   :  { %15842 = vmatpush3.bf16.msra.mxu0 %v18318_v22  ;;  %13733 = vmatprep.mubr.msk.f32.mxu0 %vm17187_vm1, %v17188_v31 }
0x18d8   :  { %15843 = vmatprep.subr.bf16.mxu0 %v17186_v21 }
0x18db   :  { %15845 = vmatpush3.bf16.msra.mxu0 %v18328_v3 }
0x18dc   :  { %15846 = vmatprep.subr.bf16.mxu0 %v17186_v21 }
0x18df   :  { %15848 = vmatpush3.bf16.msra.mxu0 %v18342_v59 }
0x18e0   :  { %15849 = vmatprep.subr.bf16.mxu0 %v17186_v21 }
0x18e3   :  { %15851 = vmatpush3.bf16.msra.mxu0 %v18358_v36 }
0x18e4   :  { %15900 = vmatprep.subr.bf16.mxu0 %v17186_v21 }
0x18e6   :  { %13734 = vmatmul.mubr.msk.f32.vlgmr.msra.gmra.mrb[28].mxu0 %vm524_vm5, %v17111_v29  ;;  %v15862_v29 = vpack.c.bf16 %v4724_v35, %v4723_v38  ;;  %v5043_v38 = vld [vmem:[%s20347_s9 + $0x538] sm:$0xff] }
0x18e7   :  { %13820 = vmatprep.mubr.msk.f32.mxu0 %vm17187_vm1, %v17188_v31  ;;  %15902 = vmatpush3.bf16.msra.mxu0 %v15901_v61  ;;  %v5369_v61 = vld [vmem:[%s20347_s9 + $0x4e0] sm:$0xff] }
0x18e8   :  { %15903 = vmatprep.subr.bf16.mxu0 %v17186_v21 }
0x1981   :  { %v4395_v53 = vpop.f32.mrb[24].mxu0 }
0x1982   :  { %v13670_v47 = vpop.f32.mrb[25].mxu0 }
0x1989   :  { %v4467_v32 = vpop.f32.mrb[26].mxu0 }
0x198a   :  { %v18460_v49 = vadd.f32 %v4467_v32, %v4395_v53  ;;  %v13681_v43 = vpop.f32.mrb[27].mxu0 }
0x19b9   :  { %v4624_v54 = vpop.f32.mrb[28].mxu0 }
0x19ba   :  { %v16896_v58 = vadd.f32 %v18383_v9, %v4624_v54  ;;  %v13735_v60 = vpop.f32.mrb[29].mxu0 }
0x19bb   :  { %v5041_v60 = vld [vmem:[%s20347_s9 + $0x528] sm:$0xff] }
0x19bc   :  { %17112 = vtanh.f32 %v16896_v58  ;;  %v5040_v58 = vld [vmem:[%s20347_s9 + $0x520] sm:$0xff] }
0x19bd   :  { %v15907_v8 = vpack.c.bf16 %v5041_v60, %v5040_v58 }
0x19c6   :  { %v17113_v42 = vpop.eup %17112 }
0x19c7   :  { %v18469_v34 = vmax.f32 %v17113_v42, 0.0 }
0x19c9   :  { %4725 = vrot.lane.b32.xlu0 %v18469_v34, %s17192_s15  ;;  %13745 = vmatmul.mubr.msk.f32.vlgmr.msra.gmra.mrb[24].mxu1 %vm450_vm3, %v18469_v34 }
0x19ca   :  { %15860 = vmatpush3.bf16.msra.mxu1 %v15859_v20  ;;  %13755 = vmatprep.mubr.msk.f32.mxu1 %vm17187_vm1, %v17188_v31  ;;  %v5042_v20 = vld [vmem:[%s20347_s9 + $0x530] sm:$0xff] }
0x19cb   :  { %15861 = vmatprep.subr.bf16.mxu1 %v17186_v21  ;;  %v15910_v35 = vpack.c.bf16 %v5043_v38, %v5042_v20 }
0x19cd   :  { %3647 = vrot.lane.b32.xlu0 %v3646_v28, %s17191_s0 }
0x19ce   :  { %15863 = vmatpush3.bf16.msra.mxu1 %v15862_v29 }
0x19cf   :  { %15864 = vmatprep.subr.bf16.mxu1 %v17186_v21 }
0x1a3b   :  { %v4726_v7 = vpop.permute.xlu0 %4725 }
0x1a3c   :  { %13756 = vmatmul.mubr.msk.f32.vlgmr.msra.gmra.mrb[26].mxu1 %vm450_vm3, %v4726_v7 }
0x1a3d   :  { %15866 = vmatpush3.bf16.msra.mxu1 %v18232_v15  ;;  %13790 = vmatprep.mubr.msk.f32.mxu1 %vm17187_vm1, %v17188_v31 }
0x1a3e   :  { %15867 = vmatprep.subr.bf16.mxu1 %v17186_v21 }
0x1a3f   :  { %v3648_v26 = vpop.permute.xlu0 %3647 }
0x1a40   :  { %3650 = vst.msk [vmem:[#allocation2 + $0x12] sm:$0x3] %vm768_vm7, %v3648_v26 }
0x1a41   :  { %3651 = vst.msk [vmem:[#allocation2 + $0x2] sm:$0x3] %vm770_vm8, %v3648_v26  ;;  %15869 = vmatpush3.bf16.msra.mxu1 %v18238_v57 }
0x1a42   :  { %3805 = vst.msk [vmem:[#allocation2 + $0x2] sm:$0x3] %vm602_vm4, %v18207_v56  ;;  %15870 = vmatprep.subr.bf16.mxu1 %v17186_v21 }
0x1a45   :  { %15872 = vmatpush3.bf16.msra.mxu1 %v18248_v14 }
0x1a46   :  { %15873 = vmatprep.subr.bf16.mxu1 %v17186_v21 }
0x1a47   :  { %v11690_v56 = vld.sshfl [vmem:[#allocation2 + $0x12] sm:$0x3 pattern:$0x76325410] }
0x1a48   :  { %v5120_v28 = vld [vmem:[#allocation2 + $0x12] sm:$0x3] }
0x1a49   :  { %v11686_v19 = vld.sshfl [vmem:[#allocation2 + $0x2] sm:$0x3 pattern:$0x76325410]  ;;  %15875 = vmatpush3.bf16.msra.mxu1 %v18258_v16 }
0x1a4a   :  { %5129 = vrot.lane.b32.xlu1 %v11686_v19, %s17191_s0  ;;  %15876 = vmatprep.subr.bf16.mxu1 %v17186_v21  ;;  %v4800_v37 = vld [vmem:[#allocation2 + $0x2] sm:$0x3] }
0x1a4b   :  { %v4813_v10 = vsel %vm524_vm5, %v4800_v37, %v4811_v46  ;;  %v5292_v37 = vld [vmem:[%s20347_s9 + $0xc8] sm:$0xff]  ;;  %v5293_v46 = vld [vmem:[%s20347_s9 + $0xd0] sm:$0xff] }
0x1a4d   :  { %15878 = vmatpush3.bf16.msra.mxu1 %v18268_v30 }
0x1a4e   :  { %1407 = vrot.lane.b32.xlu1 %v1406_v12, %s17191_s0  ;;  %15879 = vmatprep.subr.bf16.mxu1 %v17186_v21 }
0x1a51   :  { %15881 = vmatpush3.bf16.msra.mxu1 %v18278_v18 }
0x1a52   :  { %5458 = vrot.lane.b32.xlu1 %v11690_v56, %s17191_s0  ;;  %15882 = vmatprep.subr.bf16.mxu1 %v17186_v21  ;;  %v5291_v56 = vld [vmem:[%s20347_s9 + $0xc0] sm:$0xff] }
0x1a55   :  { %15884 = vmatpush3.bf16.msra.mxu1 %v18288_v1 }
0x1a56   :  { %15885 = vmatprep.subr.bf16.mxu1 %v17186_v21 }
0x1a59   :  { %15887 = vmatpush3.bf16.msra.mxu1 %v18298_v55 }
0x1a5a   :  { %15888 = vmatprep.subr.bf16.mxu1 %v17186_v21 }
0x1a5c   :  { %13791 = vmatmul.mubr.f32.vlgmr.msra.gmra.mrb[28].mxu1 %v4813_v10  ;;  %v15949_v10 = vpack.c.bf16 %v5292_v37, %v5291_v56 }
0x1a5d   :  { %15890 = vmatpush3.bf16.msra.mxu1 %v18318_v22  ;;  %13809 = vmatprep.mubr.msk.f32.mxu1 %vm17187_vm1, %v17188_v31 }
0x1a5e   :  { %15891 = vmatprep.subr.bf16.mxu1 %v17186_v21 }
0x1a61   :  { %15893 = vmatpush3.bf16.msra.mxu1 %v18328_v3 }
0x1a62   :  { %15894 = vmatprep.subr.bf16.mxu1 %v17186_v21 }
0x1a65   :  { %15896 = vmatpush3.bf16.msra.mxu1 %v18342_v59 }
0x1a66   :  { %15897 = vmatprep.subr.bf16.mxu1 %v17186_v21 }
0x1a69   :  { %15899 = vmatpush3.bf16.msra.mxu1 %v18358_v36 }
0x1a6a   :  { %15948 = vmatprep.subr.bf16.mxu1 %v17186_v21 }
0x1a6c   :  { %13810 = vmatmul.mubr.msk.f32.vlgmr.msra.gmra.mrb[28].mxu1 %vm524_vm5, %v17113_v42 }
0x1a6d   :  { %13896 = vmatprep.mubr.msk.f32.mxu1 %vm17187_vm1, %v17188_v31  ;;  %15950 = vmatpush3.bf16.msra.mxu1 %v15949_v10 }
0x1a6e   :  { %15951 = vmatprep.subr.bf16.mxu1 %v17186_v21 }
0x1a9c   :  { %v4715_v5 = vpop.f32.mrb[24].mxu1 }
0x1a9d   :  { %v4719_v40 = vadd.f32 %v4715_v5, %v18460_v49  ;;  %v13746_v51 = vpop.f32.mrb[25].mxu1  ;;  %v5294_v5 = vld [vmem:[%s20347_s9 + $0xd8] sm:$0xff] }
0x1abc   :  { %v5130_v50 = vpop.permute.xlu1 %5129 }
0x1abd   :  { %v5132_v7 = vsel %vm524_vm5, %v5130_v50, %v5120_v28 }
0x1ac0   :  { %v1408_v33 = vpop.permute.xlu1 %1407 }
0x1ac1   :  { %1410 = vst.msk [vmem:[#allocation2 + $0x4] sm:$0x3] %vm768_vm7, %v1408_v33 }
0x1ac2   :  { %1411 = vst.msk [vmem:[#allocation2 + $0x10] sm:$0x3] %vm770_vm8, %v1408_v33 }
0x1ac3   :  { %1565 = vst.msk [vmem:[#allocation2 + $0x10] sm:$0x3] %vm602_vm4, %v17723_v17  ;;  %v4964_v17 = vld [vmem:[%s20347_s9 + $0x98] sm:$0xff] }
0x1ac4   :  { %3164 = vst.msk [vmem:[#allocation2 + $0x10] sm:$0x3] %vm600_vm6, %v18109_v2  ;;  %v15904_v0 = vpack.c.bf16 %v4964_v17, %v4963_v62  ;;  %v5370_v17 = vld [vmem:[%s20347_s9 + $0x4e8] sm:$0xff] }
0x1ac6   :  { %15905 = vmatpush3.bf16.msra.mxu0 %v15904_v0 }
0x1ac7   :  { %15906 = vmatprep.subr.bf16.mxu0 %v17186_v21 }
0x1b0f   :  { %v4795_v53 = vpop.f32.mrb[26].mxu1 }
0x1b10   :  { %v4799_v47 = vadd.f32 %v4795_v53, %v4719_v40  ;;  %v13757_v32 = vpop.f32.mrb[27].mxu1  ;;  %v15952_v40 = vpack.c.bf16 %v5294_v5, %v5293_v46  ;;  %v15955_v53 = vpack.c.bf16 %v5370_v17, %v5369_v61  ;;  %v5690_v17 = vld [vmem:[%s20347_s9 + $0x4b0] sm:$0xff] }
0x1b11   :  { %v5371_v32 = vld [vmem:[%s20347_s9 + $0x4f0] sm:$0xff] }
0x1b12   :  { %15953 = vmatpush3.bf16.msra.mxu1 %v15952_v40 }
0x1b13   :  { %15954 = vmatprep.subr.bf16.mxu1 %v17186_v21 }
0x1b3f   :  { %v4953_v49 = vpop.f32.mrb[28].mxu1 }
0x1b40   :  { %v16897_v43 = vadd.f32 %v18383_v9, %v4953_v49  ;;  %v13811_v54 = vpop.f32.mrb[29].mxu1  ;;  %v5372_v49 = vld [vmem:[%s20347_s9 + $0x4f8] sm:$0xff] }
0x1b41   :  { %v3326_v54 = vrot.slane %v18134_v11, %v17870_v27 }
0x1b42   :  { %17114 = vtanh.f32 %v16897_v43  ;;  %v15958_v43 = vpack.c.bf16 %v5372_v49, %v5371_v32 }
0x1b4c   :  { %v17115_v13 = vpop.eup %17114 }
0x1b4d   :  { %v18558_v42 = vmax.f32 %v17115_v13, 0.0 }
0x1b4f   :  { %5044 = vrot.lane.b32.xlu0 %v18558_v42, %s17192_s15  ;;  %4960 = vst.msk [vmem:[%s20350_s12 + $0x2] sm:$0x3] %vm600_vm6, %v18558_v42  ;;  %13821 = vmatmul.mubr.msk.f32.vlgmr.msra.gmra.mrb[30].mxu0 %vm450_vm3, %v18558_v42 }
0x1b50   :  { %15908 = vmatpush3.bf16.msra.mxu0 %v15907_v8  ;;  %13831 = vmatprep.mubr.msk.f32.mxu0 %vm17187_vm1, %v17188_v31  ;;  %v5459_v8 = vpop.permute.xlu1 %5458 }
0x1b51   :  { %15909 = vmatprep.subr.bf16.mxu0 %v17186_v21 }
0x1b54   :  { %15911 = vmatpush3.bf16.msra.mxu0 %v15910_v35 }
0x1b55   :  { %15912 = vmatprep.subr.bf16.mxu0 %v17186_v21 }
0x1bc1   :  { %v5045_v29 = vpop.permute.xlu0 %5044 }
0x1bc2   :  { %13832 = vmatmul.mubr.msk.f32.vlgmr.msra.gmra.mrb[32].mxu0 %vm450_vm3, %v5045_v29 }
0x1bc3   :  { %15914 = vmatpush3.bf16.msra.mxu0 %v18232_v15  ;;  %13866 = vmatprep.mubr.msk.f32.mxu0 %vm17187_vm1, %v17188_v31 }
0x1bc4   :  { %15915 = vmatprep.subr.bf16.mxu0 %v17186_v21 }
0x1bc7   :  { %15917 = vmatpush3.bf16.msra.mxu0 %v18238_v57 }
0x1bc8   :  { %15918 = vmatprep.subr.bf16.mxu0 %v17186_v21 }
0x1bcb   :  { %15920 = vmatpush3.bf16.msra.mxu0 %v18248_v14 }
0x1bcc   :  { %15921 = vmatprep.subr.bf16.mxu0 %v17186_v21 }
0x1bcf   :  { %15923 = vmatpush3.bf16.msra.mxu0 %v18258_v16 }
0x1bd0   :  { %15924 = vmatprep.subr.bf16.mxu0 %v17186_v21 }
0x1bd3   :  { %15926 = vmatpush3.bf16.msra.mxu0 %v18268_v30 }
0x1bd4   :  { %15927 = vmatprep.subr.bf16.mxu0 %v17186_v21 }
0x1bd7   :  { %15929 = vmatpush3.bf16.msra.mxu0 %v18278_v18 }
0x1bd8   :  { %15930 = vmatprep.subr.bf16.mxu0 %v17186_v21 }
0x1bdb   :  { %15932 = vmatpush3.bf16.msra.mxu0 %v18288_v1 }
0x1bdc   :  { %15933 = vmatprep.subr.bf16.mxu0 %v17186_v21 }
0x1bdf   :  { %15935 = vmatpush3.bf16.msra.mxu0 %v18298_v55 }
0x1be0   :  { %15936 = vmatprep.subr.bf16.mxu0 %v17186_v21 }
0x1be2   :  { %13867 = vmatmul.mubr.f32.vlgmr.msra.gmra.mrb[34].mxu0 %v5132_v7 }
0x1be3   :  { %15938 = vmatpush3.bf16.msra.mxu0 %v18318_v22  ;;  %13885 = vmatprep.mubr.msk.f32.mxu0 %vm17187_vm1, %v17188_v31 }
0x1be4   :  { %15939 = vmatprep.subr.bf16.mxu0 %v17186_v21 }
0x1be7   :  { %15941 = vmatpush3.bf16.msra.mxu0 %v18328_v3 }
0x1be8   :  { %15942 = vmatprep.subr.bf16.mxu0 %v17186_v21 }
0x1beb   :  { %15944 = vmatpush3.bf16.msra.mxu0 %v18342_v59 }
0x1bec   :  { %15945 = vmatprep.subr.bf16.mxu0 %v17186_v21 }
0x1bef   :  { %15947 = vmatpush3.bf16.msra.mxu0 %v18358_v36 }
0x1bf0   :  { %15996 = vmatprep.subr.bf16.mxu0 %v17186_v21 }
0x1bf2   :  { %13886 = vmatmul.mubr.msk.f32.vlgmr.msra.gmra.mrb[34].mxu0 %vm524_vm5, %v17115_v13 }
0x1bf3   :  { %13972 = vmatprep.mubr.msk.f32.mxu0 %vm17187_vm1, %v17188_v31 }
0x1c22   :  { %v5034_v26 = vpop.f32.mrb[30].mxu0 }
0x1c23   :  { %v5038_v19 = vadd.f32 %v5034_v26, %v4799_v47  ;;  %v13822_v12 = vpop.f32.mrb[31].mxu0  ;;  %v5609_v26 = vld [vmem:[%s20347_s9 + $0x100] sm:$0xff] }
0x1c24   :  { %v5611_v12 = vld [vmem:[%s20347_s9 + $0x110] sm:$0xff] }
0x1c95   :  { %v5114_v51 = vpop.f32.mrb[32].mxu0 }
0x1c96   :  { %v18626_v50 = vadd.f32 %v5114_v51, %v5038_v19  ;;  %v13833_v33 = vpop.f32.mrb[33].mxu0  ;;  %v5610_v19 = vld [vmem:[%s20347_s9 + $0x108] sm:$0xff] }
0x1c97   :  { %v15997_v56 = vpack.c.bf16 %v5610_v19, %v5609_v26  ;;  %v5688_v33 = vld [vmem:[%s20347_s9 + $0x4a0] sm:$0xff] }
0x1c99   :  { %15998 = vmatpush3.bf16.msra.mxu0 %v15997_v56  ;;  %v6017_v56 = vld [vmem:[%s20347_s9 + $0x460] sm:$0xff] }
0x1c9a   :  { %15999 = vmatprep.subr.bf16.mxu0 %v17186_v21 }
0x1cc5   :  { %v5272_v24 = vpop.f32.mrb[34].mxu0 }
0x1cc6   :  { %v16898_v45 = vadd.f32 %v18383_v9, %v5272_v24  ;;  %v13887_v62 = vpop.f32.mrb[35].mxu0  ;;  %v5689_v24 = vld [vmem:[%s20347_s9 + $0x4a8] sm:$0xff] }
0x1cc7   :  { %v16003_v62 = vpack.c.bf16 %v5689_v24, %v5688_v33 }
0x1cc8   :  { %17116 = vtanh.f32 %v16898_v45 }
0x1cd2   :  { %v17117_v0 = vpop.eup %17116 }
0x1cd3   :  { %v18635_v47 = vmax.f32 %v17117_v0, 0.0 }
0x1cd5   :  { %5373 = vrot.lane.b32.xlu0 %v18635_v47, %s17192_s15  ;;  %13897 = vmatmul.mubr.msk.f32.vlgmr.msra.gmra.mrb[30].mxu1 %vm450_vm3, %v18635_v47 }
0x1cd6   :  { %15956 = vmatpush3.bf16.msra.mxu1 %v15955_v53  ;;  %13907 = vmatprep.mubr.msk.f32.mxu1 %vm17187_vm1, %v17188_v31 }
0x1cd7   :  { %15957 = vmatprep.subr.bf16.mxu1 %v17186_v21 }
0x1cd9   :  { %3327 = vrot.lane.b32.xlu0 %v3326_v54, %s17191_s0 }
0x1cda   :  { %15959 = vmatpush3.bf16.msra.mxu1 %v15958_v43 }
0x1cdb   :  { %15960 = vmatprep.subr.bf16.mxu1 %v17186_v21 }
0x1d47   :  { %v5374_v58 = vpop.permute.xlu0 %5373 }
0x1d48   :  { %13908 = vmatmul.mubr.msk.f32.vlgmr.msra.gmra.mrb[32].mxu1 %vm450_vm3, %v5374_v58 }
0x1d49   :  { %15962 = vmatpush3.bf16.msra.mxu1 %v18232_v15  ;;  %13942 = vmatprep.mubr.msk.f32.mxu1 %vm17187_vm1, %v17188_v31 }
0x1d4a   :  { %15963 = vmatprep.subr.bf16.mxu1 %v17186_v21 }
0x1d4b   :  { %v3328_v60 = vpop.permute.xlu0 %3327 }
0x1d4c   :  { %3330 = vst.msk [vmem:[#allocation2 + $0x10] sm:$0x3] %vm768_vm7, %v3328_v60 }
0x1d4d   :  { %3331 = vst.msk [vmem:[#allocation2 + $0x4] sm:$0x3] %vm770_vm8, %v3328_v60  ;;  %15965 = vmatpush3.bf16.msra.mxu1 %v18238_v57 }
0x1d4e   :  { %3485 = vst.msk [vmem:[#allocation2 + $0x4] sm:$0x3] %vm602_vm4, %v18158_v4  ;;  %15966 = vmatprep.subr.bf16.mxu1 %v17186_v21  ;;  %v1726_v4 = vrot.slane %v17786_v39, %v17870_v27 }
0x1d51   :  { %15968 = vmatpush3.bf16.msra.mxu1 %v18248_v14 }
0x1d52   :  { %15969 = vmatprep.subr.bf16.mxu1 %v17186_v21 }
0x1d53   :  { %v18678_v13 = vld.sshfl [vmem:[#allocation2 + $0x10] sm:$0x3 pattern:$0x76325410] }
0x1d54   :  { %v5768_v49 = vld [vmem:[#allocation2 + $0x10] sm:$0x3] }
0x1d55   :  { %v18667_v11 = vld.sshfl [vmem:[#allocation2 + $0x4] sm:$0x3 pattern:$0x76325410]  ;;  %15971 = vmatpush3.bf16.msra.mxu1 %v18258_v16 }
0x1d56   :  { %5777 = vrot.lane.b32.xlu1 %v18667_v11, %s17191_s0  ;;  %15972 = vmatprep.subr.bf16.mxu1 %v17186_v21  ;;  %v5448_v39 = vld [vmem:[#allocation2 + $0x4] sm:$0x3] }
0x1d57   :  { %v5461_v20 = vsel %vm524_vm5, %v5448_v39, %v5459_v8  ;;  %v5940_v39 = vld [vmem:[%s20347_s9 + $0x148] sm:$0xff]  ;;  %v5941_v8 = vld [vmem:[%s20347_s9 + $0x150] sm:$0xff] }
0x1d59   :  { %15974 = vmatpush3.bf16.msra.mxu1 %v18268_v30 }
0x1d5a   :  { %1727 = vrot.lane.b32.xlu1 %v1726_v4, %s17191_s0  ;;  %15975 = vmatprep.subr.bf16.mxu1 %v17186_v21  ;;  %v5939_v4 = vld [vmem:[%s20347_s9 + $0x140] sm:$0xff] }
0x1d5d   :  { %15977 = vmatpush3.bf16.msra.mxu1 %v18278_v18 }
0x1d5e   :  { %6106 = vrot.lane.b32.xlu1 %v18678_v13, %s17191_s0  ;;  %15978 = vmatprep.subr.bf16.mxu1 %v17186_v21 }
0x1d61   :  { %15980 = vmatpush3.bf16.msra.mxu1 %v18288_v1 }
0x1d62   :  { %15981 = vmatprep.subr.bf16.mxu1 %v17186_v21 }
0x1d65   :  { %15983 = vmatpush3.bf16.msra.mxu1 %v18298_v55 }
0x1d66   :  { %15984 = vmatprep.subr.bf16.mxu1 %v17186_v21 }
0x1d68   :  { %13943 = vmatmul.mubr.f32.vlgmr.msra.gmra.mrb[34].mxu1 %v5461_v20  ;;  %v16045_v20 = vpack.c.bf16 %v5940_v39, %v5939_v4 }
0x1d69   :  { %15986 = vmatpush3.bf16.msra.mxu1 %v18318_v22  ;;  %13961 = vmatprep.mubr.msk.f32.mxu1 %vm17187_vm1, %v17188_v31 }
0x1d6a   :  { %15987 = vmatprep.subr.bf16.mxu1 %v17186_v21 }
0x1d6d   :  { %15989 = vmatpush3.bf16.msra.mxu1 %v18328_v3 }
0x1d6e   :  { %15990 = vmatprep.subr.bf16.mxu1 %v17186_v21 }
0x1d71   :  { %15992 = vmatpush3.bf16.msra.mxu1 %v18342_v59 }
0x1d72   :  { %15993 = vmatprep.subr.bf16.mxu1 %v17186_v21 }
0x1d75   :  { %15995 = vmatpush3.bf16.msra.mxu1 %v18358_v36 }
0x1d76   :  { %16044 = vmatprep.subr.bf16.mxu1 %v17186_v21 }
0x1d78   :  { %13962 = vmatmul.mubr.msk.f32.vlgmr.msra.gmra.mrb[34].mxu1 %vm524_vm5, %v17117_v0  ;;  %v5691_v0 = vld [vmem:[%s20347_s9 + $0x4b8] sm:$0xff] }
0x1d79   :  { %14048 = vmatprep.mubr.msk.f32.mxu1 %vm17187_vm1, %v17188_v31  ;;  %v16006_v53 = vpack.c.bf16 %v5691_v0, %v5690_v17  ;;  %16046 = vmatpush3.bf16.msra.mxu1 %v16045_v20 }
0x1d7a   :  { %16047 = vmatprep.subr.bf16.mxu1 %v17186_v21 }
0x1da8   :  { %v5363_v38 = vpop.f32.mrb[30].mxu1 }
0x1da9   :  { %v5367_v35 = vadd.f32 %v5363_v38, %v18626_v50  ;;  %v13898_v29 = vpop.f32.mrb[31].mxu1  ;;  %v5942_v38 = vld [vmem:[%s20347_s9 + $0x158] sm:$0xff] }
0x1dc8   :  { %v5778_v28 = vpop.permute.xlu1 %5777 }
0x1dc9   :  { %v5780_v43 = vsel %vm524_vm5, %v5778_v28, %v5768_v49 }
0x1dcc   :  { %v1728_v7 = vpop.permute.xlu1 %1727 }
0x1dcd   :  { %1730 = vst.msk [vmem:[#allocation2 + $0x6] sm:$0x3] %vm768_vm7, %v1728_v7 }
0x1dce   :  { %1731 = vst.msk [vmem:[#allocation2 + $0xe] sm:$0x3] %vm770_vm8, %v1728_v7 }
0x1dcf   :  { %1885 = vst.msk [vmem:[#allocation2 + $0xe] sm:$0x3] %vm602_vm4, %v17825_v23  ;;  %v5612_v23 = vld [vmem:[%s20347_s9 + $0x118] sm:$0xff] }
0x1dd0   :  { %2844 = vst.msk [vmem:[#allocation2 + $0xe] sm:$0x3] %vm600_vm6, %v18061_v63  ;;  %v16000_v37 = vpack.c.bf16 %v5612_v23, %v5611_v12  ;;  %v6018_v23 = vld [vmem:[%s20347_s9 + $0x468] sm:$0xff] }
0x1dd2   :  { %16001 = vmatpush3.bf16.msra.mxu0 %v16000_v37 }
0x1dd3   :  { %16002 = vmatprep.subr.bf16.mxu0 %v17186_v21 }
0x1e1b   :  { %v5443_v46 = vpop.f32.mrb[32].mxu1 }
0x1e1c   :  { %v5447_v10 = vadd.f32 %v5443_v46, %v5367_v35  ;;  %v13909_v5 = vpop.f32.mrb[33].mxu1  ;;  %v16048_v35 = vpack.c.bf16 %v5942_v38, %v5941_v8  ;;  %v16051_v46 = vpack.c.bf16 %v6018_v23, %v6017_v56  ;;  %v6338_v23 = vld [vmem:[%s20347_s9 + $0x430] sm:$0xff] }
0x1e1d   :  { %v6019_v5 = vld [vmem:[%s20347_s9 + $0x470] sm:$0xff] }
0x1e1e   :  { %16049 = vmatpush3.bf16.msra.mxu1 %v16048_v35 }
0x1e1f   :  { %16050 = vmatprep.subr.bf16.mxu1 %v17186_v21 }
0x1e4b   :  { %v5601_v40 = vpop.f32.mrb[34].mxu1 }
0x1e4c   :  { %v16899_v51 = vadd.f32 %v18383_v9, %v5601_v40  ;;  %v13963_v50 = vpop.f32.mrb[35].mxu1  ;;  %v6020_v40 = vld [vmem:[%s20347_s9 + $0x478] sm:$0xff] }
0x1e4d   :  { %v3006_v50 = vrot.slane %v18085_v44, %v17870_v27 }
0x1e4e   :  { %17118 = vtanh.f32 %v16899_v51  ;;  %v16054_v51 = vpack.c.bf16 %v6020_v40, %v6019_v5 }
0x1e58   :  { %v17119_v45 = vpop.eup %17118 }
0x1e59   :  { %v18730_v61 = vmax.f32 %v17119_v45, 0.0 }
0x1e5b   :  { %5692 = vrot.lane.b32.xlu0 %v18730_v61, %s17192_s15  ;;  %5608 = vst.msk [vmem:[%s20350_s12 + $0x4] sm:$0x3] %vm600_vm6, %v18730_v61  ;;  %13973 = vmatmul.mubr.msk.f32.vlgmr.msra.gmra.mrb[36].mxu0 %vm450_vm3, %v18730_v61 }
0x1e5c   :  { %16004 = vmatpush3.bf16.msra.mxu0 %v16003_v62  ;;  %13983 = vmatprep.mubr.msk.f32.mxu0 %vm17187_vm1, %v17188_v31  ;;  %v6107_v62 = vpop.permute.xlu1 %6106 }
0x1e5d   :  { %16005 = vmatprep.subr.bf16.mxu0 %v17186_v21 }
0x1e60   :  { %16007 = vmatpush3.bf16.msra.mxu0 %v16006_v53 }
0x1e61   :  { %16008 = vmatprep.subr.bf16.mxu0 %v17186_v21 }
0x1ecd   :  { %v5693_v32 = vpop.permute.xlu0 %5692 }
0x1ece   :  { %13984 = vmatmul.mubr.msk.f32.vlgmr.msra.gmra.mrb[38].mxu0 %vm450_vm3, %v5693_v32 }
0x1ecf   :  { %16010 = vmatpush3.bf16.msra.mxu0 %v18232_v15  ;;  %14018 = vmatprep.mubr.msk.f32.mxu0 %vm17187_vm1, %v17188_v31 }
0x1ed0   :  { %16011 = vmatprep.subr.bf16.mxu0 %v17186_v21 }
0x1ed3   :  { %16013 = vmatpush3.bf16.msra.mxu0 %v18238_v57 }
0x1ed4   :  { %16014 = vmatprep.subr.bf16.mxu0 %v17186_v21 }
0x1ed7   :  { %16016 = vmatpush3.bf16.msra.mxu0 %v18248_v14 }
0x1ed8   :  { %16017 = vmatprep.subr.bf16.mxu0 %v17186_v21 }
0x1edb   :  { %16019 = vmatpush3.bf16.msra.mxu0 %v18258_v16 }
0x1edc   :  { %16020 = vmatprep.subr.bf16.mxu0 %v17186_v21 }
0x1edf   :  { %16022 = vmatpush3.bf16.msra.mxu0 %v18268_v30 }
0x1ee0   :  { %16023 = vmatprep.subr.bf16.mxu0 %v17186_v21 }
0x1ee3   :  { %16025 = vmatpush3.bf16.msra.mxu0 %v18278_v18 }
0x1ee4   :  { %16026 = vmatprep.subr.bf16.mxu0 %v17186_v21 }
0x1ee7   :  { %16028 = vmatpush3.bf16.msra.mxu0 %v18288_v1 }
0x1ee8   :  { %16029 = vmatprep.subr.bf16.mxu0 %v17186_v21 }
0x1eeb   :  { %16031 = vmatpush3.bf16.msra.mxu0 %v18298_v55 }
0x1eec   :  { %16032 = vmatprep.subr.bf16.mxu0 %v17186_v21 }
0x1eee   :  { %14019 = vmatmul.mubr.f32.vlgmr.msra.gmra.mrb[40].mxu0 %v5780_v43 }
0x1eef   :  { %16034 = vmatpush3.bf16.msra.mxu0 %v18318_v22  ;;  %14037 = vmatprep.mubr.msk.f32.mxu0 %vm17187_vm1, %v17188_v31 }
0x1ef0   :  { %16035 = vmatprep.subr.bf16.mxu0 %v17186_v21 }
0x1ef3   :  { %16037 = vmatpush3.bf16.msra.mxu0 %v18328_v3 }
0x1ef4   :  { %16038 = vmatprep.subr.bf16.mxu0 %v17186_v21 }
0x1ef7   :  { %16040 = vmatpush3.bf16.msra.mxu0 %v18342_v59 }
0x1ef8   :  { %16041 = vmatprep.subr.bf16.mxu0 %v17186_v21 }
0x1efb   :  { %16043 = vmatpush3.bf16.msra.mxu0 %v18358_v36 }
0x1efc   :  { %16092 = vmatprep.subr.bf16.mxu0 %v17186_v21 }
0x1efe   :  { %14038 = vmatmul.mubr.msk.f32.vlgmr.msra.gmra.mrb[40].mxu0 %vm524_vm5, %v17119_v45 }
0x1eff   :  { %14124 = vmatprep.mubr.msk.f32.mxu0 %vm17187_vm1, %v17188_v31 }
0x1f2e   :  { %v5682_v54 = vpop.f32.mrb[36].mxu0 }
0x1f2f   :  { %v5686_v58 = vadd.f32 %v5682_v54, %v5447_v10  ;;  %v13974_v60 = vpop.f32.mrb[37].mxu0  ;;  %v6257_v54 = vld [vmem:[%s20347_s9 + $0x180] sm:$0xff] }
0x1f30   :  { %v6259_v60 = vld [vmem:[%s20347_s9 + $0x190] sm:$0xff] }
0x1fa1   :  { %v5762_v29 = vpop.f32.mrb[38].mxu0 }
0x1fa2   :  { %v18798_v28 = vadd.f32 %v5762_v29, %v5686_v58  ;;  %v13985_v7 = vpop.f32.mrb[39].mxu0  ;;  %v6258_v58 = vld [vmem:[%s20347_s9 + $0x188] sm:$0xff] }
0x1fa3   :  { %v16093_v4 = vpack.c.bf16 %v6258_v58, %v6257_v54  ;;  %v6336_v7 = vld [vmem:[%s20347_s9 + $0x420] sm:$0xff] }
0x1fa4   :  { %v18975_v54 = vld [vmem:[%s20346_s8] ss:$0 sm:$0xff] }
0x1fa5   :  { %16094 = vmatpush3.bf16.msra.mxu0 %v16093_v4  ;;  %v6665_v4 = vld [vmem:[%s20347_s9 + $0x3e0] sm:$0xff] }
0x1fa6   :  { %16095 = vmatprep.subr.bf16.mxu0 %v17186_v21 }
0x1fd1   :  { %v5920_v26 = vpop.f32.mrb[40].mxu0 }
0x1fd2   :  { %v16900_v19 = vadd.f32 %v18383_v9, %v5920_v26  ;;  %v14039_v12 = vpop.f32.mrb[41].mxu0  ;;  %v6337_v26 = vld [vmem:[%s20347_s9 + $0x428] sm:$0xff] }
0x1fd3   :  { %v16099_v12 = vpack.c.bf16 %v6337_v26, %v6336_v7 }
0x1fd4   :  { %17120 = vtanh.f32 %v16900_v19 }
0x1fde   :  { %v17121_v37 = vpop.eup %17120 }
0x1fdf   :  { %v18807_v10 = vmax.f32 %v17121_v37, 0.0 }
0x1fe1   :  { %6021 = vrot.lane.b32.xlu0 %v18807_v10, %s17192_s15  ;;  %14049 = vmatmul.mubr.msk.f32.vlgmr.msra.gmra.mrb[36].mxu1 %vm450_vm3, %v18807_v10 }
0x1fe2   :  { %16052 = vmatpush3.bf16.msra.mxu1 %v16051_v46  ;;  %14059 = vmatprep.mubr.msk.f32.mxu1 %vm17187_vm1, %v17188_v31 }
0x1fe3   :  { %16053 = vmatprep.subr.bf16.mxu1 %v17186_v21 }
0x1fe5   :  { %3007 = vrot.lane.b32.xlu0 %v3006_v50, %s17191_s0 }
0x1fe6   :  { %16055 = vmatpush3.bf16.msra.mxu1 %v16054_v51 }
0x1fe7   :  { %16056 = vmatprep.subr.bf16.mxu1 %v17186_v21 }
0x2053   :  { %v6022_v33 = vpop.permute.xlu0 %6021 }
0x2054   :  { %14060 = vmatmul.mubr.msk.f32.vlgmr.msra.gmra.mrb[38].mxu1 %vm450_vm3, %v6022_v33 }
0x2055   :  { %16058 = vmatpush3.bf16.msra.mxu1 %v18232_v15  ;;  %14094 = vmatprep.mubr.msk.f32.mxu1 %vm17187_vm1, %v17188_v31 }
0x2056   :  { %16059 = vmatprep.subr.bf16.mxu1 %v17186_v21 }
0x2057   :  { %v3008_v24 = vpop.permute.xlu0 %3007 }
0x2058   :  { %3010 = vst.msk [vmem:[#allocation2 + $0xe] sm:$0x3] %vm768_vm7, %v3008_v24 }
0x2059   :  { %3011 = vst.msk [vmem:[#allocation2 + $0x6] sm:$0x3] %vm770_vm8, %v3008_v24  ;;  %16061 = vmatpush3.bf16.msra.mxu1 %v18238_v57  ;;  %v6587_v24 = vld [vmem:[%s20347_s9 + $0x1c0] sm:$0xff] }
0x205a   :  { %3165 = vst.msk [vmem:[#allocation2 + $0x6] sm:$0x3] %vm602_vm4, %v18109_v2  ;;  %16062 = vmatprep.subr.bf16.mxu1 %v17186_v21  ;;  %v2046_v2 = vrot.slane %v17892_v48, %v17870_v27 }
0x205d   :  { %16064 = vmatpush3.bf16.msra.mxu1 %v18248_v14 }
0x205e   :  { %16065 = vmatprep.subr.bf16.mxu1 %v17186_v21 }
0x205f   :  { %v18850_v45 = vld.sshfl [vmem:[#allocation2 + $0xe] sm:$0x3 pattern:$0x76325410] }
0x2060   :  { %v6416_v5 = vld [vmem:[#allocation2 + $0xe] sm:$0x3] }
0x2061   :  { %v18839_v44 = vld.sshfl [vmem:[#allocation2 + $0x6] sm:$0x3 pattern:$0x76325410]  ;;  %16067 = vmatpush3.bf16.msra.mxu1 %v18258_v16 }
0x2062   :  { %6425 = vrot.lane.b32.xlu1 %v18839_v44, %s17191_s0  ;;  %16068 = vmatprep.subr.bf16.mxu1 %v17186_v21  ;;  %v6096_v48 = vld [vmem:[#allocation2 + $0x6] sm:$0x3] }
0x2063   :  { %v6109_v17 = vsel %vm524_vm5, %v6096_v48, %v6107_v62  ;;  %v6589_v48 = vld [vmem:[%s20347_s9 + $0x1d0] sm:$0xff] }
0x2065   :  { %16070 = vmatpush3.bf16.msra.mxu1 %v18268_v30 }
0x2066   :  { %2047 = vrot.lane.b32.xlu1 %v2046_v2, %s17191_s0  ;;  %16071 = vmatprep.subr.bf16.mxu1 %v17186_v21  ;;  %v6588_v2 = vld [vmem:[%s20347_s9 + $0x1c8] sm:$0xff] }
0x2067   :  { %v16141_v62 = vpack.c.bf16 %v6588_v2, %v6587_v24  ;;  %v6908_v24 = vld [vmem:[%s20347_s9 + $0x218] sm:$0xff] }
0x2069   :  { %16073 = vmatpush3.bf16.msra.mxu1 %v18278_v18 }
0x206a   :  { %6754 = vrot.lane.b32.xlu1 %v18850_v45, %s17191_s0  ;;  %16074 = vmatprep.subr.bf16.mxu1 %v17186_v21 }
0x206d   :  { %16076 = vmatpush3.bf16.msra.mxu1 %v18288_v1 }
0x206e   :  { %16077 = vmatprep.subr.bf16.mxu1 %v17186_v21 }
0x2071   :  { %16079 = vmatpush3.bf16.msra.mxu1 %v18298_v55 }
0x2072   :  { %16080 = vmatprep.subr.bf16.mxu1 %v17186_v21 }
0x2074   :  { %14095 = vmatmul.mubr.f32.vlgmr.msra.gmra.mrb[40].mxu1 %v6109_v17  ;;  %v6590_v17 = vld [vmem:[%s20347_s9 + $0x1d8] sm:$0xff] }
0x2075   :  { %16082 = vmatpush3.bf16.msra.mxu1 %v18318_v22  ;;  %14113 = vmatprep.mubr.msk.f32.mxu1 %vm17187_vm1, %v17188_v31 }
0x2076   :  { %16083 = vmatprep.subr.bf16.mxu1 %v17186_v21 }
0x2079   :  { %16085 = vmatpush3.bf16.msra.mxu1 %v18328_v3 }
0x207a   :  { %16086 = vmatprep.subr.bf16.mxu1 %v17186_v21 }
0x207d   :  { %16088 = vmatpush3.bf16.msra.mxu1 %v18342_v59 }
0x207e   :  { %16089 = vmatprep.subr.bf16.mxu1 %v17186_v21 }
0x2081   :  { %16091 = vmatpush3.bf16.msra.mxu1 %v18358_v36 }
0x2082   :  { %16140 = vmatprep.subr.bf16.mxu1 %v17186_v21 }
0x2084   :  { %14114 = vmatmul.mubr.msk.f32.vlgmr.msra.gmra.mrb[40].mxu1 %vm524_vm5, %v17121_v37 }
0x2085   :  { %14200 = vmatprep.mubr.msk.f32.mxu1 %vm17187_vm1, %v17188_v31  ;;  %16142 = vmatpush3.bf16.msra.mxu1 %v16141_v62 }
0x2086   :  { %16143 = vmatprep.subr.bf16.mxu1 %v17186_v21 }
0x20b4   :  { %v6011_v0 = vpop.f32.mrb[36].mxu1 }
0x20b5   :  { %v6015_v53 = vadd.f32 %v6011_v0, %v18798_v28  ;;  %v14050_v32 = vpop.f32.mrb[37].mxu1  ;;  %v16144_v0 = vpack.c.bf16 %v6590_v17, %v6589_v48 }
0x20b7   :  { %16145 = vmatpush3.bf16.msra.mxu1 %v16144_v0 }
0x20b8   :  { %16146 = vmatprep.subr.bf16.mxu1 %v17186_v21 }
0x20d4   :  { %v6426_v49 = vpop.permute.xlu1 %6425 }
0x20d5   :  { %v6428_v40 = vsel %vm524_vm5, %v6426_v49, %v6416_v5 }
0x20d8   :  { %v2048_v43 = vpop.permute.xlu1 %2047 }
0x20d9   :  { %2050 = vst.msk [vmem:[#allocation2 + $0x8] sm:$0x3] %vm768_vm7, %v2048_v43 }
0x20da   :  { %2051 = vst.msk [vmem:[#allocation2 + $0xc] sm:$0x3] %vm770_vm8, %v2048_v43 }
0x20db   :  { %2205 = vst.msk [vmem:[#allocation2 + $0xc] sm:$0x3] %vm602_vm4, %v17937_v25  ;;  %v6260_v25 = vld [vmem:[%s20347_s9 + $0x198] sm:$0xff] }
0x20dc   :  { %2524 = vst.msk [vmem:[#allocation2 + $0xc] sm:$0x3] %vm600_vm6, %v18013_v41  ;;  %v16096_v39 = vpack.c.bf16 %v6260_v25, %v6259_v60  ;;  %v6666_v25 = vld [vmem:[%s20347_s9 + $0x3e8] sm:$0xff] }
0x20de   :  { %16097 = vmatpush3.bf16.msra.mxu0 %v16096_v39 }
0x20df   :  { %16098 = vmatprep.subr.bf16.mxu0 %v17186_v21 }
0x2127   :  { %v6091_v8 = vpop.f32.mrb[38].mxu1 }
0x2128   :  { %v6095_v20 = vadd.f32 %v6091_v8, %v6015_v53  ;;  %v14061_v38 = vpop.f32.mrb[39].mxu1  ;;  %v16147_v8 = vpack.c.bf16 %v6666_v25, %v6665_v4  ;;  %v6986_v4 = vld [vmem:[%s20347_s9 + $0x3b0] sm:$0xff]  ;;  %v6987_v25 = vld [vmem:[%s20347_s9 + $0x3b8] sm:$0xff] }
0x2129   :  { %v6667_v38 = vld [vmem:[%s20347_s9 + $0x3f0] sm:$0xff] }
0x2157   :  { %v6249_v35 = vpop.f32.mrb[40].mxu1 }
0x2158   :  { %v16901_v29 = vadd.f32 %v18383_v9, %v6249_v35  ;;  %v14115_v28 = vpop.f32.mrb[41].mxu1  ;;  %v6339_v9 = vld [vmem:[%s20347_s9 + $0x438] sm:$0xff] }
0x2159   :  { %v16102_v37 = vpack.c.bf16 %v6339_v9, %v6338_v23  ;;  %v6668_v35 = vld [vmem:[%s20347_s9 + $0x3f8] sm:$0xff]  ;;  %v2686_v28 = vrot.slane %v18037_v52, %v17870_v27 }
0x215a   :  { %17122 = vtanh.f32 %v16901_v29  ;;  %v16150_v29 = vpack.c.bf16 %v6668_v35, %v6667_v38 }
0x2164   :  { %v17123_v19 = vpop.eup %17122 }
0x2165   :  { %v18902_v56 = vmax.f32 %v17123_v19, 0.0 }
0x2167   :  { %6340 = vrot.lane.b32.xlu0 %v18902_v56, %s17192_s15  ;;  %6256 = vst.msk [vmem:[%s20350_s12 + $0x6] sm:$0x3] %vm600_vm6, %v18902_v56  ;;  %14125 = vmatmul.mubr.msk.f32.vlgmr.msra.gmra.mrb[42].mxu0 %vm450_vm3, %v18902_v56 }
0x2168   :  { %16100 = vmatpush3.bf16.msra.mxu0 %v16099_v12  ;;  %14135 = vmatprep.mubr.msk.f32.mxu0 %vm17187_vm1, %v17188_v31  ;;  %v6755_v12 = vpop.permute.xlu1 %6754 }
0x2169   :  { %16101 = vmatprep.subr.bf16.mxu0 %v17186_v21 }
0x216c   :  { %16103 = vmatpush3.bf16.msra.mxu0 %v16102_v37 }
0x216d   :  { %16104 = vmatprep.subr.bf16.mxu0 %v17186_v21 }
0x21d9   :  { %v6341_v46 = vpop.permute.xlu0 %6340 }
0x21da   :  { %14136 = vmatmul.mubr.msk.f32.vlgmr.msra.gmra.mrb[44].mxu0 %vm450_vm3, %v6341_v46 }
0x21db   :  { %16106 = vmatpush3.bf16.msra.mxu0 %v18232_v15  ;;  %14170 = vmatprep.mubr.msk.f32.mxu0 %vm17187_vm1, %v17188_v31 }
0x21dc   :  { %16107 = vmatprep.subr.bf16.mxu0 %v17186_v21 }
0x21df   :  { %16109 = vmatpush3.bf16.msra.mxu0 %v18238_v57 }
0x21e0   :  { %16110 = vmatprep.subr.bf16.mxu0 %v17186_v21 }
0x21e3   :  { %16112 = vmatpush3.bf16.msra.mxu0 %v18248_v14 }
0x21e4   :  { %16113 = vmatprep.subr.bf16.mxu0 %v17186_v21 }
0x21e7   :  { %16115 = vmatpush3.bf16.msra.mxu0 %v18258_v16 }
0x21e8   :  { %16116 = vmatprep.subr.bf16.mxu0 %v17186_v21 }
0x21eb   :  { %16118 = vmatpush3.bf16.msra.mxu0 %v18268_v30 }
0x21ec   :  { %16119 = vmatprep.subr.bf16.mxu0 %v17186_v21 }
0x21ef   :  { %16121 = vmatpush3.bf16.msra.mxu0 %v18278_v18 }
0x21f0   :  { %16122 = vmatprep.subr.bf16.mxu0 %v17186_v21 }
0x21f3   :  { %16124 = vmatpush3.bf16.msra.mxu0 %v18288_v1 }
0x21f4   :  { %16125 = vmatprep.subr.bf16.mxu0 %v17186_v21 }
0x21f7   :  { %16127 = vmatpush3.bf16.msra.mxu0 %v18298_v55 }
0x21f8   :  { %16128 = vmatprep.subr.bf16.mxu0 %v17186_v21 }
0x21fa   :  { %14171 = vmatmul.mubr.f32.vlgmr.msra.gmra.mrb[46].mxu0 %v6428_v40  ;;  %v6905_v40 = vld [vmem:[%s20347_s9 + $0x200] sm:$0xff] }
0x21fb   :  { %16130 = vmatpush3.bf16.msra.mxu0 %v18318_v22  ;;  %14189 = vmatprep.mubr.msk.f32.mxu0 %vm17187_vm1, %v17188_v31 }
0x21fc   :  { %16131 = vmatprep.subr.bf16.mxu0 %v17186_v21 }
0x21ff   :  { %16133 = vmatpush3.bf16.msra.mxu0 %v18328_v3 }
0x2200   :  { %16134 = vmatprep.subr.bf16.mxu0 %v17186_v21 }
0x2203   :  { %16136 = vmatpush3.bf16.msra.mxu0 %v18342_v59 }
0x2204   :  { %16137 = vmatprep.subr.bf16.mxu0 %v17186_v21 }
0x2207   :  { %16139 = vmatpush3.bf16.msra.mxu0 %v18358_v36 }
0x2208   :  { %16188 = vmatprep.subr.bf16.mxu0 %v17186_v21 }
0x220a   :  { %14190 = vmatmul.mubr.msk.f32.vlgmr.msra.gmra.mrb[46].mxu0 %vm524_vm5, %v17123_v19 }
0x220b   :  { %14276 = vmatprep.mubr.msk.f32.mxu0 %vm17187_vm1, %v17188_v31 }
0x223a   :  { %v6330_v51 = vpop.f32.mrb[42].mxu0 }
0x223b   :  { %v6334_v50 = vadd.f32 %v6330_v51, %v6095_v20  ;;  %v14126_v33 = vpop.f32.mrb[43].mxu0  ;;  %v6906_v51 = vld [vmem:[%s20347_s9 + $0x208] sm:$0xff] }
0x223c   :  { %v16189_v33 = vpack.c.bf16 %v6906_v51, %v6905_v40 }
0x223e   :  { %16190 = vmatpush3.bf16.msra.mxu0 %v16189_v33  ;;  %v7314_v33 = vld [vmem:[%s20347_s9 + $0x368] sm:$0xff] }
0x223f   :  { %16191 = vmatprep.subr.bf16.mxu0 %v17186_v21 }
0x22ad   :  { %v6410_v53 = vpop.f32.mrb[44].mxu0 }
0x22ae   :  { %v18970_v32 = vadd.f32 %v6410_v53, %v6334_v50  ;;  %v14137_v49 = vpop.f32.mrb[45].mxu0  ;;  %v6907_v50 = vld [vmem:[%s20347_s9 + $0x210] sm:$0xff] }
0x22af   :  { %v16192_v2 = vpack.c.bf16 %v6908_v24, %v6907_v50  ;;  %v6985_v49 = vld [vmem:[%s20347_s9 + $0x3a8] sm:$0xff]  ;;  %v7313_v50 = vld [vmem:[%s20347_s9 + $0x360] sm:$0xff] }
0x22b1   :  { %16193 = vmatpush3.bf16.msra.mxu0 %v16192_v2  ;;  %v16243_v2 = vpack.c.bf16 %v7314_v33, %v7313_v50  ;;  %v7555_v50 = vld [vmem:[%s20347_s9 + $0x290] sm:$0xff] }
0x22b2   :  { %16194 = vmatprep.subr.bf16.mxu0 %v17186_v21 }
0x22dd   :  { %v6568_v43 = vpop.f32.mrb[46].mxu0 }
0x22de   :  { %v16902_v58 = vadd.f32 %v18975_v54, %v6568_v43  ;;  %v14191_v60 = vpop.f32.mrb[47].mxu0 }
0x22e0   :  { %17124 = vtanh.f32 %v16902_v58 }
0x22ea   :  { %v17125_v39 = vpop.eup %17124 }
0x22eb   :  { %v18984_v20 = vmax.f32 %v17125_v39, 0.0 }
0x22ed   :  { %6669 = vrot.lane.b32.xlu0 %v18984_v20, %s17192_s15  ;;  %14201 = vmatmul.mubr.msk.f32.vlgmr.msra.gmra.mrb[42].mxu1 %vm450_vm3, %v18984_v20 }
0x22ee   :  { %16148 = vmatpush3.bf16.msra.mxu1 %v16147_v8  ;;  %14211 = vmatprep.mubr.msk.f32.mxu1 %vm17187_vm1, %v17188_v31 }
0x22ef   :  { %16149 = vmatprep.subr.bf16.mxu1 %v17186_v21 }
0x22f1   :  { %2687 = vrot.lane.b32.xlu0 %v2686_v28, %s17191_s0 }
0x22f2   :  { %16151 = vmatpush3.bf16.msra.mxu1 %v16150_v29 }
0x22f3   :  { %16152 = vmatprep.subr.bf16.mxu1 %v17186_v21 }
0x235f   :  { %v6670_v7 = vpop.permute.xlu0 %6669 }
0x2360   :  { %14212 = vmatmul.mubr.msk.f32.vlgmr.msra.gmra.mrb[44].mxu1 %vm450_vm3, %v6670_v7 }
0x2361   :  { %16154 = vmatpush3.bf16.msra.mxu1 %v18232_v15  ;;  %14246 = vmatprep.mubr.msk.f32.mxu1 %vm17187_vm1, %v17188_v31 }
0x2362   :  { %16155 = vmatprep.subr.bf16.mxu1 %v17186_v21 }
0x2363   :  { %v2688_v26 = vpop.permute.xlu0 %2687 }
0x2364   :  { %2690 = vst.msk [vmem:[#allocation2 + $0xc] sm:$0x3] %vm768_vm7, %v2688_v26 }
0x2365   :  { %2691 = vst.msk [vmem:[#allocation2 + $0x8] sm:$0x3] %vm770_vm8, %v2688_v26  ;;  %16157 = vmatpush3.bf16.msra.mxu1 %v18238_v57  ;;  %v7235_v26 = vld [vmem:[%s20347_s9 + $0x240] sm:$0xff] }
0x2366   :  { %2845 = vst.msk [vmem:[#allocation2 + $0x8] sm:$0x3] %vm602_vm4, %v18061_v63  ;;  %16158 = vmatprep.subr.bf16.mxu1 %v17186_v21  ;;  %v2366_v63 = vrot.slane %v17988_v6, %v17870_v27 }
0x2369   :  { %16160 = vmatpush3.bf16.msra.mxu1 %v18248_v14 }
0x236a   :  { %16161 = vmatprep.subr.bf16.mxu1 %v17186_v21 }
0x236b   :  { %v7064_v38 = vld [vmem:[#allocation2 + $0xc] sm:$0x3] }
0x236d   :  { %v19016_v52 = vld.sshfl [vmem:[#allocation2 + $0x8] sm:$0x3 pattern:$0x76325410]  ;;  %16163 = vmatpush3.bf16.msra.mxu1 %v18258_v16 }
0x236e   :  { %7073 = vrot.lane.b32.xlu1 %v19016_v52, %s17191_s0  ;;  %16164 = vmatprep.subr.bf16.mxu1 %v17186_v21  ;;  %v6744_v19 = vld [vmem:[#allocation2 + $0x8] sm:$0x3] }
0x236f   :  { %v6757_v6 = vsel %vm524_vm5, %v6744_v19, %v6755_v12  ;;  %v7237_v19 = vld [vmem:[%s20347_s9 + $0x250] sm:$0xff] }
0x2371   :  { %16166 = vmatpush3.bf16.msra.mxu1 %v18268_v30 }
0x2372   :  { %2367 = vrot.lane.b32.xlu1 %v2366_v63, %s17191_s0  ;;  %16167 = vmatprep.subr.bf16.mxu1 %v17186_v21  ;;  %v7236_v63 = vld [vmem:[%s20347_s9 + $0x248] sm:$0xff] }
0x2373   :  { %v16237_v12 = vpack.c.bf16 %v7236_v63, %v7235_v26 }
0x2375   :  { %16169 = vmatpush3.bf16.msra.mxu1 %v18278_v18 }
0x2376   :  { %16170 = vmatprep.subr.bf16.mxu1 %v17186_v21 }
0x2379   :  { %16172 = vmatpush3.bf16.msra.mxu1 %v18288_v1 }
0x237a   :  { %16173 = vmatprep.subr.bf16.mxu1 %v17186_v21 }
0x237d   :  { %16175 = vmatpush3.bf16.msra.mxu1 %v18298_v55 }
0x237e   :  { %16176 = vmatprep.subr.bf16.mxu1 %v17186_v21 }
0x2380   :  { %14247 = vmatmul.mubr.f32.vlgmr.msra.gmra.mrb[46].mxu1 %v6757_v6  ;;  %v7238_v6 = vld [vmem:[%s20347_s9 + $0x258] sm:$0xff] }
0x2381   :  { %16178 = vmatpush3.bf16.msra.mxu1 %v18318_v22  ;;  %14265 = vmatprep.mubr.msk.f32.mxu1 %vm17187_vm1, %v17188_v31 }
0x2382   :  { %16179 = vmatprep.subr.bf16.mxu1 %v17186_v21 }
0x2385   :  { %16181 = vmatpush3.bf16.msra.mxu1 %v18328_v3 }
0x2386   :  { %16182 = vmatprep.subr.bf16.mxu1 %v17186_v21 }
0x2389   :  { %16184 = vmatpush3.bf16.msra.mxu1 %v18342_v59 }
0x238a   :  { %16185 = vmatprep.subr.bf16.mxu1 %v17186_v21 }
0x238d   :  { %16187 = vmatpush3.bf16.msra.mxu1 %v18358_v36 }
0x238e   :  { %16236 = vmatprep.subr.bf16.mxu1 %v17186_v21 }
0x2390   :  { %14266 = vmatmul.mubr.msk.f32.vlgmr.msra.gmra.mrb[46].mxu1 %vm524_vm5, %v17125_v39  ;;  %v16198_v39 = vpack.c.bf16 %v6987_v25, %v6986_v4  ;;  %v11757_v4 = vld.sshfl [vmem:[#allocation2 + $0x14] sm:$0x3 pattern:$0x76325410] }
0x2391   :  { %14352 = vmatprep.mubr.msk.f32.mxu1 %vm17187_vm1, %v17188_v31  ;;  %16238 = vmatpush3.bf16.msra.mxu1 %v16237_v12 }
0x2392   :  { %16239 = vmatprep.subr.bf16.mxu1 %v17186_v21 }
0x23c0   :  { %v6659_v23 = vpop.f32.mrb[42].mxu1 }
0x23c1   :  { %v6663_v9 = vadd.f32 %v6659_v23, %v18970_v32  ;;  %v14202_v37 = vpop.f32.mrb[43].mxu1  ;;  %v6984_v32 = vld [vmem:[%s20347_s9 + $0x3a0] sm:$0xff]  ;;  %v16240_v23 = vpack.c.bf16 %v7238_v6, %v7237_v19 }
0x23c2   :  { %v16195_v58 = vpack.c.bf16 %v6985_v49, %v6984_v32 }
0x23c3   :  { %16241 = vmatpush3.bf16.msra.mxu1 %v16240_v23 }
0x23c4   :  { %16242 = vmatprep.subr.bf16.mxu1 %v17186_v21 }
0x23e0   :  { %v7074_v46 = vpop.permute.xlu1 %7073 }
0x23e1   :  { %v7076_v35 = vsel %vm524_vm5, %v7074_v46, %v7064_v38 }
0x23e4   :  { %v2368_v5 = vpop.permute.xlu1 %2367 }
0x23e5   :  { %2370 = vst.msk [vmem:[#allocation2 + $0xa] sm:$0x3] %vm768_vm7, %v2368_v5 }
0x23e6   :  { %2371 = vst.msk [vmem:[#allocation2 + $0xa] sm:$0x3] %vm770_vm8, %v2368_v5 }
0x23e7   :  { %2525 = vst.msk [vmem:[#allocation2 + $0xa] sm:$0x3] %vm602_vm4, %v18013_v41 }
0x23ee   :  { %v11721_v49 = vld.sshfl [vmem:[#allocation2 + $0xa] sm:$0x3 pattern:$0x76325410] }
0x2433   :  { %v6739_v41 = vpop.f32.mrb[44].mxu1 }
0x2434   :  { %v6743_v48 = vadd.f32 %v6739_v41, %v6663_v9  ;;  %v14213_v62 = vpop.f32.mrb[45].mxu1 }
0x2435   :  { %v7316_v62 = vld [vmem:[%s20347_s9 + $0x378] sm:$0xff] }
0x2463   :  { %v6897_v17 = vpop.f32.mrb[46].mxu1 }
0x2464   :  { %v16903_v0 = vadd.f32 %v18975_v54, %v6897_v17  ;;  %v14267_v53 = vpop.f32.mrb[47].mxu1 }
0x2465   :  { %v19164_v53 = vld [vmem:[#allocation2 + $0xa] sm:$0x3] }
0x2466   :  { %17126 = vtanh.f32 %v16903_v0  ;;  %v11714_v0 = vld.sshfl [vmem:[#allocation2 + $0xc] sm:$0x3 pattern:$0x76325410]  ;;  %v7719_v32 = vrot.slane %v19164_v53, %v17870_v27 }
0x2470   :  { %v17127_v43 = vpop.eup %17126 }
0x2471   :  { %v19073_v60 = vmax.f32 %v17127_v43, 0.0 }
0x2473   :  { %6988 = vrot.lane.b32.xlu0 %v19073_v60, %s17192_s15  ;;  %6904 = vst.msk [vmem:[%s20350_s12 + $0x8] sm:$0x3] %vm600_vm6, %v19073_v60  ;;  %14277 = vmatmul.mubr.msk.f32.vlgmr.msra.gmra.mrb[48].mxu0 %vm450_vm3, %v19073_v60 }
0x2474   :  { %16196 = vmatpush3.bf16.msra.mxu0 %v16195_v58  ;;  %14287 = vmatprep.mubr.msk.f32.mxu0 %vm17187_vm1, %v17188_v31  ;;  %v11753_v58 = vld.sshfl [vmem:[#allocation2 + $0x2] sm:$0x3 pattern:$0x76325410] }
0x2475   :  { %16197 = vmatprep.subr.bf16.mxu0 %v17186_v21 }
0x2478   :  { %16199 = vmatpush3.bf16.msra.mxu0 %v16198_v39 }
0x2479   :  { %16200 = vmatprep.subr.bf16.mxu0 %v17186_v21 }
0x24e5   :  { %v6989_v8 = vpop.permute.xlu0 %6988 }
0x24e6   :  { %14288 = vmatmul.mubr.msk.f32.vlgmr.msra.gmra.mrb[50].mxu0 %vm450_vm3, %v6989_v8 }
0x24e7   :  { %16202 = vmatpush3.bf16.msra.mxu0 %v18232_v15  ;;  %14322 = vmatprep.mubr.msk.f32.mxu0 %vm17187_vm1, %v17188_v31 }
0x24e8   :  { %16203 = vmatprep.subr.bf16.mxu0 %v17186_v21 }
0x24eb   :  { %16205 = vmatpush3.bf16.msra.mxu0 %v18238_v57 }
0x24ec   :  { %16206 = vmatprep.subr.bf16.mxu0 %v17186_v21 }
0x24ef   :  { %16208 = vmatpush3.bf16.msra.mxu0 %v18248_v14 }
0x24f0   :  { %16209 = vmatprep.subr.bf16.mxu0 %v17186_v21 }
0x24f3   :  { %16211 = vmatpush3.bf16.msra.mxu0 %v18258_v16 }
0x24f4   :  { %16212 = vmatprep.subr.bf16.mxu0 %v17186_v21 }
0x24f7   :  { %16214 = vmatpush3.bf16.msra.mxu0 %v18268_v30 }
0x24f8   :  { %16215 = vmatprep.subr.bf16.mxu0 %v17186_v21 }
0x24fb   :  { %16217 = vmatpush3.bf16.msra.mxu0 %v18278_v18 }
0x24fc   :  { %16218 = vmatprep.subr.bf16.mxu0 %v17186_v21 }
0x24ff   :  { %16220 = vmatpush3.bf16.msra.mxu0 %v18288_v1 }
0x2500   :  { %16221 = vmatprep.subr.bf16.mxu0 %v17186_v21 }
0x2503   :  { %16223 = vmatpush3.bf16.msra.mxu0 %v18298_v55 }
0x2504   :  { %16224 = vmatprep.subr.bf16.mxu0 %v17186_v21 }
0x2506   :  { %14323 = vmatmul.mubr.f32.vlgmr.msra.gmra.mrb[52].mxu0 %v7076_v35 }
0x2507   :  { %16226 = vmatpush3.bf16.msra.mxu0 %v18318_v22  ;;  %14341 = vmatprep.mubr.msk.f32.mxu0 %vm17187_vm1, %v17188_v31 }
0x2508   :  { %16227 = vmatprep.subr.bf16.mxu0 %v17186_v21 }
0x250b   :  { %16229 = vmatpush3.bf16.msra.mxu0 %v18328_v3 }
0x250c   :  { %16230 = vmatprep.subr.bf16.mxu0 %v17186_v21 }
0x250f   :  { %16232 = vmatpush3.bf16.msra.mxu0 %v18342_v59 }
0x2510   :  { %16233 = vmatprep.subr.bf16.mxu0 %v17186_v21 }
0x2513   :  { %16235 = vmatpush3.bf16.msra.mxu0 %v18358_v36 }
0x2514   :  { %16284 = vmatprep.subr.bf16.mxu0 %v17186_v21 }
0x2516   :  { %14342 = vmatmul.mubr.msk.f32.vlgmr.msra.gmra.mrb[52].mxu0 %vm524_vm5, %v17127_v43  ;;  %v11749_v43 = vld.sshfl [vmem:[#allocation2 + $0x12] sm:$0x3 pattern:$0x76325410] }
0x2517   :  { %14428 = vmatprep.mubr.msk.f32.mxu0 %vm17187_vm1, %v17188_v31 }
0x2546   :  { %v6978_v29 = vpop.f32.mrb[48].mxu0 }
0x2547   :  { %v6982_v28 = vadd.f32 %v6978_v29, %v6743_v48  ;;  %v14278_v7 = vpop.f32.mrb[49].mxu0  ;;  %v7315_v48 = vld [vmem:[%s20347_s9 + $0x370] sm:$0xff]  ;;  %v7392_v29 = vld [vmem:[#allocation2 + $0xa] sm:$0x3] }
0x2548   :  { %v16246_v17 = vpack.c.bf16 %v7316_v62, %v7315_v48 }
0x25b9   :  { %v7058_v9 = vpop.f32.mrb[50].mxu0 }
0x25ba   :  { %v19141_v37 = vadd.f32 %v7058_v9, %v6982_v28  ;;  %v14289_v46 = vpop.f32.mrb[51].mxu0 }
0x25e9   :  { %v7216_v5 = vpop.f32.mrb[52].mxu0 }
0x25ea   :  { %v16904_v40 = vadd.f32 %v18975_v54, %v7216_v5  ;;  %v14343_v51 = vpop.f32.mrb[53].mxu0 }
0x25eb   :  { %v7553_v51 = vld [vmem:[%s20347_s9 + $0x280] sm:$0xff] }
0x25ec   :  { %17128 = vtanh.f32 %v16904_v40 }
0x25f6   :  { %v19150_v24 = vpop.eup %17128 }
0x25f7   :  { %v7222_v41 = vmax.f32 %v19150_v24, 0.0 }
0x25f9   :  { %7317 = vrot.lane.b32.xlu0 %v7222_v41, %s17192_s15  ;;  %14353 = vmatmul.mubr.msk.f32.vlgmr.msra.gmra.mrb[48].mxu1 %vm450_vm3, %v7222_v41 }
0x25fa   :  { %16244 = vmatpush3.bf16.msra.mxu1 %v16243_v2  ;;  %14363 = vmatprep.mubr.msk.f32.mxu1 %vm17187_vm1, %v17188_v31 }
0x25fb   :  { %16245 = vmatprep.subr.bf16.mxu1 %v17186_v21 }
0x25fd   :  { %7402 = vrot.lane.b32.xlu0 %v11714_v0, %s17191_s0 }
0x25fe   :  { %16247 = vmatpush3.bf16.msra.mxu1 %v16246_v17 }
0x25ff   :  { %16248 = vmatprep.subr.bf16.mxu1 %v17186_v21 }
0x2601   :  { %7720 = vrot.lane.b32.xlu0 %v7719_v32, %s17191_s0  ;;  %v7632_v32 = vld [vmem:[%s20347_s9 + $0x320] sm:$0xff] }
0x2605   :  { %8049 = vrot.lane.b32.xlu0 %v11721_v49, %s17191_s0  ;;  %v7633_v49 = vld [vmem:[%s20347_s9 + $0x328] sm:$0xff] }
0x2609   :  { %8368 = vrot.lane.b32.xlu0 %v11714_v0, %s17191_s0 }
0x260d   :  { %8697 = vrot.lane.b32.xlu0 %v19016_v52, %s17191_s0  ;;  %v11761_v52 = vld.sshfl [vmem:[#allocation2] sm:$0x3 pattern:$0x76325410] }
0x2611   :  { %9016 = vrot.lane.b32.xlu0 %v18850_v45, %s17191_s0 }
0x2615   :  { %9345 = vrot.lane.b32.xlu0 %v18839_v44, %s17191_s0  ;;  %v4638_v44 = vrot.slane %v18469_v34, %v17870_v27 }
0x2619   :  { %9664 = vrot.lane.b32.xlu0 %v18678_v13, %s17191_s0  ;;  %v7230_v13 = vrot.slane %v7222_v41, %v17870_v27 }
0x261d   :  { %9993 = vrot.lane.b32.xlu0 %v18667_v11, %s17191_s0  ;;  %v5934_v11 = vrot.slane %v18807_v10, %v17870_v27 }
0x2621   :  { %10312 = vrot.lane.b32.xlu0 %v11749_v43, %s17191_s0 }
0x2625   :  { %10641 = vrot.lane.b32.xlu0 %v11753_v58, %s17191_s0  ;;  %v16291_v58 = vpack.c.bf16 %v7633_v49, %v7632_v32  ;;  %v8039_v49 = vld [vmem:[#allocation2 + $0xc] sm:$0x3] }
0x2629   :  { %10960 = vrot.lane.b32.xlu0 %v11757_v4, %s17191_s0 }
0x262d   :  { %11289 = vrot.lane.b32.xlu0 %v11761_v52, %s17191_s0  ;;  %v7634_v52 = vld [vmem:[%s20347_s9 + $0x330] sm:$0xff] }
0x2631   :  { %4639 = vrot.lane.b32.xlu0 %v4638_v44, %s17191_s0  ;;  %v7635_v44 = vld [vmem:[%s20347_s9 + $0x338] sm:$0xff] }
0x2635   :  { %5935 = vrot.lane.b32.xlu0 %v5934_v11, %s17191_s0  ;;  %v16294_v11 = vpack.c.bf16 %v7635_v44, %v7634_v52  ;;  %v8200_v52 = vld [vmem:[%s20347_s9 + $0x300] sm:$0xff]  ;;  %v8201_v44 = vld [vmem:[%s20347_s9 + $0x308] sm:$0xff] }
0x2639   :  { %7231 = vrot.lane.b32.xlu0 %v7230_v13, %s17191_s0 }
0x266b   :  { %v7318_v45 = vpop.permute.xlu0 %7317 }
0x266c   :  { %14364 = vmatmul.mubr.msk.f32.vlgmr.msra.gmra.mrb[50].mxu1 %vm450_vm3, %v7318_v45 }
0x266d   :  { %16250 = vmatpush3.bf16.msra.mxu1 %v18232_v15  ;;  %14398 = vmatprep.mubr.msk.f32.mxu1 %vm17187_vm1, %v17188_v31 }
0x266e   :  { %16251 = vmatprep.subr.bf16.mxu1 %v17186_v21 }
0x266f   :  { %v7403_v34 = vpop.permute.xlu0 %7402 }
0x2670   :  { %v7405_v28 = vsel %vm524_vm5, %v7392_v29, %v7403_v34  ;;  %v7882_v29 = vld [vmem:[%s20347_s9 + $0x2c0] sm:$0xff] }
0x2671   :  { %16253 = vmatpush3.bf16.msra.mxu1 %v18238_v57 }
0x2672   :  { %16254 = vmatprep.subr.bf16.mxu1 %v17186_v21 }
0x2673   :  { %v19202_v10 = vpop.permute.xlu0 %7720 }
0x2674   :  { %v7723_v45 = vsel %vm524_vm5, %v19202_v10, %v19164_v53 }
0x2675   :  { %16256 = vmatpush3.bf16.msra.mxu1 %v18248_v14 }
0x2676   :  { %16257 = vmatprep.subr.bf16.mxu1 %v17186_v21 }
0x2677   :  { %v19206_v25 = vpop.permute.xlu0 %8049 }
0x2679   :  { %16259 = vmatpush3.bf16.msra.mxu1 %v18258_v16 }
0x267a   :  { %16260 = vmatprep.subr.bf16.mxu1 %v17186_v21 }
0x267b   :  { %v19210_v39 = vpop.permute.xlu0 %8368 }
0x267d   :  { %16262 = vmatpush3.bf16.msra.mxu1 %v18268_v30 }
0x267e   :  { %16263 = vmatprep.subr.bf16.mxu1 %v17186_v21 }
0x267f   :  { %v19214_v8 = vpop.permute.xlu0 %8697 }
0x2681   :  { %16265 = vmatpush3.bf16.msra.mxu1 %v18278_v18 }
0x2682   :  { %16266 = vmatprep.subr.bf16.mxu1 %v17186_v21 }
0x2683   :  { %v19218_v38 = vpop.permute.xlu0 %9016 }
0x2685   :  { %16268 = vmatpush3.bf16.msra.mxu1 %v18288_v1 }
0x2686   :  { %16269 = vmatprep.subr.bf16.mxu1 %v17186_v21 }
0x2687   :  { %v19222_v35 = vpop.permute.xlu0 %9345 }
0x2689   :  { %16271 = vmatpush3.bf16.msra.mxu1 %v18298_v55 }
0x268a   :  { %16272 = vmatprep.subr.bf16.mxu1 %v17186_v21 }
0x268b   :  { %v19227_v7 = vpop.permute.xlu0 %9664 }
0x268c   :  { %14399 = vmatmul.mubr.f32.vlgmr.msra.gmra.mrb[52].mxu1 %v7405_v28  ;;  %v7883_v28 = vld [vmem:[%s20347_s9 + $0x2c8] sm:$0xff] }
0x268d   :  { %16274 = vmatpush3.bf16.msra.mxu1 %v18318_v22  ;;  %14417 = vmatprep.mubr.msk.f32.mxu1 %vm17187_vm1, %v17188_v31 }
0x268e   :  { %16275 = vmatprep.subr.bf16.mxu1 %v17186_v21 }
0x268f   :  { %v19233_v26 = vpop.permute.xlu0 %9993 }
0x2691   :  { %16277 = vmatpush3.bf16.msra.mxu1 %v18328_v3 }
0x2692   :  { %16278 = vmatprep.subr.bf16.mxu1 %v17186_v21 }
0x2693   :  { %v19237_v63 = vpop.permute.xlu0 %10312 }
0x2695   :  { %16280 = vmatpush3.bf16.msra.mxu1 %v18342_v59 }
0x2696   :  { %16281 = vmatprep.subr.bf16.mxu1 %v17186_v21 }
0x2697   :  { %v19241_v19 = vpop.permute.xlu0 %10641 }
0x2699   :  { %16283 = vmatpush3.bf16.msra.mxu1 %v18358_v36 }
0x269a   :  { %16332 = vmatprep.subr.bf16.mxu1 %v17186_v21 }
0x269b   :  { %v19245_v12 = vpop.permute.xlu0 %10960 }
0x269c   :  { %14418 = vmatmul.mubr.msk.f32.vlgmr.msra.gmra.mrb[52].mxu1 %vm524_vm5, %v19150_v24  ;;  %v7556_v24 = vld [vmem:[%s20347_s9 + $0x298] sm:$0xff] }
0x269d   :  { %14504 = vmatprep.mubr.msk.f32.mxu1 %vm17187_vm1, %v17188_v31 }
0x269f   :  { %v19251_v6 = vpop.permute.xlu0 %11289 }
0x26a3   :  { %v4640_v23 = vpop.permute.xlu0 %4639 }
0x26a4   :  { %4642 = vst.msk [vmem:[%s20350_s12] sm:$0x3] %vm768_vm7, %v4640_v23 }
0x26a5   :  { %4720 = vst.msk [vmem:[%s20350_s12 + $0x14] sm:$0x3] %vm770_vm8, %v4640_v23  ;;  %v7884_v23 = vld [vmem:[%s20347_s9 + $0x2d0] sm:$0xff] }
0x26a6   :  { %5039 = vst.msk [vmem:[%s20350_s12 + $0x14] sm:$0x3] %vm602_vm4, %v18558_v42 }
0x26a7   :  { %v5936_v9 = vpop.permute.xlu0 %5935 }
0x26a8   :  { %5938 = vst.msk [vmem:[%s20350_s12 + $0x4] sm:$0x3] %vm768_vm7, %v5936_v9 }
0x26a9   :  { %6016 = vst.msk [vmem:[%s20350_s12 + $0x10] sm:$0x3] %vm770_vm8, %v5936_v9  ;;  %v16333_v9 = vpack.c.bf16 %v7883_v28, %v7882_v29 }
0x26aa   :  { %6335 = vst.msk [vmem:[%s20350_s12 + $0x10] sm:$0x3] %vm602_vm4, %v18902_v56  ;;  %v7554_v56 = vld [vmem:[%s20347_s9 + $0x288] sm:$0xff] }
0x26ab   :  { %v7232_v46 = vpop.permute.xlu0 %7231  ;;  %v16285_v33 = vpack.c.bf16 %v7554_v56, %v7553_v51  ;;  %16334 = vmatpush3.bf16.msra.mxu1 %v16333_v9 }
0x26ac   :  { %7234 = vst.msk [vmem:[%s20350_s12 + $0x8] sm:$0x3] %vm768_vm7, %v7232_v46  ;;  %16335 = vmatprep.subr.bf16.mxu1 %v17186_v21 }
0x26ad   :  { %7312 = vst.msk [vmem:[%s20350_s12 + $0xc] sm:$0x3] %vm770_vm8, %v7232_v46  ;;  %16286 = vmatpush3.bf16.msra.mxu0 %v16285_v33  ;;  %v7885_v46 = vld [vmem:[%s20347_s9 + $0x2d8] sm:$0xff] }
0x26ae   :  { %16287 = vmatprep.subr.bf16.mxu0 %v17186_v21 }
0x26cc   :  { %v7307_v42 = vpop.f32.mrb[48].mxu1 }
0x26cd   :  { %v7311_v5 = vadd.f32 %v7307_v42, %v19141_v37  ;;  %v14354_v40 = vpop.f32.mrb[49].mxu1  ;;  %v16288_v37 = vpack.c.bf16 %v7556_v24, %v7555_v50  ;;  %v16336_v42 = vpack.c.bf16 %v7885_v46, %v7884_v23  ;;  %v7960_v24 = vld [vmem:[%s20347_s9 + $0x2e0] sm:$0xff] }
0x26ce   :  { %v8279_v46 = vld [vmem:[%s20347_s9 + $0x2a0] sm:$0xff] }
0x26cf   :  { %16289 = vmatpush3.bf16.msra.mxu0 %v16288_v37  ;;  %16337 = vmatpush3.bf16.msra.mxu1 %v16336_v42  ;;  %v7961_v37 = vld [vmem:[%s20347_s9 + $0x2e8] sm:$0xff] }
0x26d0   :  { %16290 = vmatprep.subr.bf16.mxu0 %v17186_v21  ;;  %16338 = vmatprep.subr.bf16.mxu1 %v17186_v21  ;;  %v8280_v42 = vld [vmem:[%s20347_s9 + $0x2a8] sm:$0xff] }
0x273f   :  { %v7387_v2 = vpop.f32.mrb[50].mxu1 }
0x2740   :  { %v7391_v41 = vadd.f32 %v7387_v2, %v7311_v5  ;;  %v14365_v48 = vpop.f32.mrb[51].mxu1 }
0x276f   :  { %v7545_v62 = vpop.f32.mrb[52].mxu1 }
0x2770   :  { %v16905_v17 = vadd.f32 %v18975_v54, %v7545_v62  ;;  %v14419_v0 = vpop.f32.mrb[53].mxu1  ;;  %v7962_v62 = vld [vmem:[%s20347_s9 + $0x2f0] sm:$0xff] }
0x2772   :  { %17130 = vtanh.f32 %v16905_v17  ;;  %v7963_v17 = vld [vmem:[%s20347_s9 + $0x2f8] sm:$0xff] }
0x2773   :  { %v16342_v0 = vpack.c.bf16 %v7963_v17, %v7962_v62  ;;  %v8530_v17 = vld [vmem:[%s20347_s9 + $0x340] sm:$0xff] }
0x277c   :  { %v17131_v43 = vpop.eup %17130 }
0x277d   :  { %v7551_v4 = vmax.f32 %v17131_v43, 0.0 }
0x277f   :  { %7636 = vrot.lane.b32.xlu1 %v7551_v4, %s17192_s15  ;;  %7552 = vst.msk [vmem:[%s20350_s12 + $0xa] sm:$0x3] %vm600_vm6, %v7551_v4  ;;  %14429 = vmatmul.mubr.msk.f32.vlgmr.msra.gmra.mrb[54].mxu0 %vm450_vm3, %v7551_v4 }
0x2780   :  { %7631 = vst.msk [vmem:[%s20350_s12 + $0xc] sm:$0x3] %vm602_vm4, %v7551_v4  ;;  %16292 = vmatpush3.bf16.msra.mxu0 %v16291_v58  ;;  %14439 = vmatprep.mubr.msk.f32.mxu0 %vm17187_vm1, %v17188_v31 }
0x2781   :  { %16293 = vmatprep.subr.bf16.mxu0 %v17186_v21 }
0x2784   :  { %16295 = vmatpush3.bf16.msra.mxu0 %v16294_v11  ;;  %v8202_v11 = vld [vmem:[%s20347_s9 + $0x310] sm:$0xff] }
0x2785   :  { %16296 = vmatprep.subr.bf16.mxu0 %v17186_v21 }
0x27f1   :  { %v7637_v13 = vpop.permute.xlu1 %7636 }
0x27f2   :  { %14440 = vmatmul.mubr.msk.f32.vlgmr.msra.gmra.mrb[56].mxu0 %vm450_vm3, %v7637_v13  ;;  %v16381_v13 = vpack.c.bf16 %v8201_v44, %v8200_v52 }
0x27f3   :  { %16298 = vmatpush3.bf16.msra.mxu0 %v18232_v15  ;;  %14474 = vmatprep.mubr.msk.f32.mxu0 %vm17187_vm1, %v17188_v31 }
0x27f4   :  { %16299 = vmatprep.subr.bf16.mxu0 %v17186_v21 }
0x27f7   :  { %16301 = vmatpush3.bf16.msra.mxu0 %v18238_v57 }
0x27f8   :  { %16302 = vmatprep.subr.bf16.mxu0 %v17186_v21 }
0x27fb   :  { %16304 = vmatpush3.bf16.msra.mxu0 %v18248_v14 }
0x27fc   :  { %16305 = vmatprep.subr.bf16.mxu0 %v17186_v21 }
0x27ff   :  { %16307 = vmatpush3.bf16.msra.mxu0 %v18258_v16 }
0x2800   :  { %16308 = vmatprep.subr.bf16.mxu0 %v17186_v21 }
0x2803   :  { %16310 = vmatpush3.bf16.msra.mxu0 %v18268_v30 }
0x2804   :  { %16311 = vmatprep.subr.bf16.mxu0 %v17186_v21 }
0x2807   :  { %16313 = vmatpush3.bf16.msra.mxu0 %v18278_v18 }
0x2808   :  { %16314 = vmatprep.subr.bf16.mxu0 %v17186_v21 }
0x280b   :  { %16316 = vmatpush3.bf16.msra.mxu0 %v18288_v1 }
0x280c   :  { %16317 = vmatprep.subr.bf16.mxu0 %v17186_v21 }
0x280f   :  { %16319 = vmatpush3.bf16.msra.mxu0 %v18298_v55 }
0x2810   :  { %16320 = vmatprep.subr.bf16.mxu0 %v17186_v21 }
0x2812   :  { %14475 = vmatmul.mubr.f32.vlgmr.msra.gmra.mrb[58].mxu0 %v7723_v45  ;;  %v8203_v45 = vld [vmem:[%s20347_s9 + $0x318] sm:$0xff] }
0x2813   :  { %16322 = vmatpush3.bf16.msra.mxu0 %v18318_v22  ;;  %14493 = vmatprep.mubr.msk.f32.mxu0 %vm17187_vm1, %v17188_v31 }
0x2814   :  { %16323 = vmatprep.subr.bf16.mxu0 %v17186_v21 }
0x2817   :  { %16325 = vmatpush3.bf16.msra.mxu0 %v18328_v3 }
0x2818   :  { %16326 = vmatprep.subr.bf16.mxu0 %v17186_v21 }
0x281b   :  { %16328 = vmatpush3.bf16.msra.mxu0 %v18342_v59 }
0x281c   :  { %16329 = vmatprep.subr.bf16.mxu0 %v17186_v21 }
0x281f   :  { %16331 = vmatpush3.bf16.msra.mxu0 %v18358_v36 }
0x2820   :  { %16380 = vmatprep.subr.bf16.mxu0 %v17186_v21 }
0x2822   :  { %14494 = vmatmul.mubr.msk.f32.vlgmr.msra.gmra.mrb[58].mxu0 %vm524_vm5, %v17131_v43  ;;  %v8052_v43 = vsel %vm524_vm5, %v8039_v49, %v19206_v25 }
0x2823   :  { %14580 = vmatprep.mubr.msk.f32.mxu0 %vm17187_vm1, %v17188_v31  ;;  %16382 = vmatpush3.bf16.msra.mxu0 %v16381_v13 }
0x2824   :  { %16383 = vmatprep.subr.bf16.mxu0 %v17186_v21 }
0x2852   :  { %v7626_v53 = vpop.f32.mrb[54].mxu0 }
0x2853   :  { %v7630_v34 = vadd.f32 %v7626_v53, %v7391_v41  ;;  %v14430_v10 = vpop.f32.mrb[55].mxu0  ;;  %v16339_v41 = vpack.c.bf16 %v7961_v37, %v7960_v24  ;;  %v16384_v53 = vpack.c.bf16 %v8203_v45, %v8202_v11  ;;  %v8359_v37 = vld [vmem:[#allocation2 + $0x8] sm:$0x3]  ;;  %v8608_v45 = vld [vmem:[%s20347_s9 + $0x260] sm:$0xff] }
0x2855   :  { %16385 = vmatpush3.bf16.msra.mxu0 %v16384_v53  ;;  %v8609_v53 = vld [vmem:[%s20347_s9 + $0x268] sm:$0xff] }
0x2856   :  { %16386 = vmatprep.subr.bf16.mxu0 %v17186_v21 }
0x28c5   :  { %v7706_v5 = vpop.f32.mrb[56].mxu0 }
0x28c6   :  { %v7710_v40 = vadd.f32 %v7706_v5, %v7630_v34  ;;  %v14441_v51 = vpop.f32.mrb[57].mxu0 }
0x28f5   :  { %v7863_v56 = vpop.f32.mrb[58].mxu0 }
0x28f6   :  { %v16906_v50 = vadd.f32 %v18975_v54, %v7863_v56  ;;  %v14495_v33 = vpop.f32.mrb[59].mxu0  ;;  %v8281_v56 = vld [vmem:[%s20347_s9 + $0x2b0] sm:$0xff] }
0x28f8   :  { %17132 = vtanh.f32 %v16906_v50  ;;  %v8282_v50 = vld [vmem:[%s20347_s9 + $0x2b8] sm:$0xff] }
0x28f9   :  { %v16390_v33 = vpack.c.bf16 %v8282_v50, %v8281_v56 }
0x2902   :  { %v17133_v2 = vpop.eup %17132 }
0x2903   :  { %v19385_v48 = vmax.f32 %v17133_v2, 0.0 }
0x2905   :  { %7964 = vrot.lane.b32.xlu1 %v19385_v48, %s17192_s15  ;;  %14505 = vmatmul.mubr.msk.f32.vlgmr.msra.gmra.mrb[54].mxu1 %vm450_vm3, %v19385_v48 }
0x2906   :  { %16340 = vmatpush3.bf16.msra.mxu1 %v16339_v41  ;;  %14515 = vmatprep.mubr.msk.f32.mxu1 %vm17187_vm1, %v17188_v31 }
0x2907   :  { %16341 = vmatprep.subr.bf16.mxu1 %v17186_v21 }
0x290a   :  { %16343 = vmatpush3.bf16.msra.mxu1 %v16342_v0  ;;  %v8531_v0 = vld [vmem:[%s20347_s9 + $0x348] sm:$0xff] }
0x290b   :  { %16344 = vmatprep.subr.bf16.mxu1 %v17186_v21  ;;  %v16429_v49 = vpack.c.bf16 %v8531_v0, %v8530_v17 }
0x2977   :  { %v7965_v32 = vpop.permute.xlu1 %7964 }
0x2978   :  { %14516 = vmatmul.mubr.msk.f32.vlgmr.msra.gmra.mrb[56].mxu1 %vm450_vm3, %v7965_v32  ;;  %v8532_v32 = vld [vmem:[%s20347_s9 + $0x350] sm:$0xff] }
0x2979   :  { %16346 = vmatpush3.bf16.msra.mxu1 %v18232_v15  ;;  %14550 = vmatprep.mubr.msk.f32.mxu1 %vm17187_vm1, %v17188_v31 }
0x297a   :  { %16347 = vmatprep.subr.bf16.mxu1 %v17186_v21 }
0x297d   :  { %16349 = vmatpush3.bf16.msra.mxu1 %v18238_v57 }
0x297e   :  { %16350 = vmatprep.subr.bf16.mxu1 %v17186_v21 }
0x2981   :  { %16352 = vmatpush3.bf16.msra.mxu1 %v18248_v14 }
0x2982   :  { %16353 = vmatprep.subr.bf16.mxu1 %v17186_v21 }
0x2985   :  { %16355 = vmatpush3.bf16.msra.mxu1 %v18258_v16 }
0x2986   :  { %16356 = vmatprep.subr.bf16.mxu1 %v17186_v21 }
0x2989   :  { %16358 = vmatpush3.bf16.msra.mxu1 %v18268_v30 }
0x298a   :  { %16359 = vmatprep.subr.bf16.mxu1 %v17186_v21 }
0x298d   :  { %16361 = vmatpush3.bf16.msra.mxu1 %v18278_v18 }
0x298e   :  { %16362 = vmatprep.subr.bf16.mxu1 %v17186_v21 }
0x2991   :  { %16364 = vmatpush3.bf16.msra.mxu1 %v18288_v1 }
0x2992   :  { %16365 = vmatprep.subr.bf16.mxu1 %v17186_v21 }
0x2995   :  { %16367 = vmatpush3.bf16.msra.mxu1 %v18298_v55 }
0x2996   :  { %16368 = vmatprep.subr.bf16.mxu1 %v17186_v21 }
0x2998   :  { %14551 = vmatmul.mubr.f32.vlgmr.msra.gmra.mrb[58].mxu1 %v8052_v43  ;;  %v8533_v43 = vld [vmem:[%s20347_s9 + $0x358] sm:$0xff] }
0x2999   :  { %16370 = vmatpush3.bf16.msra.mxu1 %v18318_v22  ;;  %14569 = vmatprep.mubr.msk.f32.mxu1 %vm17187_vm1, %v17188_v31 }
0x299a   :  { %16371 = vmatprep.subr.bf16.mxu1 %v17186_v21 }
0x299d   :  { %16373 = vmatpush3.bf16.msra.mxu1 %v18328_v3 }
0x299e   :  { %16374 = vmatprep.subr.bf16.mxu1 %v17186_v21 }
0x29a1   :  { %16376 = vmatpush3.bf16.msra.mxu1 %v18342_v59 }
0x29a2   :  { %16377 = vmatprep.subr.bf16.mxu1 %v17186_v21 }
0x29a5   :  { %16379 = vmatpush3.bf16.msra.mxu1 %v18358_v36 }
0x29a6   :  { %16428 = vmatprep.subr.bf16.mxu1 %v17186_v21 }
0x29a8   :  { %14570 = vmatmul.mubr.msk.f32.vlgmr.msra.gmra.mrb[58].mxu1 %vm524_vm5, %v17133_v2  ;;  %v8371_v2 = vsel %vm524_vm5, %v19210_v39, %v8359_v37  ;;  %v8850_v37 = vld [vmem:[%s20347_s9 + $0x390] sm:$0xff] }
0x29a9   :  { %14656 = vmatprep.mubr.msk.f32.mxu1 %vm17187_vm1, %v17188_v31  ;;  %16430 = vmatpush3.bf16.msra.mxu1 %v16429_v49  ;;  %v19605_v49 = vld [vmem:[%s20346_s8] ss:$0 sm:$0xff] }
0x29aa   :  { %16431 = vmatprep.subr.bf16.mxu1 %v17186_v21 }
0x29d8   :  { %v7954_v25 = vpop.f32.mrb[54].mxu1 }
0x29d9   :  { %v7958_v58 = vadd.f32 %v7954_v25, %v7710_v40  ;;  %v14506_v4 = vpop.f32.mrb[55].mxu1  ;;  %v16387_v40 = vpack.c.bf16 %v8280_v42, %v8279_v46  ;;  %v16432_v25 = vpack.c.bf16 %v8533_v43, %v8532_v32 }
0x29db   :  { %16433 = vmatpush3.bf16.msra.mxu1 %v16432_v25 }
0x29dc   :  { %16434 = vmatprep.subr.bf16.mxu1 %v17186_v21 }
0x2a4b   :  { %v8034_v34 = vpop.f32.mrb[56].mxu1 }
0x2a4c   :  { %v8038_v10 = vadd.f32 %v8034_v34, %v7958_v58  ;;  %v14517_v29 = vpop.f32.mrb[57].mxu1 }
0x2a7b   :  { %v8192_v28 = vpop.f32.mrb[58].mxu1 }
0x2a7c   :  { %v16907_v23 = vadd.f32 %v18975_v54, %v8192_v28  ;;  %v14571_v9 = vpop.f32.mrb[59].mxu1  ;;  %v8610_v28 = vld [vmem:[%s20347_s9 + $0x270] sm:$0xff] }
0x2a7e   :  { %17134 = vtanh.f32 %v16907_v23 }
0x2a88   :  { %v17135_v5 = vpop.eup %17134 }
0x2a89   :  { %v19456_v51 = vmax.f32 %v17135_v5, 0.0 }
0x2a8b   :  { %8283 = vrot.lane.b32.xlu1 %v19456_v51, %s17192_s15  ;;  %8199 = vst.msk [vmem:[%s20350_s12 + $0xc] sm:$0x3] %vm600_vm6, %v19456_v51  ;;  %14581 = vmatmul.mubr.msk.f32.vlgmr.msra.gmra.mrb[60].mxu0 %vm450_vm3, %v19456_v51 }
0x2a8c   :  { %16388 = vmatpush3.bf16.msra.mxu0 %v16387_v40  ;;  %14591 = vmatprep.mubr.msk.f32.mxu0 %vm17187_vm1, %v17188_v31 }
0x2a8d   :  { %16389 = vmatprep.subr.bf16.mxu0 %v17186_v21 }
0x2a90   :  { %16391 = vmatpush3.bf16.msra.mxu0 %v16390_v33  ;;  %v8848_v33 = vld [vmem:[%s20347_s9 + $0x380] sm:$0xff] }
0x2a91   :  { %16392 = vmatprep.subr.bf16.mxu0 %v17186_v21 }
0x2afd   :  { %v8284_v24 = vpop.permute.xlu1 %8283 }
0x2afe   :  { %14592 = vmatmul.mubr.msk.f32.vlgmr.msra.gmra.mrb[62].mxu0 %vm450_vm3, %v8284_v24  ;;  %v8849_v24 = vld [vmem:[%s20347_s9 + $0x388] sm:$0xff] }
0x2aff   :  { %16394 = vmatpush3.bf16.msra.mxu0 %v18232_v15  ;;  %14626 = vmatprep.mubr.msk.f32.mxu0 %vm17187_vm1, %v17188_v31 }
0x2b00   :  { %16395 = vmatprep.subr.bf16.mxu0 %v17186_v21 }
0x2b03   :  { %16397 = vmatpush3.bf16.msra.mxu0 %v18238_v57 }
0x2b04   :  { %16398 = vmatprep.subr.bf16.mxu0 %v17186_v21 }
0x2b07   :  { %16400 = vmatpush3.bf16.msra.mxu0 %v18248_v14 }
0x2b08   :  { %16401 = vmatprep.subr.bf16.mxu0 %v17186_v21 }
0x2b0b   :  { %16403 = vmatpush3.bf16.msra.mxu0 %v18258_v16 }
0x2b0c   :  { %16404 = vmatprep.subr.bf16.mxu0 %v17186_v21 }
0x2b0f   :  { %16406 = vmatpush3.bf16.msra.mxu0 %v18268_v30 }
0x2b10   :  { %16407 = vmatprep.subr.bf16.mxu0 %v17186_v21 }
0x2b13   :  { %16409 = vmatpush3.bf16.msra.mxu0 %v18278_v18 }
0x2b14   :  { %16410 = vmatprep.subr.bf16.mxu0 %v17186_v21 }
0x2b17   :  { %16412 = vmatpush3.bf16.msra.mxu0 %v18288_v1 }
0x2b18   :  { %16413 = vmatprep.subr.bf16.mxu0 %v17186_v21 }
0x2b1b   :  { %16415 = vmatpush3.bf16.msra.mxu0 %v18298_v55 }
0x2b1c   :  { %16416 = vmatprep.subr.bf16.mxu0 %v17186_v21 }
0x2b1e   :  { %14627 = vmatmul.mubr.f32.vlgmr.msra.gmra.mrb[64].mxu0 %v8371_v2  ;;  %v16477_v2 = vpack.c.bf16 %v8849_v24, %v8848_v33 }
0x2b1f   :  { %16418 = vmatpush3.bf16.msra.mxu0 %v18318_v22  ;;  %14645 = vmatprep.mubr.msk.f32.mxu0 %vm17187_vm1, %v17188_v31 }
0x2b20   :  { %16419 = vmatprep.subr.bf16.mxu0 %v17186_v21 }
0x2b23   :  { %16421 = vmatpush3.bf16.msra.mxu0 %v18328_v3 }
0x2b24   :  { %16422 = vmatprep.subr.bf16.mxu0 %v17186_v21 }
0x2b27   :  { %16424 = vmatpush3.bf16.msra.mxu0 %v18342_v59 }
0x2b28   :  { %16425 = vmatprep.subr.bf16.mxu0 %v17186_v21 }
0x2b2b   :  { %16427 = vmatpush3.bf16.msra.mxu0 %v18358_v36 }
0x2b2c   :  { %16476 = vmatprep.subr.bf16.mxu0 %v17186_v21 }
0x2b2e   :  { %14646 = vmatmul.mubr.msk.f32.vlgmr.msra.gmra.mrb[64].mxu0 %vm524_vm5, %v17135_v5  ;;  %v8687_v5 = vld [vmem:[#allocation2 + $0xe] sm:$0x3] }
0x2b2f   :  { %14732 = vmatprep.mubr.msk.f32.mxu0 %vm17187_vm1, %v17188_v31  ;;  %v8700_v40 = vsel %vm524_vm5, %v8687_v5, %v19214_v8  ;;  %16478 = vmatpush3.bf16.msra.mxu0 %v16477_v2  ;;  %v9181_v5 = vld [vmem:[%s20347_s9 + $0x3d8] sm:$0xff]  ;;  %v9256_v2 = vld [vmem:[%s20347_s9 + $0x1e0] sm:$0xff] }
0x2b30   :  { %16479 = vmatprep.subr.bf16.mxu0 %v17186_v21 }
0x2b5e   :  { %v8273_v39 = vpop.f32.mrb[60].mxu0 }
0x2b5f   :  { %v8277_v41 = vadd.f32 %v8273_v39, %v8038_v10  ;;  %v14582_v62 = vpop.f32.mrb[61].mxu0  ;;  %v16435_v10 = vpack.c.bf16 %v8609_v53, %v8608_v45  ;;  %v8851_v39 = vld [vmem:[%s20347_s9 + $0x398] sm:$0xff] }
0x2b60   :  { %v8930_v45 = vld [vmem:[%s20347_s9 + $0x238] sm:$0xff] }
0x2bd1   :  { %v8353_v58 = vpop.f32.mrb[62].mxu0 }
0x2bd2   :  { %v8357_v4 = vadd.f32 %v8353_v58, %v8277_v41  ;;  %v14593_v52 = vpop.f32.mrb[63].mxu0  ;;  %v16480_v41 = vpack.c.bf16 %v8851_v39, %v8850_v37  ;;  %v8927_v58 = vld [vmem:[%s20347_s9 + $0x220] sm:$0xff]  ;;  %v9257_v39 = vld [vmem:[%s20347_s9 + $0x1e8] sm:$0xff] }
0x2bd4   :  { %16481 = vmatpush3.bf16.msra.mxu0 %v16480_v41 }
0x2bd5   :  { %16482 = vmatprep.subr.bf16.mxu0 %v17186_v21 }
0x2c01   :  { %v8511_v44 = vpop.f32.mrb[64].mxu0 }
0x2c02   :  { %v16908_v11 = vadd.f32 %v18975_v54, %v8511_v44  ;;  %v14647_v13 = vpop.f32.mrb[65].mxu0  ;;  %v8611_v54 = vld [vmem:[%s20347_s9 + $0x278] sm:$0xff] }
0x2c03   :  { %v16438_v9 = vpack.c.bf16 %v8611_v54, %v8610_v28  ;;  %v8929_v13 = vld [vmem:[%s20347_s9 + $0x230] sm:$0xff] }
0x2c04   :  { %17136 = vtanh.f32 %v16908_v11  ;;  %v16486_v53 = vpack.c.bf16 %v8930_v45, %v8929_v13  ;;  %v9496_v13 = vld [vmem:[%s20347_s9 + $0x400] sm:$0xff]  ;;  %v9497_v45 = vld [vmem:[%s20347_s9 + $0x408] sm:$0xff] }
0x2c0e   :  { %v17137_v34 = vpop.eup %17136 }
0x2c0f   :  { %v8517_v29 = vmax.f32 %v17137_v34, 0.0 }
0x2c11   :  { %8612 = vrot.lane.b32.xlu1 %v8517_v29, %s17192_s15  ;;  %14657 = vmatmul.mubr.msk.f32.vlgmr.msra.gmra.mrb[60].mxu1 %vm450_vm3, %v8517_v29  ;;  %v8525_v23 = vrot.slane %v8517_v29, %v17870_v27 }
0x2c12   :  { %16436 = vmatpush3.bf16.msra.mxu1 %v16435_v10  ;;  %14667 = vmatprep.mubr.msk.f32.mxu1 %vm17187_vm1, %v17188_v31  ;;  %v9007_v10 = vld [vmem:[#allocation2 + $0x6] sm:$0x3] }
0x2c13   :  { %8526 = vrot.lane.b32.xlu0 %v8525_v23, %s17191_s0  ;;  %16437 = vmatprep.subr.bf16.mxu1 %v17186_v21  ;;  %v9019_v29 = vsel %vm524_vm5, %v19218_v38, %v9007_v10  ;;  %v9178_v23 = vld [vmem:[%s20347_s9 + $0x3c0] sm:$0xff]  ;;  %v9499_v10 = vld [vmem:[%s20347_s9 + $0x418] sm:$0xff] }
0x2c16   :  { %16439 = vmatpush3.bf16.msra.mxu1 %v16438_v9  ;;  %v9179_v9 = vld [vmem:[%s20347_s9 + $0x3c8] sm:$0xff] }
0x2c17   :  { %16440 = vmatprep.subr.bf16.mxu1 %v17186_v21 }
0x2c83   :  { %v8613_v46 = vpop.permute.xlu1 %8612 }
0x2c84   :  { %14668 = vmatmul.mubr.msk.f32.vlgmr.msra.gmra.mrb[62].mxu1 %vm450_vm3, %v8613_v46  ;;  %v9180_v46 = vld [vmem:[%s20347_s9 + $0x3d0] sm:$0xff] }
0x2c85   :  { %16442 = vmatpush3.bf16.msra.mxu1 %v18232_v15  ;;  %v8527_v42 = vpop.permute.xlu0 %8526  ;;  %14702 = vmatprep.mubr.msk.f32.mxu1 %vm17187_vm1, %v17188_v31 }
0x2c86   :  { %8529 = vst.msk [vmem:[%s20350_s12 + $0xc] sm:$0x3] %vm768_vm7, %v8527_v42  ;;  %16443 = vmatprep.subr.bf16.mxu1 %v17186_v21 }
0x2c87   :  { %8607 = vst.msk [vmem:[%s20350_s12 + $0x8] sm:$0x3] %vm770_vm8, %v8527_v42  ;;  %v16525_v42 = vpack.c.bf16 %v9179_v9, %v9178_v23 }
0x2c89   :  { %16445 = vmatpush3.bf16.msra.mxu1 %v18238_v57 }
0x2c8a   :  { %16446 = vmatprep.subr.bf16.mxu1 %v17186_v21 }
0x2c8d   :  { %16448 = vmatpush3.bf16.msra.mxu1 %v18248_v14 }
0x2c8e   :  { %16449 = vmatprep.subr.bf16.mxu1 %v17186_v21 }
0x2c91   :  { %16451 = vmatpush3.bf16.msra.mxu1 %v18258_v16 }
0x2c92   :  { %16452 = vmatprep.subr.bf16.mxu1 %v17186_v21 }
0x2c95   :  { %16454 = vmatpush3.bf16.msra.mxu1 %v18268_v30 }
0x2c96   :  { %16455 = vmatprep.subr.bf16.mxu1 %v17186_v21 }
0x2c99   :  { %16457 = vmatpush3.bf16.msra.mxu1 %v18278_v18 }
0x2c9a   :  { %16458 = vmatprep.subr.bf16.mxu1 %v17186_v21 }
0x2c9d   :  { %16460 = vmatpush3.bf16.msra.mxu1 %v18288_v1 }
0x2c9e   :  { %16461 = vmatprep.subr.bf16.mxu1 %v17186_v21 }
0x2ca1   :  { %16463 = vmatpush3.bf16.msra.mxu1 %v18298_v55 }
0x2ca2   :  { %16464 = vmatprep.subr.bf16.mxu1 %v17186_v21 }
0x2ca4   :  { %14703 = vmatmul.mubr.f32.vlgmr.msra.gmra.mrb[64].mxu1 %v8700_v40  ;;  %v16528_v40 = vpack.c.bf16 %v9181_v5, %v9180_v46  ;;  %v9576_v5 = vld [vmem:[%s20347_s9 + $0x1a8] sm:$0xff] }
0x2ca5   :  { %16466 = vmatpush3.bf16.msra.mxu1 %v18318_v22  ;;  %14721 = vmatprep.mubr.msk.f32.mxu1 %vm17187_vm1, %v17188_v31 }
0x2ca6   :  { %16467 = vmatprep.subr.bf16.mxu1 %v17186_v21 }
0x2ca9   :  { %16469 = vmatpush3.bf16.msra.mxu1 %v18328_v3 }
0x2caa   :  { %16470 = vmatprep.subr.bf16.mxu1 %v17186_v21 }
0x2cad   :  { %16472 = vmatpush3.bf16.msra.mxu1 %v18342_v59 }
0x2cae   :  { %16473 = vmatprep.subr.bf16.mxu1 %v17186_v21 }
0x2cb1   :  { %16475 = vmatpush3.bf16.msra.mxu1 %v18358_v36 }
0x2cb2   :  { %16524 = vmatprep.subr.bf16.mxu1 %v17186_v21 }
0x2cb4   :  { %14722 = vmatmul.mubr.msk.f32.vlgmr.msra.gmra.mrb[64].mxu1 %vm524_vm5, %v17137_v34 }
0x2cb5   :  { %14808 = vmatprep.mubr.msk.f32.mxu1 %vm17187_vm1, %v17188_v31  ;;  %16526 = vmatpush3.bf16.msra.mxu1 %v16525_v42  ;;  %v9575_v42 = vld [vmem:[%s20347_s9 + $0x1a0] sm:$0xff] }
0x2cb6   :  { %16527 = vmatprep.subr.bf16.mxu1 %v17186_v21 }
0x2cb9   :  { %16529 = vmatpush3.bf16.msra.mxu1 %v16528_v40 }
0x2cba   :  { %16530 = vmatprep.subr.bf16.mxu1 %v17186_v21 }
0x2ce4   :  { %v8602_v8 = vpop.f32.mrb[60].mxu1 }
0x2ce5   :  { %v8606_v56 = vadd.f32 %v8602_v8, %v8357_v4  ;;  %v14658_v50 = vpop.f32.mrb[61].mxu1  ;;  %v8928_v4 = vld [vmem:[%s20347_s9 + $0x228] sm:$0xff] }
0x2ce6   :  { %v16483_v44 = vpack.c.bf16 %v8928_v4, %v8927_v58  ;;  %v9335_v58 = vld [vmem:[#allocation2 + $0x10] sm:$0x3] }
0x2ce7   :  { %v9348_v4 = vsel %vm524_vm5, %v9335_v58, %v19222_v35  ;;  %v9829_v58 = vld [vmem:[%s20347_s9 + $0x458] sm:$0xff] }
0x2d57   :  { %v8682_v62 = vpop.f32.mrb[62].mxu1 }
0x2d58   :  { %v8686_v17 = vadd.f32 %v8682_v62, %v8606_v56  ;;  %v14669_v0 = vpop.f32.mrb[63].mxu1  ;;  %v16531_v62 = vpack.c.bf16 %v9257_v39, %v9256_v2  ;;  %v9655_v2 = vld [vmem:[#allocation2 + $0x4] sm:$0x3] }
0x2d59   :  { %v9258_v0 = vld [vmem:[%s20347_s9 + $0x1f0] sm:$0xff]  ;;  %v9667_v39 = vsel %vm524_vm5, %v19227_v7, %v9655_v2 }
0x2d5a   :  { %v10146_v2 = vld [vmem:[%s20347_s9 + $0x490] sm:$0xff] }
0x2d87   :  { %v8840_v32 = vpop.f32.mrb[64].mxu1 }
0x2d88   :  { %v16909_v43 = vadd.f32 %v19605_v49, %v8840_v32  ;;  %v14723_v25 = vpop.f32.mrb[65].mxu1  ;;  %v9259_v32 = vld [vmem:[%s20347_s9 + $0x1f8] sm:$0xff] }
0x2d8a   :  { %17138 = vtanh.f32 %v16909_v43  ;;  %v16534_v43 = vpack.c.bf16 %v9259_v32, %v9258_v0  ;;  %v9826_v0 = vld [vmem:[%s20347_s9 + $0x440] sm:$0xff]  ;;  %v9827_v32 = vld [vmem:[%s20347_s9 + $0x448] sm:$0xff] }
0x2d94   :  { %v17139_v52 = vpop.eup %17138 }
0x2d95   :  { %v19614_v11 = vmax.f32 %v17139_v52, 0.0 }
0x2d97   :  { %8931 = vrot.lane.b32.xlu1 %v19614_v11, %s17192_s15  ;;  %8926 = vst.msk [vmem:[%s20350_s12 + $0x8] sm:$0x3] %vm602_vm4, %v19614_v11  ;;  %14733 = vmatmul.mubr.msk.f32.vlgmr.msra.gmra.mrb[66].mxu0 %vm450_vm3, %v19614_v11 }
0x2d98   :  { %16484 = vmatpush3.bf16.msra.mxu0 %v16483_v44  ;;  %14743 = vmatprep.mubr.msk.f32.mxu0 %vm17187_vm1, %v17188_v31 }
0x2d99   :  { %16485 = vmatprep.subr.bf16.mxu0 %v17186_v21 }
0x2d9c   :  { %16487 = vmatpush3.bf16.msra.mxu0 %v16486_v53  ;;  %v9498_v53 = vld [vmem:[%s20347_s9 + $0x410] sm:$0xff] }
0x2d9d   :  { %16488 = vmatprep.subr.bf16.mxu0 %v17186_v21 }
0x2e09   :  { %v8932_v34 = vpop.permute.xlu1 %8931 }
0x2e0a   :  { %14744 = vmatmul.mubr.msk.f32.vlgmr.msra.gmra.mrb[68].mxu0 %vm450_vm3, %v8932_v34  ;;  %v16573_v34 = vpack.c.bf16 %v9497_v45, %v9496_v13 }
0x2e0b   :  { %16490 = vmatpush3.bf16.msra.mxu0 %v18232_v15  ;;  %14778 = vmatprep.mubr.msk.f32.mxu0 %vm17187_vm1, %v17188_v31 }
0x2e0c   :  { %16491 = vmatprep.subr.bf16.mxu0 %v17186_v21 }
0x2e0f   :  { %16493 = vmatpush3.bf16.msra.mxu0 %v18238_v57 }
0x2e10   :  { %16494 = vmatprep.subr.bf16.mxu0 %v17186_v21 }
0x2e13   :  { %16496 = vmatpush3.bf16.msra.mxu0 %v18248_v14 }
0x2e14   :  { %16497 = vmatprep.subr.bf16.mxu0 %v17186_v21 }
0x2e17   :  { %16499 = vmatpush3.bf16.msra.mxu0 %v18258_v16 }
0x2e18   :  { %16500 = vmatprep.subr.bf16.mxu0 %v17186_v21 }
0x2e1b   :  { %16502 = vmatpush3.bf16.msra.mxu0 %v18268_v30 }
0x2e1c   :  { %16503 = vmatprep.subr.bf16.mxu0 %v17186_v21 }
0x2e1f   :  { %16505 = vmatpush3.bf16.msra.mxu0 %v18278_v18 }
0x2e20   :  { %16506 = vmatprep.subr.bf16.mxu0 %v17186_v21 }
0x2e23   :  { %16508 = vmatpush3.bf16.msra.mxu0 %v18288_v1 }
0x2e24   :  { %16509 = vmatprep.subr.bf16.mxu0 %v17186_v21 }
0x2e27   :  { %16511 = vmatpush3.bf16.msra.mxu0 %v18298_v55 }
0x2e28   :  { %16512 = vmatprep.subr.bf16.mxu0 %v17186_v21 }
0x2e2a   :  { %14779 = vmatmul.mubr.f32.vlgmr.msra.gmra.mrb[70].mxu0 %v9019_v29  ;;  %v16576_v29 = vpack.c.bf16 %v9499_v10, %v9498_v53  ;;  %v9905_v10 = vld [vmem:[%s20347_s9 + $0x168] sm:$0xff] }
0x2e2b   :  { %16514 = vmatpush3.bf16.msra.mxu0 %v18318_v22  ;;  %14797 = vmatprep.mubr.msk.f32.mxu0 %vm17187_vm1, %v17188_v31 }
0x2e2c   :  { %16515 = vmatprep.subr.bf16.mxu0 %v17186_v21 }
0x2e2f   :  { %16517 = vmatpush3.bf16.msra.mxu0 %v18328_v3 }
0x2e30   :  { %16518 = vmatprep.subr.bf16.mxu0 %v17186_v21 }
0x2e33   :  { %16520 = vmatpush3.bf16.msra.mxu0 %v18342_v59 }
0x2e34   :  { %16521 = vmatprep.subr.bf16.mxu0 %v17186_v21 }
0x2e37   :  { %16523 = vmatpush3.bf16.msra.mxu0 %v18358_v36 }
0x2e38   :  { %16572 = vmatprep.subr.bf16.mxu0 %v17186_v21 }
0x2e3a   :  { %14798 = vmatmul.mubr.msk.f32.vlgmr.msra.gmra.mrb[70].mxu0 %vm524_vm5, %v17139_v52 }
0x2e3b   :  { %14884 = vmatprep.mubr.msk.f32.mxu0 %vm17187_vm1, %v17188_v31  ;;  %16574 = vmatpush3.bf16.msra.mxu0 %v16573_v34  ;;  %v9904_v34 = vld [vmem:[%s20347_s9 + $0x160] sm:$0xff] }
0x2e3c   :  { %16575 = vmatprep.subr.bf16.mxu0 %v17186_v21 }
0x2e3f   :  { %16577 = vmatpush3.bf16.msra.mxu0 %v16576_v29 }
0x2e40   :  { %16578 = vmatprep.subr.bf16.mxu0 %v17186_v21 }
0x2e6a   :  { %v8921_v38 = vpop.f32.mrb[66].mxu0 }
0x2e6b   :  { %v8925_v28 = vadd.f32 %v8921_v38, %v8686_v17  ;;  %v14734_v54 = vpop.f32.mrb[67].mxu0 }
0x2edd   :  { %v9001_v8 = vpop.f32.mrb[68].mxu0 }
0x2ede   :  { %v9005_v56 = vadd.f32 %v9001_v8, %v8925_v28  ;;  %v14745_v50 = vpop.f32.mrb[69].mxu0  ;;  %v16579_v8 = vpack.c.bf16 %v9576_v5, %v9575_v42 }
0x2edf   :  { %v9577_v50 = vld [vmem:[%s20347_s9 + $0x1b0] sm:$0xff] }
0x2f0d   :  { %v9159_v33 = vpop.f32.mrb[70].mxu0 }
0x2f0e   :  { %v16910_v24 = vadd.f32 %v19605_v49, %v9159_v33  ;;  %v14799_v37 = vpop.f32.mrb[71].mxu0  ;;  %v9578_v33 = vld [vmem:[%s20347_s9 + $0x1b8] sm:$0xff] }
0x2f10   :  { %17140 = vtanh.f32 %v16910_v24  ;;  %v16582_v24 = vpack.c.bf16 %v9578_v33, %v9577_v50 }
0x2f1a   :  { %v17141_v41 = vpop.eup %17140 }
0x2f1b   :  { %v19690_v17 = vmax.f32 %v17141_v41, 0.0 }
0x2f1d   :  { %9260 = vrot.lane.b32.xlu1 %v19690_v17, %s17192_s15  ;;  %14809 = vmatmul.mubr.msk.f32.vlgmr.msra.gmra.mrb[66].mxu1 %vm450_vm3, %v19690_v17 }
0x2f1e   :  { %16532 = vmatpush3.bf16.msra.mxu1 %v16531_v62  ;;  %14819 = vmatprep.mubr.msk.f32.mxu1 %vm17187_vm1, %v17188_v31 }
0x2f1f   :  { %16533 = vmatprep.subr.bf16.mxu1 %v17186_v21 }
0x2f22   :  { %16535 = vmatpush3.bf16.msra.mxu1 %v16534_v43  ;;  %v9828_v43 = vld [vmem:[%s20347_s9 + $0x450] sm:$0xff] }
0x2f23   :  { %16536 = vmatprep.subr.bf16.mxu1 %v17186_v21 }
0x2f8f   :  { %v9261_v25 = vpop.permute.xlu1 %9260 }
0x2f90   :  { %14820 = vmatmul.mubr.msk.f32.vlgmr.msra.gmra.mrb[68].mxu1 %vm450_vm3, %v9261_v25  ;;  %v16621_v25 = vpack.c.bf16 %v9827_v32, %v9826_v0 }
0x2f91   :  { %16538 = vmatpush3.bf16.msra.mxu1 %v18232_v15  ;;  %14854 = vmatprep.mubr.msk.f32.mxu1 %vm17187_vm1, %v17188_v31 }
0x2f92   :  { %16539 = vmatprep.subr.bf16.mxu1 %v17186_v21 }
0x2f95   :  { %16541 = vmatpush3.bf16.msra.mxu1 %v18238_v57 }
0x2f96   :  { %16542 = vmatprep.subr.bf16.mxu1 %v17186_v21 }
0x2f99   :  { %16544 = vmatpush3.bf16.msra.mxu1 %v18248_v14 }
0x2f9a   :  { %16545 = vmatprep.subr.bf16.mxu1 %v17186_v21 }
0x2f9d   :  { %16547 = vmatpush3.bf16.msra.mxu1 %v18258_v16 }
0x2f9e   :  { %16548 = vmatprep.subr.bf16.mxu1 %v17186_v21 }
0x2fa1   :  { %16550 = vmatpush3.bf16.msra.mxu1 %v18268_v30 }
0x2fa2   :  { %16551 = vmatprep.subr.bf16.mxu1 %v17186_v21 }
0x2fa5   :  { %16553 = vmatpush3.bf16.msra.mxu1 %v18278_v18 }
0x2fa6   :  { %16554 = vmatprep.subr.bf16.mxu1 %v17186_v21 }
0x2fa9   :  { %16556 = vmatpush3.bf16.msra.mxu1 %v18288_v1 }
0x2faa   :  { %16557 = vmatprep.subr.bf16.mxu1 %v17186_v21 }
0x2fad   :  { %16559 = vmatpush3.bf16.msra.mxu1 %v18298_v55 }
0x2fae   :  { %16560 = vmatprep.subr.bf16.mxu1 %v17186_v21 }
0x2fb0   :  { %14855 = vmatmul.mubr.f32.vlgmr.msra.gmra.mrb[70].mxu1 %v9348_v4  ;;  %v16624_v4 = vpack.c.bf16 %v9829_v58, %v9828_v43 }
0x2fb1   :  { %16562 = vmatpush3.bf16.msra.mxu1 %v18318_v22  ;;  %14873 = vmatprep.mubr.msk.f32.mxu1 %vm17187_vm1, %v17188_v31 }
0x2fb2   :  { %16563 = vmatprep.subr.bf16.mxu1 %v17186_v21 }
0x2fb5   :  { %16565 = vmatpush3.bf16.msra.mxu1 %v18328_v3 }
0x2fb6   :  { %16566 = vmatprep.subr.bf16.mxu1 %v17186_v21 }
0x2fb9   :  { %16568 = vmatpush3.bf16.msra.mxu1 %v18342_v59 }
0x2fba   :  { %16569 = vmatprep.subr.bf16.mxu1 %v17186_v21 }
0x2fbd   :  { %16571 = vmatpush3.bf16.msra.mxu1 %v18358_v36 }
0x2fbe   :  { %16620 = vmatprep.subr.bf16.mxu1 %v17186_v21 }
0x2fc0   :  { %14874 = vmatmul.mubr.msk.f32.vlgmr.msra.gmra.mrb[70].mxu1 %vm524_vm5, %v17141_v41 }
0x2fc1   :  { %14960 = vmatprep.mubr.msk.f32.mxu1 %vm17187_vm1, %v17188_v31  ;;  %16622 = vmatpush3.bf16.msra.mxu1 %v16621_v25 }
0x2fc2   :  { %16623 = vmatprep.subr.bf16.mxu1 %v17186_v21 }
0x2fc5   :  { %16625 = vmatpush3.bf16.msra.mxu1 %v16624_v4  ;;  %v10223_v4 = vld [vmem:[%s20347_s9 + $0x120] sm:$0xff] }
0x2fc6   :  { %16626 = vmatprep.subr.bf16.mxu1 %v17186_v21 }
0x2ff0   :  { %v9250_v35 = vpop.f32.mrb[66].mxu1 }
0x2ff1   :  { %v9254_v52 = vadd.f32 %v9250_v35, %v9005_v56  ;;  %v14810_v44 = vpop.f32.mrb[67].mxu1 }
0x3063   :  { %v9330_v38 = vpop.f32.mrb[68].mxu1 }
0x3064   :  { %v9334_v28 = vadd.f32 %v9330_v38, %v9254_v52  ;;  %v14821_v54 = vpop.f32.mrb[69].mxu1  ;;  %v16627_v38 = vpack.c.bf16 %v9905_v10, %v9904_v34 }
0x3065   :  { %v9906_v54 = vld [vmem:[%s20347_s9 + $0x170] sm:$0xff] }
0x3093   :  { %v9488_v23 = vpop.f32.mrb[70].mxu1 }
0x3094   :  { %v16911_v9 = vadd.f32 %v19605_v49, %v9488_v23  ;;  %v14875_v46 = vpop.f32.mrb[71].mxu1  ;;  %v9907_v23 = vld [vmem:[%s20347_s9 + $0x178] sm:$0xff] }
0x3095   :  { %v16630_v46 = vpack.c.bf16 %v9907_v23, %v9906_v54  ;;  %v10474_v23 = vld [vmem:[%s20347_s9 + $0x4c0] sm:$0xff] }
0x3096   :  { %17142 = vtanh.f32 %v16911_v9 }
0x30a0   :  { %v17143_v40 = vpop.eup %17142 }
0x30a1   :  { %v19761_v56 = vmax.f32 %v17143_v40, 0.0 }
0x30a3   :  { %9579 = vrot.lane.b32.xlu1 %v19761_v56, %s17192_s15  ;;  %9495 = vst.msk [vmem:[%s20350_s12 + $0x10] sm:$0x3] %vm600_vm6, %v19761_v56  ;;  %14885 = vmatmul.mubr.msk.f32.vlgmr.msra.gmra.mrb[72].mxu0 %vm450_vm3, %v19761_v56 }
0x30a4   :  { %16580 = vmatpush3.bf16.msra.mxu0 %v16579_v8  ;;  %14895 = vmatprep.mubr.msk.f32.mxu0 %vm17187_vm1, %v17188_v31 }
0x30a5   :  { %16581 = vmatprep.subr.bf16.mxu0 %v17186_v21 }
0x30a8   :  { %16583 = vmatpush3.bf16.msra.mxu0 %v16582_v24  ;;  %v10144_v24 = vld [vmem:[%s20347_s9 + $0x480] sm:$0xff] }
0x30a9   :  { %16584 = vmatprep.subr.bf16.mxu0 %v17186_v21 }
0x3115   :  { %v9580_v37 = vpop.permute.xlu1 %9579 }
0x3116   :  { %14896 = vmatmul.mubr.msk.f32.vlgmr.msra.gmra.mrb[74].mxu0 %vm450_vm3, %v9580_v37  ;;  %v10145_v37 = vld [vmem:[%s20347_s9 + $0x488] sm:$0xff] }
0x3117   :  { %16586 = vmatpush3.bf16.msra.mxu0 %v18232_v15  ;;  %14930 = vmatprep.mubr.msk.f32.mxu0 %vm17187_vm1, %v17188_v31 }
0x3118   :  { %16587 = vmatprep.subr.bf16.mxu0 %v17186_v21 }
0x311b   :  { %16589 = vmatpush3.bf16.msra.mxu0 %v18238_v57 }
0x311c   :  { %16590 = vmatprep.subr.bf16.mxu0 %v17186_v21 }
0x311f   :  { %16592 = vmatpush3.bf16.msra.mxu0 %v18248_v14 }
0x3120   :  { %16593 = vmatprep.subr.bf16.mxu0 %v17186_v21 }
0x3123   :  { %16595 = vmatpush3.bf16.msra.mxu0 %v18258_v16 }
0x3124   :  { %16596 = vmatprep.subr.bf16.mxu0 %v17186_v21 }
0x3127   :  { %16598 = vmatpush3.bf16.msra.mxu0 %v18268_v30 }
0x3128   :  { %16599 = vmatprep.subr.bf16.mxu0 %v17186_v21 }
0x312b   :  { %16601 = vmatpush3.bf16.msra.mxu0 %v18278_v18 }
0x312c   :  { %16602 = vmatprep.subr.bf16.mxu0 %v17186_v21 }
0x312f   :  { %16604 = vmatpush3.bf16.msra.mxu0 %v18288_v1 }
0x3130   :  { %16605 = vmatprep.subr.bf16.mxu0 %v17186_v21 }
0x3133   :  { %16607 = vmatpush3.bf16.msra.mxu0 %v18298_v55 }
0x3134   :  { %16608 = vmatprep.subr.bf16.mxu0 %v17186_v21 }
0x3136   :  { %14931 = vmatmul.mubr.f32.vlgmr.msra.gmra.mrb[76].mxu0 %v9667_v39  ;;  %v16669_v39 = vpack.c.bf16 %v10145_v37, %v10144_v24 }
0x3137   :  { %16610 = vmatpush3.bf16.msra.mxu0 %v18318_v22  ;;  %14949 = vmatprep.mubr.msk.f32.mxu0 %vm17187_vm1, %v17188_v31 }
0x3138   :  { %16611 = vmatprep.subr.bf16.mxu0 %v17186_v21 }
0x313b   :  { %16613 = vmatpush3.bf16.msra.mxu0 %v18328_v3 }
0x313c   :  { %16614 = vmatprep.subr.bf16.mxu0 %v17186_v21 }
0x313f   :  { %16616 = vmatpush3.bf16.msra.mxu0 %v18342_v59 }
0x3140   :  { %16617 = vmatprep.subr.bf16.mxu0 %v17186_v21 }
0x3143   :  { %16619 = vmatpush3.bf16.msra.mxu0 %v18358_v36 }
0x3144   :  { %16668 = vmatprep.subr.bf16.mxu0 %v17186_v21 }
0x3146   :  { %14950 = vmatmul.mubr.msk.f32.vlgmr.msra.gmra.mrb[76].mxu0 %vm524_vm5, %v17143_v40  ;;  %v9983_v40 = vld [vmem:[#allocation2 + $0x12] sm:$0x3] }
0x3147   :  { %15036 = vmatprep.mubr.msk.f32.mxu0 %vm17187_vm1, %v17188_v31  ;;  %v9996_v8 = vsel %vm524_vm5, %v9983_v40, %v19233_v26  ;;  %16670 = vmatpush3.bf16.msra.mxu0 %v16669_v39  ;;  %v10553_v39 = vld [vmem:[%s20347_s9 + $0xe8] sm:$0xff] }
0x3148   :  { %16671 = vmatprep.subr.bf16.mxu0 %v17186_v21 }
0x3176   :  { %v9569_v7 = vpop.f32.mrb[72].mxu0 }
0x3177   :  { %v9573_v41 = vadd.f32 %v9569_v7, %v9334_v28  ;;  %v14886_v62 = vpop.f32.mrb[73].mxu0  ;;  %v10147_v7 = vld [vmem:[%s20347_s9 + $0x498] sm:$0xff] }
0x31e9   :  { %v9649_v35 = vpop.f32.mrb[74].mxu0 }
0x31ea   :  { %v9653_v52 = vadd.f32 %v9649_v35, %v9573_v41  ;;  %v14897_v44 = vpop.f32.mrb[75].mxu0  ;;  %v16672_v41 = vpack.c.bf16 %v10147_v7, %v10146_v2  ;;  %v10224_v35 = vld [vmem:[%s20347_s9 + $0x128] sm:$0xff]  ;;  %v10552_v2 = vld [vmem:[%s20347_s9 + $0xe0] sm:$0xff] }
0x31eb   :  { %v16675_v44 = vpack.c.bf16 %v10224_v35, %v10223_v4 }
0x31ec   :  { %16673 = vmatpush3.bf16.msra.mxu0 %v16672_v41  ;;  %v16723_v41 = vpack.c.bf16 %v10553_v39, %v10552_v2 }
0x31ed   :  { %16674 = vmatprep.subr.bf16.mxu0 %v17186_v21 }
0x3219   :  { %v9807_v13 = vpop.f32.mrb[76].mxu0 }
0x321a   :  { %v16912_v45 = vadd.f32 %v19605_v49, %v9807_v13  ;;  %v14951_v53 = vpop.f32.mrb[77].mxu0 }
0x321b   :  { %v10226_v53 = vld [vmem:[%s20347_s9 + $0x138] sm:$0xff] }
0x321c   :  { %17144 = vtanh.f32 %v16912_v45  ;;  %v10225_v45 = vld [vmem:[%s20347_s9 + $0x130] sm:$0xff] }
0x321d   :  { %v16678_v34 = vpack.c.bf16 %v10226_v53, %v10225_v45  ;;  %v10793_v45 = vld [vmem:[%s20347_s9 + $0x508] sm:$0xff]  ;;  %v10794_v53 = vld [vmem:[%s20347_s9 + $0x510] sm:$0xff] }
0x3226   :  { %v17145_v29 = vpop.eup %17144 }
0x3227   :  { %v9813_v28 = vmax.f32 %v17145_v29, 0.0 }
0x3229   :  { %9908 = vrot.lane.b32.xlu1 %v9813_v28, %s17192_s15  ;;  %14961 = vmatmul.mubr.msk.f32.vlgmr.msra.gmra.mrb[72].mxu1 %vm450_vm3, %v9813_v28  ;;  %v9821_v9 = vrot.slane %v9813_v28, %v17870_v27 }
0x322a   :  { %16628 = vmatpush3.bf16.msra.mxu1 %v16627_v38  ;;  %14971 = vmatprep.mubr.msk.f32.mxu1 %vm17187_vm1, %v17188_v31 }
0x322b   :  { %9822 = vrot.lane.b32.xlu0 %v9821_v9, %s17191_s0  ;;  %16629 = vmatprep.subr.bf16.mxu1 %v17186_v21  ;;  %v10475_v9 = vld [vmem:[%s20347_s9 + $0x4c8] sm:$0xff] }
0x322e   :  { %16631 = vmatpush3.bf16.msra.mxu1 %v16630_v46  ;;  %v10476_v46 = vld [vmem:[%s20347_s9 + $0x4d0] sm:$0xff] }
0x322f   :  { %16632 = vmatprep.subr.bf16.mxu1 %v17186_v21 }
0x329b   :  { %v9909_v42 = vpop.permute.xlu1 %9908 }
0x329c   :  { %14972 = vmatmul.mubr.msk.f32.vlgmr.msra.gmra.mrb[74].mxu1 %vm450_vm3, %v9909_v42  ;;  %v16717_v42 = vpack.c.bf16 %v10475_v9, %v10474_v23 }
0x329d   :  { %16634 = vmatpush3.bf16.msra.mxu1 %v18232_v15  ;;  %v9823_v5 = vpop.permute.xlu0 %9822  ;;  %15006 = vmatprep.mubr.msk.f32.mxu1 %vm17187_vm1, %v17188_v31 }
0x329e   :  { %9825 = vst.msk [vmem:[%s20350_s12 + $0x10] sm:$0x3] %vm768_vm7, %v9823_v5  ;;  %16635 = vmatprep.subr.bf16.mxu1 %v17186_v21 }
0x329f   :  { %9903 = vst.msk [vmem:[%s20350_s12 + $0x4] sm:$0x3] %vm770_vm8, %v9823_v5  ;;  %v10477_v5 = vld [vmem:[%s20347_s9 + $0x4d8] sm:$0xff] }
0x32a0   :  { %v16720_v40 = vpack.c.bf16 %v10477_v5, %v10476_v46  ;;  %v10871_v46 = vld [vmem:[%s20347_s9 + $0xa0] sm:$0xff] }
0x32a1   :  { %16637 = vmatpush3.bf16.msra.mxu1 %v18238_v57 }
0x32a2   :  { %16638 = vmatprep.subr.bf16.mxu1 %v17186_v21 }
0x32a5   :  { %16640 = vmatpush3.bf16.msra.mxu1 %v18248_v14 }
0x32a6   :  { %16641 = vmatprep.subr.bf16.mxu1 %v17186_v21 }
0x32a9   :  { %16643 = vmatpush3.bf16.msra.mxu1 %v18258_v16 }
0x32aa   :  { %16644 = vmatprep.subr.bf16.mxu1 %v17186_v21 }
0x32ad   :  { %16646 = vmatpush3.bf16.msra.mxu1 %v18268_v30 }
0x32ae   :  { %16647 = vmatprep.subr.bf16.mxu1 %v17186_v21 }
0x32b1   :  { %16649 = vmatpush3.bf16.msra.mxu1 %v18278_v18 }
0x32b2   :  { %16650 = vmatprep.subr.bf16.mxu1 %v17186_v21 }
0x32b5   :  { %16652 = vmatpush3.bf16.msra.mxu1 %v18288_v1 }
0x32b6   :  { %16653 = vmatprep.subr.bf16.mxu1 %v17186_v21 }
0x32b9   :  { %16655 = vmatpush3.bf16.msra.mxu1 %v18298_v55 }
0x32ba   :  { %16656 = vmatprep.subr.bf16.mxu1 %v17186_v21 }
0x32bc   :  { %15007 = vmatmul.mubr.f32.vlgmr.msra.gmra.mrb[76].mxu1 %v9996_v8 }
0x32bd   :  { %16658 = vmatpush3.bf16.msra.mxu1 %v18318_v22  ;;  %15025 = vmatprep.mubr.msk.f32.mxu1 %vm17187_vm1, %v17188_v31 }
0x32be   :  { %16659 = vmatprep.subr.bf16.mxu1 %v17186_v21 }
0x32c1   :  { %16661 = vmatpush3.bf16.msra.mxu1 %v18328_v3 }
0x32c2   :  { %16662 = vmatprep.subr.bf16.mxu1 %v17186_v21 }
0x32c5   :  { %16664 = vmatpush3.bf16.msra.mxu1 %v18342_v59 }
0x32c6   :  { %16665 = vmatprep.subr.bf16.mxu1 %v17186_v21 }
0x32c9   :  { %16667 = vmatpush3.bf16.msra.mxu1 %v18358_v36 }
0x32ca   :  { %16716 = vmatprep.subr.bf16.mxu1 %v17186_v21 }
0x32cc   :  { %15026 = vmatmul.mubr.msk.f32.vlgmr.msra.gmra.mrb[76].mxu1 %vm524_vm5, %v17145_v29  ;;  %v10303_v29 = vld [vmem:[#allocation2 + $0x2] sm:$0x3] }
0x32cd   :  { %15112 = vmatprep.mubr.msk.f32.mxu1 %vm17187_vm1, %v17188_v31  ;;  %v10315_v38 = vsel %vm524_vm5, %v19237_v63, %v10303_v29  ;;  %16718 = vmatpush3.bf16.msra.mxu1 %v16717_v42  ;;  %v10872_v42 = vld [vmem:[%s20347_s9 + $0xa8] sm:$0xff] }
0x32ce   :  { %16719 = vmatprep.subr.bf16.mxu1 %v17186_v21 }
0x32d1   :  { %16721 = vmatpush3.bf16.msra.mxu1 %v16720_v40  ;;  %v16771_v40 = vpack.c.bf16 %v10872_v42, %v10871_v46 }
0x32d2   :  { %16722 = vmatprep.subr.bf16.mxu1 %v17186_v21 }
0x32fc   :  { %v9898_v26 = vpop.f32.mrb[72].mxu1 }
0x32fd   :  { %v9902_v50 = vadd.f32 %v9898_v26, %v9653_v52  ;;  %v14962_v33 = vpop.f32.mrb[73].mxu1 }
0x336f   :  { %v9978_v62 = vpop.f32.mrb[74].mxu1 }
0x3370   :  { %v9982_v0 = vadd.f32 %v9978_v62, %v9902_v50  ;;  %v14973_v32 = vpop.f32.mrb[75].mxu1 }
0x3371   :  { %v10555_v32 = vld [vmem:[%s20347_s9 + $0xf8] sm:$0xff] }
0x339f   :  { %v10136_v43 = vpop.f32.mrb[76].mxu1 }
0x33a0   :  { %v16913_v25 = vadd.f32 %v19605_v49, %v10136_v43  ;;  %v15027_v58 = vpop.f32.mrb[77].mxu1 }
0x33a1   :  { %v10631_v58 = vld [vmem:[#allocation2 + $0x14] sm:$0x3] }
0x33a2   :  { %17146 = vtanh.f32 %v16913_v25  ;;  %v10644_v4 = vsel %vm524_vm5, %v10631_v58, %v19241_v19 }
0x33ac   :  { %v17147_v52 = vpop.eup %17146 }
0x33ad   :  { %v19914_v13 = vmax.f32 %v17147_v52, 0.0 }
0x33af   :  { %10227 = vrot.lane.b32.xlu1 %v19914_v13, %s17192_s15  ;;  %10222 = vst.msk [vmem:[%s20350_s12 + $0x4] sm:$0x3] %vm602_vm4, %v19914_v13  ;;  %15037 = vmatmul.mubr.msk.f32.vlgmr.msra.gmra.mrb[78].mxu0 %vm450_vm3, %v19914_v13 }
0x33b0   :  { %16676 = vmatpush3.bf16.msra.mxu0 %v16675_v44  ;;  %15047 = vmatprep.mubr.msk.f32.mxu0 %vm17187_vm1, %v17188_v31  ;;  %v10792_v44 = vld [vmem:[%s20347_s9 + $0x500] sm:$0xff] }
0x33b1   :  { %16677 = vmatprep.subr.bf16.mxu0 %v17186_v21 }
0x33b4   :  { %16679 = vmatpush3.bf16.msra.mxu0 %v16678_v34  ;;  %v16765_v34 = vpack.c.bf16 %v10793_v45, %v10792_v44 }
0x33b5   :  { %16680 = vmatprep.subr.bf16.mxu0 %v17186_v21 }
0x3421   :  { %v10228_v10 = vpop.permute.xlu1 %10227 }
0x3422   :  { %15048 = vmatmul.mubr.msk.f32.vlgmr.msra.gmra.mrb[80].mxu0 %vm450_vm3, %v10228_v10  ;;  %v10795_v10 = vld [vmem:[%s20347_s9 + $0x518] sm:$0xff] }
0x3423   :  { %16682 = vmatpush3.bf16.msra.mxu0 %v18232_v15  ;;  %15082 = vmatprep.mubr.msk.f32.mxu0 %vm17187_vm1, %v17188_v31  ;;  %v16768_v29 = vpack.c.bf16 %v10795_v10, %v10794_v53  ;;  %v11200_v53 = vld [vmem:[%s20347_s9 + $0x60] sm:$0xff] }
0x3424   :  { %16683 = vmatprep.subr.bf16.mxu0 %v17186_v21 }
0x3427   :  { %16685 = vmatpush3.bf16.msra.mxu0 %v18238_v57 }
0x3428   :  { %16686 = vmatprep.subr.bf16.mxu0 %v17186_v21 }
0x342b   :  { %16688 = vmatpush3.bf16.msra.mxu0 %v18248_v14 }
0x342c   :  { %16689 = vmatprep.subr.bf16.mxu0 %v17186_v21 }
0x342f   :  { %16691 = vmatpush3.bf16.msra.mxu0 %v18258_v16 }
0x3430   :  { %16692 = vmatprep.subr.bf16.mxu0 %v17186_v21 }
0x3433   :  { %16694 = vmatpush3.bf16.msra.mxu0 %v18268_v30 }
0x3434   :  { %16695 = vmatprep.subr.bf16.mxu0 %v17186_v21 }
0x3437   :  { %16697 = vmatpush3.bf16.msra.mxu0 %v18278_v18 }
0x3438   :  { %16698 = vmatprep.subr.bf16.mxu0 %v17186_v21 }
0x343b   :  { %16700 = vmatpush3.bf16.msra.mxu0 %v18288_v1 }
0x343c   :  { %16701 = vmatprep.subr.bf16.mxu0 %v17186_v21 }
0x343f   :  { %16703 = vmatpush3.bf16.msra.mxu0 %v18298_v55 }
0x3440   :  { %16704 = vmatprep.subr.bf16.mxu0 %v17186_v21 }
0x3442   :  { %15083 = vmatmul.mubr.f32.vlgmr.msra.gmra.mrb[82].mxu0 %v10315_v38 }
0x3443   :  { %16706 = vmatpush3.bf16.msra.mxu0 %v18318_v22  ;;  %15101 = vmatprep.mubr.msk.f32.mxu0 %vm17187_vm1, %v17188_v31 }
0x3444   :  { %16707 = vmatprep.subr.bf16.mxu0 %v17186_v21 }
0x3447   :  { %16709 = vmatpush3.bf16.msra.mxu0 %v18328_v3 }
0x3448   :  { %16710 = vmatprep.subr.bf16.mxu0 %v17186_v21 }
0x344b   :  { %16712 = vmatpush3.bf16.msra.mxu0 %v18342_v59 }
0x344c   :  { %16713 = vmatprep.subr.bf16.mxu0 %v17186_v21 }
0x344f   :  { %16715 = vmatpush3.bf16.msra.mxu0 %v18358_v36 }
0x3450   :  { %16764 = vmatprep.subr.bf16.mxu0 %v17186_v21 }
0x3452   :  { %15102 = vmatmul.mubr.msk.f32.vlgmr.msra.gmra.mrb[82].mxu0 %vm524_vm5, %v17147_v52 }
0x3453   :  { %15188 = vmatprep.mubr.msk.f32.mxu0 %vm17187_vm1, %v17188_v31  ;;  %16766 = vmatpush3.bf16.msra.mxu0 %v16765_v34  ;;  %v11201_v34 = vld [vmem:[%s20347_s9 + $0x68] sm:$0xff] }
0x3454   :  { %16767 = vmatprep.subr.bf16.mxu0 %v17186_v21 }
0x3457   :  { %16769 = vmatpush3.bf16.msra.mxu0 %v16768_v29  ;;  %v16819_v29 = vpack.c.bf16 %v11201_v34, %v11200_v53 }
0x3458   :  { %16770 = vmatprep.subr.bf16.mxu0 %v17186_v21 }
0x3482   :  { %v10217_v63 = vpop.f32.mrb[78].mxu0 }
0x3483   :  { %v10221_v28 = vadd.f32 %v10217_v63, %v9982_v0  ;;  %v15038_v54 = vpop.f32.mrb[79].mxu0  ;;  %v10554_v0 = vld [vmem:[%s20347_s9 + $0xf0] sm:$0xff] }
0x3484   :  { %v16726_v43 = vpack.c.bf16 %v10555_v32, %v10554_v0  ;;  %v11123_v0 = vld [vmem:[%s20347_s9 + $0x548] sm:$0xff]  ;;  %v11124_v32 = vld [vmem:[%s20347_s9 + $0x550] sm:$0xff] }
0x34f5   :  { %v10297_v8 = vpop.f32.mrb[80].mxu0 }
0x34f6   :  { %v10301_v26 = vadd.f32 %v10297_v8, %v10221_v28  ;;  %v15049_v50 = vpop.f32.mrb[81].mxu0 }
0x34f7   :  { %v10874_v50 = vld [vmem:[%s20347_s9 + $0xb8] sm:$0xff] }
0x3525   :  { %v10455_v33 = vpop.f32.mrb[82].mxu0 }
0x3526   :  { %v16914_v24 = vadd.f32 %v19605_v49, %v10455_v33  ;;  %v15103_v37 = vpop.f32.mrb[83].mxu0 }
0x3527   :  { %v10951_v37 = vld [vmem:[#allocation2] sm:$0x3] }
0x3528   :  { %17148 = vtanh.f32 %v16914_v24  ;;  %v10963_v2 = vsel %vm524_vm5, %v19245_v12, %v10951_v37 }
0x3532   :  { %v17149_v7 = vpop.eup %17148 }
0x3533   :  { %v19990_v62 = vmax.f32 %v17149_v7, 0.0 }
0x3535   :  { %10556 = vrot.lane.b32.xlu1 %v19990_v62, %s17192_s15  ;;  %15113 = vmatmul.mubr.msk.f32.vlgmr.msra.gmra.mrb[78].mxu1 %vm450_vm3, %v19990_v62 }
0x3536   :  { %16724 = vmatpush3.bf16.msra.mxu1 %v16723_v41  ;;  %15123 = vmatprep.mubr.msk.f32.mxu1 %vm17187_vm1, %v17188_v31  ;;  %v11122_v41 = vld [vmem:[%s20347_s9 + $0x540] sm:$0xff] }
0x3537   :  { %16725 = vmatprep.subr.bf16.mxu1 %v17186_v21 }
0x353a   :  { %16727 = vmatpush3.bf16.msra.mxu1 %v16726_v43  ;;  %v16813_v43 = vpack.c.bf16 %v11123_v0, %v11122_v41  ;;  %v5286_v41 = vrot.slane %v18635_v47, %v17870_v27  ;;  %v6582_v0 = vrot.slane %v18984_v20, %v17870_v27 }
0x353b   :  { %16728 = vmatprep.subr.bf16.mxu1 %v17186_v21 }
0x35a7   :  { %v10557_v25 = vpop.permute.xlu1 %10556 }
0x35a8   :  { %15124 = vmatmul.mubr.msk.f32.vlgmr.msra.gmra.mrb[80].mxu1 %vm450_vm3, %v10557_v25  ;;  %v11125_v25 = vld [vmem:[%s20347_s9 + $0x558] sm:$0xff] }
0x35a9   :  { %16730 = vmatpush3.bf16.msra.mxu1 %v18232_v15  ;;  %15158 = vmatprep.mubr.msk.f32.mxu1 %vm17187_vm1, %v17188_v31  ;;  %v16816_v58 = vpack.c.bf16 %v11125_v25, %v11124_v32  ;;  %v7877_v32 = vrot.slane %v19385_v48, %v17870_v27 }
0x35aa   :  { %16731 = vmatprep.subr.bf16.mxu1 %v17186_v21 }
0x35ad   :  { %16733 = vmatpush3.bf16.msra.mxu1 %v18238_v57 }
0x35ae   :  { %16734 = vmatprep.subr.bf16.mxu1 %v17186_v21 }
0x35b1   :  { %16736 = vmatpush3.bf16.msra.mxu1 %v18248_v14 }
0x35b2   :  { %16737 = vmatprep.subr.bf16.mxu1 %v17186_v21 }
0x35b5   :  { %16739 = vmatpush3.bf16.msra.mxu1 %v18258_v16 }
0x35b6   :  { %16740 = vmatprep.subr.bf16.mxu1 %v17186_v21 }
0x35b9   :  { %16742 = vmatpush3.bf16.msra.mxu1 %v18268_v30 }
0x35ba   :  { %16743 = vmatprep.subr.bf16.mxu1 %v17186_v21 }
0x35bd   :  { %16745 = vmatpush3.bf16.msra.mxu1 %v18278_v18 }
0x35be   :  { %16746 = vmatprep.subr.bf16.mxu1 %v17186_v21 }
0x35c1   :  { %16748 = vmatpush3.bf16.msra.mxu1 %v18288_v1 }
0x35c2   :  { %16749 = vmatprep.subr.bf16.mxu1 %v17186_v21 }
0x35c5   :  { %16751 = vmatpush3.bf16.msra.mxu1 %v18298_v55 }
0x35c6   :  { %16752 = vmatprep.subr.bf16.mxu1 %v17186_v21 }
0x35c8   :  { %15159 = vmatmul.mubr.f32.vlgmr.msra.gmra.mrb[82].mxu1 %v10644_v4 }
0x35c9   :  { %16754 = vmatpush3.bf16.msra.mxu1 %v18318_v22  ;;  %15177 = vmatprep.mubr.msk.f32.mxu1 %vm17187_vm1, %v17188_v31 }
0x35ca   :  { %16755 = vmatprep.subr.bf16.mxu1 %v17186_v21 }
0x35cd   :  { %16757 = vmatpush3.bf16.msra.mxu1 %v18328_v3 }
0x35ce   :  { %16758 = vmatprep.subr.bf16.mxu1 %v17186_v21 }
0x35d1   :  { %16760 = vmatpush3.bf16.msra.mxu1 %v18342_v59 }
0x35d2   :  { %16761 = vmatprep.subr.bf16.mxu1 %v17186_v21 }
0x35d5   :  { %16763 = vmatpush3.bf16.msra.mxu1 %v18358_v36 }
0x35d6   :  { %16812 = vmatprep.subr.bf16.mxu1 %v17186_v21 }
0x35d8   :  { %15178 = vmatmul.mubr.msk.f32.vlgmr.msra.gmra.mrb[82].mxu1 %vm524_vm5, %v17149_v7 }
0x35d9   :  { %15264 = vmatprep.mubr.msk.f32.mxu1 %vm17187_vm1, %v17188_v31  ;;  %16814 = vmatpush3.bf16.msra.mxu1 %v16813_v43 }
0x35da   :  { %16815 = vmatprep.subr.bf16.mxu1 %v17186_v21 }
0x35dd   :  { %16817 = vmatpush3.bf16.msra.mxu1 %v16816_v58 }
0x35de   :  { %16818 = vmatprep.subr.bf16.mxu1 %v17186_v21 }
0x3608   :  { %v10546_v19 = vpop.f32.mrb[78].mxu1 }
0x3609   :  { %v10550_v35 = vadd.f32 %v10546_v19, %v10301_v26  ;;  %v15114_v52 = vpop.f32.mrb[79].mxu1  ;;  %v10873_v26 = vld [vmem:[%s20347_s9 + $0xb0] sm:$0xff] }
0x360a   :  { %v16774_v33 = vpack.c.bf16 %v10874_v50, %v10873_v26  ;;  %v11519_v50 = vld [vmem:[%s20347_s9 + $0x20] sm:$0xff] }
0x367b   :  { %v10626_v38 = vpop.f32.mrb[80].mxu1 }
0x367c   :  { %v10630_v63 = vadd.f32 %v10626_v38, %v10550_v35  ;;  %v15125_v28 = vpop.f32.mrb[81].mxu1 }
0x36ab   :  { %v10784_v54 = vpop.f32.mrb[82].mxu1 }
0x36ac   :  { %v16915_v23 = vadd.f32 %v19605_v49, %v10784_v54  ;;  %v15179_v9 = vpop.f32.mrb[83].mxu1 }
0x36ae   :  { %17150 = vtanh.f32 %v16915_v23 }
0x36b8   :  { %v17151_v5 = vpop.eup %17150 }
0x36b9   :  { %v20061_v8 = vmax.f32 %v17151_v5, 0.0 }
0x36bb   :  { %10875 = vrot.lane.b32.xlu1 %v20061_v8, %s17192_s15  ;;  %10791 = vst.msk [vmem:[%s20350_s12 + $0x14] sm:$0x3] %vm600_vm6, %v20061_v8  ;;  %15189 = vmatmul.mubr.msk.f32.vlgmr.msra.gmra.mrb[84].mxu0 %vm450_vm3, %v20061_v8 }
0x36bc   :  { %16772 = vmatpush3.bf16.msra.mxu0 %v16771_v40  ;;  %15199 = vmatprep.mubr.msk.f32.mxu0 %vm17187_vm1, %v17188_v31 }
0x36bd   :  { %16773 = vmatprep.subr.bf16.mxu0 %v17186_v21 }
0x36c0   :  { %16775 = vmatpush3.bf16.msra.mxu0 %v16774_v33  ;;  %v11520_v33 = vld [vmem:[%s20347_s9 + $0x28] sm:$0xff] }
0x36c1   :  { %16776 = vmatprep.subr.bf16.mxu0 %v17186_v21  ;;  %v16867_v37 = vpack.c.bf16 %v11520_v33, %v11519_v50 }
0x372d   :  { %v10876_v24 = vpop.permute.xlu1 %10875 }
0x372e   :  { %15200 = vmatmul.mubr.msk.f32.vlgmr.msra.gmra.mrb[86].mxu0 %vm450_vm3, %v10876_v24 }
0x372f   :  { %16778 = vmatpush3.bf16.msra.mxu0 %v18232_v15  ;;  %15234 = vmatprep.mubr.msk.f32.mxu0 %vm17187_vm1, %v17188_v31 }
0x3730   :  { %16779 = vmatprep.subr.bf16.mxu0 %v17186_v21 }
0x3733   :  { %16781 = vmatpush3.bf16.msra.mxu0 %v18238_v57 }
0x3734   :  { %16782 = vmatprep.subr.bf16.mxu0 %v17186_v21 }
0x3737   :  { %16784 = vmatpush3.bf16.msra.mxu0 %v18248_v14 }
0x3738   :  { %16785 = vmatprep.subr.bf16.mxu0 %v17186_v21 }
0x373b   :  { %16787 = vmatpush3.bf16.msra.mxu0 %v18258_v16 }
0x373c   :  { %16788 = vmatprep.subr.bf16.mxu0 %v17186_v21 }
0x373f   :  { %16790 = vmatpush3.bf16.msra.mxu0 %v18268_v30 }
0x3740   :  { %16791 = vmatprep.subr.bf16.mxu0 %v17186_v21 }
0x3743   :  { %16793 = vmatpush3.bf16.msra.mxu0 %v18278_v18 }
0x3744   :  { %16794 = vmatprep.subr.bf16.mxu0 %v17186_v21 }
0x3747   :  { %16796 = vmatpush3.bf16.msra.mxu0 %v18288_v1 }
0x3748   :  { %16797 = vmatprep.subr.bf16.mxu0 %v17186_v21 }
0x374b   :  { %16799 = vmatpush3.bf16.msra.mxu0 %v18298_v55 }
0x374c   :  { %16800 = vmatprep.subr.bf16.mxu0 %v17186_v21 }
0x374e   :  { %15235 = vmatmul.mubr.f32.vlgmr.msra.gmra.mrb[88].mxu0 %v10963_v2 }
0x374f   :  { %16802 = vmatpush3.bf16.msra.mxu0 %v18318_v22  ;;  %15253 = vmatprep.mubr.msk.f32.mxu0 %vm17187_vm1, %v17188_v31 }
0x3750   :  { %16803 = vmatprep.subr.bf16.mxu0 %v17186_v21 }
0x3753   :  { %16805 = vmatpush3.bf16.msra.mxu0 %v18328_v3 }
0x3754   :  { %16806 = vmatprep.subr.bf16.mxu0 %v17186_v21 }
0x3757   :  { %16808 = vmatpush3.bf16.msra.mxu0 %v18342_v59 }
0x3758   :  { %16809 = vmatprep.subr.bf16.mxu0 %v17186_v21 }
0x375b   :  { %16811 = vmatpush3.bf16.msra.mxu0 %v18358_v36 }
0x375c   :  { %16860 = vmatprep.subr.bf16.mxu0 %v17186_v21 }
0x375e   :  { %15254 = vmatmul.mubr.msk.f32.vlgmr.msra.gmra.mrb[88].mxu0 %vm524_vm5, %v17151_v5  ;;  %v17161_v5 = vld [vmem:[%s20346_s8] ss:$0 sm:$0xff] }
0x375f   :  { %15340 = vmatprep.mubr.msk.f32.mxu0 %vm17187_vm1, %v17188_v31 }
0x378e   :  { %v10865_v12 = vpop.f32.mrb[84].mxu0 }
0x378f   :  { %v10869_v39 = vadd.f32 %v10865_v12, %v10630_v63  ;;  %v15190_v7 = vpop.f32.mrb[85].mxu0  ;;  %v11202_v63 = vld [vmem:[%s20347_s9 + $0x70] sm:$0xff] }
0x3790   :  { %v11521_v12 = vld [vmem:[%s20347_s9 + $0x30] sm:$0xff] }
0x3801   :  { %v10945_v4 = vpop.f32.mrb[86].mxu0 }
0x3802   :  { %v10949_v19 = vadd.f32 %v10945_v4, %v10869_v39  ;;  %v15201_v35 = vpop.f32.mrb[87].mxu0  ;;  %v11522_v39 = vld [vmem:[%s20347_s9 + $0x38] sm:$0xff] }
0x3803   :  { %v16870_v7 = vpack.c.bf16 %v11522_v39, %v11521_v12 }
0x3831   :  { %v11103_v52 = vpop.f32.mrb[88].mxu0 }
0x3832   :  { %v16916_v44 = vadd.f32 %v19605_v49, %v11103_v52  ;;  %v15255_v45 = vpop.f32.mrb[89].mxu0  ;;  %v11203_v49 = vld [vmem:[%s20347_s9 + $0x78] sm:$0xff] }
0x3833   :  { %v16822_v54 = vpack.c.bf16 %v11203_v49, %v11202_v63 }
0x3834   :  { %17152 = vtanh.f32 %v16916_v44 }
0x383e   :  { %v17153_v10 = vpop.eup %17152 }
0x383f   :  { %v11109_v38 = vmax.f32 %v17153_v10, 0.0 }
0x3841   :  { %11204 = vrot.lane.b32.xlu1 %v11109_v38, %s17192_s15  ;;  %15265 = vmatmul.mubr.msk.f32.vlgmr.msra.gmra.mrb[84].mxu1 %vm450_vm3, %v11109_v38  ;;  %v11117_v28 = vrot.slane %v11109_v38, %v17870_v27 }
0x3842   :  { %16820 = vmatpush3.bf16.msra.mxu1 %v16819_v29  ;;  %15275 = vmatprep.mubr.msk.f32.mxu1 %vm17187_vm1, %v17188_v31 }
0x3843   :  { %11118 = vrot.lane.b32.xlu0 %v11117_v28, %s17191_s0  ;;  %16821 = vmatprep.subr.bf16.mxu1 %v17186_v21 }
0x3846   :  { %16823 = vmatpush3.bf16.msra.mxu1 %v16822_v54 }
0x3847   :  { %16824 = vmatprep.subr.bf16.mxu1 %v17186_v21 }
0x38b3   :  { %v11205_v23 = vpop.permute.xlu1 %11204 }
0x38b4   :  { %15276 = vmatmul.mubr.msk.f32.vlgmr.msra.gmra.mrb[86].mxu1 %vm450_vm3, %v11205_v23 }
0x38b5   :  { %16826 = vmatpush3.bf16.msra.mxu1 %v18232_v15  ;;  %v11119_v9 = vpop.permute.xlu0 %11118  ;;  %15310 = vmatprep.mubr.msk.f32.mxu1 %vm17187_vm1, %v17188_v31  ;;  %v11279_v15 = vld [vmem:[#allocation2 + $0x16] sm:$0x3] }
0x38b6   :  { %11121 = vst.msk [vmem:[%s20350_s12 + $0x14] sm:$0x3] %vm768_vm7, %v11119_v9  ;;  %16827 = vmatprep.subr.bf16.mxu1 %v17186_v21 }
0x38b7   :  { %11199 = vst.msk [vmem:[%s20350_s12] sm:$0x3] %vm770_vm8, %v11119_v9 }
0x38b9   :  { %16829 = vmatpush3.bf16.msra.mxu1 %v18238_v57  ;;  %v11292_v57 = vsel %vm524_vm5, %v11279_v15, %v19251_v6 }
0x38ba   :  { %16830 = vmatprep.subr.bf16.mxu1 %v17186_v21 }
0x38bd   :  { %16832 = vmatpush3.bf16.msra.mxu1 %v18248_v14 }
0x38be   :  { %16833 = vmatprep.subr.bf16.mxu1 %v17186_v21 }
0x38c1   :  { %16835 = vmatpush3.bf16.msra.mxu1 %v18258_v16 }
0x38c2   :  { %16836 = vmatprep.subr.bf16.mxu1 %v17186_v21 }
0x38c5   :  { %16838 = vmatpush3.bf16.msra.mxu1 %v18268_v30 }
0x38c6   :  { %16839 = vmatprep.subr.bf16.mxu1 %v17186_v21 }
0x38c9   :  { %16841 = vmatpush3.bf16.msra.mxu1 %v18278_v18  ;;  %v11440_v18 = vld [vmem:[%s20347_s9 + $0x580] sm:$0xff] }
0x38ca   :  { %16842 = vmatprep.subr.bf16.mxu1 %v17186_v21 }
0x38cd   :  { %16844 = vmatpush3.bf16.msra.mxu1 %v18288_v1  ;;  %v11441_v1 = vld [vmem:[%s20347_s9 + $0x588] sm:$0xff] }
0x38ce   :  { %16845 = vmatprep.subr.bf16.mxu1 %v17186_v21 }
0x38d1   :  { %16847 = vmatpush3.bf16.msra.mxu1 %v18298_v55  ;;  %v16861_v55 = vpack.c.bf16 %v11441_v1, %v11440_v18 }
0x38d2   :  { %16848 = vmatprep.subr.bf16.mxu1 %v17186_v21 }
0x38d3   :  { %16862 = vmatpush3.bf16.msra.mxu0 %v16861_v55 }
0x38d4   :  { %15311 = vmatmul.mubr.f32.vlgmr.msra.gmra.mrb[88].mxu1 %v11292_v57  ;;  %16863 = vmatprep.subr.bf16.mxu0 %v17186_v21 }
0x38d5   :  { %16850 = vmatpush3.bf16.msra.mxu1 %v18318_v22  ;;  %15329 = vmatprep.mubr.msk.f32.mxu1 %vm17187_vm1, %v17188_v31  ;;  %v11442_v22 = vld [vmem:[%s20347_s9 + $0x590] sm:$0xff] }
0x38d6   :  { %16851 = vmatprep.subr.bf16.mxu1 %v17186_v21 }
0x38d9   :  { %16853 = vmatpush3.bf16.msra.mxu1 %v18328_v3  ;;  %v11443_v3 = vld [vmem:[%s20347_s9 + $0x598] sm:$0xff] }
0x38da   :  { %16854 = vmatprep.subr.bf16.mxu1 %v17186_v21 }
0x38dd   :  { %16856 = vmatpush3.bf16.msra.mxu1 %v18342_v59  ;;  %v16864_v59 = vpack.c.bf16 %v11443_v3, %v11442_v22 }
0x38de   :  { %16857 = vmatprep.subr.bf16.mxu1 %v17186_v21 }
0x38df   :  { %16865 = vmatpush3.bf16.msra.mxu0 %v16864_v59 }
0x38e0   :  { %16866 = vmatprep.subr.bf16.mxu0 %v17186_v21 }
0x38e1   :  { %16859 = vmatpush3.bf16.msra.mxu1 %v18358_v36 }
0x38e4   :  { %15330 = vmatmul.mubr.msk.f32.vlgmr.msra.gmra.mrb[88].mxu1 %vm524_vm5, %v17153_v10 }
0x3914   :  { %v11194_v14 = vpop.f32.mrb[84].mxu1 }
0x3915   :  { %v11198_v16 = vadd.f32 %v11194_v14, %v10949_v19  ;;  %v15266_v30 = vpop.f32.mrb[85].mxu1 }
0x3987   :  { %v11274_v36 = vpop.f32.mrb[86].mxu1 }
0x3988   :  { %v11278_v6 = vadd.f32 %v11274_v36, %v11198_v16  ;;  %v15277_v46 = vpop.f32.mrb[87].mxu1 }
0x39b7   :  { %v11432_v42 = vpop.f32.mrb[88].mxu1 }
0x39b8   :  { %v16917_v40 = vadd.f32 %v17161_v5, %v11432_v42  ;;  %v15331_v26 = vpop.f32.mrb[89].mxu1 }
0x39ba   :  { %17154 = vtanh.f32 %v16917_v40 }
0x39c4   :  { %v17155_v24 = vpop.eup %17154 }
0x39c5   :  { %v11438_v2 = vmax.f32 %v17155_v24, 0.0 }
0x39c7   :  { %11439 = vst.msk [vmem:[%s20350_s12 + $0x16] sm:$0x3] %vm600_vm6, %v11438_v2  ;;  %11523 = vrot.lane.b32.xlu1 %v11438_v2, %s17192_s15  ;;  %15341 = vmatmul.mubr.msk.f32.vlgmr.msra.gmra.mrb[90].mxu0 %vm450_vm3, %v11438_v2 }
0x39c8   :  { %11518 = vst.msk [vmem:[%s20350_s12] sm:$0x3] %vm602_vm4, %v11438_v2  ;;  %16868 = vmatpush3.bf16.msra.mxu0 %v16867_v37  ;;  %15351 = vmatprep.mubr.msk.f32.mxu0 %vm17187_vm1, %v17188_v31  ;;  %v9173_v31 = vrot.slane %v19690_v17, %v17870_v27 }
0x39c9   :  { %16869 = vmatprep.subr.bf16.mxu0 %v17186_v21  ;;  %v10469_v21 = vrot.slane %v19990_v62, %v17870_v27 }
0x39cb   :  { %5287 = vrot.lane.b32.xlu1 %v5286_v41, %s17191_s0 }
0x39cc   :  { %16871 = vmatpush3.bf16.msra.mxu0 %v16870_v7 }
0x39cf   :  { %6583 = vrot.lane.b32.xlu1 %v6582_v0, %s17191_s0 }
0x39d3   :  { %7878 = vrot.lane.b32.xlu1 %v7877_v32, %s17191_s0 }
0x39d7   :  { %9174 = vrot.lane.b32.xlu1 %v9173_v31, %s17191_s0 }
0x39db   :  { %10470 = vrot.lane.b32.xlu1 %v10469_v21, %s17191_s0 }
0x3a39   :  { %v11524_v47 = vpop.permute.xlu1 %11523 }
0x3a3a   :  { %15352 = vmatmul.mubr.msk.f32.vlgmr.msra.gmra.mrb[92].mxu0 %vm450_vm3, %v11524_v47 }
0x3a3d   :  { %v5288_v20 = vpop.permute.xlu1 %5287 }
0x3a3e   :  { %5290 = vst.msk [vmem:[%s20350_s12 + $0x2] sm:$0x3] %vm768_vm7, %v5288_v20 }
0x3a3f   :  { %5368 = vst.msk [vmem:[%s20350_s12 + $0x12] sm:$0x3] %vm770_vm8, %v5288_v20 }
0x3a40   :  { %5687 = vst.msk [vmem:[%s20350_s12 + $0x12] sm:$0x3] %vm602_vm4, %v18730_v61 }
0x3a41   :  { %10143 = vst.msk [vmem:[%s20350_s12 + $0x12] sm:$0x3] %vm600_vm6, %v19914_v13  ;;  %v6584_v27 = vpop.permute.xlu1 %6583  ;;  %v11765_v13 = vld [vmem:[%s20348_s10] ss:$0 sm:$0xff] }
0x3a42   :  { %6586 = vst.msk [vmem:[%s20350_s12 + $0x6] sm:$0x3] %vm768_vm7, %v6584_v27 }
0x3a43   :  { %6664 = vst.msk [vmem:[%s20350_s12 + $0xe] sm:$0x3] %vm770_vm8, %v6584_v27 }
0x3a44   :  { %6983 = vst.msk [vmem:[%s20350_s12 + $0xe] sm:$0x3] %vm602_vm4, %v19073_v60 }
0x3a45   :  { %8847 = vst.msk [vmem:[%s20350_s12 + $0xe] sm:$0x3] %vm600_vm6, %v19614_v11  ;;  %v7879_v61 = vpop.permute.xlu1 %7878 }
0x3a46   :  { %7881 = vst.msk [vmem:[%s20350_s12 + $0xa] sm:$0x3] %vm768_vm7, %v7879_v61 }
0x3a47   :  { %7959 = vst.msk [vmem:[%s20350_s12 + $0xa] sm:$0x3] %vm770_vm8, %v7879_v61 }
0x3a48   :  { %8278 = vst.msk [vmem:[%s20350_s12 + $0xa] sm:$0x3] %vm602_vm4, %v19456_v51 }
0x3a49   :  { %v9175_v60 = vpop.permute.xlu1 %9174 }
0x3a4a   :  { %9177 = vst.msk [vmem:[%s20350_s12 + $0xe] sm:$0x3] %vm768_vm7, %v9175_v60 }
0x3a4b   :  { %9255 = vst.msk [vmem:[%s20350_s12 + $0x6] sm:$0x3] %vm770_vm8, %v9175_v60 }
0x3a4c   :  { %9574 = vst.msk [vmem:[%s20350_s12 + $0x6] sm:$0x3] %vm602_vm4, %v19761_v56 }
0x3a4d   :  { %v10471_v48 = vpop.permute.xlu1 %10470 }
0x3a4e   :  { %10473 = vst.msk [vmem:[%s20350_s12 + $0x12] sm:$0x3] %vm768_vm7, %v10471_v48 }
0x3a4f   :  { %10551 = vst.msk [vmem:[%s20350_s12 + $0x2] sm:$0x3] %vm770_vm8, %v10471_v48 }
0x3a50   :  { %10870 = vst.msk [vmem:[%s20350_s12 + $0x2] sm:$0x3] %vm602_vm4, %v20061_v8 }
0x3a9a   :  { %v11513_v51 = vpop.f32.mrb[90].mxu0 }
0x3a9b   :  { %v11517_v11 = vadd.f32 %v11513_v51, %v11278_v6  ;;  %v15342_v17 = vpop.f32.mrb[91].mxu0 }
0x3b0d   :  { %v11593_v56 = vpop.f32.mrb[92].mxu0 }
0x3b0e   :  { %v11597_v62 = vadd.f32 %v11593_v56, %v11517_v11  ;;  %v15353_v43 = vpop.f32.mrb[93].mxu0 }
0x3b10   :  { %v11605_v25 = vadd.f32 %v11765_v13, %v11597_v62 }
0x3b12   :  { %11607 = vst.msk [vmem:[#allocation3] sm:$0x3] %vm11606_vm9, %v11605_v25 }
0x3b13   :  { %17173 = shalt.err (!%p17170_p4)
}
0x3b14   :  { %s17174_s16 = scalar_lea.hbm %s20349_s11, 32 }
0x3b15   :  { %p17175_p5 = scmp.ne.s32.totalorder %s20349_s11, %s17174_s16  ;;  %p17178_p6 = scmp.lt.u32.totalorder %s17174_s16, %s20349_s11 }
0x3b17   :  { %p17180_p7 = pnand %p17178_p6, %p17175_p5 }
0x3b19   :  { %17183 = shalt.err (!%p17180_p7)
}
0x3b1a   :  { %11617 = dma.vmem_to_hbm [thread:$0]  %s11615_s13, 32, %s20349_s11, [#allocation4]  }
0x3b1b   :  { %17184 = dma.done.wait [#allocation4], 32  }
0x3b1c   :  { %17185 = vsyncadd [#allocation4], 4294967264 }
0x3b1d   :  { %11625 = vsyncpa [#allocation4], 1 }

</bundles_post_ra>
